<compile_context>
chip_gen: v6e
topology: v6e:2x2x1
jax: 0.10.0
libtpu: 0.0.40
codegen_flags: <defaults>
</compile_context>

<pallas_src>
import functools

import jax
import jax.numpy as jnp
from jax.experimental import pallas as pl
from jax.experimental.pallas import tpu as pltpu

HP = 128                 # padded hidden width  (1 lane tile;   real hidden = 64)
BP = 8                   # padded batch         (1 sublane tile; real batch = 2)
G4 = 4 * HP              # packed gate width (i | f | g | o), each block 128 lanes

# slice indices inside the stacked weight / bias arrays
W_IH_E1, W_IH_E2, W_IH_D1, W_IH_D2 = 0, 1, 2, 3
W_HH_E1, W_HH_E2, W_HH_D1, W_HH_D2 = 4, 5, 6, 7
B_E1, B_E2, B_D1, B_D2, B_FC_E, B_FC_D = 0, 1, 2, 3, 4, 5

_GATE_SCALE = (1.0, 1.0, 2.0, 1.0)   # x2 on the g-gate: tanh(x) == 2*sigmoid(2x) - 1


# -----------------------------------------------------------------------------
# Fused Pallas kernel: full forward pass in one invocation (no grid).
# -----------------------------------------------------------------------------
def _tae_kernel(x_ref, wl_ref, wf_ref, b_ref,        # inputs (4 DMAs)
                recon_ref, enc_ref,                   # outputs (lane-dense, 128 wide)
                xp1_ref, d2_ref,                      # VMEM scratch
                *, T):
    f32, bf16 = jnp.float32, jnp.bfloat16

    def dotf(a, w):
        return jnp.dot(a, w, preferred_element_type=f32)

    def gates_to_hc(gates, c):
        # gates: (BP, 4*HP) f32 pre-activations; the g block is pre-scaled by 2 so
        # tanh(g_pre) == 2*sigmoid(2*g_pre) - 1  ->  one full-width EUP sigmoid pass.
        s = jax.nn.sigmoid(gates)
        i_g = s[:, 0 * HP:1 * HP]
        f_g = s[:, 1 * HP:2 * HP]
        g_g = 2.0 * s[:, 2 * HP:3 * HP] - 1.0
        o_g = s[:, 3 * HP:4 * HP]
        c_new = f_g * c + i_g * g_g
        h_new = o_g * jnp.tanh(c_new)
        return h_new, c_new

    zeros = jnp.zeros((BP, HP), f32)

    # ---- encoder layer-1 input projection: one batched matmul over all T*BP rows ----
    xp1_ref[...] = dotf(x_ref[...], wl_ref[W_IH_E1]) + b_ref[B_E1]

    # ---- encoder: two stacked LSTM layers, wavefront-interleaved ----------------
    # Wave w runs layer-1 step w and layer-2 step w-1 (which only needs h1 from step
    # w-1), so the two latency chains are independent and can overlap on MXU/EUP.
    # NOTE: static unroll is fine at T=8; switch to lax.fori_loop(..., unroll=True)
    # if T grows past ~16 to bound vreg live ranges.
    h1, c1, h2, c2 = zeros, zeros, zeros, zeros
    for w in range(T + 1):
        nxt1 = None
        if w < T:
            g1 = (xp1_ref[w * BP:(w + 1) * BP, :]
                  + dotf(h1.astype(bf16), wl_ref[W_HH_E1]))
            nxt1 = gates_to_hc(g1, c1)
        if w > 0:
            g2 = (dotf(h1.astype(bf16), wl_ref[W_IH_E2])
                  + dotf(h2.astype(bf16), wl_ref[W_HH_E2])
                  + b_ref[B_E2])
            h2, c2 = gates_to_hc(g2, c2)
        if w < T:
            h1, c1 = nxt1
    # h2 == h_n[-1]: final hidden state of encoder layer 2

    # ---- encoder FC (H -> E, lane-padded to 128) --------------------------------
    encoded = dotf(h2.astype(bf16), wf_ref[0]) + b_ref[B_FC_E][:, :HP]      # (BP, HP)
    enc_ref[...] = encoded

    # ---- decoder layer-1 input projection: repeated encoding => constant in t ----
    dp1 = dotf(encoded.astype(bf16), wl_ref[W_IH_D1]) + b_ref[B_D1]         # (BP, 4HP)

    # ---- decoder: two stacked LSTM layers, wavefront-interleaved ----------------
    h1, c1, h2, c2 = zeros, zeros, zeros, zeros
    for w in range(T + 1):
        nxt1 = None
        if w < T:
            g1 = dp1 + dotf(h1.astype(bf16), wl_ref[W_HH_D1])
            nxt1 = gates_to_hc(g1, c1)
        if w > 0:
            g2 = (dotf(h1.astype(bf16), wl_ref[W_IH_D2])
                  + dotf(h2.astype(bf16), wl_ref[W_HH_D2])
                  + b_ref[B_D2])
            h2, c2 = gates_to_hc(g2, c2)
            d2_ref[(w - 1) * BP:w * BP, :] = h2      # aligned full (8,128) f32 store
        if w < T:
            h1, c1 = nxt1

    # ---- decoder FC, batched over all timesteps (lane-dense 128-wide output) ----
    recon_ref[...] = (dotf(d2_ref[...].astype(bf16), wf_ref[1])
                      + b_ref[B_FC_D][:, :HP])


# -----------------------------------------------------------------------------
# Wrapper-side parameter packing (padding / transpose / bias fold / x2 g-gate fold)
# -----------------------------------------------------------------------------
def _pack_lstm_w(w):
    """(4H, n_in) PyTorch-layout weight -> (HP, 4*HP): transposed, input dim padded
    to HP rows, each gate block padded to 128 lanes, g-gate pre-scaled by 2."""
    h = w.shape[0] // 4
    n_in = w.shape[1]
    out = jnp.zeros((HP, G4), jnp.float32)
    for k, s in enumerate(_GATE_SCALE):
        out = out.at[:n_in, k * HP:k * HP + h].set(s * w[k * h:(k + 1) * h, :].T)
    return out


def _pack_lstm_b(b_ih, b_hh):
    """Folded LSTM bias -> (1, 4*HP) gate-block layout, g-gate pre-scaled by 2."""
    b = (b_ih + b_hh).astype(jnp.float32)
    h = b.shape[0] // 4
    out = jnp.zeros((1, G4), jnp.float32)
    for k, s in enumerate(_GATE_SCALE):
        out = out.at[0, k * HP:k * HP + h].set(s * b[k * h:(k + 1) * h])
    return out


def _pack_fc_w(w):
    """(out, in) Linear weight -> (HP, HP) transposed + zero-padded."""
    o, i = w.shape
    return jnp.zeros((HP, HP), jnp.float32).at[:i, :o].set(w.T)


def _pack_fc_b(b):
    """(out,) Linear bias -> (1, 4*HP) zero-padded (so it stacks with the LSTM biases)."""
    return jnp.zeros((1, G4), jnp.float32).at[0, :b.shape[0]].set(b)


# -----------------------------------------------------------------------------
# Wrapper: packing + single pallas_call
# -----------------------------------------------------------------------------
@jax.jit
def temporal_autoencoder_forward(params, x):
    """x: (B, T, input_size) -> (x_reconstructed (B, T, input_size), encoded (B, E))."""
    B, T, I = x.shape
    E = params["enc_fc"]["w"].shape[0]
    H = params["enc_lstm"][0]["w_hh"].shape[1]
    assert B <= BP and I <= HP and E <= HP and H <= HP

    layers = (params["enc_lstm"][0], params["enc_lstm"][1],
              params["dec_lstm"][0], params["dec_lstm"][1])

    # 3 packed parameter arrays (instead of 17) -> 4 input DMAs total.
    w_lstm = jnp.stack(
        [_pack_lstm_w(lp["w_ih"]) for lp in layers]
        + [_pack_lstm_w(lp["w_hh"]) for lp in layers]).astype(jnp.bfloat16)   # (8,HP,4HP)
    w_fc = jnp.stack(
        [_pack_fc_w(params["enc_fc"]["w"]),
         _pack_fc_w(params["dec_fc"]["w"])]).astype(jnp.bfloat16)             # (2,HP,HP)
    b_all = jnp.stack(
        [_pack_lstm_b(lp["b_ih"], lp["b_hh"]) for lp in layers]
        + [_pack_fc_b(params["enc_fc"]["b"]),
           _pack_fc_b(params["dec_fc"]["b"])])                                # (6,1,4HP) f32

    # time-major, batch padded to 8 sublanes, features padded to 128 lanes.
    x_t = jnp.transpose(x.astype(jnp.float32), (1, 0, 2))                     # (T, B, I)
    x_pad = jnp.zeros((T, BP, HP), jnp.float32).at[:, :B, :I].set(x_t)
    x_pad = x_pad.reshape(T * BP, HP).astype(jnp.bfloat16)

    vmem = pl.BlockSpec(memory_space=pltpu.MemorySpace.VMEM)
    recon_pad, enc_pad = pl.pallas_call(
        functools.partial(_tae_kernel, T=T),
        out_shape=(jax.ShapeDtypeStruct((T * BP, HP), jnp.float32),   # lane-dense recon
                   jax.ShapeDtypeStruct((BP, HP), jnp.float32)),      # lane-dense encoding
        in_specs=[vmem, vmem, vmem, vmem],
        out_specs=(vmem, vmem),
        scratch_shapes=[
            pltpu.VMEM((T * BP, G4), jnp.float32),   # hoisted encoder-L1 input projection
            pltpu.VMEM((T * BP, HP), jnp.float32),   # decoder-L2 hidden sequence
        ],
        # scaling guardrail; today's total footprint is ~1.5 MiB (fits v7x 64 MiB easily)
        compiler_params=pltpu.CompilerParams(vmem_limit_bytes=32 * 1024 * 1024),
    )(x_pad, w_lstm, w_fc, b_all)

    x_recon = jnp.transpose(recon_pad.reshape(T, BP, HP)[:, :B, :I], (1, 0, 2))
    encoded = enc_pad[:B, :E]
    return x_recon, encoded


# -----------------------------------------------------------------------------
# Parameter construction (deterministic, mimics PyTorch LSTM/Linear shapes)
# -----------------------------------------------------------------------------
def _uniform(key, shape, bound):
    return jax.random.uniform(key, shape, jnp.float32, -bound, bound)


def init_params(key, input_size, encoding_size, hidden=64):
    keys = iter(jax.random.split(key, 64))
    bound_h = 1.0 / jnp.sqrt(hidden)

    def lstm_layer_params(in_size):
        return dict(
            w_ih=_uniform(next(keys), (4 * hidden, in_size), bound_h),
            w_hh=_uniform(next(keys), (4 * hidden, hidden), bound_h),
            b_ih=_uniform(next(keys), (4 * hidden,), bound_h),
            b_hh=_uniform(next(keys), (4 * hidden,), bound_h),
        )

    return dict(
        enc_lstm=[lstm_layer_params(input_size), lstm_layer_params(hidden)],
        enc_fc=dict(
            w=_uniform(next(keys), (encoding_size, hidden), bound_h),
            b=_uniform(next(keys), (encoding_size,), bound_h),
        ),
        dec_lstm=[lstm_layer_params(encoding_size), lstm_layer_params(hidden)],
        dec_fc=dict(
            w=_uniform(next(keys), (input_size, hidden), bound_h),
            b=_uniform(next(keys), (input_size,), bound_h),
        ),
    )


# -----------------------------------------------------------------------------
if __name__ == "__main__":
    key = jax.random.PRNGKey(0)
    k_params, k_x = jax.random.split(key)

    batch_size = 2
    seq_len = 8
    input_size = 4
    encoding_size = 10

    params = init_params(k_params, input_size, encoding_size)
    x = jax.random.normal(k_x, (batch_size, seq_len, input_size), jnp.float32)

    x_recon, encoded = temporal_autoencoder_forward(params, x)
    jax.block_until_ready((x_recon, encoded))

    assert x_recon.shape == (batch_size, seq_len, input_size), x_recon.shape
    assert encoded.shape == (batch_size, encoding_size), encoded.shape
    assert bool(jnp.all(jnp.isfinite(x_recon))) and bool(jnp.all(jnp.isfinite(encoded)))
    print("KERNEL_OK")
</pallas_src>

<mosaic_0001>
module attributes {stable_mosaic.version = 11 : i64} {
  func.func @_tae_kernel(%arg0: memref<64x128xbf16, #tpu.memory_space<vmem>>, %arg1: memref<8x128x512xbf16, #tpu.memory_space<vmem>>, %arg2: memref<2x128x128xbf16, #tpu.memory_space<vmem>>, %arg3: memref<6x1x512xf32, #tpu.memory_space<vmem>>, %arg4: memref<64x128xf32, #tpu.memory_space<vmem>>, %arg5: memref<8x128xf32, #tpu.memory_space<vmem>>, %arg6: memref<64x512xf32, #tpu.memory_space<vmem>>, %arg7: memref<64x128xf32, #tpu.memory_space<vmem>>) attributes {dimension_semantics = [], scalar_prefetch = 0 : i64, scratch_operands = 2 : i64, tpu.core_type = #tpu.core_type<tc>} {
    %cst = arith.constant 0.000000e+00 : f32
    %0 = vector.broadcast %cst : f32 to vector<8x128xf32>
    %c0 = arith.constant 0 : index
    %c0_0 = arith.constant 0 : index
    %1 = vector.load %arg0[%c0, %c0_0] : memref<64x128xbf16, #tpu.memory_space<vmem>>, vector<64x128xbf16>
    %c0_1 = arith.constant 0 : index
    %c0_2 = arith.constant 0 : index
    %c0_3 = arith.constant 0 : index
    %2 = vector.load %arg1[%c0_1, %c0_2, %c0_3] : memref<8x128x512xbf16, #tpu.memory_space<vmem>>, vector<1x128x512xbf16>
    %3 = vector.shape_cast %2 : vector<1x128x512xbf16> to vector<128x512xbf16>
    %cst_4 = arith.constant dense<0.000000e+00> : vector<64x512xf32>
    %4 = tpu.matmul %1, %3, %cst_4 {dimension_numbers = #tpu.dot_dimension_numbers<[1], [0], [0], [1], [0, 0, 1, 1], [], []>} : vector<64x128xbf16>, vector<128x512xbf16>, vector<64x512xf32> -> vector<64x512xf32>
    %c0_5 = arith.constant 0 : index
    %c0_6 = arith.constant 0 : index
    %c0_7 = arith.constant 0 : index
    %5 = vector.load %arg3[%c0_5, %c0_6, %c0_7] : memref<6x1x512xf32, #tpu.memory_space<vmem>>, vector<1x1x512xf32>
    %6 = vector.shape_cast %5 : vector<1x1x512xf32> to vector<1x512xf32>
    %7 = vector.broadcast %6 : vector<1x512xf32> to vector<64x512xf32>
    %8 = arith.addf %4, %7 : vector<64x512xf32>
    %c0_8 = arith.constant 0 : index
    %c0_9 = arith.constant 0 : index
    %9 = vector.load %arg6[%c0_8, %c0_9] : memref<64x512xf32, #tpu.memory_space<vmem>>, vector<64x512xf32>
    tpu.vector_store %arg6[%c0_8, %c0_9], %8 {strides = array<i32>} : memref<64x512xf32, #tpu.memory_space<vmem>>, vector<64x512xf32>,
    %c0_10 = arith.constant 0 : index
    %c0_11 = arith.constant 0 : index
    %10 = vector.load %arg6[%c0_10, %c0_11] : memref<64x512xf32, #tpu.memory_space<vmem>>, vector<8x512xf32>
    %11 = arith.truncf %0 : vector<8x128xf32> to vector<8x128xbf16>
    %c4 = arith.constant 4 : index
    %c0_12 = arith.constant 0 : index
    %c0_13 = arith.constant 0 : index
    %12 = vector.load %arg1[%c4, %c0_12, %c0_13] : memref<8x128x512xbf16, #tpu.memory_space<vmem>>, vector<1x128x512xbf16>
    %13 = vector.shape_cast %12 : vector<1x128x512xbf16> to vector<128x512xbf16>
    %cst_14 = arith.constant dense<0.000000e+00> : vector<8x512xf32>
    %14 = tpu.matmul %11, %13, %cst_14 {dimension_numbers = #tpu.dot_dimension_numbers<[1], [0], [0], [1], [0, 0, 1, 1], [], []>} : vector<8x128xbf16>, vector<128x512xbf16>, vector<8x512xf32> -> vector<8x512xf32>
    %15 = arith.addf %10, %14 : vector<8x512xf32>
    %16 = arith.negf %15 : vector<8x512xf32>
    %17 = math.exp %16 : vector<8x512xf32>
    %cst_15 = arith.constant 1.000000e+00 : f32
    %18 = vector.broadcast %cst_15 : f32 to vector<8x512xf32>
    %19 = arith.addf %18, %17 : vector<8x512xf32>
    %20 = arith.divf %18, %19 : vector<8x512xf32>
    %21 = vector.extract_strided_slice %20 {offsets = [0, 0], sizes = [8, 128], strides = [1, 1]} : vector<8x512xf32> to vector<8x128xf32>
    %22 = vector.extract_strided_slice %20 {offsets = [0, 128], sizes = [8, 128], strides = [1, 1]} : vector<8x512xf32> to vector<8x128xf32>
    %23 = vector.extract_strided_slice %20 {offsets = [0, 256], sizes = [8, 128], strides = [1, 1]} : vector<8x512xf32> to vector<8x128xf32>
    %cst_16 = arith.constant 2.000000e+00 : f32
    %24 = vector.broadcast %cst_16 : f32 to vector<8x128xf32>
    %25 = arith.mulf %24, %23 : vector<8x128xf32>
    %cst_17 = arith.constant 1.000000e+00 : f32
    %26 = vector.broadcast %cst_17 : f32 to vector<8x128xf32>
    %27 = arith.subf %25, %26 : vector<8x128xf32>
    %28 = vector.extract_strided_slice %20 {offsets = [0, 384], sizes = [8, 128], strides = [1, 1]} : vector<8x512xf32> to vector<8x128xf32>
    %29 = arith.mulf %22, %0 : vector<8x128xf32>
    %30 = arith.mulf %21, %27 : vector<8x128xf32>
    %31 = arith.addf %29, %30 : vector<8x128xf32>
    %32 = math.tanh %31 : vector<8x128xf32>
    %33 = arith.mulf %28, %32 : vector<8x128xf32>
    %c8 = arith.constant 8 : index
    %c0_18 = arith.constant 0 : index
    %34 = vector.load %arg6[%c8, %c0_18] : memref<64x512xf32, #tpu.memory_space<vmem>>, vector<8x512xf32>
    %35 = arith.truncf %33 : vector<8x128xf32> to vector<8x128xbf16>
    %c4_19 = arith.constant 4 : index
    %c0_20 = arith.constant 0 : index
    %c0_21 = arith.constant 0 : index
    %36 = vector.load %arg1[%c4_19, %c0_20, %c0_21] : memref<8x128x512xbf16, #tpu.memory_space<vmem>>, vector<1x128x512xbf16>
    %37 = vector.shape_cast %36 : vector<1x128x512xbf16> to vector<128x512xbf16>
    %cst_22 = arith.constant dense<0.000000e+00> : vector<8x512xf32>
    %38 = tpu.matmul %35, %37, %cst_22 {dimension_numbers = #tpu.dot_dimension_numbers<[1], [0], [0], [1], [0, 0, 1, 1], [], []>} : vector<8x128xbf16>, vector<128x512xbf16>, vector<8x512xf32> -> vector<8x512xf32>
    %39 = arith.addf %34, %38 : vector<8x512xf32>
    %40 = arith.negf %39 : vector<8x512xf32>
    %41 = math.exp %40 : vector<8x512xf32>
    %cst_23 = arith.constant 1.000000e+00 : f32
    %42 = vector.broadcast %cst_23 : f32 to vector<8x512xf32>
    %43 = arith.addf %42, %41 : vector<8x512xf32>
    %44 = arith.divf %42, %43 : vector<8x512xf32>
    %45 = vector.extract_strided_slice %44 {offsets = [0, 0], sizes = [8, 128], strides = [1, 1]} : vector<8x512xf32> to vector<8x128xf32>
    %46 = vector.extract_strided_slice %44 {offsets = [0, 128], sizes = [8, 128], strides = [1, 1]} : vector<8x512xf32> to vector<8x128xf32>
    %47 = vector.extract_strided_slice %44 {offsets = [0, 256], sizes = [8, 128], strides = [1, 1]} : vector<8x512xf32> to vector<8x128xf32>
    %cst_24 = arith.constant 2.000000e+00 : f32
    %48 = vector.broadcast %cst_24 : f32 to vector<8x128xf32>
    %49 = arith.mulf %48, %47 : vector<8x128xf32>
    %cst_25 = arith.constant 1.000000e+00 : f32
    %50 = vector.broadcast %cst_25 : f32 to vector<8x128xf32>
    %51 = arith.subf %49, %50 : vector<8x128xf32>
    %52 = vector.extract_strided_slice %44 {offsets = [0, 384], sizes = [8, 128], strides = [1, 1]} : vector<8x512xf32> to vector<8x128xf32>
    %53 = arith.mulf %46, %31 : vector<8x128xf32>
    %54 = arith.mulf %45, %51 : vector<8x128xf32>
    %55 = arith.addf %53, %54 : vector<8x128xf32>
    %56 = math.tanh %55 : vector<8x128xf32>
    %57 = arith.mulf %52, %56 : vector<8x128xf32>
    %58 = arith.truncf %33 : vector<8x128xf32> to vector<8x128xbf16>
    %c1 = arith.constant 1 : index
    %c0_26 = arith.constant 0 : index
    %c0_27 = arith.constant 0 : index
    %59 = vector.load %arg1[%c1, %c0_26, %c0_27] : memref<8x128x512xbf16, #tpu.memory_space<vmem>>, vector<1x128x512xbf16>
    %60 = vector.shape_cast %59 : vector<1x128x512xbf16> to vector<128x512xbf16>
    %cst_28 = arith.constant dense<0.000000e+00> : vector<8x512xf32>
    %61 = tpu.matmul %58, %60, %cst_28 {dimension_numbers = #tpu.dot_dimension_numbers<[1], [0], [0], [1], [0, 0, 1, 1], [], []>} : vector<8x128xbf16>, vector<128x512xbf16>, vector<8x512xf32> -> vector<8x512xf32>
    %62 = arith.truncf %0 : vector<8x128xf32> to vector<8x128xbf16>
    %c5 = arith.constant 5 : index
    %c0_29 = arith.constant 0 : index
    %c0_30 = arith.constant 0 : index
    %63 = vector.load %arg1[%c5, %c0_29, %c0_30] : memref<8x128x512xbf16, #tpu.memory_space<vmem>>, vector<1x128x512xbf16>
    %64 = vector.shape_cast %63 : vector<1x128x512xbf16> to vector<128x512xbf16>
    %cst_31 = arith.constant dense<0.000000e+00> : vector<8x512xf32>
    %65 = tpu.matmul %62, %64, %cst_31 {dimension_numbers = #tpu.dot_dimension_numbers<[1], [0], [0], [1], [0, 0, 1, 1], [], []>} : vector<8x128xbf16>, vector<128x512xbf16>, vector<8x512xf32> -> vector<8x512xf32>
    %66 = arith.addf %61, %65 : vector<8x512xf32>
    %c1_32 = arith.constant 1 : index
    %c0_33 = arith.constant 0 : index
    %c0_34 = arith.constant 0 : index
    %67 = vector.load %arg3[%c1_32, %c0_33, %c0_34] : memref<6x1x512xf32, #tpu.memory_space<vmem>>, vector<1x1x512xf32>
    %68 = vector.shape_cast %67 : vector<1x1x512xf32> to vector<1x512xf32>
    %69 = vector.broadcast %68 : vector<1x512xf32> to vector<8x512xf32>
    %70 = arith.addf %66, %69 : vector<8x512xf32>
    %71 = arith.negf %70 : vector<8x512xf32>
    %72 = math.exp %71 : vector<8x512xf32>
    %cst_35 = arith.constant 1.000000e+00 : f32
    %73 = vector.broadcast %cst_35 : f32 to vector<8x512xf32>
    %74 = arith.addf %73, %72 : vector<8x512xf32>
    %75 = arith.divf %73, %74 : vector<8x512xf32>
    %76 = vector.extract_strided_slice %75 {offsets = [0, 0], sizes = [8, 128], strides = [1, 1]} : vector<8x512xf32> to vector<8x128xf32>
    %77 = vector.extract_strided_slice %75 {offsets = [0, 128], sizes = [8, 128], strides = [1, 1]} : vector<8x512xf32> to vector<8x128xf32>
    %78 = vector.extract_strided_slice %75 {offsets = [0, 256], sizes = [8, 128], strides = [1, 1]} : vector<8x512xf32> to vector<8x128xf32>
    %cst_36 = arith.constant 2.000000e+00 : f32
    %79 = vector.broadcast %cst_36 : f32 to vector<8x128xf32>
    %80 = arith.mulf %79, %78 : vector<8x128xf32>
    %cst_37 = arith.constant 1.000000e+00 : f32
    %81 = vector.broadcast %cst_37 : f32 to vector<8x128xf32>
    %82 = arith.subf %80, %81 : vector<8x128xf32>
    %83 = vector.extract_strided_slice %75 {offsets = [0, 384], sizes = [8, 128], strides = [1, 1]} : vector<8x512xf32> to vector<8x128xf32>
    %84 = arith.mulf %77, %0 : vector<8x128xf32>
    %85 = arith.mulf %76, %82 : vector<8x128xf32>
    %86 = arith.addf %84, %85 : vector<8x128xf32>
    %87 = math.tanh %86 : vector<8x128xf32>
    %88 = arith.mulf %83, %87 : vector<8x128xf32>
    %c16 = arith.constant 16 : index
    %c0_38 = arith.constant 0 : index
    %89 = vector.load %arg6[%c16, %c0_38] : memref<64x512xf32, #tpu.memory_space<vmem>>, vector<8x512xf32>
    %90 = arith.truncf %57 : vector<8x128xf32> to vector<8x128xbf16>
    %c4_39 = arith.constant 4 : index
    %c0_40 = arith.constant 0 : index
    %c0_41 = arith.constant 0 : index
    %91 = vector.load %arg1[%c4_39, %c0_40, %c0_41] : memref<8x128x512xbf16, #tpu.memory_space<vmem>>, vector<1x128x512xbf16>
    %92 = vector.shape_cast %91 : vector<1x128x512xbf16> to vector<128x512xbf16>
    %cst_42 = arith.constant dense<0.000000e+00> : vector<8x512xf32>
    %93 = tpu.matmul %90, %92, %cst_42 {dimension_numbers = #tpu.dot_dimension_numbers<[1], [0], [0], [1], [0, 0, 1, 1], [], []>} : vector<8x128xbf16>, vector<128x512xbf16>, vector<8x512xf32> -> vector<8x512xf32>
    %94 = arith.addf %89, %93 : vector<8x512xf32>
    %95 = arith.negf %94 : vector<8x512xf32>
    %96 = math.exp %95 : vector<8x512xf32>
    %cst_43 = arith.constant 1.000000e+00 : f32
    %97 = vector.broadcast %cst_43 : f32 to vector<8x512xf32>
    %98 = arith.addf %97, %96 : vector<8x512xf32>
    %99 = arith.divf %97, %98 : vector<8x512xf32>
    %100 = vector.extract_strided_slice %99 {offsets = [0, 0], sizes = [8, 128], strides = [1, 1]} : vector<8x512xf32> to vector<8x128xf32>
    %101 = vector.extract_strided_slice %99 {offsets = [0, 128], sizes = [8, 128], strides = [1, 1]} : vector<8x512xf32> to vector<8x128xf32>
    %102 = vector.extract_strided_slice %99 {offsets = [0, 256], sizes = [8, 128], strides = [1, 1]} : vector<8x512xf32> to vector<8x128xf32>
    %cst_44 = arith.constant 2.000000e+00 : f32
    %103 = vector.broadcast %cst_44 : f32 to vector<8x128xf32>
    %104 = arith.mulf %103, %102 : vector<8x128xf32>
    %cst_45 = arith.constant 1.000000e+00 : f32
    %105 = vector.broadcast %cst_45 : f32 to vector<8x128xf32>
    %106 = arith.subf %104, %105 : vector<8x128xf32>
    %107 = vector.extract_strided_slice %99 {offsets = [0, 384], sizes = [8, 128], strides = [1, 1]} : vector<8x512xf32> to vector<8x128xf32>
    %108 = arith.mulf %101, %55 : vector<8x128xf32>
    %109 = arith.mulf %100, %106 : vector<8x128xf32>
    %110 = arith.addf %108, %109 : vector<8x128xf32>
    %111 = math.tanh %110 : vector<8x128xf32>
    %112 = arith.mulf %107, %111 : vector<8x128xf32>
    %113 = arith.truncf %57 : vector<8x128xf32> to vector<8x128xbf16>
    %c1_46 = arith.constant 1 : index
    %c0_47 = arith.constant 0 : index
    %c0_48 = arith.constant 0 : index
    %114 = vector.load %arg1[%c1_46, %c0_47, %c0_48] : memref<8x128x512xbf16, #tpu.memory_space<vmem>>, vector<1x128x512xbf16>
    %115 = vector.shape_cast %114 : vector<1x128x512xbf16> to vector<128x512xbf16>
    %cst_49 = arith.constant dense<0.000000e+00> : vector<8x512xf32>
    %116 = tpu.matmul %113, %115, %cst_49 {dimension_numbers = #tpu.dot_dimension_numbers<[1], [0], [0], [1], [0, 0, 1, 1], [], []>} : vector<8x128xbf16>, vector<128x512xbf16>, vector<8x512xf32> -> vector<8x512xf32>
    %117 = arith.truncf %88 : vector<8x128xf32> to vector<8x128xbf16>
    %c5_50 = arith.constant 5 : index
    %c0_51 = arith.constant 0 : index
    %c0_52 = arith.constant 0 : index
    %118 = vector.load %arg1[%c5_50, %c0_51, %c0_52] : memref<8x128x512xbf16, #tpu.memory_space<vmem>>, vector<1x128x512xbf16>
    %119 = vector.shape_cast %118 : vector<1x128x512xbf16> to vector<128x512xbf16>
    %cst_53 = arith.constant dense<0.000000e+00> : vector<8x512xf32>
    %120 = tpu.matmul %117, %119, %cst_53 {dimension_numbers = #tpu.dot_dimension_numbers<[1], [0], [0], [1], [0, 0, 1, 1], [], []>} : vector<8x128xbf16>, vector<128x512xbf16>, vector<8x512xf32> -> vector<8x512xf32>
    %121 = arith.addf %116, %120 : vector<8x512xf32>
    %c1_54 = arith.constant 1 : index
    %c0_55 = arith.constant 0 : index
    %c0_56 = arith.constant 0 : index
    %122 = vector.load %arg3[%c1_54, %c0_55, %c0_56] : memref<6x1x512xf32, #tpu.memory_space<vmem>>, vector<1x1x512xf32>
    %123 = vector.shape_cast %122 : vector<1x1x512xf32> to vector<1x512xf32>
    %124 = vector.broadcast %123 : vector<1x512xf32> to vector<8x512xf32>
    %125 = arith.addf %121, %124 : vector<8x512xf32>
    %126 = arith.negf %125 : vector<8x512xf32>
    %127 = math.exp %126 : vector<8x512xf32>
    %cst_57 = arith.constant 1.000000e+00 : f32
    %128 = vector.broadcast %cst_57 : f32 to vector<8x512xf32>
    %129 = arith.addf %128, %127 : vector<8x512xf32>
    %130 = arith.divf %128, %129 : vector<8x512xf32>
    %131 = vector.extract_strided_slice %130 {offsets = [0, 0], sizes = [8, 128], strides = [1, 1]} : vector<8x512xf32> to vector<8x128xf32>
    %132 = vector.extract_strided_slice %130 {offsets = [0, 128], sizes = [8, 128], strides = [1, 1]} : vector<8x512xf32> to vector<8x128xf32>
    %133 = vector.extract_strided_slice %130 {offsets = [0, 256], sizes = [8, 128], strides = [1, 1]} : vector<8x512xf32> to vector<8x128xf32>
    %cst_58 = arith.constant 2.000000e+00 : f32
    %134 = vector.broadcast %cst_58 : f32 to vector<8x128xf32>
    %135 = arith.mulf %134, %133 : vector<8x128xf32>
    %cst_59 = arith.constant 1.000000e+00 : f32
    %136 = vector.broadcast %cst_59 : f32 to vector<8x128xf32>
    %137 = arith.subf %135, %136 : vector<8x128xf32>
    %138 = vector.extract_strided_slice %130 {offsets = [0, 384], sizes = [8, 128], strides = [1, 1]} : vector<8x512xf32> to vector<8x128xf32>
    %139 = arith.mulf %132, %86 : vector<8x128xf32>
    %140 = arith.mulf %131, %137 : vector<8x128xf32>
    %141 = arith.addf %139, %140 : vector<8x128xf32>
    %142 = math.tanh %141 : vector<8x128xf32>
    %143 = arith.mulf %138, %142 : vector<8x128xf32>
    %c24 = arith.constant 24 : index
    %c0_60 = arith.constant 0 : index
    %144 = vector.load %arg6[%c24, %c0_60] : memref<64x512xf32, #tpu.memory_space<vmem>>, vector<8x512xf32>
    %145 = arith.truncf %112 : vector<8x128xf32> to vector<8x128xbf16>
    %c4_61 = arith.constant 4 : index
    %c0_62 = arith.constant 0 : index
    %c0_63 = arith.constant 0 : index
    %146 = vector.load %arg1[%c4_61, %c0_62, %c0_63] : memref<8x128x512xbf16, #tpu.memory_space<vmem>>, vector<1x128x512xbf16>
    %147 = vector.shape_cast %146 : vector<1x128x512xbf16> to vector<128x512xbf16>
    %cst_64 = arith.constant dense<0.000000e+00> : vector<8x512xf32>
    %148 = tpu.matmul %145, %147, %cst_64 {dimension_numbers = #tpu.dot_dimension_numbers<[1], [0], [0], [1], [0, 0, 1, 1], [], []>} : vector<8x128xbf16>, vector<128x512xbf16>, vector<8x512xf32> -> vector<8x512xf32>
    %149 = arith.addf %144, %148 : vector<8x512xf32>
    %150 = arith.negf %149 : vector<8x512xf32>
    %151 = math.exp %150 : vector<8x512xf32>
    %cst_65 = arith.constant 1.000000e+00 : f32
    %152 = vector.broadcast %cst_65 : f32 to vector<8x512xf32>
    %153 = arith.addf %152, %151 : vector<8x512xf32>
    %154 = arith.divf %152, %153 : vector<8x512xf32>
    %155 = vector.extract_strided_slice %154 {offsets = [0, 0], sizes = [8, 128], strides = [1, 1]} : vector<8x512xf32> to vector<8x128xf32>
    %156 = vector.extract_strided_slice %154 {offsets = [0, 128], sizes = [8, 128], strides = [1, 1]} : vector<8x512xf32> to vector<8x128xf32>
    %157 = vector.extract_strided_slice %154 {offsets = [0, 256], sizes = [8, 128], strides = [1, 1]} : vector<8x512xf32> to vector<8x128xf32>
    %cst_66 = arith.constant 2.000000e+00 : f32
    %158 = vector.broadcast %cst_66 : f32 to vector<8x128xf32>
    %159 = arith.mulf %158, %157 : vector<8x128xf32>
    %cst_67 = arith.constant 1.000000e+00 : f32
    %160 = vector.broadcast %cst_67 : f32 to vector<8x128xf32>
    %161 = arith.subf %159, %160 : vector<8x128xf32>
    %162 = vector.extract_strided_slice %154 {offsets = [0, 384], sizes = [8, 128], strides = [1, 1]} : vector<8x512xf32> to vector<8x128xf32>
    %163 = arith.mulf %156, %110 : vector<8x128xf32>
    %164 = arith.mulf %155, %161 : vector<8x128xf32>
    %165 = arith.addf %163, %164 : vector<8x128xf32>
    %166 = math.tanh %165 : vector<8x128xf32>
    %167 = arith.mulf %162, %166 : vector<8x128xf32>
    %168 = arith.truncf %112 : vector<8x128xf32> to vector<8x128xbf16>
    %c1_68 = arith.constant 1 : index
    %c0_69 = arith.constant 0 : index
    %c0_70 = arith.constant 0 : index
    %169 = vector.load %arg1[%c1_68, %c0_69, %c0_70] : memref<8x128x512xbf16, #tpu.memory_space<vmem>>, vector<1x128x512xbf16>
    %170 = vector.shape_cast %169 : vector<1x128x512xbf16> to vector<128x512xbf16>
    %cst_71 = arith.constant dense<0.000000e+00> : vector<8x512xf32>
    %171 = tpu.matmul %168, %170, %cst_71 {dimension_numbers = #tpu.dot_dimension_numbers<[1], [0], [0], [1], [0, 0, 1, 1], [], []>} : vector<8x128xbf16>, vector<128x512xbf16>, vector<8x512xf32> -> vector<8x512xf32>
    %172 = arith.truncf %143 : vector<8x128xf32> to vector<8x128xbf16>
    %c5_72 = arith.constant 5 : index
    %c0_73 = arith.constant 0 : index
    %c0_74 = arith.constant 0 : index
    %173 = vector.load %arg1[%c5_72, %c0_73, %c0_74] : memref<8x128x512xbf16, #tpu.memory_space<vmem>>, vector<1x128x512xbf16>
    %174 = vector.shape_cast %173 : vector<1x128x512xbf16> to vector<128x512xbf16>
    %cst_75 = arith.constant dense<0.000000e+00> : vector<8x512xf32>
    %175 = tpu.matmul %172, %174, %cst_75 {dimension_numbers = #tpu.dot_dimension_numbers<[1], [0], [0], [1], [0, 0, 1, 1], [], []>} : vector<8x128xbf16>, vector<128x512xbf16>, vector<8x512xf32> -> vector<8x512xf32>
    %176 = arith.addf %171, %175 : vector<8x512xf32>
    %c1_76 = arith.constant 1 : index
    %c0_77 = arith.constant 0 : index
    %c0_78 = arith.constant 0 : index
    %177 = vector.load %arg3[%c1_76, %c0_77, %c0_78] : memref<6x1x512xf32, #tpu.memory_space<vmem>>, vector<1x1x512xf32>
    %178 = vector.shape_cast %177 : vector<1x1x512xf32> to vector<1x512xf32>
    %179 = vector.broadcast %178 : vector<1x512xf32> to vector<8x512xf32>
    %180 = arith.addf %176, %179 : vector<8x512xf32>
    %181 = arith.negf %180 : vector<8x512xf32>
    %182 = math.exp %181 : vector<8x512xf32>
    %cst_79 = arith.constant 1.000000e+00 : f32
    %183 = vector.broadcast %cst_79 : f32 to vector<8x512xf32>
    %184 = arith.addf %183, %182 : vector<8x512xf32>
    %185 = arith.divf %183, %184 : vector<8x512xf32>
    %186 = vector.extract_strided_slice %185 {offsets = [0, 0], sizes = [8, 128], strides = [1, 1]} : vector<8x512xf32> to vector<8x128xf32>
    %187 = vector.extract_strided_slice %185 {offsets = [0, 128], sizes = [8, 128], strides = [1, 1]} : vector<8x512xf32> to vector<8x128xf32>
    %188 = vector.extract_strided_slice %185 {offsets = [0, 256], sizes = [8, 128], strides = [1, 1]} : vector<8x512xf32> to vector<8x128xf32>
    %cst_80 = arith.constant 2.000000e+00 : f32
    %189 = vector.broadcast %cst_80 : f32 to vector<8x128xf32>
    %190 = arith.mulf %189, %188 : vector<8x128xf32>
    %cst_81 = arith.constant 1.000000e+00 : f32
    %191 = vector.broadcast %cst_81 : f32 to vector<8x128xf32>
    %192 = arith.subf %190, %191 : vector<8x128xf32>
    %193 = vector.extract_strided_slice %185 {offsets = [0, 384], sizes = [8, 128], strides = [1, 1]} : vector<8x512xf32> to vector<8x128xf32>
    %194 = arith.mulf %187, %141 : vector<8x128xf32>
    %195 = arith.mulf %186, %192 : vector<8x128xf32>
    %196 = arith.addf %194, %195 : vector<8x128xf32>
    %197 = math.tanh %196 : vector<8x128xf32>
    %198 = arith.mulf %193, %197 : vector<8x128xf32>
    %c32 = arith.constant 32 : index
    %c0_82 = arith.constant 0 : index
    %199 = vector.load %arg6[%c32, %c0_82] : memref<64x512xf32, #tpu.memory_space<vmem>>, vector<8x512xf32>
    %200 = arith.truncf %167 : vector<8x128xf32> to vector<8x128xbf16>
    %c4_83 = arith.constant 4 : index
    %c0_84 = arith.constant 0 : index
    %c0_85 = arith.constant 0 : index
    %201 = vector.load %arg1[%c4_83, %c0_84, %c0_85] : memref<8x128x512xbf16, #tpu.memory_space<vmem>>, vector<1x128x512xbf16>
    %202 = vector.shape_cast %201 : vector<1x128x512xbf16> to vector<128x512xbf16>
    %cst_86 = arith.constant dense<0.000000e+00> : vector<8x512xf32>
    %203 = tpu.matmul %200, %202, %cst_86 {dimension_numbers = #tpu.dot_dimension_numbers<[1], [0], [0], [1], [0, 0, 1, 1], [], []>} : vector<8x128xbf16>, vector<128x512xbf16>, vector<8x512xf32> -> vector<8x512xf32>
    %204 = arith.addf %199, %203 : vector<8x512xf32>
    %205 = arith.negf %204 : vector<8x512xf32>
    %206 = math.exp %205 : vector<8x512xf32>
    %cst_87 = arith.constant 1.000000e+00 : f32
    %207 = vector.broadcast %cst_87 : f32 to vector<8x512xf32>
    %208 = arith.addf %207, %206 : vector<8x512xf32>
    %209 = arith.divf %207, %208 : vector<8x512xf32>
    %210 = vector.extract_strided_slice %209 {offsets = [0, 0], sizes = [8, 128], strides = [1, 1]} : vector<8x512xf32> to vector<8x128xf32>
    %211 = vector.extract_strided_slice %209 {offsets = [0, 128], sizes = [8, 128], strides = [1, 1]} : vector<8x512xf32> to vector<8x128xf32>
    %212 = vector.extract_strided_slice %209 {offsets = [0, 256], sizes = [8, 128], strides = [1, 1]} : vector<8x512xf32> to vector<8x128xf32>
    %cst_88 = arith.constant 2.000000e+00 : f32
    %213 = vector.broadcast %cst_88 : f32 to vector<8x128xf32>
    %214 = arith.mulf %213, %212 : vector<8x128xf32>
    %cst_89 = arith.constant 1.000000e+00 : f32
    %215 = vector.broadcast %cst_89 : f32 to vector<8x128xf32>
    %216 = arith.subf %214, %215 : vector<8x128xf32>
    %217 = vector.extract_strided_slice %209 {offsets = [0, 384], sizes = [8, 128], strides = [1, 1]} : vector<8x512xf32> to vector<8x128xf32>
    %218 = arith.mulf %211, %165 : vector<8x128xf32>
    %219 = arith.mulf %210, %216 : vector<8x128xf32>
    %220 = arith.addf %218, %219 : vector<8x128xf32>
    %221 = math.tanh %220 : vector<8x128xf32>
    %222 = arith.mulf %217, %221 : vector<8x128xf32>
    %223 = arith.truncf %167 : vector<8x128xf32> to vector<8x128xbf16>
    %c1_90 = arith.constant 1 : index
    %c0_91 = arith.constant 0 : index
    %c0_92 = arith.constant 0 : index
    %224 = vector.load %arg1[%c1_90, %c0_91, %c0_92] : memref<8x128x512xbf16, #tpu.memory_space<vmem>>, vector<1x128x512xbf16>
    %225 = vector.shape_cast %224 : vector<1x128x512xbf16> to vector<128x512xbf16>
    %cst_93 = arith.constant dense<0.000000e+00> : vector<8x512xf32>
    %226 = tpu.matmul %223, %225, %cst_93 {dimension_numbers = #tpu.dot_dimension_numbers<[1], [0], [0], [1], [0, 0, 1, 1], [], []>} : vector<8x128xbf16>, vector<128x512xbf16>, vector<8x512xf32> -> vector<8x512xf32>
    %227 = arith.truncf %198 : vector<8x128xf32> to vector<8x128xbf16>
    %c5_94 = arith.constant 5 : index
    %c0_95 = arith.constant 0 : index
    %c0_96 = arith.constant 0 : index
    %228 = vector.load %arg1[%c5_94, %c0_95, %c0_96] : memref<8x128x512xbf16, #tpu.memory_space<vmem>>, vector<1x128x512xbf16>
    %229 = vector.shape_cast %228 : vector<1x128x512xbf16> to vector<128x512xbf16>
    %cst_97 = arith.constant dense<0.000000e+00> : vector<8x512xf32>
    %230 = tpu.matmul %227, %229, %cst_97 {dimension_numbers = #tpu.dot_dimension_numbers<[1], [0], [0], [1], [0, 0, 1, 1], [], []>} : vector<8x128xbf16>, vector<128x512xbf16>, vector<8x512xf32> -> vector<8x512xf32>
    %231 = arith.addf %226, %230 : vector<8x512xf32>
    %c1_98 = arith.constant 1 : index
    %c0_99 = arith.constant 0 : index
    %c0_100 = arith.constant 0 : index
    %232 = vector.load %arg3[%c1_98, %c0_99, %c0_100] : memref<6x1x512xf32, #tpu.memory_space<vmem>>, vector<1x1x512xf32>
    %233 = vector.shape_cast %232 : vector<1x1x512xf32> to vector<1x512xf32>
    %234 = vector.broadcast %233 : vector<1x512xf32> to vector<8x512xf32>
    %235 = arith.addf %231, %234 : vector<8x512xf32>
    %236 = arith.negf %235 : vector<8x512xf32>
    %237 = math.exp %236 : vector<8x512xf32>
    %cst_101 = arith.constant 1.000000e+00 : f32
    %238 = vector.broadcast %cst_101 : f32 to vector<8x512xf32>
    %239 = arith.addf %238, %237 : vector<8x512xf32>
    %240 = arith.divf %238, %239 : vector<8x512xf32>
    %241 = vector.extract_strided_slice %240 {offsets = [0, 0], sizes = [8, 128], strides = [1, 1]} : vector<8x512xf32> to vector<8x128xf32>
    %242 = vector.extract_strided_slice %240 {offsets = [0, 128], sizes = [8, 128], strides = [1, 1]} : vector<8x512xf32> to vector<8x128xf32>
    %243 = vector.extract_strided_slice %240 {offsets = [0, 256], sizes = [8, 128], strides = [1, 1]} : vector<8x512xf32> to vector<8x128xf32>
    %cst_102 = arith.constant 2.000000e+00 : f32
    %244 = vector.broadcast %cst_102 : f32 to vector<8x128xf32>
    %245 = arith.mulf %244, %243 : vector<8x128xf32>
    %cst_103 = arith.constant 1.000000e+00 : f32
    %246 = vector.broadcast %cst_103 : f32 to vector<8x128xf32>
    %247 = arith.subf %245, %246 : vector<8x128xf32>
    %248 = vector.extract_strided_slice %240 {offsets = [0, 384], sizes = [8, 128], strides = [1, 1]} : vector<8x512xf32> to vector<8x128xf32>
    %249 = arith.mulf %242, %196 : vector<8x128xf32>
    %250 = arith.mulf %241, %247 : vector<8x128xf32>
    %251 = arith.addf %249, %250 : vector<8x128xf32>
    %252 = math.tanh %251 : vector<8x128xf32>
    %253 = arith.mulf %248, %252 : vector<8x128xf32>
    %c40 = arith.constant 40 : index
    %c0_104 = arith.constant 0 : index
    %254 = vector.load %arg6[%c40, %c0_104] : memref<64x512xf32, #tpu.memory_space<vmem>>, vector<8x512xf32>
    %255 = arith.truncf %222 : vector<8x128xf32> to vector<8x128xbf16>
    %c4_105 = arith.constant 4 : index
    %c0_106 = arith.constant 0 : index
    %c0_107 = arith.constant 0 : index
    %256 = vector.load %arg1[%c4_105, %c0_106, %c0_107] : memref<8x128x512xbf16, #tpu.memory_space<vmem>>, vector<1x128x512xbf16>
    %257 = vector.shape_cast %256 : vector<1x128x512xbf16> to vector<128x512xbf16>
    %cst_108 = arith.constant dense<0.000000e+00> : vector<8x512xf32>
    %258 = tpu.matmul %255, %257, %cst_108 {dimension_numbers = #tpu.dot_dimension_numbers<[1], [0], [0], [1], [0, 0, 1, 1], [], []>} : vector<8x128xbf16>, vector<128x512xbf16>, vector<8x512xf32> -> vector<8x512xf32>
    %259 = arith.addf %254, %258 : vector<8x512xf32>
    %260 = arith.negf %259 : vector<8x512xf32>
    %261 = math.exp %260 : vector<8x512xf32>
    %cst_109 = arith.constant 1.000000e+00 : f32
    %262 = vector.broadcast %cst_109 : f32 to vector<8x512xf32>
    %263 = arith.addf %262, %261 : vector<8x512xf32>
    %264 = arith.divf %262, %263 : vector<8x512xf32>
    %265 = vector.extract_strided_slice %264 {offsets = [0, 0], sizes = [8, 128], strides = [1, 1]} : vector<8x512xf32> to vector<8x128xf32>
    %266 = vector.extract_strided_slice %264 {offsets = [0, 128], sizes = [8, 128], strides = [1, 1]} : vector<8x512xf32> to vector<8x128xf32>
    %267 = vector.extract_strided_slice %264 {offsets = [0, 256], sizes = [8, 128], strides = [1, 1]} : vector<8x512xf32> to vector<8x128xf32>
    %cst_110 = arith.constant 2.000000e+00 : f32
    %268 = vector.broadcast %cst_110 : f32 to vector<8x128xf32>
    %269 = arith.mulf %268, %267 : vector<8x128xf32>
    %cst_111 = arith.constant 1.000000e+00 : f32
    %270 = vector.broadcast %cst_111 : f32 to vector<8x128xf32>
    %271 = arith.subf %269, %270 : vector<8x128xf32>
    %272 = vector.extract_strided_slice %264 {offsets = [0, 384], sizes = [8, 128], strides = [1, 1]} : vector<8x512xf32> to vector<8x128xf32>
    %273 = arith.mulf %266, %220 : vector<8x128xf32>
    %274 = arith.mulf %265, %271 : vector<8x128xf32>
    %275 = arith.addf %273, %274 : vector<8x128xf32>
    %276 = math.tanh %275 : vector<8x128xf32>
    %277 = arith.mulf %272, %276 : vector<8x128xf32>
    %278 = arith.truncf %222 : vector<8x128xf32> to vector<8x128xbf16>
    %c1_112 = arith.constant 1 : index
    %c0_113 = arith.constant 0 : index
    %c0_114 = arith.constant 0 : index
    %279 = vector.load %arg1[%c1_112, %c0_113, %c0_114] : memref<8x128x512xbf16, #tpu.memory_space<vmem>>, vector<1x128x512xbf16>
    %280 = vector.shape_cast %279 : vector<1x128x512xbf16> to vector<128x512xbf16>
    %cst_115 = arith.constant dense<0.000000e+00> : vector<8x512xf32>
    %281 = tpu.matmul %278, %280, %cst_115 {dimension_numbers = #tpu.dot_dimension_numbers<[1], [0], [0], [1], [0, 0, 1, 1], [], []>} : vector<8x128xbf16>, vector<128x512xbf16>, vector<8x512xf32> -> vector<8x512xf32>
    %282 = arith.truncf %253 : vector<8x128xf32> to vector<8x128xbf16>
    %c5_116 = arith.constant 5 : index
    %c0_117 = arith.constant 0 : index
    %c0_118 = arith.constant 0 : index
    %283 = vector.load %arg1[%c5_116, %c0_117, %c0_118] : memref<8x128x512xbf16, #tpu.memory_space<vmem>>, vector<1x128x512xbf16>
    %284 = vector.shape_cast %283 : vector<1x128x512xbf16> to vector<128x512xbf16>
    %cst_119 = arith.constant dense<0.000000e+00> : vector<8x512xf32>
    %285 = tpu.matmul %282, %284, %cst_119 {dimension_numbers = #tpu.dot_dimension_numbers<[1], [0], [0], [1], [0, 0, 1, 1], [], []>} : vector<8x128xbf16>, vector<128x512xbf16>, vector<8x512xf32> -> vector<8x512xf32>
    %286 = arith.addf %281, %285 : vector<8x512xf32>
    %c1_120 = arith.constant 1 : index
    %c0_121 = arith.constant 0 : index
    %c0_122 = arith.constant 0 : index
    %287 = vector.load %arg3[%c1_120, %c0_121, %c0_122] : memref<6x1x512xf32, #tpu.memory_space<vmem>>, vector<1x1x512xf32>
    %288 = vector.shape_cast %287 : vector<1x1x512xf32> to vector<1x512xf32>
    %289 = vector.broadcast %288 : vector<1x512xf32> to vector<8x512xf32>
    %290 = arith.addf %286, %289 : vector<8x512xf32>
    %291 = arith.negf %290 : vector<8x512xf32>
    %292 = math.exp %291 : vector<8x512xf32>
    %cst_123 = arith.constant 1.000000e+00 : f32
    %293 = vector.broadcast %cst_123 : f32 to vector<8x512xf32>
    %294 = arith.addf %293, %292 : vector<8x512xf32>
    %295 = arith.divf %293, %294 : vector<8x512xf32>
    %296 = vector.extract_strided_slice %295 {offsets = [0, 0], sizes = [8, 128], strides = [1, 1]} : vector<8x512xf32> to vector<8x128xf32>
    %297 = vector.extract_strided_slice %295 {offsets = [0, 128], sizes = [8, 128], strides = [1, 1]} : vector<8x512xf32> to vector<8x128xf32>
    %298 = vector.extract_strided_slice %295 {offsets = [0, 256], sizes = [8, 128], strides = [1, 1]} : vector<8x512xf32> to vector<8x128xf32>
    %cst_124 = arith.constant 2.000000e+00 : f32
    %299 = vector.broadcast %cst_124 : f32 to vector<8x128xf32>
    %300 = arith.mulf %299, %298 : vector<8x128xf32>
    %cst_125 = arith.constant 1.000000e+00 : f32
    %301 = vector.broadcast %cst_125 : f32 to vector<8x128xf32>
    %302 = arith.subf %300, %301 : vector<8x128xf32>
    %303 = vector.extract_strided_slice %295 {offsets = [0, 384], sizes = [8, 128], strides = [1, 1]} : vector<8x512xf32> to vector<8x128xf32>
    %304 = arith.mulf %297, %251 : vector<8x128xf32>
    %305 = arith.mulf %296, %302 : vector<8x128xf32>
    %306 = arith.addf %304, %305 : vector<8x128xf32>
    %307 = math.tanh %306 : vector<8x128xf32>
    %308 = arith.mulf %303, %307 : vector<8x128xf32>
    %c48 = arith.constant 48 : index
    %c0_126 = arith.constant 0 : index
    %309 = vector.load %arg6[%c48, %c0_126] : memref<64x512xf32, #tpu.memory_space<vmem>>, vector<8x512xf32>
    %310 = arith.truncf %277 : vector<8x128xf32> to vector<8x128xbf16>
    %c4_127 = arith.constant 4 : index
    %c0_128 = arith.constant 0 : index
    %c0_129 = arith.constant 0 : index
    %311 = vector.load %arg1[%c4_127, %c0_128, %c0_129] : memref<8x128x512xbf16, #tpu.memory_space<vmem>>, vector<1x128x512xbf16>
    %312 = vector.shape_cast %311 : vector<1x128x512xbf16> to vector<128x512xbf16>
    %cst_130 = arith.constant dense<0.000000e+00> : vector<8x512xf32>
    %313 = tpu.matmul %310, %312, %cst_130 {dimension_numbers = #tpu.dot_dimension_numbers<[1], [0], [0], [1], [0, 0, 1, 1], [], []>} : vector<8x128xbf16>, vector<128x512xbf16>, vector<8x512xf32> -> vector<8x512xf32>
    %314 = arith.addf %309, %313 : vector<8x512xf32>
    %315 = arith.negf %314 : vector<8x512xf32>
    %316 = math.exp %315 : vector<8x512xf32>
    %cst_131 = arith.constant 1.000000e+00 : f32
    %317 = vector.broadcast %cst_131 : f32 to vector<8x512xf32>
    %318 = arith.addf %317, %316 : vector<8x512xf32>
    %319 = arith.divf %317, %318 : vector<8x512xf32>
    %320 = vector.extract_strided_slice %319 {offsets = [0, 0], sizes = [8, 128], strides = [1, 1]} : vector<8x512xf32> to vector<8x128xf32>
    %321 = vector.extract_strided_slice %319 {offsets = [0, 128], sizes = [8, 128], strides = [1, 1]} : vector<8x512xf32> to vector<8x128xf32>
    %322 = vector.extract_strided_slice %319 {offsets = [0, 256], sizes = [8, 128], strides = [1, 1]} : vector<8x512xf32> to vector<8x128xf32>
    %cst_132 = arith.constant 2.000000e+00 : f32
    %323 = vector.broadcast %cst_132 : f32 to vector<8x128xf32>
    %324 = arith.mulf %323, %322 : vector<8x128xf32>
    %cst_133 = arith.constant 1.000000e+00 : f32
    %325 = vector.broadcast %cst_133 : f32 to vector<8x128xf32>
    %326 = arith.subf %324, %325 : vector<8x128xf32>
    %327 = vector.extract_strided_slice %319 {offsets = [0, 384], sizes = [8, 128], strides = [1, 1]} : vector<8x512xf32> to vector<8x128xf32>
    %328 = arith.mulf %321, %275 : vector<8x128xf32>
    %329 = arith.mulf %320, %326 : vector<8x128xf32>
    %330 = arith.addf %328, %329 : vector<8x128xf32>
    %331 = math.tanh %330 : vector<8x128xf32>
    %332 = arith.mulf %327, %331 : vector<8x128xf32>
    %333 = arith.truncf %277 : vector<8x128xf32> to vector<8x128xbf16>
    %c1_134 = arith.constant 1 : index
    %c0_135 = arith.constant 0 : index
    %c0_136 = arith.constant 0 : index
    %334 = vector.load %arg1[%c1_134, %c0_135, %c0_136] : memref<8x128x512xbf16, #tpu.memory_space<vmem>>, vector<1x128x512xbf16>
    %335 = vector.shape_cast %334 : vector<1x128x512xbf16> to vector<128x512xbf16>
    %cst_137 = arith.constant dense<0.000000e+00> : vector<8x512xf32>
    %336 = tpu.matmul %333, %335, %cst_137 {dimension_numbers = #tpu.dot_dimension_numbers<[1], [0], [0], [1], [0, 0, 1, 1], [], []>} : vector<8x128xbf16>, vector<128x512xbf16>, vector<8x512xf32> -> vector<8x512xf32>
    %337 = arith.truncf %308 : vector<8x128xf32> to vector<8x128xbf16>
    %c5_138 = arith.constant 5 : index
    %c0_139 = arith.constant 0 : index
    %c0_140 = arith.constant 0 : index
    %338 = vector.load %arg1[%c5_138, %c0_139, %c0_140] : memref<8x128x512xbf16, #tpu.memory_space<vmem>>, vector<1x128x512xbf16>
    %339 = vector.shape_cast %338 : vector<1x128x512xbf16> to vector<128x512xbf16>
    %cst_141 = arith.constant dense<0.000000e+00> : vector<8x512xf32>
    %340 = tpu.matmul %337, %339, %cst_141 {dimension_numbers = #tpu.dot_dimension_numbers<[1], [0], [0], [1], [0, 0, 1, 1], [], []>} : vector<8x128xbf16>, vector<128x512xbf16>, vector<8x512xf32> -> vector<8x512xf32>
    %341 = arith.addf %336, %340 : vector<8x512xf32>
    %c1_142 = arith.constant 1 : index
    %c0_143 = arith.constant 0 : index
    %c0_144 = arith.constant 0 : index
    %342 = vector.load %arg3[%c1_142, %c0_143, %c0_144] : memref<6x1x512xf32, #tpu.memory_space<vmem>>, vector<1x1x512xf32>
    %343 = vector.shape_cast %342 : vector<1x1x512xf32> to vector<1x512xf32>
    %344 = vector.broadcast %343 : vector<1x512xf32> to vector<8x512xf32>
    %345 = arith.addf %341, %344 : vector<8x512xf32>
    %346 = arith.negf %345 : vector<8x512xf32>
    %347 = math.exp %346 : vector<8x512xf32>
    %cst_145 = arith.constant 1.000000e+00 : f32
    %348 = vector.broadcast %cst_145 : f32 to vector<8x512xf32>
    %349 = arith.addf %348, %347 : vector<8x512xf32>
    %350 = arith.divf %348, %349 : vector<8x512xf32>
    %351 = vector.extract_strided_slice %350 {offsets = [0, 0], sizes = [8, 128], strides = [1, 1]} : vector<8x512xf32> to vector<8x128xf32>
    %352 = vector.extract_strided_slice %350 {offsets = [0, 128], sizes = [8, 128], strides = [1, 1]} : vector<8x512xf32> to vector<8x128xf32>
    %353 = vector.extract_strided_slice %350 {offsets = [0, 256], sizes = [8, 128], strides = [1, 1]} : vector<8x512xf32> to vector<8x128xf32>
    %cst_146 = arith.constant 2.000000e+00 : f32
    %354 = vector.broadcast %cst_146 : f32 to vector<8x128xf32>
    %355 = arith.mulf %354, %353 : vector<8x128xf32>
    %cst_147 = arith.constant 1.000000e+00 : f32
    %356 = vector.broadcast %cst_147 : f32 to vector<8x128xf32>
    %357 = arith.subf %355, %356 : vector<8x128xf32>
    %358 = vector.extract_strided_slice %350 {offsets = [0, 384], sizes = [8, 128], strides = [1, 1]} : vector<8x512xf32> to vector<8x128xf32>
    %359 = arith.mulf %352, %306 : vector<8x128xf32>
    %360 = arith.mulf %351, %357 : vector<8x128xf32>
    %361 = arith.addf %359, %360 : vector<8x128xf32>
    %362 = math.tanh %361 : vector<8x128xf32>
    %363 = arith.mulf %358, %362 : vector<8x128xf32>
    %c56 = arith.constant 56 : index
    %c0_148 = arith.constant 0 : index
    %364 = vector.load %arg6[%c56, %c0_148] : memref<64x512xf32, #tpu.memory_space<vmem>>, vector<8x512xf32>
    %365 = arith.truncf %332 : vector<8x128xf32> to vector<8x128xbf16>
    %c4_149 = arith.constant 4 : index
    %c0_150 = arith.constant 0 : index
    %c0_151 = arith.constant 0 : index
    %366 = vector.load %arg1[%c4_149, %c0_150, %c0_151] : memref<8x128x512xbf16, #tpu.memory_space<vmem>>, vector<1x128x512xbf16>
    %367 = vector.shape_cast %366 : vector<1x128x512xbf16> to vector<128x512xbf16>
    %cst_152 = arith.constant dense<0.000000e+00> : vector<8x512xf32>
    %368 = tpu.matmul %365, %367, %cst_152 {dimension_numbers = #tpu.dot_dimension_numbers<[1], [0], [0], [1], [0, 0, 1, 1], [], []>} : vector<8x128xbf16>, vector<128x512xbf16>, vector<8x512xf32> -> vector<8x512xf32>
    %369 = arith.addf %364, %368 : vector<8x512xf32>
    %370 = arith.negf %369 : vector<8x512xf32>
    %371 = math.exp %370 : vector<8x512xf32>
    %cst_153 = arith.constant 1.000000e+00 : f32
    %372 = vector.broadcast %cst_153 : f32 to vector<8x512xf32>
    %373 = arith.addf %372, %371 : vector<8x512xf32>
    %374 = arith.divf %372, %373 : vector<8x512xf32>
    %375 = vector.extract_strided_slice %374 {offsets = [0, 0], sizes = [8, 128], strides = [1, 1]} : vector<8x512xf32> to vector<8x128xf32>
    %376 = vector.extract_strided_slice %374 {offsets = [0, 128], sizes = [8, 128], strides = [1, 1]} : vector<8x512xf32> to vector<8x128xf32>
    %377 = vector.extract_strided_slice %374 {offsets = [0, 256], sizes = [8, 128], strides = [1, 1]} : vector<8x512xf32> to vector<8x128xf32>
    %cst_154 = arith.constant 2.000000e+00 : f32
    %378 = vector.broadcast %cst_154 : f32 to vector<8x128xf32>
    %379 = arith.mulf %378, %377 : vector<8x128xf32>
    %cst_155 = arith.constant 1.000000e+00 : f32
    %380 = vector.broadcast %cst_155 : f32 to vector<8x128xf32>
    %381 = arith.subf %379, %380 : vector<8x128xf32>
    %382 = vector.extract_strided_slice %374 {offsets = [0, 384], sizes = [8, 128], strides = [1, 1]} : vector<8x512xf32> to vector<8x128xf32>
    %383 = arith.mulf %376, %330 : vector<8x128xf32>
    %384 = arith.mulf %375, %381 : vector<8x128xf32>
    %385 = arith.addf %383, %384 : vector<8x128xf32>
    %386 = math.tanh %385 : vector<8x128xf32>
    %387 = arith.mulf %382, %386 : vector<8x128xf32>
    %388 = arith.truncf %332 : vector<8x128xf32> to vector<8x128xbf16>
    %c1_156 = arith.constant 1 : index
    %c0_157 = arith.constant 0 : index
    %c0_158 = arith.constant 0 : index
    %389 = vector.load %arg1[%c1_156, %c0_157, %c0_158] : memref<8x128x512xbf16, #tpu.memory_space<vmem>>, vector<1x128x512xbf16>
    %390 = vector.shape_cast %389 : vector<1x128x512xbf16> to vector<128x512xbf16>
    %cst_159 = arith.constant dense<0.000000e+00> : vector<8x512xf32>
    %391 = tpu.matmul %388, %390, %cst_159 {dimension_numbers = #tpu.dot_dimension_numbers<[1], [0], [0], [1], [0, 0, 1, 1], [], []>} : vector<8x128xbf16>, vector<128x512xbf16>, vector<8x512xf32> -> vector<8x512xf32>
    %392 = arith.truncf %363 : vector<8x128xf32> to vector<8x128xbf16>
    %c5_160 = arith.constant 5 : index
    %c0_161 = arith.constant 0 : index
    %c0_162 = arith.constant 0 : index
    %393 = vector.load %arg1[%c5_160, %c0_161, %c0_162] : memref<8x128x512xbf16, #tpu.memory_space<vmem>>, vector<1x128x512xbf16>
    %394 = vector.shape_cast %393 : vector<1x128x512xbf16> to vector<128x512xbf16>
    %cst_163 = arith.constant dense<0.000000e+00> : vector<8x512xf32>
    %395 = tpu.matmul %392, %394, %cst_163 {dimension_numbers = #tpu.dot_dimension_numbers<[1], [0], [0], [1], [0, 0, 1, 1], [], []>} : vector<8x128xbf16>, vector<128x512xbf16>, vector<8x512xf32> -> vector<8x512xf32>
    %396 = arith.addf %391, %395 : vector<8x512xf32>
    %c1_164 = arith.constant 1 : index
    %c0_165 = arith.constant 0 : index
    %c0_166 = arith.constant 0 : index
    %397 = vector.load %arg3[%c1_164, %c0_165, %c0_166] : memref<6x1x512xf32, #tpu.memory_space<vmem>>, vector<1x1x512xf32>
    %398 = vector.shape_cast %397 : vector<1x1x512xf32> to vector<1x512xf32>
    %399 = vector.broadcast %398 : vector<1x512xf32> to vector<8x512xf32>
    %400 = arith.addf %396, %399 : vector<8x512xf32>
    %401 = arith.negf %400 : vector<8x512xf32>
    %402 = math.exp %401 : vector<8x512xf32>
    %cst_167 = arith.constant 1.000000e+00 : f32
    %403 = vector.broadcast %cst_167 : f32 to vector<8x512xf32>
    %404 = arith.addf %403, %402 : vector<8x512xf32>
    %405 = arith.divf %403, %404 : vector<8x512xf32>
    %406 = vector.extract_strided_slice %405 {offsets = [0, 0], sizes = [8, 128], strides = [1, 1]} : vector<8x512xf32> to vector<8x128xf32>
    %407 = vector.extract_strided_slice %405 {offsets = [0, 128], sizes = [8, 128], strides = [1, 1]} : vector<8x512xf32> to vector<8x128xf32>
    %408 = vector.extract_strided_slice %405 {offsets = [0, 256], sizes = [8, 128], strides = [1, 1]} : vector<8x512xf32> to vector<8x128xf32>
    %cst_168 = arith.constant 2.000000e+00 : f32
    %409 = vector.broadcast %cst_168 : f32 to vector<8x128xf32>
    %410 = arith.mulf %409, %408 : vector<8x128xf32>
    %cst_169 = arith.constant 1.000000e+00 : f32
    %411 = vector.broadcast %cst_169 : f32 to vector<8x128xf32>
    %412 = arith.subf %410, %411 : vector<8x128xf32>
    %413 = vector.extract_strided_slice %405 {offsets = [0, 384], sizes = [8, 128], strides = [1, 1]} : vector<8x512xf32> to vector<8x128xf32>
    %414 = arith.mulf %407, %361 : vector<8x128xf32>
    %415 = arith.mulf %406, %412 : vector<8x128xf32>
    %416 = arith.addf %414, %415 : vector<8x128xf32>
    %417 = math.tanh %416 : vector<8x128xf32>
    %418 = arith.mulf %413, %417 : vector<8x128xf32>
    %419 = arith.truncf %387 : vector<8x128xf32> to vector<8x128xbf16>
    %c1_170 = arith.constant 1 : index
    %c0_171 = arith.constant 0 : index
    %c0_172 = arith.constant 0 : index
    %420 = vector.load %arg1[%c1_170, %c0_171, %c0_172] : memref<8x128x512xbf16, #tpu.memory_space<vmem>>, vector<1x128x512xbf16>
    %421 = vector.shape_cast %420 : vector<1x128x512xbf16> to vector<128x512xbf16>
    %cst_173 = arith.constant dense<0.000000e+00> : vector<8x512xf32>
    %422 = tpu.matmul %419, %421, %cst_173 {dimension_numbers = #tpu.dot_dimension_numbers<[1], [0], [0], [1], [0, 0, 1, 1], [], []>} : vector<8x128xbf16>, vector<128x512xbf16>, vector<8x512xf32> -> vector<8x512xf32>
    %423 = arith.truncf %418 : vector<8x128xf32> to vector<8x128xbf16>
    %c5_174 = arith.constant 5 : index
    %c0_175 = arith.constant 0 : index
    %c0_176 = arith.constant 0 : index
    %424 = vector.load %arg1[%c5_174, %c0_175, %c0_176] : memref<8x128x512xbf16, #tpu.memory_space<vmem>>, vector<1x128x512xbf16>
    %425 = vector.shape_cast %424 : vector<1x128x512xbf16> to vector<128x512xbf16>
    %cst_177 = arith.constant dense<0.000000e+00> : vector<8x512xf32>
    %426 = tpu.matmul %423, %425, %cst_177 {dimension_numbers = #tpu.dot_dimension_numbers<[1], [0], [0], [1], [0, 0, 1, 1], [], []>} : vector<8x128xbf16>, vector<128x512xbf16>, vector<8x512xf32> -> vector<8x512xf32>
    %427 = arith.addf %422, %426 : vector<8x512xf32>
    %c1_178 = arith.constant 1 : index
    %c0_179 = arith.constant 0 : index
    %c0_180 = arith.constant 0 : index
    %428 = vector.load %arg3[%c1_178, %c0_179, %c0_180] : memref<6x1x512xf32, #tpu.memory_space<vmem>>, vector<1x1x512xf32>
    %429 = vector.shape_cast %428 : vector<1x1x512xf32> to vector<1x512xf32>
    %430 = vector.broadcast %429 : vector<1x512xf32> to vector<8x512xf32>
    %431 = arith.addf %427, %430 : vector<8x512xf32>
    %432 = arith.negf %431 : vector<8x512xf32>
    %433 = math.exp %432 : vector<8x512xf32>
    %cst_181 = arith.constant 1.000000e+00 : f32
    %434 = vector.broadcast %cst_181 : f32 to vector<8x512xf32>
    %435 = arith.addf %434, %433 : vector<8x512xf32>
    %436 = arith.divf %434, %435 : vector<8x512xf32>
    %437 = vector.extract_strided_slice %436 {offsets = [0, 0], sizes = [8, 128], strides = [1, 1]} : vector<8x512xf32> to vector<8x128xf32>
    %438 = vector.extract_strided_slice %436 {offsets = [0, 128], sizes = [8, 128], strides = [1, 1]} : vector<8x512xf32> to vector<8x128xf32>
    %439 = vector.extract_strided_slice %436 {offsets = [0, 256], sizes = [8, 128], strides = [1, 1]} : vector<8x512xf32> to vector<8x128xf32>
    %cst_182 = arith.constant 2.000000e+00 : f32
    %440 = vector.broadcast %cst_182 : f32 to vector<8x128xf32>
    %441 = arith.mulf %440, %439 : vector<8x128xf32>
    %cst_183 = arith.constant 1.000000e+00 : f32
    %442 = vector.broadcast %cst_183 : f32 to vector<8x128xf32>
    %443 = arith.subf %441, %442 : vector<8x128xf32>
    %444 = vector.extract_strided_slice %436 {offsets = [0, 384], sizes = [8, 128], strides = [1, 1]} : vector<8x512xf32> to vector<8x128xf32>
    %445 = arith.mulf %438, %416 : vector<8x128xf32>
    %446 = arith.mulf %437, %443 : vector<8x128xf32>
    %447 = arith.addf %445, %446 : vector<8x128xf32>
    %448 = math.tanh %447 : vector<8x128xf32>
    %449 = arith.mulf %444, %448 : vector<8x128xf32>
    %450 = arith.truncf %449 : vector<8x128xf32> to vector<8x128xbf16>
    %c0_184 = arith.constant 0 : index
    %c0_185 = arith.constant 0 : index
    %c0_186 = arith.constant 0 : index
    %451 = vector.load %arg2[%c0_184, %c0_185, %c0_186] : memref<2x128x128xbf16, #tpu.memory_space<vmem>>, vector<1x128x128xbf16>
    %452 = vector.shape_cast %451 : vector<1x128x128xbf16> to vector<128x128xbf16>
    %cst_187 = arith.constant dense<0.000000e+00> : vector<8x128xf32>
    %453 = tpu.matmul %450, %452, %cst_187 {dimension_numbers = #tpu.dot_dimension_numbers<[1], [0], [0], [1], [0, 0, 1, 1], [], []>} : vector<8x128xbf16>, vector<128x128xbf16>, vector<8x128xf32> -> vector<8x128xf32>
    %c4_188 = arith.constant 4 : index
    %c0_189 = arith.constant 0 : index
    %c0_190 = arith.constant 0 : index
    %454 = vector.load %arg3[%c4_188, %c0_189, %c0_190] : memref<6x1x512xf32, #tpu.memory_space<vmem>>, vector<1x1x512xf32>
    %455 = vector.shape_cast %454 : vector<1x1x512xf32> to vector<1x512xf32>
    %456 = vector.extract_strided_slice %455 {offsets = [0, 0], sizes = [1, 128], strides = [1, 1]} : vector<1x512xf32> to vector<1x128xf32>
    %457 = vector.broadcast %456 : vector<1x128xf32> to vector<8x128xf32>
    %458 = arith.addf %453, %457 : vector<8x128xf32>
    %c0_191 = arith.constant 0 : index
    %c0_192 = arith.constant 0 : index
    %459 = vector.load %arg5[%c0_191, %c0_192] : memref<8x128xf32, #tpu.memory_space<vmem>>, vector<8x128xf32>
    tpu.vector_store %arg5[%c0_191, %c0_192], %458 {strides = array<i32>} : memref<8x128xf32, #tpu.memory_space<vmem>>, vector<8x128xf32>,
    %460 = arith.truncf %458 : vector<8x128xf32> to vector<8x128xbf16>
    %c2 = arith.constant 2 : index
    %c0_193 = arith.constant 0 : index
    %c0_194 = arith.constant 0 : index
    %461 = vector.load %arg1[%c2, %c0_193, %c0_194] : memref<8x128x512xbf16, #tpu.memory_space<vmem>>, vector<1x128x512xbf16>
    %462 = vector.shape_cast %461 : vector<1x128x512xbf16> to vector<128x512xbf16>
    %cst_195 = arith.constant dense<0.000000e+00> : vector<8x512xf32>
    %463 = tpu.matmul %460, %462, %cst_195 {dimension_numbers = #tpu.dot_dimension_numbers<[1], [0], [0], [1], [0, 0, 1, 1], [], []>} : vector<8x128xbf16>, vector<128x512xbf16>, vector<8x512xf32> -> vector<8x512xf32>
    %c2_196 = arith.constant 2 : index
    %c0_197 = arith.constant 0 : index
    %c0_198 = arith.constant 0 : index
    %464 = vector.load %arg3[%c2_196, %c0_197, %c0_198] : memref<6x1x512xf32, #tpu.memory_space<vmem>>, vector<1x1x512xf32>
    %465 = vector.shape_cast %464 : vector<1x1x512xf32> to vector<1x512xf32>
    %466 = vector.broadcast %465 : vector<1x512xf32> to vector<8x512xf32>
    %467 = arith.addf %463, %466 : vector<8x512xf32>
    %468 = arith.truncf %0 : vector<8x128xf32> to vector<8x128xbf16>
    %c6 = arith.constant 6 : index
    %c0_199 = arith.constant 0 : index
    %c0_200 = arith.constant 0 : index
    %469 = vector.load %arg1[%c6, %c0_199, %c0_200] : memref<8x128x512xbf16, #tpu.memory_space<vmem>>, vector<1x128x512xbf16>
    %470 = vector.shape_cast %469 : vector<1x128x512xbf16> to vector<128x512xbf16>
    %cst_201 = arith.constant dense<0.000000e+00> : vector<8x512xf32>
    %471 = tpu.matmul %468, %470, %cst_201 {dimension_numbers = #tpu.dot_dimension_numbers<[1], [0], [0], [1], [0, 0, 1, 1], [], []>} : vector<8x128xbf16>, vector<128x512xbf16>, vector<8x512xf32> -> vector<8x512xf32>
    %472 = arith.addf %467, %471 : vector<8x512xf32>
    %473 = arith.negf %472 : vector<8x512xf32>
    %474 = math.exp %473 : vector<8x512xf32>
    %cst_202 = arith.constant 1.000000e+00 : f32
    %475 = vector.broadcast %cst_202 : f32 to vector<8x512xf32>
    %476 = arith.addf %475, %474 : vector<8x512xf32>
    %477 = arith.divf %475, %476 : vector<8x512xf32>
    %478 = vector.extract_strided_slice %477 {offsets = [0, 0], sizes = [8, 128], strides = [1, 1]} : vector<8x512xf32> to vector<8x128xf32>
    %479 = vector.extract_strided_slice %477 {offsets = [0, 128], sizes = [8, 128], strides = [1, 1]} : vector<8x512xf32> to vector<8x128xf32>
    %480 = vector.extract_strided_slice %477 {offsets = [0, 256], sizes = [8, 128], strides = [1, 1]} : vector<8x512xf32> to vector<8x128xf32>
    %cst_203 = arith.constant 2.000000e+00 : f32
    %481 = vector.broadcast %cst_203 : f32 to vector<8x128xf32>
    %482 = arith.mulf %481, %480 : vector<8x128xf32>
    %cst_204 = arith.constant 1.000000e+00 : f32
    %483 = vector.broadcast %cst_204 : f32 to vector<8x128xf32>
    %484 = arith.subf %482, %483 : vector<8x128xf32>
    %485 = vector.extract_strided_slice %477 {offsets = [0, 384], sizes = [8, 128], strides = [1, 1]} : vector<8x512xf32> to vector<8x128xf32>
    %486 = arith.mulf %479, %0 : vector<8x128xf32>
    %487 = arith.mulf %478, %484 : vector<8x128xf32>
    %488 = arith.addf %486, %487 : vector<8x128xf32>
    %489 = math.tanh %488 : vector<8x128xf32>
    %490 = arith.mulf %485, %489 : vector<8x128xf32>
    %491 = arith.truncf %490 : vector<8x128xf32> to vector<8x128xbf16>
    %c6_205 = arith.constant 6 : index
    %c0_206 = arith.constant 0 : index
    %c0_207 = arith.constant 0 : index
    %492 = vector.load %arg1[%c6_205, %c0_206, %c0_207] : memref<8x128x512xbf16, #tpu.memory_space<vmem>>, vector<1x128x512xbf16>
    %493 = vector.shape_cast %492 : vector<1x128x512xbf16> to vector<128x512xbf16>
    %cst_208 = arith.constant dense<0.000000e+00> : vector<8x512xf32>
    %494 = tpu.matmul %491, %493, %cst_208 {dimension_numbers = #tpu.dot_dimension_numbers<[1], [0], [0], [1], [0, 0, 1, 1], [], []>} : vector<8x128xbf16>, vector<128x512xbf16>, vector<8x512xf32> -> vector<8x512xf32>
    %495 = arith.addf %467, %494 : vector<8x512xf32>
    %496 = arith.negf %495 : vector<8x512xf32>
    %497 = math.exp %496 : vector<8x512xf32>
    %cst_209 = arith.constant 1.000000e+00 : f32
    %498 = vector.broadcast %cst_209 : f32 to vector<8x512xf32>
    %499 = arith.addf %498, %497 : vector<8x512xf32>
    %500 = arith.divf %498, %499 : vector<8x512xf32>
    %501 = vector.extract_strided_slice %500 {offsets = [0, 0], sizes = [8, 128], strides = [1, 1]} : vector<8x512xf32> to vector<8x128xf32>
    %502 = vector.extract_strided_slice %500 {offsets = [0, 128], sizes = [8, 128], strides = [1, 1]} : vector<8x512xf32> to vector<8x128xf32>
    %503 = vector.extract_strided_slice %500 {offsets = [0, 256], sizes = [8, 128], strides = [1, 1]} : vector<8x512xf32> to vector<8x128xf32>
    %cst_210 = arith.constant 2.000000e+00 : f32
    %504 = vector.broadcast %cst_210 : f32 to vector<8x128xf32>
    %505 = arith.mulf %504, %503 : vector<8x128xf32>
    %cst_211 = arith.constant 1.000000e+00 : f32
    %506 = vector.broadcast %cst_211 : f32 to vector<8x128xf32>
    %507 = arith.subf %505, %506 : vector<8x128xf32>
    %508 = vector.extract_strided_slice %500 {offsets = [0, 384], sizes = [8, 128], strides = [1, 1]} : vector<8x512xf32> to vector<8x128xf32>
    %509 = arith.mulf %502, %488 : vector<8x128xf32>
    %510 = arith.mulf %501, %507 : vector<8x128xf32>
    %511 = arith.addf %509, %510 : vector<8x128xf32>
    %512 = math.tanh %511 : vector<8x128xf32>
    %513 = arith.mulf %508, %512 : vector<8x128xf32>
    %514 = arith.truncf %490 : vector<8x128xf32> to vector<8x128xbf16>
    %c3 = arith.constant 3 : index
    %c0_212 = arith.constant 0 : index
    %c0_213 = arith.constant 0 : index
    %515 = vector.load %arg1[%c3, %c0_212, %c0_213] : memref<8x128x512xbf16, #tpu.memory_space<vmem>>, vector<1x128x512xbf16>
    %516 = vector.shape_cast %515 : vector<1x128x512xbf16> to vector<128x512xbf16>
    %cst_214 = arith.constant dense<0.000000e+00> : vector<8x512xf32>
    %517 = tpu.matmul %514, %516, %cst_214 {dimension_numbers = #tpu.dot_dimension_numbers<[1], [0], [0], [1], [0, 0, 1, 1], [], []>} : vector<8x128xbf16>, vector<128x512xbf16>, vector<8x512xf32> -> vector<8x512xf32>
    %518 = arith.truncf %0 : vector<8x128xf32> to vector<8x128xbf16>
    %c7 = arith.constant 7 : index
    %c0_215 = arith.constant 0 : index
    %c0_216 = arith.constant 0 : index
    %519 = vector.load %arg1[%c7, %c0_215, %c0_216] : memref<8x128x512xbf16, #tpu.memory_space<vmem>>, vector<1x128x512xbf16>
    %520 = vector.shape_cast %519 : vector<1x128x512xbf16> to vector<128x512xbf16>
    %cst_217 = arith.constant dense<0.000000e+00> : vector<8x512xf32>
    %521 = tpu.matmul %518, %520, %cst_217 {dimension_numbers = #tpu.dot_dimension_numbers<[1], [0], [0], [1], [0, 0, 1, 1], [], []>} : vector<8x128xbf16>, vector<128x512xbf16>, vector<8x512xf32> -> vector<8x512xf32>
    %522 = arith.addf %517, %521 : vector<8x512xf32>
    %c3_218 = arith.constant 3 : index
    %c0_219 = arith.constant 0 : index
    %c0_220 = arith.constant 0 : index
    %523 = vector.load %arg3[%c3_218, %c0_219, %c0_220] : memref<6x1x512xf32, #tpu.memory_space<vmem>>, vector<1x1x512xf32>
    %524 = vector.shape_cast %523 : vector<1x1x512xf32> to vector<1x512xf32>
    %525 = vector.broadcast %524 : vector<1x512xf32> to vector<8x512xf32>
    %526 = arith.addf %522, %525 : vector<8x512xf32>
    %527 = arith.negf %526 : vector<8x512xf32>
    %528 = math.exp %527 : vector<8x512xf32>
    %cst_221 = arith.constant 1.000000e+00 : f32
    %529 = vector.broadcast %cst_221 : f32 to vector<8x512xf32>
    %530 = arith.addf %529, %528 : vector<8x512xf32>
    %531 = arith.divf %529, %530 : vector<8x512xf32>
    %532 = vector.extract_strided_slice %531 {offsets = [0, 0], sizes = [8, 128], strides = [1, 1]} : vector<8x512xf32> to vector<8x128xf32>
    %533 = vector.extract_strided_slice %531 {offsets = [0, 128], sizes = [8, 128], strides = [1, 1]} : vector<8x512xf32> to vector<8x128xf32>
    %534 = vector.extract_strided_slice %531 {offsets = [0, 256], sizes = [8, 128], strides = [1, 1]} : vector<8x512xf32> to vector<8x128xf32>
    %cst_222 = arith.constant 2.000000e+00 : f32
    %535 = vector.broadcast %cst_222 : f32 to vector<8x128xf32>
    %536 = arith.mulf %535, %534 : vector<8x128xf32>
    %cst_223 = arith.constant 1.000000e+00 : f32
    %537 = vector.broadcast %cst_223 : f32 to vector<8x128xf32>
    %538 = arith.subf %536, %537 : vector<8x128xf32>
    %539 = vector.extract_strided_slice %531 {offsets = [0, 384], sizes = [8, 128], strides = [1, 1]} : vector<8x512xf32> to vector<8x128xf32>
    %540 = arith.mulf %533, %0 : vector<8x128xf32>
    %541 = arith.mulf %532, %538 : vector<8x128xf32>
    %542 = arith.addf %540, %541 : vector<8x128xf32>
    %543 = math.tanh %542 : vector<8x128xf32>
    %544 = arith.mulf %539, %543 : vector<8x128xf32>
    %c0_224 = arith.constant 0 : index
    %c0_225 = arith.constant 0 : index
    %545 = vector.load %arg7[%c0_224, %c0_225] : memref<64x128xf32, #tpu.memory_space<vmem>>, vector<8x128xf32>
    tpu.vector_store %arg7[%c0_224, %c0_225], %544 {strides = array<i32>} : memref<64x128xf32, #tpu.memory_space<vmem>>, vector<8x128xf32>,
    %546 = arith.truncf %513 : vector<8x128xf32> to vector<8x128xbf16>
    %c6_226 = arith.constant 6 : index
    %c0_227 = arith.constant 0 : index
    %c0_228 = arith.constant 0 : index
    %547 = vector.load %arg1[%c6_226, %c0_227, %c0_228] : memref<8x128x512xbf16, #tpu.memory_space<vmem>>, vector<1x128x512xbf16>
    %548 = vector.shape_cast %547 : vector<1x128x512xbf16> to vector<128x512xbf16>
    %cst_229 = arith.constant dense<0.000000e+00> : vector<8x512xf32>
    %549 = tpu.matmul %546, %548, %cst_229 {dimension_numbers = #tpu.dot_dimension_numbers<[1], [0], [0], [1], [0, 0, 1, 1], [], []>} : vector<8x128xbf16>, vector<128x512xbf16>, vector<8x512xf32> -> vector<8x512xf32>
    %550 = arith.addf %467, %549 : vector<8x512xf32>
    %551 = arith.negf %550 : vector<8x512xf32>
    %552 = math.exp %551 : vector<8x512xf32>
    %cst_230 = arith.constant 1.000000e+00 : f32
    %553 = vector.broadcast %cst_230 : f32 to vector<8x512xf32>
    %554 = arith.addf %553, %552 : vector<8x512xf32>
    %555 = arith.divf %553, %554 : vector<8x512xf32>
    %556 = vector.extract_strided_slice %555 {offsets = [0, 0], sizes = [8, 128], strides = [1, 1]} : vector<8x512xf32> to vector<8x128xf32>
    %557 = vector.extract_strided_slice %555 {offsets = [0, 128], sizes = [8, 128], strides = [1, 1]} : vector<8x512xf32> to vector<8x128xf32>
    %558 = vector.extract_strided_slice %555 {offsets = [0, 256], sizes = [8, 128], strides = [1, 1]} : vector<8x512xf32> to vector<8x128xf32>
    %cst_231 = arith.constant 2.000000e+00 : f32
    %559 = vector.broadcast %cst_231 : f32 to vector<8x128xf32>
    %560 = arith.mulf %559, %558 : vector<8x128xf32>
    %cst_232 = arith.constant 1.000000e+00 : f32
    %561 = vector.broadcast %cst_232 : f32 to vector<8x128xf32>
    %562 = arith.subf %560, %561 : vector<8x128xf32>
    %563 = vector.extract_strided_slice %555 {offsets = [0, 384], sizes = [8, 128], strides = [1, 1]} : vector<8x512xf32> to vector<8x128xf32>
    %564 = arith.mulf %557, %511 : vector<8x128xf32>
    %565 = arith.mulf %556, %562 : vector<8x128xf32>
    %566 = arith.addf %564, %565 : vector<8x128xf32>
    %567 = math.tanh %566 : vector<8x128xf32>
    %568 = arith.mulf %563, %567 : vector<8x128xf32>
    %569 = arith.truncf %513 : vector<8x128xf32> to vector<8x128xbf16>
    %c3_233 = arith.constant 3 : index
    %c0_234 = arith.constant 0 : index
    %c0_235 = arith.constant 0 : index
    %570 = vector.load %arg1[%c3_233, %c0_234, %c0_235] : memref<8x128x512xbf16, #tpu.memory_space<vmem>>, vector<1x128x512xbf16>
    %571 = vector.shape_cast %570 : vector<1x128x512xbf16> to vector<128x512xbf16>
    %cst_236 = arith.constant dense<0.000000e+00> : vector<8x512xf32>
    %572 = tpu.matmul %569, %571, %cst_236 {dimension_numbers = #tpu.dot_dimension_numbers<[1], [0], [0], [1], [0, 0, 1, 1], [], []>} : vector<8x128xbf16>, vector<128x512xbf16>, vector<8x512xf32> -> vector<8x512xf32>
    %573 = arith.truncf %544 : vector<8x128xf32> to vector<8x128xbf16>
    %c7_237 = arith.constant 7 : index
    %c0_238 = arith.constant 0 : index
    %c0_239 = arith.constant 0 : index
    %574 = vector.load %arg1[%c7_237, %c0_238, %c0_239] : memref<8x128x512xbf16, #tpu.memory_space<vmem>>, vector<1x128x512xbf16>
    %575 = vector.shape_cast %574 : vector<1x128x512xbf16> to vector<128x512xbf16>
    %cst_240 = arith.constant dense<0.000000e+00> : vector<8x512xf32>
    %576 = tpu.matmul %573, %575, %cst_240 {dimension_numbers = #tpu.dot_dimension_numbers<[1], [0], [0], [1], [0, 0, 1, 1], [], []>} : vector<8x128xbf16>, vector<128x512xbf16>, vector<8x512xf32> -> vector<8x512xf32>
    %577 = arith.addf %572, %576 : vector<8x512xf32>
    %c3_241 = arith.constant 3 : index
    %c0_242 = arith.constant 0 : index
    %c0_243 = arith.constant 0 : index
    %578 = vector.load %arg3[%c3_241, %c0_242, %c0_243] : memref<6x1x512xf32, #tpu.memory_space<vmem>>, vector<1x1x512xf32>
    %579 = vector.shape_cast %578 : vector<1x1x512xf32> to vector<1x512xf32>
    %580 = vector.broadcast %579 : vector<1x512xf32> to vector<8x512xf32>
    %581 = arith.addf %577, %580 : vector<8x512xf32>
    %582 = arith.negf %581 : vector<8x512xf32>
    %583 = math.exp %582 : vector<8x512xf32>
    %cst_244 = arith.constant 1.000000e+00 : f32
    %584 = vector.broadcast %cst_244 : f32 to vector<8x512xf32>
    %585 = arith.addf %584, %583 : vector<8x512xf32>
    %586 = arith.divf %584, %585 : vector<8x512xf32>
    %587 = vector.extract_strided_slice %586 {offsets = [0, 0], sizes = [8, 128], strides = [1, 1]} : vector<8x512xf32> to vector<8x128xf32>
    %588 = vector.extract_strided_slice %586 {offsets = [0, 128], sizes = [8, 128], strides = [1, 1]} : vector<8x512xf32> to vector<8x128xf32>
    %589 = vector.extract_strided_slice %586 {offsets = [0, 256], sizes = [8, 128], strides = [1, 1]} : vector<8x512xf32> to vector<8x128xf32>
    %cst_245 = arith.constant 2.000000e+00 : f32
    %590 = vector.broadcast %cst_245 : f32 to vector<8x128xf32>
    %591 = arith.mulf %590, %589 : vector<8x128xf32>
    %cst_246 = arith.constant 1.000000e+00 : f32
    %592 = vector.broadcast %cst_246 : f32 to vector<8x128xf32>
    %593 = arith.subf %591, %592 : vector<8x128xf32>
    %594 = vector.extract_strided_slice %586 {offsets = [0, 384], sizes = [8, 128], strides = [1, 1]} : vector<8x512xf32> to vector<8x128xf32>
    %595 = arith.mulf %588, %542 : vector<8x128xf32>
    %596 = arith.mulf %587, %593 : vector<8x128xf32>
    %597 = arith.addf %595, %596 : vector<8x128xf32>
    %598 = math.tanh %597 : vector<8x128xf32>
    %599 = arith.mulf %594, %598 : vector<8x128xf32>
    %c8_247 = arith.constant 8 : index
    %c0_248 = arith.constant 0 : index
    %600 = vector.load %arg7[%c8_247, %c0_248] : memref<64x128xf32, #tpu.memory_space<vmem>>, vector<8x128xf32>
    tpu.vector_store %arg7[%c8_247, %c0_248], %599 {strides = array<i32>} : memref<64x128xf32, #tpu.memory_space<vmem>>, vector<8x128xf32>,
    %601 = arith.truncf %568 : vector<8x128xf32> to vector<8x128xbf16>
    %c6_249 = arith.constant 6 : index
    %c0_250 = arith.constant 0 : index
    %c0_251 = arith.constant 0 : index
    %602 = vector.load %arg1[%c6_249, %c0_250, %c0_251] : memref<8x128x512xbf16, #tpu.memory_space<vmem>>, vector<1x128x512xbf16>
    %603 = vector.shape_cast %602 : vector<1x128x512xbf16> to vector<128x512xbf16>
    %cst_252 = arith.constant dense<0.000000e+00> : vector<8x512xf32>
    %604 = tpu.matmul %601, %603, %cst_252 {dimension_numbers = #tpu.dot_dimension_numbers<[1], [0], [0], [1], [0, 0, 1, 1], [], []>} : vector<8x128xbf16>, vector<128x512xbf16>, vector<8x512xf32> -> vector<8x512xf32>
    %605 = arith.addf %467, %604 : vector<8x512xf32>
    %606 = arith.negf %605 : vector<8x512xf32>
    %607 = math.exp %606 : vector<8x512xf32>
    %cst_253 = arith.constant 1.000000e+00 : f32
    %608 = vector.broadcast %cst_253 : f32 to vector<8x512xf32>
    %609 = arith.addf %608, %607 : vector<8x512xf32>
    %610 = arith.divf %608, %609 : vector<8x512xf32>
    %611 = vector.extract_strided_slice %610 {offsets = [0, 0], sizes = [8, 128], strides = [1, 1]} : vector<8x512xf32> to vector<8x128xf32>
    %612 = vector.extract_strided_slice %610 {offsets = [0, 128], sizes = [8, 128], strides = [1, 1]} : vector<8x512xf32> to vector<8x128xf32>
    %613 = vector.extract_strided_slice %610 {offsets = [0, 256], sizes = [8, 128], strides = [1, 1]} : vector<8x512xf32> to vector<8x128xf32>
    %cst_254 = arith.constant 2.000000e+00 : f32
    %614 = vector.broadcast %cst_254 : f32 to vector<8x128xf32>
    %615 = arith.mulf %614, %613 : vector<8x128xf32>
    %cst_255 = arith.constant 1.000000e+00 : f32
    %616 = vector.broadcast %cst_255 : f32 to vector<8x128xf32>
    %617 = arith.subf %615, %616 : vector<8x128xf32>
    %618 = vector.extract_strided_slice %610 {offsets = [0, 384], sizes = [8, 128], strides = [1, 1]} : vector<8x512xf32> to vector<8x128xf32>
    %619 = arith.mulf %612, %566 : vector<8x128xf32>
    %620 = arith.mulf %611, %617 : vector<8x128xf32>
    %621 = arith.addf %619, %620 : vector<8x128xf32>
    %622 = math.tanh %621 : vector<8x128xf32>
    %623 = arith.mulf %618, %622 : vector<8x128xf32>
    %624 = arith.truncf %568 : vector<8x128xf32> to vector<8x128xbf16>
    %c3_256 = arith.constant 3 : index
    %c0_257 = arith.constant 0 : index
    %c0_258 = arith.constant 0 : index
    %625 = vector.load %arg1[%c3_256, %c0_257, %c0_258] : memref<8x128x512xbf16, #tpu.memory_space<vmem>>, vector<1x128x512xbf16>
    %626 = vector.shape_cast %625 : vector<1x128x512xbf16> to vector<128x512xbf16>
    %cst_259 = arith.constant dense<0.000000e+00> : vector<8x512xf32>
    %627 = tpu.matmul %624, %626, %cst_259 {dimension_numbers = #tpu.dot_dimension_numbers<[1], [0], [0], [1], [0, 0, 1, 1], [], []>} : vector<8x128xbf16>, vector<128x512xbf16>, vector<8x512xf32> -> vector<8x512xf32>
    %628 = arith.truncf %599 : vector<8x128xf32> to vector<8x128xbf16>
    %c7_260 = arith.constant 7 : index
    %c0_261 = arith.constant 0 : index
    %c0_262 = arith.constant 0 : index
    %629 = vector.load %arg1[%c7_260, %c0_261, %c0_262] : memref<8x128x512xbf16, #tpu.memory_space<vmem>>, vector<1x128x512xbf16>
    %630 = vector.shape_cast %629 : vector<1x128x512xbf16> to vector<128x512xbf16>
    %cst_263 = arith.constant dense<0.000000e+00> : vector<8x512xf32>
    %631 = tpu.matmul %628, %630, %cst_263 {dimension_numbers = #tpu.dot_dimension_numbers<[1], [0], [0], [1], [0, 0, 1, 1], [], []>} : vector<8x128xbf16>, vector<128x512xbf16>, vector<8x512xf32> -> vector<8x512xf32>
    %632 = arith.addf %627, %631 : vector<8x512xf32>
    %c3_264 = arith.constant 3 : index
    %c0_265 = arith.constant 0 : index
    %c0_266 = arith.constant 0 : index
    %633 = vector.load %arg3[%c3_264, %c0_265, %c0_266] : memref<6x1x512xf32, #tpu.memory_space<vmem>>, vector<1x1x512xf32>
    %634 = vector.shape_cast %633 : vector<1x1x512xf32> to vector<1x512xf32>
    %635 = vector.broadcast %634 : vector<1x512xf32> to vector<8x512xf32>
    %636 = arith.addf %632, %635 : vector<8x512xf32>
    %637 = arith.negf %636 : vector<8x512xf32>
    %638 = math.exp %637 : vector<8x512xf32>
    %cst_267 = arith.constant 1.000000e+00 : f32
    %639 = vector.broadcast %cst_267 : f32 to vector<8x512xf32>
    %640 = arith.addf %639, %638 : vector<8x512xf32>
    %641 = arith.divf %639, %640 : vector<8x512xf32>
    %642 = vector.extract_strided_slice %641 {offsets = [0, 0], sizes = [8, 128], strides = [1, 1]} : vector<8x512xf32> to vector<8x128xf32>
    %643 = vector.extract_strided_slice %641 {offsets = [0, 128], sizes = [8, 128], strides = [1, 1]} : vector<8x512xf32> to vector<8x128xf32>
    %644 = vector.extract_strided_slice %641 {offsets = [0, 256], sizes = [8, 128], strides = [1, 1]} : vector<8x512xf32> to vector<8x128xf32>
    %cst_268 = arith.constant 2.000000e+00 : f32
    %645 = vector.broadcast %cst_268 : f32 to vector<8x128xf32>
    %646 = arith.mulf %645, %644 : vector<8x128xf32>
    %cst_269 = arith.constant 1.000000e+00 : f32
    %647 = vector.broadcast %cst_269 : f32 to vector<8x128xf32>
    %648 = arith.subf %646, %647 : vector<8x128xf32>
    %649 = vector.extract_strided_slice %641 {offsets = [0, 384], sizes = [8, 128], strides = [1, 1]} : vector<8x512xf32> to vector<8x128xf32>
    %650 = arith.mulf %643, %597 : vector<8x128xf32>
    %651 = arith.mulf %642, %648 : vector<8x128xf32>
    %652 = arith.addf %650, %651 : vector<8x128xf32>
    %653 = math.tanh %652 : vector<8x128xf32>
    %654 = arith.mulf %649, %653 : vector<8x128xf32>
    %c16_270 = arith.constant 16 : index
    %c0_271 = arith.constant 0 : index
    %655 = vector.load %arg7[%c16_270, %c0_271] : memref<64x128xf32, #tpu.memory_space<vmem>>, vector<8x128xf32>
    tpu.vector_store %arg7[%c16_270, %c0_271], %654 {strides = array<i32>} : memref<64x128xf32, #tpu.memory_space<vmem>>, vector<8x128xf32>,
    %656 = arith.truncf %623 : vector<8x128xf32> to vector<8x128xbf16>
    %c6_272 = arith.constant 6 : index
    %c0_273 = arith.constant 0 : index
    %c0_274 = arith.constant 0 : index
    %657 = vector.load %arg1[%c6_272, %c0_273, %c0_274] : memref<8x128x512xbf16, #tpu.memory_space<vmem>>, vector<1x128x512xbf16>
    %658 = vector.shape_cast %657 : vector<1x128x512xbf16> to vector<128x512xbf16>
    %cst_275 = arith.constant dense<0.000000e+00> : vector<8x512xf32>
    %659 = tpu.matmul %656, %658, %cst_275 {dimension_numbers = #tpu.dot_dimension_numbers<[1], [0], [0], [1], [0, 0, 1, 1], [], []>} : vector<8x128xbf16>, vector<128x512xbf16>, vector<8x512xf32> -> vector<8x512xf32>
    %660 = arith.addf %467, %659 : vector<8x512xf32>
    %661 = arith.negf %660 : vector<8x512xf32>
    %662 = math.exp %661 : vector<8x512xf32>
    %cst_276 = arith.constant 1.000000e+00 : f32
    %663 = vector.broadcast %cst_276 : f32 to vector<8x512xf32>
    %664 = arith.addf %663, %662 : vector<8x512xf32>
    %665 = arith.divf %663, %664 : vector<8x512xf32>
    %666 = vector.extract_strided_slice %665 {offsets = [0, 0], sizes = [8, 128], strides = [1, 1]} : vector<8x512xf32> to vector<8x128xf32>
    %667 = vector.extract_strided_slice %665 {offsets = [0, 128], sizes = [8, 128], strides = [1, 1]} : vector<8x512xf32> to vector<8x128xf32>
    %668 = vector.extract_strided_slice %665 {offsets = [0, 256], sizes = [8, 128], strides = [1, 1]} : vector<8x512xf32> to vector<8x128xf32>
    %cst_277 = arith.constant 2.000000e+00 : f32
    %669 = vector.broadcast %cst_277 : f32 to vector<8x128xf32>
    %670 = arith.mulf %669, %668 : vector<8x128xf32>
    %cst_278 = arith.constant 1.000000e+00 : f32
    %671 = vector.broadcast %cst_278 : f32 to vector<8x128xf32>
    %672 = arith.subf %670, %671 : vector<8x128xf32>
    %673 = vector.extract_strided_slice %665 {offsets = [0, 384], sizes = [8, 128], strides = [1, 1]} : vector<8x512xf32> to vector<8x128xf32>
    %674 = arith.mulf %667, %621 : vector<8x128xf32>
    %675 = arith.mulf %666, %672 : vector<8x128xf32>
    %676 = arith.addf %674, %675 : vector<8x128xf32>
    %677 = math.tanh %676 : vector<8x128xf32>
    %678 = arith.mulf %673, %677 : vector<8x128xf32>
    %679 = arith.truncf %623 : vector<8x128xf32> to vector<8x128xbf16>
    %c3_279 = arith.constant 3 : index
    %c0_280 = arith.constant 0 : index
    %c0_281 = arith.constant 0 : index
    %680 = vector.load %arg1[%c3_279, %c0_280, %c0_281] : memref<8x128x512xbf16, #tpu.memory_space<vmem>>, vector<1x128x512xbf16>
    %681 = vector.shape_cast %680 : vector<1x128x512xbf16> to vector<128x512xbf16>
    %cst_282 = arith.constant dense<0.000000e+00> : vector<8x512xf32>
    %682 = tpu.matmul %679, %681, %cst_282 {dimension_numbers = #tpu.dot_dimension_numbers<[1], [0], [0], [1], [0, 0, 1, 1], [], []>} : vector<8x128xbf16>, vector<128x512xbf16>, vector<8x512xf32> -> vector<8x512xf32>
    %683 = arith.truncf %654 : vector<8x128xf32> to vector<8x128xbf16>
    %c7_283 = arith.constant 7 : index
    %c0_284 = arith.constant 0 : index
    %c0_285 = arith.constant 0 : index
    %684 = vector.load %arg1[%c7_283, %c0_284, %c0_285] : memref<8x128x512xbf16, #tpu.memory_space<vmem>>, vector<1x128x512xbf16>
    %685 = vector.shape_cast %684 : vector<1x128x512xbf16> to vector<128x512xbf16>
    %cst_286 = arith.constant dense<0.000000e+00> : vector<8x512xf32>
    %686 = tpu.matmul %683, %685, %cst_286 {dimension_numbers = #tpu.dot_dimension_numbers<[1], [0], [0], [1], [0, 0, 1, 1], [], []>} : vector<8x128xbf16>, vector<128x512xbf16>, vector<8x512xf32> -> vector<8x512xf32>
    %687 = arith.addf %682, %686 : vector<8x512xf32>
    %c3_287 = arith.constant 3 : index
    %c0_288 = arith.constant 0 : index
    %c0_289 = arith.constant 0 : index
    %688 = vector.load %arg3[%c3_287, %c0_288, %c0_289] : memref<6x1x512xf32, #tpu.memory_space<vmem>>, vector<1x1x512xf32>
    %689 = vector.shape_cast %688 : vector<1x1x512xf32> to vector<1x512xf32>
    %690 = vector.broadcast %689 : vector<1x512xf32> to vector<8x512xf32>
    %691 = arith.addf %687, %690 : vector<8x512xf32>
    %692 = arith.negf %691 : vector<8x512xf32>
    %693 = math.exp %692 : vector<8x512xf32>
    %cst_290 = arith.constant 1.000000e+00 : f32
    %694 = vector.broadcast %cst_290 : f32 to vector<8x512xf32>
    %695 = arith.addf %694, %693 : vector<8x512xf32>
    %696 = arith.divf %694, %695 : vector<8x512xf32>
    %697 = vector.extract_strided_slice %696 {offsets = [0, 0], sizes = [8, 128], strides = [1, 1]} : vector<8x512xf32> to vector<8x128xf32>
    %698 = vector.extract_strided_slice %696 {offsets = [0, 128], sizes = [8, 128], strides = [1, 1]} : vector<8x512xf32> to vector<8x128xf32>
    %699 = vector.extract_strided_slice %696 {offsets = [0, 256], sizes = [8, 128], strides = [1, 1]} : vector<8x512xf32> to vector<8x128xf32>
    %cst_291 = arith.constant 2.000000e+00 : f32
    %700 = vector.broadcast %cst_291 : f32 to vector<8x128xf32>
    %701 = arith.mulf %700, %699 : vector<8x128xf32>
    %cst_292 = arith.constant 1.000000e+00 : f32
    %702 = vector.broadcast %cst_292 : f32 to vector<8x128xf32>
    %703 = arith.subf %701, %702 : vector<8x128xf32>
    %704 = vector.extract_strided_slice %696 {offsets = [0, 384], sizes = [8, 128], strides = [1, 1]} : vector<8x512xf32> to vector<8x128xf32>
    %705 = arith.mulf %698, %652 : vector<8x128xf32>
    %706 = arith.mulf %697, %703 : vector<8x128xf32>
    %707 = arith.addf %705, %706 : vector<8x128xf32>
    %708 = math.tanh %707 : vector<8x128xf32>
    %709 = arith.mulf %704, %708 : vector<8x128xf32>
    %c24_293 = arith.constant 24 : index
    %c0_294 = arith.constant 0 : index
    %710 = vector.load %arg7[%c24_293, %c0_294] : memref<64x128xf32, #tpu.memory_space<vmem>>, vector<8x128xf32>
    tpu.vector_store %arg7[%c24_293, %c0_294], %709 {strides = array<i32>} : memref<64x128xf32, #tpu.memory_space<vmem>>, vector<8x128xf32>,
    %711 = arith.truncf %678 : vector<8x128xf32> to vector<8x128xbf16>
    %c6_295 = arith.constant 6 : index
    %c0_296 = arith.constant 0 : index
    %c0_297 = arith.constant 0 : index
    %712 = vector.load %arg1[%c6_295, %c0_296, %c0_297] : memref<8x128x512xbf16, #tpu.memory_space<vmem>>, vector<1x128x512xbf16>
    %713 = vector.shape_cast %712 : vector<1x128x512xbf16> to vector<128x512xbf16>
    %cst_298 = arith.constant dense<0.000000e+00> : vector<8x512xf32>
    %714 = tpu.matmul %711, %713, %cst_298 {dimension_numbers = #tpu.dot_dimension_numbers<[1], [0], [0], [1], [0, 0, 1, 1], [], []>} : vector<8x128xbf16>, vector<128x512xbf16>, vector<8x512xf32> -> vector<8x512xf32>
    %715 = arith.addf %467, %714 : vector<8x512xf32>
    %716 = arith.negf %715 : vector<8x512xf32>
    %717 = math.exp %716 : vector<8x512xf32>
    %cst_299 = arith.constant 1.000000e+00 : f32
    %718 = vector.broadcast %cst_299 : f32 to vector<8x512xf32>
    %719 = arith.addf %718, %717 : vector<8x512xf32>
    %720 = arith.divf %718, %719 : vector<8x512xf32>
    %721 = vector.extract_strided_slice %720 {offsets = [0, 0], sizes = [8, 128], strides = [1, 1]} : vector<8x512xf32> to vector<8x128xf32>
    %722 = vector.extract_strided_slice %720 {offsets = [0, 128], sizes = [8, 128], strides = [1, 1]} : vector<8x512xf32> to vector<8x128xf32>
    %723 = vector.extract_strided_slice %720 {offsets = [0, 256], sizes = [8, 128], strides = [1, 1]} : vector<8x512xf32> to vector<8x128xf32>
    %cst_300 = arith.constant 2.000000e+00 : f32
    %724 = vector.broadcast %cst_300 : f32 to vector<8x128xf32>
    %725 = arith.mulf %724, %723 : vector<8x128xf32>
    %cst_301 = arith.constant 1.000000e+00 : f32
    %726 = vector.broadcast %cst_301 : f32 to vector<8x128xf32>
    %727 = arith.subf %725, %726 : vector<8x128xf32>
    %728 = vector.extract_strided_slice %720 {offsets = [0, 384], sizes = [8, 128], strides = [1, 1]} : vector<8x512xf32> to vector<8x128xf32>
    %729 = arith.mulf %722, %676 : vector<8x128xf32>
    %730 = arith.mulf %721, %727 : vector<8x128xf32>
    %731 = arith.addf %729, %730 : vector<8x128xf32>
    %732 = math.tanh %731 : vector<8x128xf32>
    %733 = arith.mulf %728, %732 : vector<8x128xf32>
    %734 = arith.truncf %678 : vector<8x128xf32> to vector<8x128xbf16>
    %c3_302 = arith.constant 3 : index
    %c0_303 = arith.constant 0 : index
    %c0_304 = arith.constant 0 : index
    %735 = vector.load %arg1[%c3_302, %c0_303, %c0_304] : memref<8x128x512xbf16, #tpu.memory_space<vmem>>, vector<1x128x512xbf16>
    %736 = vector.shape_cast %735 : vector<1x128x512xbf16> to vector<128x512xbf16>
    %cst_305 = arith.constant dense<0.000000e+00> : vector<8x512xf32>
    %737 = tpu.matmul %734, %736, %cst_305 {dimension_numbers = #tpu.dot_dimension_numbers<[1], [0], [0], [1], [0, 0, 1, 1], [], []>} : vector<8x128xbf16>, vector<128x512xbf16>, vector<8x512xf32> -> vector<8x512xf32>
    %738 = arith.truncf %709 : vector<8x128xf32> to vector<8x128xbf16>
    %c7_306 = arith.constant 7 : index
    %c0_307 = arith.constant 0 : index
    %c0_308 = arith.constant 0 : index
    %739 = vector.load %arg1[%c7_306, %c0_307, %c0_308] : memref<8x128x512xbf16, #tpu.memory_space<vmem>>, vector<1x128x512xbf16>
    %740 = vector.shape_cast %739 : vector<1x128x512xbf16> to vector<128x512xbf16>
    %cst_309 = arith.constant dense<0.000000e+00> : vector<8x512xf32>
    %741 = tpu.matmul %738, %740, %cst_309 {dimension_numbers = #tpu.dot_dimension_numbers<[1], [0], [0], [1], [0, 0, 1, 1], [], []>} : vector<8x128xbf16>, vector<128x512xbf16>, vector<8x512xf32> -> vector<8x512xf32>
    %742 = arith.addf %737, %741 : vector<8x512xf32>
    %c3_310 = arith.constant 3 : index
    %c0_311 = arith.constant 0 : index
    %c0_312 = arith.constant 0 : index
    %743 = vector.load %arg3[%c3_310, %c0_311, %c0_312] : memref<6x1x512xf32, #tpu.memory_space<vmem>>, vector<1x1x512xf32>
    %744 = vector.shape_cast %743 : vector<1x1x512xf32> to vector<1x512xf32>
    %745 = vector.broadcast %744 : vector<1x512xf32> to vector<8x512xf32>
    %746 = arith.addf %742, %745 : vector<8x512xf32>
    %747 = arith.negf %746 : vector<8x512xf32>
    %748 = math.exp %747 : vector<8x512xf32>
    %cst_313 = arith.constant 1.000000e+00 : f32
    %749 = vector.broadcast %cst_313 : f32 to vector<8x512xf32>
    %750 = arith.addf %749, %748 : vector<8x512xf32>
    %751 = arith.divf %749, %750 : vector<8x512xf32>
    %752 = vector.extract_strided_slice %751 {offsets = [0, 0], sizes = [8, 128], strides = [1, 1]} : vector<8x512xf32> to vector<8x128xf32>
    %753 = vector.extract_strided_slice %751 {offsets = [0, 128], sizes = [8, 128], strides = [1, 1]} : vector<8x512xf32> to vector<8x128xf32>
    %754 = vector.extract_strided_slice %751 {offsets = [0, 256], sizes = [8, 128], strides = [1, 1]} : vector<8x512xf32> to vector<8x128xf32>
    %cst_314 = arith.constant 2.000000e+00 : f32
    %755 = vector.broadcast %cst_314 : f32 to vector<8x128xf32>
    %756 = arith.mulf %755, %754 : vector<8x128xf32>
    %cst_315 = arith.constant 1.000000e+00 : f32
    %757 = vector.broadcast %cst_315 : f32 to vector<8x128xf32>
    %758 = arith.subf %756, %757 : vector<8x128xf32>
    %759 = vector.extract_strided_slice %751 {offsets = [0, 384], sizes = [8, 128], strides = [1, 1]} : vector<8x512xf32> to vector<8x128xf32>
    %760 = arith.mulf %753, %707 : vector<8x128xf32>
    %761 = arith.mulf %752, %758 : vector<8x128xf32>
    %762 = arith.addf %760, %761 : vector<8x128xf32>
    %763 = math.tanh %762 : vector<8x128xf32>
    %764 = arith.mulf %759, %763 : vector<8x128xf32>
    %c32_316 = arith.constant 32 : index
    %c0_317 = arith.constant 0 : index
    %765 = vector.load %arg7[%c32_316, %c0_317] : memref<64x128xf32, #tpu.memory_space<vmem>>, vector<8x128xf32>
    tpu.vector_store %arg7[%c32_316, %c0_317], %764 {strides = array<i32>} : memref<64x128xf32, #tpu.memory_space<vmem>>, vector<8x128xf32>,
    %766 = arith.truncf %733 : vector<8x128xf32> to vector<8x128xbf16>
    %c6_318 = arith.constant 6 : index
    %c0_319 = arith.constant 0 : index
    %c0_320 = arith.constant 0 : index
    %767 = vector.load %arg1[%c6_318, %c0_319, %c0_320] : memref<8x128x512xbf16, #tpu.memory_space<vmem>>, vector<1x128x512xbf16>
    %768 = vector.shape_cast %767 : vector<1x128x512xbf16> to vector<128x512xbf16>
    %cst_321 = arith.constant dense<0.000000e+00> : vector<8x512xf32>
    %769 = tpu.matmul %766, %768, %cst_321 {dimension_numbers = #tpu.dot_dimension_numbers<[1], [0], [0], [1], [0, 0, 1, 1], [], []>} : vector<8x128xbf16>, vector<128x512xbf16>, vector<8x512xf32> -> vector<8x512xf32>
    %770 = arith.addf %467, %769 : vector<8x512xf32>
    %771 = arith.negf %770 : vector<8x512xf32>
    %772 = math.exp %771 : vector<8x512xf32>
    %cst_322 = arith.constant 1.000000e+00 : f32
    %773 = vector.broadcast %cst_322 : f32 to vector<8x512xf32>
    %774 = arith.addf %773, %772 : vector<8x512xf32>
    %775 = arith.divf %773, %774 : vector<8x512xf32>
    %776 = vector.extract_strided_slice %775 {offsets = [0, 0], sizes = [8, 128], strides = [1, 1]} : vector<8x512xf32> to vector<8x128xf32>
    %777 = vector.extract_strided_slice %775 {offsets = [0, 128], sizes = [8, 128], strides = [1, 1]} : vector<8x512xf32> to vector<8x128xf32>
    %778 = vector.extract_strided_slice %775 {offsets = [0, 256], sizes = [8, 128], strides = [1, 1]} : vector<8x512xf32> to vector<8x128xf32>
    %cst_323 = arith.constant 2.000000e+00 : f32
    %779 = vector.broadcast %cst_323 : f32 to vector<8x128xf32>
    %780 = arith.mulf %779, %778 : vector<8x128xf32>
    %cst_324 = arith.constant 1.000000e+00 : f32
    %781 = vector.broadcast %cst_324 : f32 to vector<8x128xf32>
    %782 = arith.subf %780, %781 : vector<8x128xf32>
    %783 = vector.extract_strided_slice %775 {offsets = [0, 384], sizes = [8, 128], strides = [1, 1]} : vector<8x512xf32> to vector<8x128xf32>
    %784 = arith.mulf %777, %731 : vector<8x128xf32>
    %785 = arith.mulf %776, %782 : vector<8x128xf32>
    %786 = arith.addf %784, %785 : vector<8x128xf32>
    %787 = math.tanh %786 : vector<8x128xf32>
    %788 = arith.mulf %783, %787 : vector<8x128xf32>
    %789 = arith.truncf %733 : vector<8x128xf32> to vector<8x128xbf16>
    %c3_325 = arith.constant 3 : index
    %c0_326 = arith.constant 0 : index
    %c0_327 = arith.constant 0 : index
    %790 = vector.load %arg1[%c3_325, %c0_326, %c0_327] : memref<8x128x512xbf16, #tpu.memory_space<vmem>>, vector<1x128x512xbf16>
    %791 = vector.shape_cast %790 : vector<1x128x512xbf16> to vector<128x512xbf16>
    %cst_328 = arith.constant dense<0.000000e+00> : vector<8x512xf32>
    %792 = tpu.matmul %789, %791, %cst_328 {dimension_numbers = #tpu.dot_dimension_numbers<[1], [0], [0], [1], [0, 0, 1, 1], [], []>} : vector<8x128xbf16>, vector<128x512xbf16>, vector<8x512xf32> -> vector<8x512xf32>
    %793 = arith.truncf %764 : vector<8x128xf32> to vector<8x128xbf16>
    %c7_329 = arith.constant 7 : index
    %c0_330 = arith.constant 0 : index
    %c0_331 = arith.constant 0 : index
    %794 = vector.load %arg1[%c7_329, %c0_330, %c0_331] : memref<8x128x512xbf16, #tpu.memory_space<vmem>>, vector<1x128x512xbf16>
    %795 = vector.shape_cast %794 : vector<1x128x512xbf16> to vector<128x512xbf16>
    %cst_332 = arith.constant dense<0.000000e+00> : vector<8x512xf32>
    %796 = tpu.matmul %793, %795, %cst_332 {dimension_numbers = #tpu.dot_dimension_numbers<[1], [0], [0], [1], [0, 0, 1, 1], [], []>} : vector<8x128xbf16>, vector<128x512xbf16>, vector<8x512xf32> -> vector<8x512xf32>
    %797 = arith.addf %792, %796 : vector<8x512xf32>
    %c3_333 = arith.constant 3 : index
    %c0_334 = arith.constant 0 : index
    %c0_335 = arith.constant 0 : index
    %798 = vector.load %arg3[%c3_333, %c0_334, %c0_335] : memref<6x1x512xf32, #tpu.memory_space<vmem>>, vector<1x1x512xf32>
    %799 = vector.shape_cast %798 : vector<1x1x512xf32> to vector<1x512xf32>
    %800 = vector.broadcast %799 : vector<1x512xf32> to vector<8x512xf32>
    %801 = arith.addf %797, %800 : vector<8x512xf32>
    %802 = arith.negf %801 : vector<8x512xf32>
    %803 = math.exp %802 : vector<8x512xf32>
    %cst_336 = arith.constant 1.000000e+00 : f32
    %804 = vector.broadcast %cst_336 : f32 to vector<8x512xf32>
    %805 = arith.addf %804, %803 : vector<8x512xf32>
    %806 = arith.divf %804, %805 : vector<8x512xf32>
    %807 = vector.extract_strided_slice %806 {offsets = [0, 0], sizes = [8, 128], strides = [1, 1]} : vector<8x512xf32> to vector<8x128xf32>
    %808 = vector.extract_strided_slice %806 {offsets = [0, 128], sizes = [8, 128], strides = [1, 1]} : vector<8x512xf32> to vector<8x128xf32>
    %809 = vector.extract_strided_slice %806 {offsets = [0, 256], sizes = [8, 128], strides = [1, 1]} : vector<8x512xf32> to vector<8x128xf32>
    %cst_337 = arith.constant 2.000000e+00 : f32
    %810 = vector.broadcast %cst_337 : f32 to vector<8x128xf32>
    %811 = arith.mulf %810, %809 : vector<8x128xf32>
    %cst_338 = arith.constant 1.000000e+00 : f32
    %812 = vector.broadcast %cst_338 : f32 to vector<8x128xf32>
    %813 = arith.subf %811, %812 : vector<8x128xf32>
    %814 = vector.extract_strided_slice %806 {offsets = [0, 384], sizes = [8, 128], strides = [1, 1]} : vector<8x512xf32> to vector<8x128xf32>
    %815 = arith.mulf %808, %762 : vector<8x128xf32>
    %816 = arith.mulf %807, %813 : vector<8x128xf32>
    %817 = arith.addf %815, %816 : vector<8x128xf32>
    %818 = math.tanh %817 : vector<8x128xf32>
    %819 = arith.mulf %814, %818 : vector<8x128xf32>
    %c40_339 = arith.constant 40 : index
    %c0_340 = arith.constant 0 : index
    %820 = vector.load %arg7[%c40_339, %c0_340] : memref<64x128xf32, #tpu.memory_space<vmem>>, vector<8x128xf32>
    tpu.vector_store %arg7[%c40_339, %c0_340], %819 {strides = array<i32>} : memref<64x128xf32, #tpu.memory_space<vmem>>, vector<8x128xf32>,
    %821 = arith.truncf %788 : vector<8x128xf32> to vector<8x128xbf16>
    %c6_341 = arith.constant 6 : index
    %c0_342 = arith.constant 0 : index
    %c0_343 = arith.constant 0 : index
    %822 = vector.load %arg1[%c6_341, %c0_342, %c0_343] : memref<8x128x512xbf16, #tpu.memory_space<vmem>>, vector<1x128x512xbf16>
    %823 = vector.shape_cast %822 : vector<1x128x512xbf16> to vector<128x512xbf16>
    %cst_344 = arith.constant dense<0.000000e+00> : vector<8x512xf32>
    %824 = tpu.matmul %821, %823, %cst_344 {dimension_numbers = #tpu.dot_dimension_numbers<[1], [0], [0], [1], [0, 0, 1, 1], [], []>} : vector<8x128xbf16>, vector<128x512xbf16>, vector<8x512xf32> -> vector<8x512xf32>
    %825 = arith.addf %467, %824 : vector<8x512xf32>
    %826 = arith.negf %825 : vector<8x512xf32>
    %827 = math.exp %826 : vector<8x512xf32>
    %cst_345 = arith.constant 1.000000e+00 : f32
    %828 = vector.broadcast %cst_345 : f32 to vector<8x512xf32>
    %829 = arith.addf %828, %827 : vector<8x512xf32>
    %830 = arith.divf %828, %829 : vector<8x512xf32>
    %831 = vector.extract_strided_slice %830 {offsets = [0, 0], sizes = [8, 128], strides = [1, 1]} : vector<8x512xf32> to vector<8x128xf32>
    %832 = vector.extract_strided_slice %830 {offsets = [0, 128], sizes = [8, 128], strides = [1, 1]} : vector<8x512xf32> to vector<8x128xf32>
    %833 = vector.extract_strided_slice %830 {offsets = [0, 256], sizes = [8, 128], strides = [1, 1]} : vector<8x512xf32> to vector<8x128xf32>
    %cst_346 = arith.constant 2.000000e+00 : f32
    %834 = vector.broadcast %cst_346 : f32 to vector<8x128xf32>
    %835 = arith.mulf %834, %833 : vector<8x128xf32>
    %cst_347 = arith.constant 1.000000e+00 : f32
    %836 = vector.broadcast %cst_347 : f32 to vector<8x128xf32>
    %837 = arith.subf %835, %836 : vector<8x128xf32>
    %838 = vector.extract_strided_slice %830 {offsets = [0, 384], sizes = [8, 128], strides = [1, 1]} : vector<8x512xf32> to vector<8x128xf32>
    %839 = arith.mulf %832, %786 : vector<8x128xf32>
    %840 = arith.mulf %831, %837 : vector<8x128xf32>
    %841 = arith.addf %839, %840 : vector<8x128xf32>
    %842 = math.tanh %841 : vector<8x128xf32>
    %843 = arith.mulf %838, %842 : vector<8x128xf32>
    %844 = arith.truncf %788 : vector<8x128xf32> to vector<8x128xbf16>
    %c3_348 = arith.constant 3 : index
    %c0_349 = arith.constant 0 : index
    %c0_350 = arith.constant 0 : index
    %845 = vector.load %arg1[%c3_348, %c0_349, %c0_350] : memref<8x128x512xbf16, #tpu.memory_space<vmem>>, vector<1x128x512xbf16>
    %846 = vector.shape_cast %845 : vector<1x128x512xbf16> to vector<128x512xbf16>
    %cst_351 = arith.constant dense<0.000000e+00> : vector<8x512xf32>
    %847 = tpu.matmul %844, %846, %cst_351 {dimension_numbers = #tpu.dot_dimension_numbers<[1], [0], [0], [1], [0, 0, 1, 1], [], []>} : vector<8x128xbf16>, vector<128x512xbf16>, vector<8x512xf32> -> vector<8x512xf32>
    %848 = arith.truncf %819 : vector<8x128xf32> to vector<8x128xbf16>
    %c7_352 = arith.constant 7 : index
    %c0_353 = arith.constant 0 : index
    %c0_354 = arith.constant 0 : index
    %849 = vector.load %arg1[%c7_352, %c0_353, %c0_354] : memref<8x128x512xbf16, #tpu.memory_space<vmem>>, vector<1x128x512xbf16>
    %850 = vector.shape_cast %849 : vector<1x128x512xbf16> to vector<128x512xbf16>
    %cst_355 = arith.constant dense<0.000000e+00> : vector<8x512xf32>
    %851 = tpu.matmul %848, %850, %cst_355 {dimension_numbers = #tpu.dot_dimension_numbers<[1], [0], [0], [1], [0, 0, 1, 1], [], []>} : vector<8x128xbf16>, vector<128x512xbf16>, vector<8x512xf32> -> vector<8x512xf32>
    %852 = arith.addf %847, %851 : vector<8x512xf32>
    %c3_356 = arith.constant 3 : index
    %c0_357 = arith.constant 0 : index
    %c0_358 = arith.constant 0 : index
    %853 = vector.load %arg3[%c3_356, %c0_357, %c0_358] : memref<6x1x512xf32, #tpu.memory_space<vmem>>, vector<1x1x512xf32>
    %854 = vector.shape_cast %853 : vector<1x1x512xf32> to vector<1x512xf32>
    %855 = vector.broadcast %854 : vector<1x512xf32> to vector<8x512xf32>
    %856 = arith.addf %852, %855 : vector<8x512xf32>
    %857 = arith.negf %856 : vector<8x512xf32>
    %858 = math.exp %857 : vector<8x512xf32>
    %cst_359 = arith.constant 1.000000e+00 : f32
    %859 = vector.broadcast %cst_359 : f32 to vector<8x512xf32>
    %860 = arith.addf %859, %858 : vector<8x512xf32>
    %861 = arith.divf %859, %860 : vector<8x512xf32>
    %862 = vector.extract_strided_slice %861 {offsets = [0, 0], sizes = [8, 128], strides = [1, 1]} : vector<8x512xf32> to vector<8x128xf32>
    %863 = vector.extract_strided_slice %861 {offsets = [0, 128], sizes = [8, 128], strides = [1, 1]} : vector<8x512xf32> to vector<8x128xf32>
    %864 = vector.extract_strided_slice %861 {offsets = [0, 256], sizes = [8, 128], strides = [1, 1]} : vector<8x512xf32> to vector<8x128xf32>
    %cst_360 = arith.constant 2.000000e+00 : f32
    %865 = vector.broadcast %cst_360 : f32 to vector<8x128xf32>
    %866 = arith.mulf %865, %864 : vector<8x128xf32>
    %cst_361 = arith.constant 1.000000e+00 : f32
    %867 = vector.broadcast %cst_361 : f32 to vector<8x128xf32>
    %868 = arith.subf %866, %867 : vector<8x128xf32>
    %869 = vector.extract_strided_slice %861 {offsets = [0, 384], sizes = [8, 128], strides = [1, 1]} : vector<8x512xf32> to vector<8x128xf32>
    %870 = arith.mulf %863, %817 : vector<8x128xf32>
    %871 = arith.mulf %862, %868 : vector<8x128xf32>
    %872 = arith.addf %870, %871 : vector<8x128xf32>
    %873 = math.tanh %872 : vector<8x128xf32>
    %874 = arith.mulf %869, %873 : vector<8x128xf32>
    %c48_362 = arith.constant 48 : index
    %c0_363 = arith.constant 0 : index
    %875 = vector.load %arg7[%c48_362, %c0_363] : memref<64x128xf32, #tpu.memory_space<vmem>>, vector<8x128xf32>
    tpu.vector_store %arg7[%c48_362, %c0_363], %874 {strides = array<i32>} : memref<64x128xf32, #tpu.memory_space<vmem>>, vector<8x128xf32>,
    %876 = arith.truncf %843 : vector<8x128xf32> to vector<8x128xbf16>
    %c3_364 = arith.constant 3 : index
    %c0_365 = arith.constant 0 : index
    %c0_366 = arith.constant 0 : index
    %877 = vector.load %arg1[%c3_364, %c0_365, %c0_366] : memref<8x128x512xbf16, #tpu.memory_space<vmem>>, vector<1x128x512xbf16>
    %878 = vector.shape_cast %877 : vector<1x128x512xbf16> to vector<128x512xbf16>
    %cst_367 = arith.constant dense<0.000000e+00> : vector<8x512xf32>
    %879 = tpu.matmul %876, %878, %cst_367 {dimension_numbers = #tpu.dot_dimension_numbers<[1], [0], [0], [1], [0, 0, 1, 1], [], []>} : vector<8x128xbf16>, vector<128x512xbf16>, vector<8x512xf32> -> vector<8x512xf32>
    %880 = arith.truncf %874 : vector<8x128xf32> to vector<8x128xbf16>
    %c7_368 = arith.constant 7 : index
    %c0_369 = arith.constant 0 : index
    %c0_370 = arith.constant 0 : index
    %881 = vector.load %arg1[%c7_368, %c0_369, %c0_370] : memref<8x128x512xbf16, #tpu.memory_space<vmem>>, vector<1x128x512xbf16>
    %882 = vector.shape_cast %881 : vector<1x128x512xbf16> to vector<128x512xbf16>
    %cst_371 = arith.constant dense<0.000000e+00> : vector<8x512xf32>
    %883 = tpu.matmul %880, %882, %cst_371 {dimension_numbers = #tpu.dot_dimension_numbers<[1], [0], [0], [1], [0, 0, 1, 1], [], []>} : vector<8x128xbf16>, vector<128x512xbf16>, vector<8x512xf32> -> vector<8x512xf32>
    %884 = arith.addf %879, %883 : vector<8x512xf32>
    %c3_372 = arith.constant 3 : index
    %c0_373 = arith.constant 0 : index
    %c0_374 = arith.constant 0 : index
    %885 = vector.load %arg3[%c3_372, %c0_373, %c0_374] : memref<6x1x512xf32, #tpu.memory_space<vmem>>, vector<1x1x512xf32>
    %886 = vector.shape_cast %885 : vector<1x1x512xf32> to vector<1x512xf32>
    %887 = vector.broadcast %886 : vector<1x512xf32> to vector<8x512xf32>
    %888 = arith.addf %884, %887 : vector<8x512xf32>
    %889 = arith.negf %888 : vector<8x512xf32>
    %890 = math.exp %889 : vector<8x512xf32>
    %cst_375 = arith.constant 1.000000e+00 : f32
    %891 = vector.broadcast %cst_375 : f32 to vector<8x512xf32>
    %892 = arith.addf %891, %890 : vector<8x512xf32>
    %893 = arith.divf %891, %892 : vector<8x512xf32>
    %894 = vector.extract_strided_slice %893 {offsets = [0, 0], sizes = [8, 128], strides = [1, 1]} : vector<8x512xf32> to vector<8x128xf32>
    %895 = vector.extract_strided_slice %893 {offsets = [0, 128], sizes = [8, 128], strides = [1, 1]} : vector<8x512xf32> to vector<8x128xf32>
    %896 = vector.extract_strided_slice %893 {offsets = [0, 256], sizes = [8, 128], strides = [1, 1]} : vector<8x512xf32> to vector<8x128xf32>
    %cst_376 = arith.constant 2.000000e+00 : f32
    %897 = vector.broadcast %cst_376 : f32 to vector<8x128xf32>
    %898 = arith.mulf %897, %896 : vector<8x128xf32>
    %cst_377 = arith.constant 1.000000e+00 : f32
    %899 = vector.broadcast %cst_377 : f32 to vector<8x128xf32>
    %900 = arith.subf %898, %899 : vector<8x128xf32>
    %901 = vector.extract_strided_slice %893 {offsets = [0, 384], sizes = [8, 128], strides = [1, 1]} : vector<8x512xf32> to vector<8x128xf32>
    %902 = arith.mulf %895, %872 : vector<8x128xf32>
    %903 = arith.mulf %894, %900 : vector<8x128xf32>
    %904 = arith.addf %902, %903 : vector<8x128xf32>
    %905 = math.tanh %904 : vector<8x128xf32>
    %906 = arith.mulf %901, %905 : vector<8x128xf32>
    %c56_378 = arith.constant 56 : index
    %c0_379 = arith.constant 0 : index
    %907 = vector.load %arg7[%c56_378, %c0_379] : memref<64x128xf32, #tpu.memory_space<vmem>>, vector<8x128xf32>
    tpu.vector_store %arg7[%c56_378, %c0_379], %906 {strides = array<i32>} : memref<64x128xf32, #tpu.memory_space<vmem>>, vector<8x128xf32>,
    %c0_380 = arith.constant 0 : index
    %c0_381 = arith.constant 0 : index
    %908 = vector.load %arg7[%c0_380, %c0_381] : memref<64x128xf32, #tpu.memory_space<vmem>>, vector<64x128xf32>
    %909 = arith.truncf %908 : vector<64x128xf32> to vector<64x128xbf16>
    %c1_382 = arith.constant 1 : index
    %c0_383 = arith.constant 0 : index
    %c0_384 = arith.constant 0 : index
    %910 = vector.load %arg2[%c1_382, %c0_383, %c0_384] : memref<2x128x128xbf16, #tpu.memory_space<vmem>>, vector<1x128x128xbf16>
    %911 = vector.shape_cast %910 : vector<1x128x128xbf16> to vector<128x128xbf16>
    %cst_385 = arith.constant dense<0.000000e+00> : vector<64x128xf32>
    %912 = tpu.matmul %909, %911, %cst_385 {dimension_numbers = #tpu.dot_dimension_numbers<[1], [0], [0], [1], [0, 0, 1, 1], [], []>} : vector<64x128xbf16>, vector<128x128xbf16>, vector<64x128xf32> -> vector<64x128xf32>
    %c5_386 = arith.constant 5 : index
    %c0_387 = arith.constant 0 : index
    %c0_388 = arith.constant 0 : index
    %913 = vector.load %arg3[%c5_386, %c0_387, %c0_388] : memref<6x1x512xf32, #tpu.memory_space<vmem>>, vector<1x1x512xf32>
    %914 = vector.shape_cast %913 : vector<1x1x512xf32> to vector<1x512xf32>
    %915 = vector.extract_strided_slice %914 {offsets = [0, 0], sizes = [1, 128], strides = [1, 1]} : vector<1x512xf32> to vector<1x128xf32>
    %916 = vector.broadcast %915 : vector<1x128xf32> to vector<64x128xf32>
    %917 = arith.addf %912, %916 : vector<64x128xf32>
    %c0_389 = arith.constant 0 : index
    %c0_390 = arith.constant 0 : index
    %918 = vector.load %arg4[%c0_389, %c0_390] : memref<64x128xf32, #tpu.memory_space<vmem>>, vector<64x128xf32>
    tpu.vector_store %arg4[%c0_389, %c0_390], %917 {strides = array<i32>} : memref<64x128xf32, #tpu.memory_space<vmem>>, vector<64x128xf32>,
    return
  }
}

</mosaic_0001>

<bundles_post_ra>
// kernel: temporal_autoencoder_forward.1
= control target key start
LH: loop header
LB: loop body
LE: loop exit
PB: predicated region body
PF: predicated region fallthrough
CT: control target
= control target key end

     0   :  { %v20700_v1 = vmov 0   ;;  %vm14989_vm0 = vmmov 0   ;;  %s20694_s1 = inlined_call_operand.vmem [shape: bf16[8,128,512], index: 1, kind: input, shape index: {}]   ;;  %s20695_s0 = inlined_call_operand.vmem [shape: bf16[64,128], index: 0, kind: input, shape index: {}]   ;;  %s20696_s3 = inlined_call_operand.vmem [shape: f32[6,1,512], index: 3, kind: input, shape index: {}]   ;;  %s20697_s2 = inlined_call_operand.vmem [shape: bf16[2,128,128], index: 2, kind: input, shape index: {}]   ;;  %s20698_s5 = inlined_call_operand.vmem [shape: f32[8,128], index: 5, kind: output, shape index: {1}]   ;;  %s20699_s4 = inlined_call_operand.vmem [shape: f32[64,128], index: 4, kind: output, shape index: {0}]  }
   0x1   :  { %v13383_v0 = vld [vmem:[%s20694_s1 + $0xe4] ss:$16 sps:$4 sm:$0xff]   ;;  %298 = vmatprep.mubr.bf16.mxu0 %v20700_v1  ;;  %371 = vmatprep.mubr.bf16.mxu1 %v20700_v1  ;;  %v13385_v2 = vld [vmem:[%s20694_s1 + $0xec] ss:$16 sps:$4 sm:$0xff]   ;;  %v13387_v3 = vld [vmem:[%s20694_s1 + $0xe0] ss:$16 sps:$4 sm:$0xff]  }
   0x2   :  { %266 = vmatprep.subr.bf16.mxu0 %v13383_v0  ;;  %v13388_v4 = vld [vmem:[%s20694_s1 + $0xe8] ss:$16 sps:$4 sm:$0xff]   ;;  %339 = vmatprep.subr.bf16.mxu1 %v13385_v2  ;;  %v13389_v5 = vld [vmem:[%s20694_s1 + $0xc4] ss:$16 sps:$4 sm:$0xff]   ;;  %v13391_v6 = vld [vmem:[%s20694_s1 + $0xcc] ss:$16 sps:$4 sm:$0xff]  }
   0x3   :  { %267 = vmatpush1.bf16.msra.mxu0 %v13387_v3  ;;  %340 = vmatpush1.bf16.msra.mxu1 %v13388_v4  ;;  %v13393_v7 = vld [vmem:[%s20694_s1 + $0xc0] ss:$16 sps:$4 sm:$0xff]   ;;  %v13394_v8 = vld [vmem:[%s20694_s1 + $0xc8] ss:$16 sps:$4 sm:$0xff]   ;;  %v13395_v9 = vld [vmem:[%s20694_s1 + $0xa4] ss:$16 sps:$4 sm:$0xff]  }
   0x4   :  { %268 = vmatprep.subr.bf16.mxu0 %v13389_v5  ;;  %341 = vmatprep.subr.bf16.mxu1 %v13391_v6  ;;  %v13397_v10 = vld [vmem:[%s20694_s1 + $0xac] ss:$16 sps:$4 sm:$0xff]   ;;  %v13399_v11 = vld [vmem:[%s20694_s1 + $0xa0] ss:$16 sps:$4 sm:$0xff]   ;;  %v13400_v12 = vld [vmem:[%s20694_s1 + $0xa8] ss:$16 sps:$4 sm:$0xff]  }
   0x5   :  { %v13401_v13 = vld [vmem:[%s20694_s1 + $0x84] ss:$16 sps:$4 sm:$0xff]   ;;  %v13403_v14 = vld [vmem:[%s20694_s1 + $0x8c] ss:$16 sps:$4 sm:$0xff]   ;;  %v13405_v15 = vld [vmem:[%s20694_s1 + $0x80] ss:$16 sps:$4 sm:$0xff]  }
   0x6   :  { %v13406_v16 = vld [vmem:[%s20694_s1 + $0x88] ss:$16 sps:$4 sm:$0xff]   ;;  %v13407_v17 = vld [vmem:[%s20694_s1 + $0x64] ss:$16 sps:$4 sm:$0xff]   ;;  %v13409_v18 = vld [vmem:[%s20694_s1 + $0x6c] ss:$16 sps:$4 sm:$0xff]  }
   0x7   :  { %269 = vmatpush1.bf16.msra.mxu0 %v13393_v7  ;;  %342 = vmatpush1.bf16.msra.mxu1 %v13394_v8  ;;  %v13411_v19 = vld [vmem:[%s20694_s1 + $0x60] ss:$16 sps:$4 sm:$0xff]   ;;  %v13412_v20 = vld [vmem:[%s20694_s1 + $0x68] ss:$16 sps:$4 sm:$0xff]   ;;  %v13413_v21 = vld [vmem:[%s20694_s1 + $0x44] ss:$16 sps:$4 sm:$0xff]   ;;  %v62_v8 = vlaneseq }
   0x8   :  { %270 = vmatprep.subr.bf16.mxu0 %v13395_v9  ;;  %343 = vmatprep.subr.bf16.mxu1 %v13397_v10  ;;  %v13415_v22 = vld [vmem:[%s20694_s1 + $0x4c] ss:$16 sps:$4 sm:$0xff]   ;;  %v13417_v23 = vld [vmem:[%s20694_s1 + $0x40] ss:$16 sps:$4 sm:$0xff]   ;;  %v13418_v24 = vld [vmem:[%s20694_s1 + $0x48] ss:$16 sps:$4 sm:$0xff]  }
   0x9   :  { %v13419_v25 = vld [vmem:[%s20694_s1 + $0x24] ss:$16 sps:$4 sm:$0xff]   ;;  %v13421_v26 = vld [vmem:[%s20694_s1 + $0x2c] ss:$16 sps:$4 sm:$0xff]   ;;  %v13423_v27 = vld [vmem:[%s20694_s1 + $0x20] ss:$16 sps:$4 sm:$0xff]  }
   0xa   :  { %v13424_v28 = vld [vmem:[%s20694_s1 + $0x28] ss:$16 sps:$4 sm:$0xff]   ;;  %v13425_v29 = vld [vmem:[%s20694_s1 + $0x4] ss:$16 sps:$4 sm:$0xff]   ;;  %v13427_v30 = vld [vmem:[%s20694_s1 + $0xc] ss:$16 sps:$4 sm:$0xff]  }
   0xb   :  { %271 = vmatpush1.bf16.msra.mxu0 %v13399_v11  ;;  %344 = vmatpush1.bf16.msra.mxu1 %v13400_v12  ;;  %v13429_v31 = vld [vmem:[%s20694_s1] ss:$16 sps:$4 sm:$0xff]   ;;  %v13430_v32 = vld [vmem:[%s20694_s1 + $0x8] ss:$16 sps:$4 sm:$0xff]   ;;  %v15121_v33 = vld [vmem:[%s20694_s1 + $0x4e4] ss:$16 sps:$4 sm:$0xff]  }
   0xc   :  { %272 = vmatprep.subr.bf16.mxu0 %v13401_v13  ;;  %345 = vmatprep.subr.bf16.mxu1 %v13403_v14  ;;  %v15126_v34 = vld [vmem:[%s20694_s1 + $0x4ec] ss:$16 sps:$4 sm:$0xff]   ;;  %v13431_v35 = vld [vmem:[%s20695_s0] sm:$0xff]   ;;  %v15139_v37 = vld [vmem:[%s20694_s1 + $0x4e8] ss:$16 sps:$4 sm:$0xff]   ;;  %v63_v9 = vshrl.u32 %v62_v8, 7 }
   0xd   :  { %v15134_v36 = vld [vmem:[%s20694_s1 + $0x4e0] ss:$16 sps:$4 sm:$0xff]   ;;  %v15146_v38 = vld [vmem:[%s20694_s1 + $0x4c4] ss:$16 sps:$4 sm:$0xff]   ;;  %v15151_v39 = vld [vmem:[%s20694_s1 + $0x4cc] ss:$16 sps:$4 sm:$0xff]  }
   0xe   :  { %v15156_v40 = vld [vmem:[%s20694_s1 + $0x4c0] ss:$16 sps:$4 sm:$0xff]   ;;  %v15163_v41 = vld [vmem:[%s20694_s1 + $0x4c8] ss:$16 sps:$4 sm:$0xff]   ;;  %v15170_v42 = vld [vmem:[%s20694_s1 + $0x4a4] ss:$16 sps:$4 sm:$0xff]  }
   0xf   :  { %273 = vmatpush1.bf16.msra.mxu0 %v13405_v15  ;;  %346 = vmatpush1.bf16.msra.mxu1 %v13406_v16  ;;  %v15175_v43 = vld [vmem:[%s20694_s1 + $0x4ac] ss:$16 sps:$4 sm:$0xff]   ;;  %v15185_v45 = vld [vmem:[%s20694_s1 + $0x4a0] ss:$16 sps:$4 sm:$0xff]   ;;  %v15190_v46 = vld [vmem:[%s20694_s1 + $0x4a8] ss:$16 sps:$4 sm:$0xff]  }
  0x10   :  { %274 = vmatprep.subr.bf16.mxu0 %v13407_v17  ;;  %347 = vmatprep.subr.bf16.mxu1 %v13409_v18  ;;  %v13444_v44 = vld [vmem:[%s20695_s0 + $0x8] sm:$0xff]   ;;  %v15197_v47 = vld [vmem:[%s20694_s1 + $0x484] ss:$16 sps:$4 sm:$0xff]   ;;  %v15209_v49 = vld [vmem:[%s20694_s1 + $0x480] ss:$16 sps:$4 sm:$0xff]   ;;  %v15322_v10 = vsub.s32 0, %v63_v9 }
  0x11   :  { %v15204_v48 = vld [vmem:[%s20694_s1 + $0x48c] ss:$16 sps:$4 sm:$0xff]   ;;  %v15214_v50 = vld [vmem:[%s20694_s1 + $0x488] ss:$16 sps:$4 sm:$0xff]   ;;  %v15221_v51 = vld [vmem:[%s20694_s1 + $0x464] ss:$16 sps:$4 sm:$0xff]  }
  0x12   :  { %v15228_v52 = vld [vmem:[%s20694_s1 + $0x46c] ss:$16 sps:$4 sm:$0xff]   ;;  %v13457_v53 = vld [vmem:[%s20695_s0 + $0x10] sm:$0xff]   ;;  %v13463_v55 = vld [vmem:[%s20694_s1 + $0x468] ss:$16 sps:$4 sm:$0xff]   ;;  %21124 = vst [vmem:[#allocation4_spill] sm:$0xff] %v15322_v10 }
  0x13   :  { %275 = vmatpush1.bf16.msra.mxu0 %v13411_v19  ;;  %348 = vmatpush1.bf16.msra.mxu1 %v13412_v20  ;;  %v13462_v54 = vld [vmem:[%s20694_s1 + $0x460] ss:$16 sps:$4 sm:$0xff]   ;;  %v13464_v56 = vld [vmem:[%s20694_s1 + $0x444] ss:$16 sps:$4 sm:$0xff]   ;;  %v13466_v57 = vld [vmem:[%s20694_s1 + $0x44c] ss:$16 sps:$4 sm:$0xff]  }
  0x14   :  { %276 = vmatprep.subr.bf16.mxu0 %v13413_v21  ;;  %349 = vmatprep.subr.bf16.mxu1 %v13415_v22  ;;  %v13468_v58 = vld [vmem:[%s20694_s1 + $0x440] ss:$16 sps:$4 sm:$0xff]   ;;  %v13469_v59 = vld [vmem:[%s20694_s1 + $0x448] ss:$16 sps:$4 sm:$0xff]   ;;  %v13471_v60 = vld [vmem:[%s20694_s1 + $0x424] ss:$16 sps:$4 sm:$0xff]  }
  0x15   :  { %v13473_v61 = vld [vmem:[%s20694_s1 + $0x42c] ss:$16 sps:$4 sm:$0xff]   ;;  %v13475_v63 = vld [vmem:[%s20694_s1 + $0x420] ss:$16 sps:$4 sm:$0xff]   ;;  %v13476_v0 = vld [vmem:[%s20694_s1 + $0x428] ss:$16 sps:$4 sm:$0xff]  }
  0x16   :  { %v13470_v62 = vld [vmem:[%s20695_s0 + $0x18] sm:$0xff]   ;;  %v13477_v2 = vld [vmem:[%s20694_s1 + $0x404] ss:$16 sps:$4 sm:$0xff]   ;;  %v13481_v4 = vld [vmem:[%s20694_s1 + $0x400] ss:$16 sps:$4 sm:$0xff]   ;;  %v15324_v11 = vsub.s32 2, %v63_v9 }
  0x17   :  { %277 = vmatpush1.bf16.msra.mxu0 %v13417_v23  ;;  %350 = vmatpush1.bf16.msra.mxu1 %v13418_v24  ;;  %v13479_v3 = vld [vmem:[%s20694_s1 + $0x40c] ss:$16 sps:$4 sm:$0xff]   ;;  %v13482_v5 = vld [vmem:[%s20694_s1 + $0x408] ss:$16 sps:$4 sm:$0xff]   ;;  %v15313_v6 = vld [vmem:[%s20694_s1 + $0x5e4] ss:$16 sps:$4 sm:$0xff]  }
  0x18   :  { %278 = vmatprep.subr.bf16.mxu0 %v13419_v25  ;;  %351 = vmatprep.subr.bf16.mxu1 %v13421_v26  ;;  %v15318_v7 = vld [vmem:[%s20694_s1 + $0x5ec] ss:$16 sps:$4 sm:$0xff]   ;;  %21125 = vst [vmem:[#allocation5_spill] sm:$0xff] %v15324_v11  ;;  %v60_v12 = vld [vmem:[%s20696_s3] sm:$0xf]  ;;  %v15333_v21 = vsub.s32 1, %v63_v9 }
  0x19   :  { %v65_v17 = vrot.slane %v60_v12, %v15322_v10  ;;  %v73_v18 = vrot.slane %v60_v12, %v15324_v11  ;;  %v15335_v22 = vsub.s32 3, %v63_v9 }
  0x1a   :  { %21126 = vst [vmem:[#allocation6_spill] sm:$0xff] %v15333_v21 }
  0x1b   :  { %279 = vmatpush1.bf16.msra.mxu0 %v13423_v27  ;;  %352 = vmatpush1.bf16.msra.mxu1 %v13424_v28  ;;  %21127 = vst [vmem:[#allocation7_spill] sm:$0xff] %v15335_v22 }
  0x1c   :  { %280 = vmatprep.subr.bf16.mxu0 %v13425_v29  ;;  %353 = vmatprep.subr.bf16.mxu1 %v13427_v30  ;;  %v15346_v29 = vrot.slane %v60_v12, %v15333_v21  ;;  %v15349_v30 = vrot.slane %v60_v12, %v15335_v22 }
  0x1e   :  { %21128 = vst [vmem:[#allocation8_spill] sm:$0xff] %v15346_v29  ;;  %21129 = vst [vmem:[#allocation9_spill] sm:$0xff] %v15349_v30 }
  0x1f   :  { %281 = vmatpush1.bf16.msra.mxu0 %v13429_v31  ;;  %354 = vmatpush1.bf16.msra.mxu1 %v13430_v32 }
  0x20   :  { %641 = vmatprep.subr.bf16.mxu0 %v15121_v33  ;;  %682 = vmatprep.subr.bf16.mxu1 %v15126_v34 }
  0x22   :  { %299 = vmatmul.mubr.bf16.vlgmr.msra.gmra.mxu0 %v13431_v35  ;;  %372 = vmatmul.mubr.bf16.vlgmr.msra.gmra.mxu1 %v13431_v35 }
  0x23   :  { %642 = vmatpush1.bf16.msra.mxu0 %v15134_v36  ;;  %683 = vmatpush1.bf16.msra.mxu1 %v15139_v37 }
  0x24   :  { %643 = vmatprep.subr.bf16.mxu0 %v15146_v38  ;;  %684 = vmatprep.subr.bf16.mxu1 %v15151_v39 }
  0x25   :  { %308 = vmatprep.mubr.bf16.mxu0 %v20700_v1  ;;  %381 = vmatprep.mubr.bf16.mxu1 %v20700_v1 }
  0x27   :  { %644 = vmatpush1.bf16.msra.mxu0 %v15156_v40  ;;  %685 = vmatpush1.bf16.msra.mxu1 %v15163_v41 }
  0x28   :  { %645 = vmatprep.subr.bf16.mxu0 %v15170_v42  ;;  %686 = vmatprep.subr.bf16.mxu1 %v15175_v43 }
  0x2a   :  { %309 = vmatmul.mubr.bf16.gmra.mxu0 %v13444_v44  ;;  %382 = vmatmul.mubr.bf16.gmra.mxu1 %v13444_v44 }
  0x2b   :  { %646 = vmatpush1.bf16.msra.mxu0 %v15185_v45  ;;  %687 = vmatpush1.bf16.msra.mxu1 %v15190_v46 }
  0x2c   :  { %647 = vmatprep.subr.bf16.mxu0 %v15197_v47  ;;  %688 = vmatprep.subr.bf16.mxu1 %v15204_v48 }
  0x2d   :  { %318 = vmatprep.mubr.bf16.mxu0 %v20700_v1  ;;  %391 = vmatprep.mubr.bf16.mxu1 %v20700_v1 }
  0x2f   :  { %648 = vmatpush1.bf16.msra.mxu0 %v15209_v49  ;;  %689 = vmatpush1.bf16.msra.mxu1 %v15214_v50 }
  0x30   :  { %649 = vmatprep.subr.bf16.mxu0 %v15221_v51  ;;  %690 = vmatprep.subr.bf16.mxu1 %v15228_v52 }
  0x32   :  { %319 = vmatmul.mubr.bf16.gmra.mxu0 %v13457_v53  ;;  %392 = vmatmul.mubr.bf16.gmra.mxu1 %v13457_v53 }
  0x33   :  { %650 = vmatpush1.bf16.msra.mxu0 %v13462_v54  ;;  %691 = vmatpush1.bf16.msra.mxu1 %v13463_v55 }
  0x34   :  { %651 = vmatprep.subr.bf16.mxu0 %v13464_v56  ;;  %692 = vmatprep.subr.bf16.mxu1 %v13466_v57 }
  0x35   :  { %328 = vmatprep.mubr.bf16.mxu0 %v20700_v1  ;;  %401 = vmatprep.mubr.bf16.mxu1 %v20700_v1 }
  0x37   :  { %652 = vmatpush1.bf16.msra.mxu0 %v13468_v58  ;;  %693 = vmatpush1.bf16.msra.mxu1 %v13469_v59 }
  0x38   :  { %653 = vmatprep.subr.bf16.mxu0 %v13471_v60  ;;  %694 = vmatprep.subr.bf16.mxu1 %v13473_v61 }
  0x3a   :  { %329 = vmatmul.mubr.bf16.gmra.mxu0 %v13470_v62  ;;  %402 = vmatmul.mubr.bf16.gmra.mxu1 %v13470_v62 }
  0x3b   :  { %654 = vmatpush1.bf16.msra.mxu0 %v13475_v63  ;;  %695 = vmatpush1.bf16.msra.mxu1 %v13476_v0 }
  0x3c   :  { %655 = vmatprep.subr.bf16.mxu0 %v13477_v2  ;;  %696 = vmatprep.subr.bf16.mxu1 %v13479_v3 }
  0x3d   :  { %673 = vmatprep.mubr.bf16.mxu0 %v20700_v1  ;;  %714 = vmatprep.mubr.bf16.mxu1 %v20700_v1 }
  0x3f   :  { %656 = vmatpush1.bf16.msra.mxu0 %v13481_v4  ;;  %697 = vmatpush1.bf16.msra.mxu1 %v13482_v5 }
  0x40   :  { %763 = vmatprep.subr.bf16.mxu0 %v15121_v33  ;;  %804 = vmatprep.subr.bf16.mxu1 %v15126_v34 }
  0x42   :  { %674 = vmatmul.mubr.bf16.vlgmr.msra.gmra.mxu0 %v20700_v1  ;;  %715 = vmatmul.mubr.bf16.vlgmr.msra.gmra.mxu1 %v20700_v1 }
  0x43   :  { %764 = vmatpush1.bf16.msra.mxu0 %v15134_v36  ;;  %805 = vmatpush1.bf16.msra.mxu1 %v15139_v37 }
  0x44   :  { %765 = vmatprep.subr.bf16.mxu0 %v15146_v38  ;;  %806 = vmatprep.subr.bf16.mxu1 %v15151_v39 }
  0x45   :  { %795 = vmatprep.mubr.bf16.mxu0 %v20700_v1  ;;  %836 = vmatprep.mubr.bf16.mxu1 %v20700_v1 }
  0x47   :  { %766 = vmatpush1.bf16.msra.mxu0 %v15156_v40  ;;  %807 = vmatpush1.bf16.msra.mxu1 %v15163_v41 }
  0x48   :  { %767 = vmatprep.subr.bf16.mxu0 %v15170_v42  ;;  %808 = vmatprep.subr.bf16.mxu1 %v15175_v43 }
  0x4b   :  { %768 = vmatpush1.bf16.msra.mxu0 %v15185_v45  ;;  %809 = vmatpush1.bf16.msra.mxu1 %v15190_v46 }
  0x4c   :  { %769 = vmatprep.subr.bf16.mxu0 %v15197_v47  ;;  %810 = vmatprep.subr.bf16.mxu1 %v15204_v48 }
  0x4f   :  { %770 = vmatpush1.bf16.msra.mxu0 %v15209_v49  ;;  %811 = vmatpush1.bf16.msra.mxu1 %v15214_v50 }
  0x50   :  { %771 = vmatprep.subr.bf16.mxu0 %v15221_v51  ;;  %812 = vmatprep.subr.bf16.mxu1 %v15228_v52 }
  0x53   :  { %772 = vmatpush1.bf16.msra.mxu0 %v13462_v54  ;;  %813 = vmatpush1.bf16.msra.mxu1 %v13463_v55 }
  0x54   :  { %773 = vmatprep.subr.bf16.mxu0 %v13464_v56  ;;  %814 = vmatprep.subr.bf16.mxu1 %v13466_v57 }
  0x57   :  { %774 = vmatpush1.bf16.msra.mxu0 %v13468_v58  ;;  %815 = vmatpush1.bf16.msra.mxu1 %v13469_v59 }
  0x58   :  { %775 = vmatprep.subr.bf16.mxu0 %v13471_v60  ;;  %816 = vmatprep.subr.bf16.mxu1 %v13473_v61 }
  0x5b   :  { %776 = vmatpush1.bf16.msra.mxu0 %v13475_v63  ;;  %817 = vmatpush1.bf16.msra.mxu1 %v13476_v0 }
  0x5c   :  { %777 = vmatprep.subr.bf16.mxu0 %v13477_v2  ;;  %818 = vmatprep.subr.bf16.mxu1 %v13479_v3 }
  0x5f   :  { %778 = vmatpush1.bf16.msra.mxu0 %v13481_v4  ;;  %819 = vmatpush1.bf16.msra.mxu1 %v13482_v5 }
  0x60   :  { %1106 = vmatprep.subr.bf16.mxu0 %v15313_v6  ;;  %1147 = vmatprep.subr.bf16.mxu1 %v15318_v7 }
  0xe2   :  { %v300_v13 = vpop.f32.mrf.mxu0  ;;  %v373_v14 = vpop.f32.mrf.mxu1 }
  0xe3   :  { %v301_v12 = vadd.f32 %v300_v13, %v65_v17 }
  0xe4   :  { %v302_v15 = vpop.f32.mrf.mxu0  ;;  %v15329_v16 = vpop.f32.mrf.mxu1 }
  0xe5   :  { %v376_v13 = vadd.f32 %v15329_v16, %v15349_v30 }
  0xe6   :  { %v304_v19 = vpop.f32.mrf.mxu0  ;;  %v377_v20 = vpop.f32.mrf.mxu1 }
  0xe7   :  { %v15337_v23 = vadd.f32 %v304_v19, %v65_v17  ;;  %v15339_v24 = vadd.f32 %v377_v20, %v73_v18  ;;  %v374_v19 = vadd.f32 %v373_v14, %v73_v18 }
  0xe8   :  { %v15341_v25 = vpop.f32.mrf.mxu0  ;;  %v15343_v26 = vpop.f32.mrf.mxu1 }
  0xea   :  { %v310_v27 = vpop.f32.mrf.mxu0  ;;  %v383_v28 = vpop.f32.mrf.mxu1 }
  0xeb   :  { %v15351_v31 = vadd.f32 %v310_v27, %v65_v17  ;;  %v15353_v32 = vadd.f32 %v383_v28, %v73_v18  ;;  %v303_v28 = vadd.f32 %v302_v15, %v15346_v29 }
  0xec   :  { %v312_v33 = vpop.f32.mrf.mxu0  ;;  %v385_v34 = vpop.f32.mrf.mxu1 }
  0xed   :  { %21130 = vst [vmem:[#allocation10_spill] sm:$0xff] %v15351_v31  ;;  %21131 = vst [vmem:[#allocation11_spill] sm:$0xff] %v15353_v32  ;;  %v15356_v35 = vadd.f32 %v312_v33, %v15346_v29  ;;  %v15359_v36 = vadd.f32 %v385_v34, %v15349_v30  ;;  %v15703_v32 = vld [vmem:[%s20694_s1 + $0x16c] ss:$16 sps:$4 sm:$0xff]   ;;  %v15710_v31 = vld [vmem:[%s20694_s1 + $0x160] ss:$16 sps:$4 sm:$0xff]  }
  0xee   :  { %v314_v37 = vpop.f32.mrf.mxu0  ;;  %v387_v38 = vpop.f32.mrf.mxu1  ;;  %21166 = vst [vmem:[#allocation45_spill] sm:$0xff] %v15703_v32  ;;  %21167 = vst [vmem:[#allocation46_spill] sm:$0xff] %v15710_v31 }
  0xef   :  { %21132 = vst [vmem:[#allocation12_spill] sm:$0xff] %v15356_v35  ;;  %21133 = vst [vmem:[#allocation13_spill] sm:$0xff] %v15359_v36  ;;  %v15361_v39 = vadd.f32 %v314_v37, %v65_v17  ;;  %v15363_v40 = vadd.f32 %v387_v38, %v73_v18  ;;  %v15691_v36 = vld [vmem:[%s20694_s1 + $0x188] ss:$16 sps:$4 sm:$0xff]   ;;  %v15698_v35 = vld [vmem:[%s20694_s1 + $0x164] ss:$16 sps:$4 sm:$0xff]  }
  0xf0   :  { %v15365_v41 = vpop.f32.mrf.mxu0  ;;  %v15367_v42 = vpop.f32.mrf.mxu1  ;;  %21164 = vst [vmem:[#allocation43_spill] sm:$0xff] %v15691_v36  ;;  %21165 = vst [vmem:[#allocation44_spill] sm:$0xff] %v15698_v35 }
  0xf1   :  { %21134 = vst [vmem:[#allocation14_spill] sm:$0xff] %v15361_v39  ;;  %21135 = vst [vmem:[#allocation15_spill] sm:$0xff] %v15363_v40  ;;  %v15674_v40 = vld [vmem:[%s20694_s1 + $0x184] ss:$16 sps:$4 sm:$0xff]   ;;  %v15679_v39 = vld [vmem:[%s20694_s1 + $0x18c] ss:$16 sps:$4 sm:$0xff]  }
  0xf2   :  { %21136 = vst [vmem:[#allocation16_spill] sm:$0xff] %v15365_v41  ;;  %21137 = vst [vmem:[#allocation17_spill] sm:$0xff] %v15367_v42  ;;  %v320_v43 = vpop.f32.mrf.mxu0  ;;  %v393_v44 = vpop.f32.mrf.mxu1  ;;  %v15667_v42 = vld [vmem:[%s20694_s1 + $0x1a8] ss:$16 sps:$4 sm:$0xff]   ;;  %v15686_v41 = vld [vmem:[%s20694_s1 + $0x180] ss:$16 sps:$4 sm:$0xff]  }
  0xf3   :  { %v15369_v45 = vadd.f32 %v320_v43, %v65_v17  ;;  %v15371_v46 = vadd.f32 %v393_v44, %v73_v18  ;;  %21160 = vst [vmem:[#allocation39_spill] sm:$0xff] %v15667_v42  ;;  %21161 = vst [vmem:[#allocation40_spill] sm:$0xff] %v15674_v40 }
  0xf4   :  { %v322_v47 = vpop.f32.mrf.mxu0  ;;  %v395_v48 = vpop.f32.mrf.mxu1  ;;  %21162 = vst [vmem:[#allocation41_spill] sm:$0xff] %v15679_v39  ;;  %21163 = vst [vmem:[#allocation42_spill] sm:$0xff] %v15686_v41 }
  0xf5   :  { %21138 = vst [vmem:[#allocation18_spill] sm:$0xff] %v15369_v45  ;;  %21139 = vst [vmem:[#allocation19_spill] sm:$0xff] %v15371_v46  ;;  %v15374_v49 = vadd.f32 %v322_v47, %v15346_v29  ;;  %v15377_v50 = vadd.f32 %v395_v48, %v15349_v30  ;;  %v15653_v46 = vld [vmem:[%s20694_s1 + $0x1ac] ss:$16 sps:$4 sm:$0xff]   ;;  %v15662_v45 = vld [vmem:[%s20694_s1 + $0x1a0] ss:$16 sps:$4 sm:$0xff]  }
  0xf6   :  { %v324_v51 = vpop.f32.mrf.mxu0  ;;  %v397_v52 = vpop.f32.mrf.mxu1  ;;  %21158 = vst [vmem:[#allocation37_spill] sm:$0xff] %v15653_v46  ;;  %21159 = vst [vmem:[#allocation38_spill] sm:$0xff] %v15662_v45 }
  0xf7   :  { %21140 = vst [vmem:[#allocation20_spill] sm:$0xff] %v15374_v49  ;;  %21141 = vst [vmem:[#allocation21_spill] sm:$0xff] %v15377_v50  ;;  %v15379_v53 = vadd.f32 %v324_v51, %v65_v17  ;;  %v15381_v54 = vadd.f32 %v397_v52, %v73_v18  ;;  %v15641_v50 = vld [vmem:[%s20694_s1 + $0x1c8] ss:$16 sps:$4 sm:$0xff]   ;;  %v15648_v49 = vld [vmem:[%s20694_s1 + $0x1a4] ss:$16 sps:$4 sm:$0xff]  }
  0xf8   :  { %v15383_v55 = vpop.f32.mrf.mxu0  ;;  %v15385_v56 = vpop.f32.mrf.mxu1  ;;  %21156 = vst [vmem:[#allocation35_spill] sm:$0xff] %v15641_v50  ;;  %21157 = vst [vmem:[#allocation36_spill] sm:$0xff] %v15648_v49 }
  0xf9   :  { %21142 = vst [vmem:[#allocation22_spill] sm:$0xff] %v15379_v53  ;;  %21143 = vst [vmem:[#allocation23_spill] sm:$0xff] %v15381_v54  ;;  %v15627_v54 = vld [vmem:[%s20694_s1 + $0x1cc] ss:$16 sps:$4 sm:$0xff]   ;;  %v21154_v53 = vmov 0  }
  0xfa   :  { %21144 = vst [vmem:[#allocation24_spill] sm:$0xff] %v15383_v55  ;;  %21145 = vst [vmem:[#allocation25_spill] sm:$0xff] %v15385_v56  ;;  %v330_v57 = vpop.f32.mrf.mxu0  ;;  %v403_v58 = vpop.f32.mrf.mxu1  ;;  %v15622_v56 = vld [vmem:[%s20694_s1 + $0x1c4] ss:$16 sps:$4 sm:$0xff]   ;;  %v15636_v55 = vld [vmem:[%s20694_s1 + $0x1c0] ss:$16 sps:$4 sm:$0xff]  }
  0xfb   :  { %v15387_v59 = vadd.f32 %v330_v57, %v65_v17  ;;  %v15389_v60 = vadd.f32 %v403_v58, %v73_v18  ;;  %21155 = vst [vmem:[#allocation34_spill] sm:$0xff] %v15636_v55 }
  0xfc   :  { %v332_v61 = vpop.f32.mrf.mxu0  ;;  %v405_v62 = vpop.f32.mrf.mxu1 }
  0xfd   :  { %21146 = vst [vmem:[#allocation26_spill] sm:$0xff] %v15387_v59  ;;  %21147 = vst [vmem:[#allocation27_spill] sm:$0xff] %v15389_v60  ;;  %v15392_v63 = vadd.f32 %v332_v61, %v15346_v29  ;;  %v15395_v0 = vadd.f32 %v405_v62, %v15349_v30  ;;  %v15610_v60 = vld [vmem:[%s20694_s1 + $0x1e0] ss:$16 sps:$4 sm:$0xff]   ;;  %v15615_v59 = vld [vmem:[%s20694_s1 + $0x1e8] ss:$16 sps:$4 sm:$0xff]  }
  0xfe   :  { %v334_v2 = vpop.f32.mrf.mxu0  ;;  %v407_v3 = vpop.f32.mrf.mxu1 }
  0xff   :  { %21148 = vst [vmem:[#allocation28_spill] sm:$0xff] %v15392_v63  ;;  %21149 = vst [vmem:[#allocation29_spill] sm:$0xff] %v15395_v0  ;;  %v15397_v4 = vadd.f32 %v334_v2, %v65_v17  ;;  %v15399_v5 = vadd.f32 %v407_v3, %v73_v18  ;;  %v15598_v0 = vld [vmem:[%s20694_s1 + $0x1e4] ss:$16 sps:$4 sm:$0xff]   ;;  %v15603_v63 = vld [vmem:[%s20694_s1 + $0x1ec] ss:$16 sps:$4 sm:$0xff]  }
 0x100   :  { %v15401_v8 = vpop.f32.mrf.mxu0  ;;  %v15403_v9 = vpop.f32.mrf.mxu1 }
 0x101   :  { %21150 = vst [vmem:[#allocation30_spill] sm:$0xff] %v15397_v4  ;;  %21151 = vst [vmem:[#allocation31_spill] sm:$0xff] %v15399_v5  ;;  %v15574_v5 = vld [vmem:[%s20694_s1 + $0x504] ss:$16 sps:$4 sm:$0xff]   ;;  %v15579_v4 = vld [vmem:[%s20694_s1 + $0x50c] ss:$16 sps:$4 sm:$0xff]  }
 0x102   :  { %21152 = vst [vmem:[#allocation32_spill] sm:$0xff] %v15401_v8  ;;  %21153 = vst [vmem:[#allocation33_spill] sm:$0xff] %v15403_v9  ;;  %v675_v20 = vpop.f32.mrf.mxu0  ;;  %v716_v27 = vpop.f32.mrf.mxu1  ;;  %v15586_v9 = vld [vmem:[%s20694_s1 + $0x500] ss:$16 sps:$4 sm:$0xff]   ;;  %v15591_v8 = vld [vmem:[%s20694_s1 + $0x508] ss:$16 sps:$4 sm:$0xff]  }
 0x103   :  { %v723_v33 = vadd.f32 %v675_v20, %v301_v12  ;;  %v725_v34 = vadd.f32 %v716_v27, %v374_v19 }
 0x104   :  { %v677_v37 = vpop.f32.mrf.mxu0  ;;  %v718_v38 = vpop.f32.mrf.mxu1 }
 0x105   :  { %v11447_v43 = vmul.f32 -1.442695, %v723_v33  ;;  %v11449_v44 = vmul.f32 -1.442695, %v725_v34  ;;  %v724_v47 = vadd.f32 %v677_v37, %v303_v28  ;;  %v726_v14 = vadd.f32 %v718_v38, %v376_v13  ;;  %v15440_v13 = vld [vmem:[%s20694_s1 + $0x5c0] ss:$16 sps:$4 sm:$0xff]  }
 0x106   :  { %v679_v48 = vpop.f32.mrf.mxu0  ;;  %v720_v51 = vpop.f32.mrf.mxu1 }
 0x107   :  { %14219 = vpow2.f32 %v11447_v43  ;;  %v11448_v52 = vmul.f32 -1.442695, %v724_v47  ;;  %v11450_v18 = vmul.f32 -1.442695, %v726_v14  ;;  %v15414_v48 = vld [vmem:[%s20694_s1 + $0x5e0] ss:$16 sps:$4 sm:$0xff]  }
 0x108   :  { %14221 = vpow2.f32 %v11449_v44  ;;  %v680_v57 = vpop.f32.mrf.mxu0  ;;  %v721_v58 = vpop.f32.mrf.mxu1  ;;  %v15419_v51 = vld [vmem:[%s20694_s1 + $0x5e8] ss:$16 sps:$4 sm:$0xff]  }
 0x109   :  { %14223 = vpow2.f32 %v11448_v52  ;;  %v15426_v57 = vld [vmem:[%s20694_s1 + $0x5c4] ss:$16 sps:$4 sm:$0xff]   ;;  %v15431_v58 = vld [vmem:[%s20694_s1 + $0x5cc] ss:$16 sps:$4 sm:$0xff]   ;;  %v15445_v14 = vld [vmem:[%s20694_s1 + $0x5c8] ss:$16 sps:$4 sm:$0xff]  }
 0x114   :  { %v14220_v15 = vpop.eup %14219 }
 0x115   :  { %v14222_v17 = vpop.eup %14221  ;;  %v739_v3 = vadd.f32 1.0, %v14220_v15  ;;  %v15452_v15 = vld [vmem:[%s20694_s1 + $0x5a4] ss:$16 sps:$4 sm:$0xff]  }
 0x116   :  { %v14224_v61 = vpop.eup %14223  ;;  %v741_v62 = vadd.f32 1.0, %v14222_v17  ;;  %v15457_v17 = vld [vmem:[%s20694_s1 + $0x5ac] ss:$16 sps:$4 sm:$0xff]  }
 0x117   :  { %v740_v2 = vadd.f32 1.0, %v14224_v61  ;;  %v15471_v61 = vld [vmem:[%s20694_s1 + $0x5a8] ss:$16 sps:$4 sm:$0xff]  }
 0x118   :  { %14225 = vrcp.f32 %v741_v62  ;;  %v15478_v62 = vld [vmem:[%s20694_s1 + $0x584] ss:$16 sps:$4 sm:$0xff]  }
 0x119   :  { %14227 = vpow2.f32 %v11450_v18  ;;  %v15466_v18 = vld [vmem:[%s20694_s1 + $0x5a0] ss:$16 sps:$4 sm:$0xff]  }
 0x11a   :  { %14229 = vrcp.f32 %v740_v2  ;;  %v15483_v2 = vld [vmem:[%s20694_s1 + $0x58c] ss:$16 sps:$4 sm:$0xff]  }
 0x11b   :  { %14231 = vrcp.f32 %v739_v3  ;;  %v15490_v3 = vld [vmem:[%s20694_s1 + $0x580] ss:$16 sps:$4 sm:$0xff]  }
 0x125   :  { %v14226_v12 = vpop.eup %14225 }
 0x126   :  { %v14228_v19 = vpop.eup %14227  ;;  %v751_v20 = vmul.f32 2.0, %v14226_v12  ;;  %v15495_v12 = vld [vmem:[%s20694_s1 + $0x588] ss:$16 sps:$4 sm:$0xff]  }
 0x127   :  { %v14230_v27 = vpop.eup %14229  ;;  %v742_v34 = vadd.f32 1.0, %v14228_v19  ;;  %v15502_v19 = vld [vmem:[%s20694_s1 + $0x564] ss:$16 sps:$4 sm:$0xff]  }
 0x128   :  { %v11451_v28 = vadd.f32 -1.0, %v751_v20  ;;  %v14232_v33 = vpop.eup %14231  ;;  %v753_v37 = vmul.f32 0.0, %v14230_v27  ;;  %v15507_v20 = vld [vmem:[%s20694_s1 + $0x56c] ss:$16 sps:$4 sm:$0xff]   ;;  %v15514_v27 = vld [vmem:[%s20694_s1 + $0x560] ss:$16 sps:$4 sm:$0xff]  }
 0x129   :  { %14233 = vrcp.f32 %v742_v34  ;;  %v15531_v34 = vld [vmem:[%s20694_s1 + $0x54c] ss:$16 sps:$4 sm:$0xff]  }
 0x12a   :  { %v754_v16 = vmul.f32 %v14232_v33, %v11451_v28  ;;  %v15519_v28 = vld [vmem:[%s20694_s1 + $0x568] ss:$16 sps:$4 sm:$0xff]   ;;  %v15526_v33 = vld [vmem:[%s20694_s1 + $0x544] ss:$16 sps:$4 sm:$0xff]  }
 0x12c   :  { %v15408_v38 = vadd.f32 %v754_v16, %v753_v37  ;;  %v15538_v16 = vld [vmem:[%s20694_s1 + $0x540] ss:$16 sps:$4 sm:$0xff]   ;;  %v15543_v37 = vld [vmem:[%s20694_s1 + $0x548] ss:$16 sps:$4 sm:$0xff]  }
 0x12e   :  { %14235 = vtanh.f32 %v15408_v38 }
 0x136   :  { %v14234_v43 = vpop.eup %14233 }
 0x13b   :  { %v14236_v44 = vpop.eup %14235 }
 0x13c   :  { %v757_v47 = vmul.f32 %v14236_v44, %v14234_v43  ;;  %v15550_v43 = vld [vmem:[%s20694_s1 + $0x524] ss:$16 sps:$4 sm:$0xff]   ;;  %v15555_v44 = vld [vmem:[%s20694_s1 + $0x52c] ss:$16 sps:$4 sm:$0xff]  }
 0x13e   :  { %v15421_v52 = vpack.c.bf16 %v757_v47, %v757_v47  ;;  %v15562_v47 = vld [vmem:[%s20694_s1 + $0x520] ss:$16 sps:$4 sm:$0xff]  }
 0x140   :  { %796 = vmatmul.mubr.bf16.vlgmr.msra.gmra.mxu0 %v15421_v52  ;;  %837 = vmatmul.mubr.bf16.vlgmr.msra.gmra.mxu1 %v15421_v52 }
 0x141   :  { %1107 = vmatpush1.bf16.msra.mxu0 %v15414_v48  ;;  %1148 = vmatpush1.bf16.msra.mxu1 %v15419_v51 }
 0x142   :  { %1108 = vmatprep.subr.bf16.mxu0 %v15426_v57  ;;  %1149 = vmatprep.subr.bf16.mxu1 %v15431_v58 }
 0x143   :  { %1138 = vmatprep.mubr.bf16.mxu0 %v20700_v1  ;;  %1179 = vmatprep.mubr.bf16.mxu1 %v20700_v1  ;;  %v15567_v1 = vld [vmem:[%s20694_s1 + $0x528] ss:$16 sps:$4 sm:$0xff]  }
 0x145   :  { %1109 = vmatpush1.bf16.msra.mxu0 %v15440_v13  ;;  %1150 = vmatpush1.bf16.msra.mxu1 %v15445_v14 }
 0x146   :  { %1110 = vmatprep.subr.bf16.mxu0 %v15452_v15  ;;  %1151 = vmatprep.subr.bf16.mxu1 %v15457_v17 }
 0x149   :  { %1111 = vmatpush1.bf16.msra.mxu0 %v15466_v18  ;;  %1152 = vmatpush1.bf16.msra.mxu1 %v15471_v61 }
 0x14a   :  { %1112 = vmatprep.subr.bf16.mxu0 %v15478_v62  ;;  %1153 = vmatprep.subr.bf16.mxu1 %v15483_v2 }
 0x14d   :  { %1113 = vmatpush1.bf16.msra.mxu0 %v15490_v3  ;;  %1154 = vmatpush1.bf16.msra.mxu1 %v15495_v12 }
 0x14e   :  { %1114 = vmatprep.subr.bf16.mxu0 %v15502_v19  ;;  %1155 = vmatprep.subr.bf16.mxu1 %v15507_v20 }
 0x151   :  { %1115 = vmatpush1.bf16.msra.mxu0 %v15514_v27  ;;  %1156 = vmatpush1.bf16.msra.mxu1 %v15519_v28 }
 0x152   :  { %1116 = vmatprep.subr.bf16.mxu0 %v15526_v33  ;;  %1157 = vmatprep.subr.bf16.mxu1 %v15531_v34 }
 0x155   :  { %1117 = vmatpush1.bf16.msra.mxu0 %v15538_v16  ;;  %1158 = vmatpush1.bf16.msra.mxu1 %v15543_v37 }
 0x156   :  { %1118 = vmatprep.subr.bf16.mxu0 %v15550_v43  ;;  %1159 = vmatprep.subr.bf16.mxu1 %v15555_v44 }
 0x159   :  { %1119 = vmatpush1.bf16.msra.mxu0 %v15562_v47  ;;  %1160 = vmatpush1.bf16.msra.mxu1 %v15567_v1 }
 0x15a   :  { %1120 = vmatprep.subr.bf16.mxu0 %v15574_v5  ;;  %1161 = vmatprep.subr.bf16.mxu1 %v15579_v4 }
 0x15d   :  { %1121 = vmatpush1.bf16.msra.mxu0 %v15586_v9  ;;  %1162 = vmatpush1.bf16.msra.mxu1 %v15591_v8 }
 0x15e   :  { %1348 = vmatprep.subr.bf16.mxu0 %v15598_v0  ;;  %1389 = vmatprep.subr.bf16.mxu1 %v15603_v63 }
 0x160   :  { %1139 = vmatmul.mubr.bf16.vlgmr.msra.gmra.mxu0 %v21154_v53  ;;  %1180 = vmatmul.mubr.bf16.vlgmr.msra.gmra.mxu1 %v21154_v53 }
 0x161   :  { %1349 = vmatpush1.bf16.msra.mxu0 %v15610_v60  ;;  %1390 = vmatpush1.bf16.msra.mxu1 %v15615_v59 }
 0x162   :  { %1350 = vmatprep.subr.bf16.mxu0 %v15622_v56  ;;  %1391 = vmatprep.subr.bf16.mxu1 %v15627_v54 }
 0x163   :  { %1380 = vmatprep.mubr.bf16.mxu0 %v21154_v53  ;;  %1421 = vmatprep.mubr.bf16.mxu1 %v21154_v53 }
 0x165   :  { %1351 = vmatpush1.bf16.msra.mxu0 %v15636_v55  ;;  %1392 = vmatpush1.bf16.msra.mxu1 %v15641_v50 }
 0x166   :  { %1352 = vmatprep.subr.bf16.mxu0 %v15648_v49  ;;  %1393 = vmatprep.subr.bf16.mxu1 %v15653_v46 }
 0x169   :  { %1353 = vmatpush1.bf16.msra.mxu0 %v15662_v45  ;;  %1394 = vmatpush1.bf16.msra.mxu1 %v15667_v42 }
 0x16a   :  { %1354 = vmatprep.subr.bf16.mxu0 %v15674_v40  ;;  %1395 = vmatprep.subr.bf16.mxu1 %v15679_v39  ;;  %v15715_v39 = vld [vmem:[%s20694_s1 + $0x168] ss:$16 sps:$4 sm:$0xff]  }
 0x16b   :  { %21168 = vst [vmem:[#allocation47_spill] sm:$0xff] %v15715_v39 }
 0x16d   :  { %1355 = vmatpush1.bf16.msra.mxu0 %v15686_v41  ;;  %1396 = vmatpush1.bf16.msra.mxu1 %v15691_v36  ;;  %v15722_v41 = vld [vmem:[%s20694_s1 + $0x144] ss:$16 sps:$4 sm:$0xff]   ;;  %v15727_v36 = vld [vmem:[%s20694_s1 + $0x14c] ss:$16 sps:$4 sm:$0xff]  }
 0x16e   :  { %1356 = vmatprep.subr.bf16.mxu0 %v15698_v35  ;;  %1397 = vmatprep.subr.bf16.mxu1 %v15703_v32  ;;  %21169 = vst [vmem:[#allocation48_spill] sm:$0xff] %v15722_v41  ;;  %21170 = vst [vmem:[#allocation49_spill] sm:$0xff] %v15727_v36  ;;  %v15734_v35 = vld [vmem:[%s20694_s1 + $0x140] ss:$16 sps:$4 sm:$0xff]   ;;  %v15739_v32 = vld [vmem:[%s20694_s1 + $0x148] ss:$16 sps:$4 sm:$0xff]  }
 0x16f   :  { %21171 = vst [vmem:[#allocation50_spill] sm:$0xff] %v15734_v35  ;;  %21172 = vst [vmem:[#allocation51_spill] sm:$0xff] %v15739_v32 }
 0x171   :  { %1357 = vmatpush1.bf16.msra.mxu0 %v15710_v31  ;;  %1398 = vmatpush1.bf16.msra.mxu1 %v15715_v39  ;;  %v15746_v31 = vld [vmem:[%s20694_s1 + $0x124] ss:$16 sps:$4 sm:$0xff]   ;;  %v15751_v39 = vld [vmem:[%s20694_s1 + $0x12c] ss:$16 sps:$4 sm:$0xff]  }
 0x172   :  { %1358 = vmatprep.subr.bf16.mxu0 %v15722_v41  ;;  %1399 = vmatprep.subr.bf16.mxu1 %v15727_v36  ;;  %21173 = vst [vmem:[#allocation52_spill] sm:$0xff] %v15746_v31  ;;  %21174 = vst [vmem:[#allocation53_spill] sm:$0xff] %v15751_v39  ;;  %v15758_v41 = vld [vmem:[%s20694_s1 + $0x120] ss:$16 sps:$4 sm:$0xff]   ;;  %v15763_v36 = vld [vmem:[%s20694_s1 + $0x128] ss:$16 sps:$4 sm:$0xff]  }
 0x173   :  { %21175 = vst [vmem:[#allocation54_spill] sm:$0xff] %v15758_v41  ;;  %21176 = vst [vmem:[#allocation55_spill] sm:$0xff] %v15763_v36 }
 0x175   :  { %1359 = vmatpush1.bf16.msra.mxu0 %v15734_v35  ;;  %1400 = vmatpush1.bf16.msra.mxu1 %v15739_v32  ;;  %v15770_v35 = vld [vmem:[%s20694_s1 + $0x104] ss:$16 sps:$4 sm:$0xff]   ;;  %v15775_v32 = vld [vmem:[%s20694_s1 + $0x10c] ss:$16 sps:$4 sm:$0xff]  }
 0x176   :  { %1360 = vmatprep.subr.bf16.mxu0 %v15746_v31  ;;  %1401 = vmatprep.subr.bf16.mxu1 %v15751_v39  ;;  %21177 = vst [vmem:[#allocation56_spill] sm:$0xff] %v15770_v35  ;;  %21178 = vst [vmem:[#allocation57_spill] sm:$0xff] %v15775_v32  ;;  %v15782_v31 = vld [vmem:[%s20694_s1 + $0x100] ss:$16 sps:$4 sm:$0xff]   ;;  %v15787_v39 = vld [vmem:[%s20694_s1 + $0x108] ss:$16 sps:$4 sm:$0xff]  }
 0x177   :  { %21179 = vst [vmem:[#allocation58_spill] sm:$0xff] %v15782_v31  ;;  %21180 = vst [vmem:[#allocation59_spill] sm:$0xff] %v15787_v39 }
 0x179   :  { %1361 = vmatpush1.bf16.msra.mxu0 %v15758_v41  ;;  %1402 = vmatpush1.bf16.msra.mxu1 %v15763_v36  ;;  %v15796_v36 = vld [vmem:[%s20694_s1 + $0x4e4] ss:$16 sps:$4 sm:$0xff]   ;;  %v15802_v41 = vld [vmem:[%s20694_s1 + $0x4ec] ss:$16 sps:$4 sm:$0xff]  }
 0x17a   :  { %1362 = vmatprep.subr.bf16.mxu0 %v15770_v35  ;;  %1403 = vmatprep.subr.bf16.mxu1 %v15775_v32  ;;  %21181 = vst [vmem:[#allocation60_spill] sm:$0xff] %v15796_v36  ;;  %21182 = vst [vmem:[#allocation61_spill] sm:$0xff] %v15802_v41 }
 0x17d   :  { %1363 = vmatpush1.bf16.msra.mxu0 %v15782_v31  ;;  %1404 = vmatpush1.bf16.msra.mxu1 %v15787_v39  ;;  %v15810_v39 = vld [vmem:[%s20694_s1 + $0x4e0] ss:$16 sps:$4 sm:$0xff]   ;;  %v307_v31 = vadd.f32 %v15341_v25, %v15346_v29  ;;  %v380_v25 = vadd.f32 %v15343_v26, %v15349_v30  ;;  %v21233_v30 = vld [vmem:[#allocation53_spill] sm:$0xff] }
 0x17e   :  { %1493 = vmatprep.subr.bf16.mxu0 %v15796_v36  ;;  %1534 = vmatprep.subr.bf16.mxu1 %v15802_v41  ;;  %21183 = vst [vmem:[#allocation62_spill] sm:$0xff] %v15810_v39  ;;  %v15816_v36 = vld [vmem:[%s20694_s1 + $0x4e8] ss:$16 sps:$4 sm:$0xff]   ;;  %v15822_v41 = vld [vmem:[%s20694_s1 + $0x4c4] ss:$16 sps:$4 sm:$0xff]  }
 0x17f   :  { %21184 = vst [vmem:[#allocation63_spill] sm:$0xff] %v15816_v36  ;;  %21185 = vst [vmem:[#allocation64_spill] sm:$0xff] %v15822_v41 }
 0x180   :  { %1381 = vmatmul.mubr.bf16.vlgmr.msra.gmra.mxu0 %v15421_v52  ;;  %1422 = vmatmul.mubr.bf16.vlgmr.msra.gmra.mxu1 %v15421_v52  ;;  %v15828_v52 = vld [vmem:[%s20694_s1 + $0x4cc] ss:$16 sps:$4 sm:$0xff]  }
 0x181   :  { %1494 = vmatpush1.bf16.msra.mxu0 %v15810_v39  ;;  %1535 = vmatpush1.bf16.msra.mxu1 %v15816_v36  ;;  %21186 = vst [vmem:[#allocation65_spill] sm:$0xff] %v15828_v52  ;;  %v15836_v36 = vld [vmem:[%s20694_s1 + $0x4c0] ss:$16 sps:$4 sm:$0xff]   ;;  %v15854_v39 = vld [vmem:[%s20694_s1 + $0x4ac] ss:$16 sps:$4 sm:$0xff]  }
 0x182   :  { %1495 = vmatprep.subr.bf16.mxu0 %v15822_v41  ;;  %1536 = vmatprep.subr.bf16.mxu1 %v15828_v52  ;;  %21187 = vst [vmem:[#allocation66_spill] sm:$0xff] %v15836_v36  ;;  %v15842_v41 = vld [vmem:[%s20694_s1 + $0x4c8] ss:$16 sps:$4 sm:$0xff]   ;;  %v15848_v52 = vld [vmem:[%s20694_s1 + $0x4a4] ss:$16 sps:$4 sm:$0xff]   ;;  %21190 = vst [vmem:[#allocation69_spill] sm:$0xff] %v15854_v39 }
 0x183   :  { %1525 = vmatprep.mubr.bf16.mxu0 %v21154_v53  ;;  %1566 = vmatprep.mubr.bf16.mxu1 %v21154_v53  ;;  %21188 = vst [vmem:[#allocation67_spill] sm:$0xff] %v15842_v41  ;;  %21189 = vst [vmem:[#allocation68_spill] sm:$0xff] %v15848_v52 }
 0x185   :  { %1496 = vmatpush1.bf16.msra.mxu0 %v15836_v36  ;;  %1537 = vmatpush1.bf16.msra.mxu1 %v15842_v41  ;;  %v15860_v36 = vld [vmem:[%s20694_s1 + $0x4a0] ss:$16 sps:$4 sm:$0xff]   ;;  %v15866_v41 = vld [vmem:[%s20694_s1 + $0x4a8] ss:$16 sps:$4 sm:$0xff]  }
 0x186   :  { %1497 = vmatprep.subr.bf16.mxu0 %v15848_v52  ;;  %1538 = vmatprep.subr.bf16.mxu1 %v15854_v39  ;;  %21191 = vst [vmem:[#allocation70_spill] sm:$0xff] %v15860_v36  ;;  %21192 = vst [vmem:[#allocation71_spill] sm:$0xff] %v15866_v41  ;;  %v15872_v52 = vld [vmem:[%s20694_s1 + $0x484] ss:$16 sps:$4 sm:$0xff]   ;;  %v15878_v39 = vld [vmem:[%s20694_s1 + $0x48c] ss:$16 sps:$4 sm:$0xff]  }
 0x187   :  { %21193 = vst [vmem:[#allocation72_spill] sm:$0xff] %v15872_v52  ;;  %21194 = vst [vmem:[#allocation73_spill] sm:$0xff] %v15878_v39 }
 0x189   :  { %1498 = vmatpush1.bf16.msra.mxu0 %v15860_v36  ;;  %1539 = vmatpush1.bf16.msra.mxu1 %v15866_v41  ;;  %v15884_v36 = vld [vmem:[%s20694_s1 + $0x480] ss:$16 sps:$4 sm:$0xff]   ;;  %v15890_v41 = vld [vmem:[%s20694_s1 + $0x488] ss:$16 sps:$4 sm:$0xff]  }
 0x18a   :  { %1499 = vmatprep.subr.bf16.mxu0 %v15872_v52  ;;  %1540 = vmatprep.subr.bf16.mxu1 %v15878_v39  ;;  %21195 = vst [vmem:[#allocation74_spill] sm:$0xff] %v15884_v36  ;;  %21196 = vst [vmem:[#allocation75_spill] sm:$0xff] %v15890_v41  ;;  %v15896_v52 = vld [vmem:[%s20694_s1 + $0x464] ss:$16 sps:$4 sm:$0xff]   ;;  %v15902_v39 = vld [vmem:[%s20694_s1 + $0x46c] ss:$16 sps:$4 sm:$0xff]  }
 0x18b   :  { %21197 = vst [vmem:[#allocation76_spill] sm:$0xff] %v15896_v52  ;;  %21198 = vst [vmem:[#allocation77_spill] sm:$0xff] %v15902_v39 }
 0x18d   :  { %1500 = vmatpush1.bf16.msra.mxu0 %v15884_v36  ;;  %1541 = vmatpush1.bf16.msra.mxu1 %v15890_v41  ;;  %v15908_v36 = vld [vmem:[%s20694_s1 + $0x460] ss:$16 sps:$4 sm:$0xff]   ;;  %v15914_v41 = vld [vmem:[%s20694_s1 + $0x468] ss:$16 sps:$4 sm:$0xff]  }
 0x18e   :  { %1501 = vmatprep.subr.bf16.mxu0 %v15896_v52  ;;  %1542 = vmatprep.subr.bf16.mxu1 %v15902_v39  ;;  %21199 = vst [vmem:[#allocation78_spill] sm:$0xff] %v15908_v36  ;;  %21200 = vst [vmem:[#allocation79_spill] sm:$0xff] %v15914_v41  ;;  %v15920_v52 = vld [vmem:[%s20694_s1 + $0x444] ss:$16 sps:$4 sm:$0xff]   ;;  %v15926_v39 = vld [vmem:[%s20694_s1 + $0x44c] ss:$16 sps:$4 sm:$0xff]  }
 0x18f   :  { %21201 = vst [vmem:[#allocation80_spill] sm:$0xff] %v15920_v52  ;;  %21202 = vst [vmem:[#allocation81_spill] sm:$0xff] %v15926_v39 }
 0x191   :  { %1502 = vmatpush1.bf16.msra.mxu0 %v15908_v36  ;;  %1543 = vmatpush1.bf16.msra.mxu1 %v15914_v41  ;;  %v15932_v36 = vld [vmem:[%s20694_s1 + $0x440] ss:$16 sps:$4 sm:$0xff]   ;;  %v15938_v41 = vld [vmem:[%s20694_s1 + $0x448] ss:$16 sps:$4 sm:$0xff]  }
 0x192   :  { %1503 = vmatprep.subr.bf16.mxu0 %v15920_v52  ;;  %1544 = vmatprep.subr.bf16.mxu1 %v15926_v39  ;;  %21203 = vst [vmem:[#allocation82_spill] sm:$0xff] %v15932_v36  ;;  %21204 = vst [vmem:[#allocation83_spill] sm:$0xff] %v15938_v41  ;;  %v15944_v52 = vld [vmem:[%s20694_s1 + $0x424] ss:$16 sps:$4 sm:$0xff]   ;;  %v15950_v39 = vld [vmem:[%s20694_s1 + $0x42c] ss:$16 sps:$4 sm:$0xff]  }
 0x193   :  { %21205 = vst [vmem:[#allocation84_spill] sm:$0xff] %v15944_v52  ;;  %21206 = vst [vmem:[#allocation85_spill] sm:$0xff] %v15950_v39 }
 0x195   :  { %1504 = vmatpush1.bf16.msra.mxu0 %v15932_v36  ;;  %1545 = vmatpush1.bf16.msra.mxu1 %v15938_v41  ;;  %v15956_v36 = vld [vmem:[%s20694_s1 + $0x420] ss:$16 sps:$4 sm:$0xff]   ;;  %v15962_v41 = vld [vmem:[%s20694_s1 + $0x428] ss:$16 sps:$4 sm:$0xff]  }
 0x196   :  { %1505 = vmatprep.subr.bf16.mxu0 %v15944_v52  ;;  %1546 = vmatprep.subr.bf16.mxu1 %v15950_v39  ;;  %21207 = vst [vmem:[#allocation86_spill] sm:$0xff] %v15956_v36  ;;  %21208 = vst [vmem:[#allocation87_spill] sm:$0xff] %v15962_v41  ;;  %v15968_v52 = vld [vmem:[%s20694_s1 + $0x404] ss:$16 sps:$4 sm:$0xff]   ;;  %v15974_v39 = vld [vmem:[%s20694_s1 + $0x40c] ss:$16 sps:$4 sm:$0xff]  }
 0x197   :  { %21209 = vst [vmem:[#allocation88_spill] sm:$0xff] %v15968_v52  ;;  %21210 = vst [vmem:[#allocation89_spill] sm:$0xff] %v15974_v39 }
 0x199   :  { %1506 = vmatpush1.bf16.msra.mxu0 %v15956_v36  ;;  %1547 = vmatpush1.bf16.msra.mxu1 %v15962_v41  ;;  %v15980_v36 = vld [vmem:[%s20694_s1 + $0x400] ss:$16 sps:$4 sm:$0xff]   ;;  %v15986_v41 = vld [vmem:[%s20694_s1 + $0x408] ss:$16 sps:$4 sm:$0xff]  }
 0x19a   :  { %1507 = vmatprep.subr.bf16.mxu0 %v15968_v52  ;;  %1548 = vmatprep.subr.bf16.mxu1 %v15974_v39  ;;  %21211 = vst [vmem:[#allocation90_spill] sm:$0xff] %v15980_v36  ;;  %21212 = vst [vmem:[#allocation91_spill] sm:$0xff] %v15986_v41 }
 0x19d   :  { %1508 = vmatpush1.bf16.msra.mxu0 %v15980_v36  ;;  %1549 = vmatpush1.bf16.msra.mxu1 %v15986_v41 }
 0x19e   :  { %1611 = vmatprep.subr.bf16.mxu0 %v15313_v6  ;;  %1652 = vmatprep.subr.bf16.mxu1 %v15318_v7 }
 0x200   :  { %v797_v52 = vpop.f32.mrf.mxu0  ;;  %v838_v39 = vpop.f32.mrf.mxu1 }
 0x201   :  { %v845_v32 = vadd.f32 %v797_v52, %v15337_v23  ;;  %v847_v36 = vadd.f32 %v838_v39, %v15339_v24 }
 0x202   :  { %v799_v35 = vpop.f32.mrf.mxu0  ;;  %v840_v40 = vpop.f32.mrf.mxu1 }
 0x203   :  { %v11452_v42 = vmul.f32 -1.442695, %v845_v32  ;;  %v11454_v45 = vmul.f32 -1.442695, %v847_v36  ;;  %v846_v46 = vadd.f32 %v799_v35, %v307_v31  ;;  %v848_v29 = vadd.f32 %v840_v40, %v380_v25 }
 0x204   :  { %v801_v49 = vpop.f32.mrf.mxu0  ;;  %v842_v41 = vpop.f32.mrf.mxu1 }
 0x205   :  { %14237 = vpow2.f32 %v11452_v42  ;;  %v11453_v6 = vmul.f32 -1.442695, %v846_v46  ;;  %v11455_v24 = vmul.f32 -1.442695, %v848_v29 }
 0x206   :  { %14239 = vpow2.f32 %v11454_v45  ;;  %v802_v7 = vpop.f32.mrf.mxu0  ;;  %v843_v50 = vpop.f32.mrf.mxu1 }
 0x207   :  { %14241 = vpow2.f32 %v11453_v6 }
 0x212   :  { %v14238_v23 = vpop.eup %14237 }
 0x213   :  { %v14240_v52 = vpop.eup %14239  ;;  %v861_v36 = vadd.f32 1.0, %v14238_v23 }
 0x214   :  { %v14242_v39 = vpop.eup %14241  ;;  %v863_v55 = vadd.f32 1.0, %v14240_v52 }
 0x215   :  { %v862_v32 = vadd.f32 1.0, %v14242_v39 }
 0x216   :  { %14243 = vrcp.f32 %v863_v55 }
 0x217   :  { %14245 = vpow2.f32 %v11455_v24 }
 0x218   :  { %14247 = vrcp.f32 %v862_v32 }
 0x219   :  { %14249 = vrcp.f32 %v861_v36 }
 0x220   :  { %v1140_v31 = vpop.f32.mrf.mxu0  ;;  %v1181_v35 = vpop.f32.mrf.mxu1 }
 0x222   :  { %v1142_v41 = vpop.f32.mrf.mxu0  ;;  %v15997_v42 = vpop.f32.mrf.mxu1 }
 0x223   :  { %v14244_v45 = vpop.eup %14243 }
 0x224   :  { %v14246_v46 = vpop.eup %14245  ;;  %v873_v26 = vmul.f32 2.0, %v14244_v45  ;;  %v1144_v40 = vpop.f32.mrf.mxu0 }
 0x225   :  { %v1185_v49 = vpop.f32.mrf.mxu1  ;;  %v14248_v50 = vpop.eup %14247  ;;  %v864_v23 = vadd.f32 1.0, %v14246_v46 }
 0x226   :  { %v11456_v29 = vadd.f32 -1.0, %v873_v26  ;;  %v1145_v6 = vpop.f32.mrf.mxu0  ;;  %v14250_v25 = vpop.eup %14249  ;;  %v875_v52 = vmul.f32 %v14248_v50, %v15408_v38  ;;  %v11585_v26 = vld [vmem:[%s20696_s3 + $0x4] sm:$0xf] }
 0x227   :  { %v1186_v7 = vpop.f32.mrf.mxu1  ;;  %14251 = vrcp.f32 %v864_v23  ;;  %v16011_v38 = vrot.slane %v11585_v26, %v15322_v10  ;;  %v16014_v46 = vrot.slane %v11585_v26, %v15324_v11  ;;  %v16021_v6 = vrot.slane %v11585_v26, %v15333_v21  ;;  %v21230_v21 = vld [vmem:[#allocation50_spill] sm:$0xff]  ;;  %v21231_v11 = vld [vmem:[#allocation51_spill] sm:$0xff]  ;;  %v21232_v10 = vld [vmem:[#allocation52_spill] sm:$0xff] }
 0x228   :  { %v876_v55 = vmul.f32 %v14250_v25, %v11456_v29 }
 0x22a   :  { %v16000_v24 = vadd.f32 %v876_v55, %v875_v52 }
 0x22c   :  { %14253 = vtanh.f32 %v16000_v24 }
 0x234   :  { %v14252_v39 = vpop.eup %14251 }
 0x239   :  { %v14254_v32 = vpop.eup %14253 }
 0x23a   :  { %v879_v36 = vmul.f32 %v14254_v32, %v14252_v39 }
 0x23c   :  { %v16003_v45 = vpack.c.bf16 %v879_v36, %v879_v36 }
 0x23e   :  { %1526 = vmatmul.mubr.bf16.vlgmr.msra.gmra.mxu0 %v16003_v45  ;;  %1567 = vmatmul.mubr.bf16.vlgmr.msra.gmra.mxu1 %v16003_v45 }
 0x23f   :  { %1612 = vmatpush1.bf16.msra.mxu0 %v15414_v48  ;;  %1653 = vmatpush1.bf16.msra.mxu1 %v15419_v51 }
 0x240   :  { %v1382_v40 = vpop.f32.mrf.mxu0  ;;  %v1423_v49 = vpop.f32.mrf.mxu1  ;;  %1613 = vmatprep.subr.bf16.mxu0 %v15426_v57  ;;  %1654 = vmatprep.subr.bf16.mxu1 %v15431_v58 }
 0x241   :  { %v1383_v50 = vadd.f32 %v1382_v40, %v1140_v31  ;;  %v1424_v29 = vadd.f32 %v1423_v49, %v1181_v35  ;;  %1643 = vmatprep.mubr.bf16.mxu0 %v21154_v53  ;;  %1684 = vmatprep.mubr.bf16.mxu1 %v21154_v53 }
 0x242   :  { %v1384_v7 = vpop.f32.mrf.mxu0  ;;  %v1425_v25 = vpop.f32.mrf.mxu1 }
 0x243   :  { %v1453_v23 = vadd.f32 %v16011_v38, %v1383_v50  ;;  %v1455_v55 = vadd.f32 %v16014_v46, %v1424_v29  ;;  %v1385_v52 = vadd.f32 %v1384_v7, %v1142_v41  ;;  %1614 = vmatpush1.bf16.msra.mxu0 %v15440_v13  ;;  %1655 = vmatpush1.bf16.msra.mxu1 %v15445_v14 }
 0x244   :  { %v1386_v39 = vpop.f32.mrf.mxu0  ;;  %v1427_v32 = vpop.f32.mrf.mxu1  ;;  %1615 = vmatprep.subr.bf16.mxu0 %v15452_v15  ;;  %1656 = vmatprep.subr.bf16.mxu1 %v15457_v17  ;;  %v1426_v41 = vadd.f32 %v1425_v25, %v15997_v42  ;;  %v16041_v29 = vrot.slane %v11585_v26, %v15335_v22  ;;  %v21229_v22 = vld [vmem:[#allocation49_spill] sm:$0xff] }
 0x245   :  { %v11586_v31 = vmul.f32 -1.442695, %v1453_v23  ;;  %v11588_v35 = vmul.f32 -1.442695, %v1455_v55  ;;  %v1454_v36 = vadd.f32 %v16021_v6, %v1385_v52 }
 0x246   :  { %v1387_v40 = vpop.f32.mrf.mxu0  ;;  %v1428_v49 = vpop.f32.mrf.mxu1  ;;  %21213 = vst [vmem:[#allocation92_spill] sm:$0xff] %v16041_v29  ;;  %v1456_v7 = vadd.f32 %v16041_v29, %v1426_v41 }
 0x247   :  { %14255 = vpow2.f32 %v11586_v31  ;;  %v11587_v50 = vmul.f32 -1.442695, %v1454_v36  ;;  %1616 = vmatpush1.bf16.msra.mxu0 %v15466_v18  ;;  %1657 = vmatpush1.bf16.msra.mxu1 %v15471_v61 }
 0x248   :  { %14257 = vpow2.f32 %v11588_v35  ;;  %1617 = vmatprep.subr.bf16.mxu0 %v15478_v62  ;;  %1658 = vmatprep.subr.bf16.mxu1 %v15483_v2  ;;  %v11589_v26 = vmul.f32 -1.442695, %v1456_v7 }
 0x249   :  { %14259 = vpow2.f32 %v11587_v50 }
 0x24b   :  { %1618 = vmatpush1.bf16.msra.mxu0 %v15490_v3  ;;  %1659 = vmatpush1.bf16.msra.mxu1 %v15495_v12 }
 0x24c   :  { %1619 = vmatprep.subr.bf16.mxu0 %v15502_v19  ;;  %1660 = vmatprep.subr.bf16.mxu1 %v15507_v20 }
 0x24f   :  { %1620 = vmatpush1.bf16.msra.mxu0 %v15514_v27  ;;  %1661 = vmatpush1.bf16.msra.mxu1 %v15519_v28 }
 0x250   :  { %1621 = vmatprep.subr.bf16.mxu0 %v15526_v33  ;;  %1662 = vmatprep.subr.bf16.mxu1 %v15531_v34 }
 0x253   :  { %1622 = vmatpush1.bf16.msra.mxu0 %v15538_v16  ;;  %1663 = vmatpush1.bf16.msra.mxu1 %v15543_v37 }
 0x254   :  { %v14256_v23 = vpop.eup %14255  ;;  %1623 = vmatprep.subr.bf16.mxu0 %v15550_v43  ;;  %1664 = vmatprep.subr.bf16.mxu1 %v15555_v44 }
 0x255   :  { %v14258_v42 = vpop.eup %14257  ;;  %v1469_v39 = vadd.f32 1.0, %v14256_v23 }
 0x256   :  { %v14260_v25 = vpop.eup %14259  ;;  %v1471_v55 = vadd.f32 1.0, %v14258_v42 }
 0x257   :  { %v1470_v52 = vadd.f32 1.0, %v14260_v25  ;;  %1624 = vmatpush1.bf16.msra.mxu0 %v15562_v47  ;;  %1665 = vmatpush1.bf16.msra.mxu1 %v15567_v1 }
 0x258   :  { %14261 = vrcp.f32 %v1471_v55  ;;  %1625 = vmatprep.subr.bf16.mxu0 %v15574_v5  ;;  %1666 = vmatprep.subr.bf16.mxu1 %v15579_v4 }
 0x259   :  { %14263 = vpow2.f32 %v11589_v26 }
 0x25a   :  { %14265 = vrcp.f32 %v1470_v52  ;;  %v21214_v52 = vld [vmem:[#allocation34_spill] sm:$0xff] }
 0x25b   :  { %1626 = vmatpush1.bf16.msra.mxu0 %v15586_v9  ;;  %14267 = vrcp.f32 %v1469_v39  ;;  %1667 = vmatpush1.bf16.msra.mxu1 %v15591_v8  ;;  %v21215_v39 = vld [vmem:[#allocation35_spill] sm:$0xff] }
 0x25c   :  { %1693 = vmatprep.subr.bf16.mxu0 %v15598_v0  ;;  %1734 = vmatprep.subr.bf16.mxu1 %v15603_v63 }
 0x265   :  { %v14262_v32 = vpop.eup %14261 }
 0x266   :  { %v14264_v31 = vpop.eup %14263  ;;  %v1481_v35 = vmul.f32 2.0, %v14262_v32  ;;  %v21216_v32 = vld [vmem:[#allocation36_spill] sm:$0xff] }
 0x267   :  { %v14266_v36 = vpop.eup %14265  ;;  %v1472_v50 = vadd.f32 1.0, %v14264_v31  ;;  %v21217_v31 = vld [vmem:[#allocation37_spill] sm:$0xff] }
 0x268   :  { %v11590_v40 = vadd.f32 -1.0, %v1481_v35  ;;  %v14268_v49 = vpop.eup %14267  ;;  %v1483_v7 = vmul.f32 0.0, %v14266_v36  ;;  %v21218_v35 = vld [vmem:[#allocation38_spill] sm:$0xff]  ;;  %v21219_v36 = vld [vmem:[#allocation39_spill] sm:$0xff] }
 0x269   :  { %14269 = vrcp.f32 %v1472_v50  ;;  %v21222_v50 = vld [vmem:[#allocation42_spill] sm:$0xff] }
 0x26a   :  { %v1484_v41 = vmul.f32 %v14268_v49, %v11590_v40  ;;  %v21220_v40 = vld [vmem:[#allocation40_spill] sm:$0xff]  ;;  %v21221_v49 = vld [vmem:[#allocation41_spill] sm:$0xff] }
 0x26c   :  { %v16061_v23 = vadd.f32 %v1484_v41, %v1483_v7  ;;  %v21223_v41 = vld [vmem:[#allocation43_spill] sm:$0xff]  ;;  %v21224_v7 = vld [vmem:[#allocation44_spill] sm:$0xff] }
 0x26e   :  { %14271 = vtanh.f32 %v16061_v23 }
 0x276   :  { %v14270_v42 = vpop.eup %14269 }
 0x27b   :  { %v14272_v26 = vpop.eup %14271 }
 0x27c   :  { %v1487_v25 = vmul.f32 %v14272_v26, %v14270_v42  ;;  %v21225_v42 = vld [vmem:[#allocation45_spill] sm:$0xff]  ;;  %v21226_v26 = vld [vmem:[#allocation46_spill] sm:$0xff] }
 0x27e   :  { %v1610_v55 = vpack.c.bf16 %v1487_v25, %v1487_v25  ;;  %v21227_v25 = vld [vmem:[#allocation47_spill] sm:$0xff] }
 0x280   :  { %1644 = vmatmul.mubr.bf16.vlgmr.msra.gmra.mxu0 %v1610_v55  ;;  %1685 = vmatmul.mubr.bf16.vlgmr.msra.gmra.mxu1 %v1610_v55  ;;  %v21228_v55 = vld [vmem:[#allocation48_spill] sm:$0xff] }
 0x281   :  { %1694 = vmatpush1.bf16.msra.mxu0 %v15610_v60  ;;  %1735 = vmatpush1.bf16.msra.mxu1 %v15615_v59 }
 0x282   :  { %1695 = vmatprep.subr.bf16.mxu0 %v15622_v56  ;;  %1736 = vmatprep.subr.bf16.mxu1 %v15627_v54 }
 0x283   :  { %1725 = vmatprep.mubr.bf16.mxu0 %v21154_v53  ;;  %1766 = vmatprep.mubr.bf16.mxu1 %v21154_v53 }
 0x285   :  { %1696 = vmatpush1.bf16.msra.mxu0 %v21214_v52  ;;  %1737 = vmatpush1.bf16.msra.mxu1 %v21215_v39 }
 0x286   :  { %1697 = vmatprep.subr.bf16.mxu0 %v21216_v32  ;;  %1738 = vmatprep.subr.bf16.mxu1 %v21217_v31 }
 0x289   :  { %1698 = vmatpush1.bf16.msra.mxu0 %v21218_v35  ;;  %1739 = vmatpush1.bf16.msra.mxu1 %v21219_v36 }
 0x28a   :  { %1699 = vmatprep.subr.bf16.mxu0 %v21220_v40  ;;  %1740 = vmatprep.subr.bf16.mxu1 %v21221_v49 }
 0x28d   :  { %1700 = vmatpush1.bf16.msra.mxu0 %v21222_v50  ;;  %1741 = vmatpush1.bf16.msra.mxu1 %v21223_v41  ;;  %v21234_v41 = vld [vmem:[#allocation54_spill] sm:$0xff]  ;;  %v21276_v50 = vld [vmem:[#allocation12_spill] sm:$0xff] }
 0x28e   :  { %1701 = vmatprep.subr.bf16.mxu0 %v21224_v7  ;;  %1742 = vmatprep.subr.bf16.mxu1 %v21225_v42  ;;  %v21235_v7 = vld [vmem:[#allocation55_spill] sm:$0xff]  ;;  %v21236_v42 = vld [vmem:[#allocation56_spill] sm:$0xff] }
 0x291   :  { %1702 = vmatpush1.bf16.msra.mxu0 %v21226_v26  ;;  %1743 = vmatpush1.bf16.msra.mxu1 %v21227_v25  ;;  %v21237_v26 = vld [vmem:[#allocation57_spill] sm:$0xff]  ;;  %v21238_v25 = vld [vmem:[#allocation58_spill] sm:$0xff] }
 0x292   :  { %1703 = vmatprep.subr.bf16.mxu0 %v21228_v55  ;;  %1744 = vmatprep.subr.bf16.mxu1 %v21229_v22  ;;  %v21239_v55 = vld [vmem:[#allocation59_spill] sm:$0xff]  ;;  %v21240_v22 = vld [vmem:[#allocation60_spill] sm:$0xff] }
 0x295   :  { %1704 = vmatpush1.bf16.msra.mxu0 %v21230_v21  ;;  %1745 = vmatpush1.bf16.msra.mxu1 %v21231_v11  ;;  %v21241_v21 = vld [vmem:[#allocation61_spill] sm:$0xff] }
 0x296   :  { %1705 = vmatprep.subr.bf16.mxu0 %v21232_v10  ;;  %1746 = vmatprep.subr.bf16.mxu1 %v21233_v30  ;;  %v21242_v30 = vld [vmem:[#allocation62_spill] sm:$0xff]  ;;  %v21256_v10 = vld [vmem:[#allocation76_spill] sm:$0xff] }
 0x299   :  { %1706 = vmatpush1.bf16.msra.mxu0 %v21234_v41  ;;  %1747 = vmatpush1.bf16.msra.mxu1 %v21235_v7  ;;  %v21243_v41 = vld [vmem:[#allocation63_spill] sm:$0xff]  ;;  %v21244_v7 = vld [vmem:[#allocation64_spill] sm:$0xff] }
 0x29a   :  { %1707 = vmatprep.subr.bf16.mxu0 %v21236_v42  ;;  %1748 = vmatprep.subr.bf16.mxu1 %v21237_v26  ;;  %v21245_v42 = vld [vmem:[#allocation65_spill] sm:$0xff]  ;;  %v21255_v26 = vld [vmem:[#allocation75_spill] sm:$0xff] }
 0x29d   :  { %1708 = vmatpush1.bf16.msra.mxu0 %v21238_v25  ;;  %1749 = vmatpush1.bf16.msra.mxu1 %v21239_v55  ;;  %v21246_v55 = vld [vmem:[#allocation66_spill] sm:$0xff]  ;;  %v21249_v25 = vld [vmem:[#allocation69_spill] sm:$0xff] }
 0x29e   :  { %1815 = vmatprep.subr.bf16.mxu0 %v21240_v22  ;;  %1856 = vmatprep.subr.bf16.mxu1 %v21241_v21  ;;  %v21247_v22 = vld [vmem:[#allocation67_spill] sm:$0xff]  ;;  %v21248_v21 = vld [vmem:[#allocation68_spill] sm:$0xff] }
 0x2a0   :  { %1726 = vmatmul.mubr.bf16.vlgmr.msra.gmra.mxu0 %v16003_v45  ;;  %1767 = vmatmul.mubr.bf16.vlgmr.msra.gmra.mxu1 %v16003_v45  ;;  %v21250_v45 = vld [vmem:[#allocation70_spill] sm:$0xff] }
 0x2a1   :  { %1816 = vmatpush1.bf16.msra.mxu0 %v21242_v30  ;;  %1857 = vmatpush1.bf16.msra.mxu1 %v21243_v41  ;;  %v21251_v30 = vld [vmem:[#allocation71_spill] sm:$0xff]  ;;  %v21252_v41 = vld [vmem:[#allocation72_spill] sm:$0xff] }
 0x2a2   :  { %1817 = vmatprep.subr.bf16.mxu0 %v21244_v7  ;;  %1858 = vmatprep.subr.bf16.mxu1 %v21245_v42  ;;  %v21253_v7 = vld [vmem:[#allocation73_spill] sm:$0xff]  ;;  %v21254_v42 = vld [vmem:[#allocation74_spill] sm:$0xff] }
 0x2a3   :  { %1847 = vmatprep.mubr.bf16.mxu0 %v21154_v53  ;;  %1888 = vmatprep.mubr.bf16.mxu1 %v21154_v53 }
 0x2a5   :  { %1818 = vmatpush1.bf16.msra.mxu0 %v21246_v55  ;;  %1859 = vmatpush1.bf16.msra.mxu1 %v21247_v22  ;;  %v21257_v55 = vld [vmem:[#allocation77_spill] sm:$0xff]  ;;  %v21258_v22 = vld [vmem:[#allocation78_spill] sm:$0xff] }
 0x2a6   :  { %1819 = vmatprep.subr.bf16.mxu0 %v21248_v21  ;;  %1860 = vmatprep.subr.bf16.mxu1 %v21249_v25  ;;  %v21259_v21 = vld [vmem:[#allocation79_spill] sm:$0xff]  ;;  %v21260_v25 = vld [vmem:[#allocation80_spill] sm:$0xff] }
 0x2a9   :  { %1820 = vmatpush1.bf16.msra.mxu0 %v21250_v45  ;;  %1861 = vmatpush1.bf16.msra.mxu1 %v21251_v30  ;;  %v21261_v45 = vld [vmem:[#allocation81_spill] sm:$0xff]  ;;  %v21262_v30 = vld [vmem:[#allocation82_spill] sm:$0xff] }
 0x2aa   :  { %1821 = vmatprep.subr.bf16.mxu0 %v21252_v41  ;;  %1862 = vmatprep.subr.bf16.mxu1 %v21253_v7  ;;  %v21263_v41 = vld [vmem:[#allocation83_spill] sm:$0xff]  ;;  %v21264_v7 = vld [vmem:[#allocation84_spill] sm:$0xff] }
 0x2ad   :  { %1822 = vmatpush1.bf16.msra.mxu0 %v21254_v42  ;;  %1863 = vmatpush1.bf16.msra.mxu1 %v21255_v26  ;;  %v21265_v42 = vld [vmem:[#allocation85_spill] sm:$0xff]  ;;  %v21266_v26 = vld [vmem:[#allocation86_spill] sm:$0xff] }
 0x2ae   :  { %1823 = vmatprep.subr.bf16.mxu0 %v21256_v10  ;;  %1864 = vmatprep.subr.bf16.mxu1 %v21257_v55  ;;  %v21267_v10 = vld [vmem:[#allocation87_spill] sm:$0xff]  ;;  %v21268_v55 = vld [vmem:[#allocation88_spill] sm:$0xff] }
 0x2b1   :  { %1824 = vmatpush1.bf16.msra.mxu0 %v21258_v22  ;;  %1865 = vmatpush1.bf16.msra.mxu1 %v21259_v21  ;;  %v21269_v22 = vld [vmem:[#allocation89_spill] sm:$0xff]  ;;  %v21270_v21 = vld [vmem:[#allocation90_spill] sm:$0xff] }
 0x2b2   :  { %1825 = vmatprep.subr.bf16.mxu0 %v21260_v25  ;;  %1866 = vmatprep.subr.bf16.mxu1 %v21261_v45  ;;  %v21271_v25 = vld [vmem:[#allocation91_spill] sm:$0xff] }
 0x2b5   :  { %1826 = vmatpush1.bf16.msra.mxu0 %v21262_v30  ;;  %1867 = vmatpush1.bf16.msra.mxu1 %v21263_v41  ;;  %v16135_v41 = vld [vmem:[%s20694_s1 + $0x5e4] ss:$16 sps:$4 sm:$0xff]  }
 0x2b6   :  { %1827 = vmatprep.subr.bf16.mxu0 %v21264_v7  ;;  %1868 = vmatprep.subr.bf16.mxu1 %v21265_v42  ;;  %21272 = vst [vmem:[#allocation93_spill] sm:$0xff] %v16135_v41  ;;  %v21275_v42 = vld [vmem:[#allocation11_spill] sm:$0xff] }
 0x2b9   :  { %1828 = vmatpush1.bf16.msra.mxu0 %v21266_v26  ;;  %1869 = vmatpush1.bf16.msra.mxu1 %v21267_v10  ;;  %v16141_v26 = vld [vmem:[%s20694_s1 + $0x5ec] ss:$16 sps:$4 sm:$0xff]   ;;  %v21274_v10 = vld [vmem:[#allocation10_spill] sm:$0xff] }
 0x2ba   :  { %1829 = vmatprep.subr.bf16.mxu0 %v21268_v55  ;;  %1870 = vmatprep.subr.bf16.mxu1 %v21269_v22  ;;  %21273 = vst [vmem:[#allocation94_spill] sm:$0xff] %v16141_v26 }
 0x2bd   :  { %1830 = vmatpush1.bf16.msra.mxu0 %v21270_v21  ;;  %1871 = vmatpush1.bf16.msra.mxu1 %v21271_v25 }
 0x2be   :  { %1933 = vmatprep.subr.bf16.mxu0 %v16135_v41  ;;  %1974 = vmatprep.subr.bf16.mxu1 %v16141_v26  ;;  %v21277_v26 = vld [vmem:[#allocation13_spill] sm:$0xff] }
 0x2fe   :  { %v1527_v55 = vpop.f32.mrf.mxu0  ;;  %v1568_v22 = vpop.f32.mrf.mxu1 }
 0x2ff   :  { %v1575_v21 = vadd.f32 %v1527_v55, %v21274_v10  ;;  %v1577_v25 = vadd.f32 %v1568_v22, %v21275_v42 }
 0x300   :  { %v1529_v7 = vpop.f32.mrf.mxu0  ;;  %v1570_v30 = vpop.f32.mrf.mxu1 }
 0x301   :  { %v11591_v45 = vmul.f32 -1.442695, %v1575_v21  ;;  %v11593_v11 = vmul.f32 -1.442695, %v1577_v25  ;;  %v1576_v49 = vadd.f32 %v1529_v7, %v21276_v50  ;;  %v1578_v32 = vadd.f32 %v1570_v30, %v21277_v26 }
 0x302   :  { %v1531_v41 = vpop.f32.mrf.mxu0  ;;  %v1572_v40 = vpop.f32.mrf.mxu1 }
 0x303   :  { %14273 = vpow2.f32 %v11591_v45  ;;  %v11592_v36 = vmul.f32 -1.442695, %v1576_v49  ;;  %v11594_v55 = vmul.f32 -1.442695, %v1578_v32 }
 0x304   :  { %14275 = vpow2.f32 %v11593_v11  ;;  %v1532_v35 = vpop.f32.mrf.mxu0  ;;  %v1573_v31 = vpop.f32.mrf.mxu1 }
 0x305   :  { %14277 = vpow2.f32 %v11592_v36 }
 0x310   :  { %v14274_v39 = vpop.eup %14273 }
 0x311   :  { %v14276_v10 = vpop.eup %14275  ;;  %v1591_v21 = vadd.f32 1.0, %v14274_v39 }
 0x312   :  { %v14278_v22 = vpop.eup %14277  ;;  %v1593_v42 = vadd.f32 1.0, %v14276_v10 }
 0x313   :  { %v1592_v52 = vadd.f32 1.0, %v14278_v22 }
 0x314   :  { %14279 = vrcp.f32 %v1593_v42 }
 0x315   :  { %14281 = vpow2.f32 %v11594_v55 }
 0x316   :  { %14283 = vrcp.f32 %v1592_v52 }
 0x317   :  { %14285 = vrcp.f32 %v1591_v21 }
 0x321   :  { %v14280_v40 = vpop.eup %14279 }
 0x322   :  { %v14282_v50 = vpop.eup %14281  ;;  %v1603_v49 = vmul.f32 2.0, %v14280_v40 }
 0x323   :  { %v14284_v11 = vpop.eup %14283  ;;  %v1594_v36 = vadd.f32 1.0, %v14282_v50 }
 0x324   :  { %v11595_v35 = vadd.f32 -1.0, %v1603_v49  ;;  %v14286_v31 = vpop.eup %14285  ;;  %v1605_v30 = vmul.f32 %v14284_v11, %v16000_v24 }
 0x325   :  { %14287 = vrcp.f32 %v1594_v36 }
 0x326   :  { %v1606_v41 = vmul.f32 %v14286_v31, %v11595_v35 }
 0x328   :  { %v16149_v7 = vadd.f32 %v1606_v41, %v1605_v30  ;;  %v21279_v30 = vld [vmem:[#allocation35_spill] sm:$0xff] }
 0x32a   :  { %14289 = vtanh.f32 %v16149_v7 }
 0x332   :  { %v14288_v39 = vpop.eup %14287 }
 0x337   :  { %v14290_v32 = vpop.eup %14289 }
 0x338   :  { %v1609_v26 = vmul.f32 %v14290_v32, %v14288_v39  ;;  %v21280_v39 = vld [vmem:[#allocation36_spill] sm:$0xff]  ;;  %v21281_v32 = vld [vmem:[#allocation37_spill] sm:$0xff] }
 0x33a   :  { %v16152_v52 = vpack.c.bf16 %v1609_v26, %v1609_v26  ;;  %v21282_v26 = vld [vmem:[#allocation38_spill] sm:$0xff] }
 0x33c   :  { %1848 = vmatmul.mubr.bf16.vlgmr.msra.gmra.mxu0 %v16152_v52  ;;  %1889 = vmatmul.mubr.bf16.vlgmr.msra.gmra.mxu1 %v16152_v52 }
 0x33d   :  { %1934 = vmatpush1.bf16.msra.mxu0 %v15414_v48  ;;  %1975 = vmatpush1.bf16.msra.mxu1 %v15419_v51 }
 0x33e   :  { %1935 = vmatprep.subr.bf16.mxu0 %v15426_v57  ;;  %1976 = vmatprep.subr.bf16.mxu1 %v15431_v58 }
 0x33f   :  { %1965 = vmatprep.mubr.bf16.mxu0 %v21154_v53  ;;  %2006 = vmatprep.mubr.bf16.mxu1 %v21154_v53 }
 0x340   :  { %v1645_v24 = vpop.f32.mrf.mxu0  ;;  %v1686_v25 = vpop.f32.mrf.mxu1 }
 0x341   :  { %1936 = vmatpush1.bf16.msra.mxu0 %v15440_v13  ;;  %1977 = vmatpush1.bf16.msra.mxu1 %v15445_v14 }
 0x342   :  { %v1647_v45 = vpop.f32.mrf.mxu0  ;;  %v1688_v10 = vpop.f32.mrf.mxu1  ;;  %1937 = vmatprep.subr.bf16.mxu0 %v15452_v15  ;;  %1978 = vmatprep.subr.bf16.mxu1 %v15457_v17 }
 0x344   :  { %v1649_v48 = vpop.f32.mrf.mxu0  ;;  %v1690_v51 = vpop.f32.mrf.mxu1 }
 0x345   :  { %1938 = vmatpush1.bf16.msra.mxu0 %v15466_v18  ;;  %1979 = vmatpush1.bf16.msra.mxu1 %v15471_v61  ;;  %v21291_v48 = vld [vmem:[#allocation47_spill] sm:$0xff]  ;;  %v21292_v51 = vld [vmem:[#allocation48_spill] sm:$0xff] }
 0x346   :  { %v1650_v57 = vpop.f32.mrf.mxu0  ;;  %v1691_v58 = vpop.f32.mrf.mxu1  ;;  %1939 = vmatprep.subr.bf16.mxu0 %v15478_v62  ;;  %1980 = vmatprep.subr.bf16.mxu1 %v15483_v2 }
 0x347   :  { %v21293_v57 = vld [vmem:[#allocation49_spill] sm:$0xff]  ;;  %v21294_v58 = vld [vmem:[#allocation50_spill] sm:$0xff] }
 0x349   :  { %1940 = vmatpush1.bf16.msra.mxu0 %v15490_v3  ;;  %1981 = vmatpush1.bf16.msra.mxu1 %v15495_v12 }
 0x34a   :  { %1941 = vmatprep.subr.bf16.mxu0 %v15502_v19  ;;  %1982 = vmatprep.subr.bf16.mxu1 %v15507_v20 }
 0x34d   :  { %1942 = vmatpush1.bf16.msra.mxu0 %v15514_v27  ;;  %1983 = vmatpush1.bf16.msra.mxu1 %v15519_v28 }
 0x34e   :  { %1943 = vmatprep.subr.bf16.mxu0 %v15526_v33  ;;  %1984 = vmatprep.subr.bf16.mxu1 %v15531_v34 }
 0x351   :  { %1944 = vmatpush1.bf16.msra.mxu0 %v15538_v16  ;;  %1985 = vmatpush1.bf16.msra.mxu1 %v15543_v37 }
 0x352   :  { %1945 = vmatprep.subr.bf16.mxu0 %v15550_v43  ;;  %1986 = vmatprep.subr.bf16.mxu1 %v15555_v44 }
 0x355   :  { %1946 = vmatpush1.bf16.msra.mxu0 %v15562_v47  ;;  %1987 = vmatpush1.bf16.msra.mxu1 %v15567_v1 }
 0x356   :  { %1947 = vmatprep.subr.bf16.mxu0 %v15574_v5  ;;  %1988 = vmatprep.subr.bf16.mxu1 %v15579_v4 }
 0x359   :  { %1948 = vmatpush1.bf16.msra.mxu0 %v15586_v9  ;;  %1989 = vmatpush1.bf16.msra.mxu1 %v15591_v8 }
 0x35a   :  { %2015 = vmatprep.subr.bf16.mxu0 %v15598_v0  ;;  %2056 = vmatprep.subr.bf16.mxu1 %v15603_v63 }
 0x360   :  { %v1727_v13 = vpop.f32.mrf.mxu0  ;;  %v1768_v14 = vpop.f32.mrf.mxu1 }
 0x361   :  { %v1728_v15 = vadd.f32 %v1727_v13, %v1645_v24  ;;  %v1769_v17 = vadd.f32 %v1768_v14, %v1686_v25  ;;  %v21287_v24 = vld [vmem:[#allocation43_spill] sm:$0xff]  ;;  %v21288_v25 = vld [vmem:[#allocation44_spill] sm:$0xff] }
 0x362   :  { %v1729_v18 = vpop.f32.mrf.mxu0  ;;  %v1770_v61 = vpop.f32.mrf.mxu1  ;;  %v21295_v13 = vld [vmem:[#allocation51_spill] sm:$0xff]  ;;  %v21296_v14 = vld [vmem:[#allocation52_spill] sm:$0xff] }
 0x363   :  { %v1775_v1 = vadd.f32 %v1728_v15, %v16011_v38  ;;  %v1777_v5 = vadd.f32 %v1769_v17, %v16014_v46  ;;  %v1730_v62 = vadd.f32 %v1729_v18, %v1647_v45  ;;  %v1771_v19 = vadd.f32 %v1770_v61, %v1688_v10  ;;  %v21289_v45 = vld [vmem:[#allocation45_spill] sm:$0xff]  ;;  %v21290_v10 = vld [vmem:[#allocation46_spill] sm:$0xff]  ;;  %v21299_v18 = vld [vmem:[#allocation55_spill] sm:$0xff] }
 0x364   :  { %v1731_v4 = vpop.f32.mrf.mxu0  ;;  %v1772_v2 = vpop.f32.mrf.mxu1  ;;  %v21297_v15 = vld [vmem:[#allocation53_spill] sm:$0xff]  ;;  %v21298_v17 = vld [vmem:[#allocation54_spill] sm:$0xff]  ;;  %v21300_v61 = vld [vmem:[#allocation56_spill] sm:$0xff] }
 0x365   :  { %v11596_v9 = vmul.f32 -1.442695, %v1775_v1  ;;  %v11598_v3 = vmul.f32 -1.442695, %v1777_v5  ;;  %v1776_v8 = vadd.f32 %v1730_v62, %v16021_v6  ;;  %v1778_v20 = vadd.f32 %v1771_v19, %v16041_v29  ;;  %v21301_v1 = vld [vmem:[#allocation57_spill] sm:$0xff]  ;;  %v21302_v5 = vld [vmem:[#allocation58_spill] sm:$0xff] }
 0x366   :  { %v1732_v0 = vpop.f32.mrf.mxu0  ;;  %v1773_v12 = vpop.f32.mrf.mxu1  ;;  %v21303_v62 = vld [vmem:[#allocation59_spill] sm:$0xff]  ;;  %v21304_v4 = vld [vmem:[#allocation60_spill] sm:$0xff]  ;;  %v21305_v2 = vld [vmem:[#allocation61_spill] sm:$0xff] }
 0x367   :  { %14291 = vpow2.f32 %v11596_v9  ;;  %v11597_v63 = vmul.f32 -1.442695, %v1776_v8  ;;  %v11599_v33 = vmul.f32 -1.442695, %v1778_v20  ;;  %v21306_v9 = vld [vmem:[#allocation62_spill] sm:$0xff]  ;;  %v21308_v8 = vld [vmem:[#allocation64_spill] sm:$0xff] }
 0x368   :  { %14293 = vpow2.f32 %v11598_v3  ;;  %v21307_v3 = vld [vmem:[#allocation63_spill] sm:$0xff]  ;;  %v21309_v0 = vld [vmem:[#allocation65_spill] sm:$0xff]  ;;  %v21310_v12 = vld [vmem:[#allocation66_spill] sm:$0xff] }
 0x369   :  { %14295 = vpow2.f32 %v11597_v63  ;;  %v21311_v63 = vld [vmem:[#allocation67_spill] sm:$0xff]  ;;  %v21312_v19 = vld [vmem:[#allocation68_spill] sm:$0xff]  ;;  %v21313_v20 = vld [vmem:[#allocation69_spill] sm:$0xff] }
 0x374   :  { %v14292_v27 = vpop.eup %14291 }
 0x375   :  { %v14294_v28 = vpop.eup %14293  ;;  %v1791_v43 = vadd.f32 1.0, %v14292_v27  ;;  %v21315_v27 = vld [vmem:[#allocation71_spill] sm:$0xff] }
 0x376   :  { %v14296_v34 = vpop.eup %14295  ;;  %v1793_v16 = vadd.f32 1.0, %v14294_v28  ;;  %v21316_v28 = vld [vmem:[#allocation72_spill] sm:$0xff] }
 0x377   :  { %v1792_v37 = vadd.f32 1.0, %v14296_v34  ;;  %v21318_v34 = vld [vmem:[#allocation74_spill] sm:$0xff] }
 0x378   :  { %14297 = vrcp.f32 %v1793_v16  ;;  %v21319_v16 = vld [vmem:[#allocation75_spill] sm:$0xff] }
 0x379   :  { %14299 = vpow2.f32 %v11599_v33  ;;  %v21317_v33 = vld [vmem:[#allocation73_spill] sm:$0xff] }
 0x37a   :  { %14301 = vrcp.f32 %v1792_v37  ;;  %v21320_v37 = vld [vmem:[#allocation76_spill] sm:$0xff] }
 0x37b   :  { %14303 = vrcp.f32 %v1791_v43  ;;  %v21321_v43 = vld [vmem:[#allocation77_spill] sm:$0xff] }
 0x385   :  { %v14298_v44 = vpop.eup %14297 }
 0x386   :  { %v14300_v47 = vpop.eup %14299  ;;  %v1803_v55 = vmul.f32 2.0, %v14298_v44  ;;  %v21322_v44 = vld [vmem:[#allocation78_spill] sm:$0xff] }
 0x387   :  { %v14302_v22 = vpop.eup %14301  ;;  %v1794_v40 = vadd.f32 1.0, %v14300_v47  ;;  %v21323_v47 = vld [vmem:[#allocation79_spill] sm:$0xff] }
 0x388   :  { %v11600_v42 = vadd.f32 -1.0, %v1803_v55  ;;  %v14304_v21 = vpop.eup %14303  ;;  %v1805_v49 = vmul.f32 %v14302_v22, %v16061_v23  ;;  %v21278_v23 = vld [vmem:[#allocation34_spill] sm:$0xff]  ;;  %v21324_v55 = vld [vmem:[#allocation80_spill] sm:$0xff]  ;;  %v21325_v22 = vld [vmem:[#allocation81_spill] sm:$0xff] }
 0x389   :  { %14305 = vrcp.f32 %v1794_v40  ;;  %v21328_v40 = vld [vmem:[#allocation84_spill] sm:$0xff] }
 0x38a   :  { %v1806_v50 = vmul.f32 %v14304_v21, %v11600_v42  ;;  %v21326_v42 = vld [vmem:[#allocation82_spill] sm:$0xff]  ;;  %v21327_v21 = vld [vmem:[#allocation83_spill] sm:$0xff] }
 0x38c   :  { %v16195_v11 = vadd.f32 %v1806_v50, %v1805_v49  ;;  %v21329_v50 = vld [vmem:[#allocation85_spill] sm:$0xff]  ;;  %v21330_v49 = vld [vmem:[#allocation86_spill] sm:$0xff] }
 0x38e   :  { %14307 = vtanh.f32 %v16195_v11 }
 0x396   :  { %v14306_v35 = vpop.eup %14305 }
 0x39b   :  { %v14308_v31 = vpop.eup %14307 }
 0x39c   :  { %v1809_v36 = vmul.f32 %v14308_v31, %v14306_v35  ;;  %v21331_v35 = vld [vmem:[#allocation87_spill] sm:$0xff]  ;;  %v21332_v31 = vld [vmem:[#allocation88_spill] sm:$0xff] }
 0x39e   :  { %v1932_v41 = vpack.c.bf16 %v1809_v36, %v1809_v36  ;;  %v21333_v36 = vld [vmem:[#allocation89_spill] sm:$0xff] }
 0x3a0   :  { %1966 = vmatmul.mubr.bf16.vlgmr.msra.gmra.mxu0 %v1932_v41  ;;  %2007 = vmatmul.mubr.bf16.vlgmr.msra.gmra.mxu1 %v1932_v41  ;;  %v21334_v41 = vld [vmem:[#allocation90_spill] sm:$0xff] }
 0x3a1   :  { %2016 = vmatpush1.bf16.msra.mxu0 %v15610_v60  ;;  %2057 = vmatpush1.bf16.msra.mxu1 %v15615_v59  ;;  %v21283_v60 = vld [vmem:[#allocation39_spill] sm:$0xff]  ;;  %v21284_v59 = vld [vmem:[#allocation40_spill] sm:$0xff] }
 0x3a2   :  { %2017 = vmatprep.subr.bf16.mxu0 %v15622_v56  ;;  %2058 = vmatprep.subr.bf16.mxu1 %v15627_v54  ;;  %v21285_v56 = vld [vmem:[#allocation41_spill] sm:$0xff]  ;;  %v21286_v54 = vld [vmem:[#allocation42_spill] sm:$0xff] }
 0x3a3   :  { %2047 = vmatprep.mubr.bf16.mxu0 %v21154_v53  ;;  %2088 = vmatprep.mubr.bf16.mxu1 %v21154_v53 }
 0x3a5   :  { %2018 = vmatpush1.bf16.msra.mxu0 %v21278_v23  ;;  %2059 = vmatpush1.bf16.msra.mxu1 %v21279_v30  ;;  %v21335_v23 = vld [vmem:[#allocation91_spill] sm:$0xff]  ;;  %v21336_v30 = vld [vmem:[#allocation93_spill] sm:$0xff] }
 0x3a6   :  { %2019 = vmatprep.subr.bf16.mxu0 %v21280_v39  ;;  %2060 = vmatprep.subr.bf16.mxu1 %v21281_v32  ;;  %v21337_v39 = vld [vmem:[#allocation94_spill] sm:$0xff] }
 0x3a9   :  { %2020 = vmatpush1.bf16.msra.mxu0 %v21282_v26  ;;  %2061 = vmatpush1.bf16.msra.mxu1 %v21283_v60  ;;  %v21338_v60 = vld [vmem:[#allocation8_spill] sm:$0xff] }
 0x3aa   :  { %2021 = vmatprep.subr.bf16.mxu0 %v21284_v59  ;;  %2062 = vmatprep.subr.bf16.mxu1 %v21285_v56  ;;  %v21339_v59 = vld [vmem:[#allocation16_spill] sm:$0xff] }
 0x3ab   :  { %v317_v56 = vadd.f32 %v21339_v59, %v21338_v60  ;;  %v16371_v59 = vld [vmem:[%s20694_s1 + $0x564] ss:$16 sps:$4 sm:$0xff]   ;;  %v16615_v60 = vld [vmem:[%s20694_s1 + $0x148] ss:$16 sps:$4 sm:$0xff]  }
 0x3ac   :  { %21362 = vst [vmem:[#allocation48_spill] sm:$0xff] %v16615_v60 }
 0x3ad   :  { %2022 = vmatpush1.bf16.msra.mxu0 %v21286_v54  ;;  %2063 = vmatpush1.bf16.msra.mxu1 %v21287_v24  ;;  %v21340_v54 = vld [vmem:[#allocation14_spill] sm:$0xff] }
 0x3ae   :  { %2023 = vmatprep.subr.bf16.mxu0 %v21288_v25  ;;  %2064 = vmatprep.subr.bf16.mxu1 %v21289_v45  ;;  %v21341_v25 = vld [vmem:[#allocation15_spill] sm:$0xff] }
 0x3b1   :  { %2024 = vmatpush1.bf16.msra.mxu0 %v21290_v10  ;;  %2065 = vmatpush1.bf16.msra.mxu1 %v21291_v48 }
 0x3b2   :  { %2025 = vmatprep.subr.bf16.mxu0 %v21292_v51  ;;  %2066 = vmatprep.subr.bf16.mxu1 %v21293_v57 }
 0x3b5   :  { %2026 = vmatpush1.bf16.msra.mxu0 %v21294_v58  ;;  %2067 = vmatpush1.bf16.msra.mxu1 %v21295_v13 }
 0x3b6   :  { %2027 = vmatprep.subr.bf16.mxu0 %v21296_v14  ;;  %2068 = vmatprep.subr.bf16.mxu1 %v21297_v15 }
 0x3b9   :  { %2028 = vmatpush1.bf16.msra.mxu0 %v21298_v17  ;;  %2069 = vmatpush1.bf16.msra.mxu1 %v21299_v18 }
 0x3ba   :  { %2029 = vmatprep.subr.bf16.mxu0 %v21300_v61  ;;  %2070 = vmatprep.subr.bf16.mxu1 %v21301_v1  ;;  %v21342_v61 = vld [vmem:[#allocation9_spill] sm:$0xff] }
 0x3bb   :  { %v21343_v1 = vld [vmem:[#allocation17_spill] sm:$0xff] }
 0x3bd   :  { %2030 = vmatpush1.bf16.msra.mxu0 %v21302_v5  ;;  %2071 = vmatpush1.bf16.msra.mxu1 %v21303_v62  ;;  %v390_v5 = vadd.f32 %v21343_v1, %v21342_v61  ;;  %v16467_v1 = vld [vmem:[%s20694_s1 + $0x1e4] ss:$16 sps:$4 sm:$0xff]  }
 0x3be   :  { %2137 = vmatprep.subr.bf16.mxu0 %v21304_v4  ;;  %2178 = vmatprep.subr.bf16.mxu1 %v21305_v2  ;;  %21345 = vst [vmem:[#allocation11_spill] sm:$0xff] %v16467_v1 }
 0x3c0   :  { %2048 = vmatmul.mubr.bf16.vlgmr.msra.gmra.mxu0 %v16152_v52  ;;  %2089 = vmatmul.mubr.bf16.vlgmr.msra.gmra.mxu1 %v16152_v52  ;;  %v21314_v52 = vld [vmem:[#allocation70_spill] sm:$0xff] }
 0x3c1   :  { %2138 = vmatpush1.bf16.msra.mxu0 %v21306_v9  ;;  %2179 = vmatpush1.bf16.msra.mxu1 %v21307_v3 }
 0x3c2   :  { %2139 = vmatprep.subr.bf16.mxu0 %v21308_v8  ;;  %2180 = vmatprep.subr.bf16.mxu1 %v21309_v0 }
 0x3c3   :  { %2169 = vmatprep.mubr.bf16.mxu0 %v21154_v53  ;;  %2210 = vmatprep.mubr.bf16.mxu1 %v21154_v53 }
 0x3c5   :  { %2140 = vmatpush1.bf16.msra.mxu0 %v21310_v12  ;;  %2181 = vmatpush1.bf16.msra.mxu1 %v21311_v63 }
 0x3c6   :  { %2141 = vmatprep.subr.bf16.mxu0 %v21312_v19  ;;  %2182 = vmatprep.subr.bf16.mxu1 %v21313_v20 }
 0x3c9   :  { %2142 = vmatpush1.bf16.msra.mxu0 %v21314_v52  ;;  %2183 = vmatpush1.bf16.msra.mxu1 %v21315_v27 }
 0x3ca   :  { %2143 = vmatprep.subr.bf16.mxu0 %v21316_v28  ;;  %2184 = vmatprep.subr.bf16.mxu1 %v21317_v33 }
 0x3cd   :  { %2144 = vmatpush1.bf16.msra.mxu0 %v21318_v34  ;;  %2185 = vmatpush1.bf16.msra.mxu1 %v21319_v16 }
 0x3ce   :  { %2145 = vmatprep.subr.bf16.mxu0 %v21320_v37  ;;  %2186 = vmatprep.subr.bf16.mxu1 %v21321_v43 }
 0x3d1   :  { %2146 = vmatpush1.bf16.msra.mxu0 %v21322_v44  ;;  %2187 = vmatpush1.bf16.msra.mxu1 %v21323_v47 }
 0x3d2   :  { %2147 = vmatprep.subr.bf16.mxu0 %v21324_v55  ;;  %2188 = vmatprep.subr.bf16.mxu1 %v21325_v22  ;;  %v16285_v22 = vld [vmem:[%s20694_s1 + $0x5e0] ss:$16 sps:$4 sm:$0xff]  }
 0x3d5   :  { %2148 = vmatpush1.bf16.msra.mxu0 %v21326_v42  ;;  %2189 = vmatpush1.bf16.msra.mxu1 %v21327_v21  ;;  %v16297_v42 = vld [vmem:[%s20694_s1 + $0x5c4] ss:$16 sps:$4 sm:$0xff]   ;;  %v16303_v21 = vld [vmem:[%s20694_s1 + $0x5cc] ss:$16 sps:$4 sm:$0xff]  }
 0x3d6   :  { %2149 = vmatprep.subr.bf16.mxu0 %v21328_v40  ;;  %2190 = vmatprep.subr.bf16.mxu1 %v21329_v50  ;;  %v16311_v40 = vld [vmem:[%s20694_s1 + $0x5c0] ss:$16 sps:$4 sm:$0xff]   ;;  %v16317_v50 = vld [vmem:[%s20694_s1 + $0x5c8] ss:$16 sps:$4 sm:$0xff]  }
 0x3d9   :  { %2150 = vmatpush1.bf16.msra.mxu0 %v21330_v49  ;;  %2191 = vmatpush1.bf16.msra.mxu1 %v21331_v35  ;;  %v16323_v49 = vld [vmem:[%s20694_s1 + $0x5a4] ss:$16 sps:$4 sm:$0xff]   ;;  %v16329_v35 = vld [vmem:[%s20694_s1 + $0x5ac] ss:$16 sps:$4 sm:$0xff]  }
 0x3da   :  { %2151 = vmatprep.subr.bf16.mxu0 %v21332_v31  ;;  %2192 = vmatprep.subr.bf16.mxu1 %v21333_v36  ;;  %v16335_v31 = vld [vmem:[%s20694_s1 + $0x5a0] ss:$16 sps:$4 sm:$0xff]   ;;  %v16341_v36 = vld [vmem:[%s20694_s1 + $0x5a8] ss:$16 sps:$4 sm:$0xff]  }
 0x3dd   :  { %2152 = vmatpush1.bf16.msra.mxu0 %v21334_v41  ;;  %2193 = vmatpush1.bf16.msra.mxu1 %v21335_v23  ;;  %v16347_v41 = vld [vmem:[%s20694_s1 + $0x584] ss:$16 sps:$4 sm:$0xff]   ;;  %v16353_v23 = vld [vmem:[%s20694_s1 + $0x58c] ss:$16 sps:$4 sm:$0xff]  }
 0x3de   :  { %2255 = vmatprep.subr.bf16.mxu0 %v21336_v30  ;;  %2296 = vmatprep.subr.bf16.mxu1 %v21337_v39 }
 0x3fc   :  { %v1849_v32 = vpop.f32.mrf.mxu0  ;;  %v1890_v26 = vpop.f32.mrf.mxu1 }
 0x3fd   :  { %v1897_v24 = vadd.f32 %v1849_v32, %v21340_v54  ;;  %v1899_v45 = vadd.f32 %v1890_v26, %v21341_v25  ;;  %v16359_v32 = vld [vmem:[%s20694_s1 + $0x580] ss:$16 sps:$4 sm:$0xff]   ;;  %v16365_v26 = vld [vmem:[%s20694_s1 + $0x588] ss:$16 sps:$4 sm:$0xff]   ;;  %v16395_v25 = vld [vmem:[%s20694_s1 + $0x544] ss:$16 sps:$4 sm:$0xff]  }
 0x3fe   :  { %v1851_v10 = vpop.f32.mrf.mxu0  ;;  %v1892_v48 = vpop.f32.mrf.mxu1  ;;  %v16383_v54 = vld [vmem:[%s20694_s1 + $0x560] ss:$16 sps:$4 sm:$0xff]  }
 0x3ff   :  { %v11601_v51 = vmul.f32 -1.442695, %v1897_v24  ;;  %v11603_v57 = vmul.f32 -1.442695, %v1899_v45  ;;  %v1898_v58 = vadd.f32 %v1851_v10, %v317_v56  ;;  %v1900_v62 = vadd.f32 %v1892_v48, %v390_v5  ;;  %v16377_v56 = vld [vmem:[%s20694_s1 + $0x56c] ss:$16 sps:$4 sm:$0xff]  }
 0x400   :  { %v1853_v13 = vpop.f32.mrf.mxu0  ;;  %v1894_v14 = vpop.f32.mrf.mxu1  ;;  %v16389_v24 = vld [vmem:[%s20694_s1 + $0x568] ss:$16 sps:$4 sm:$0xff]   ;;  %v16401_v45 = vld [vmem:[%s20694_s1 + $0x54c] ss:$16 sps:$4 sm:$0xff]   ;;  %v16407_v10 = vld [vmem:[%s20694_s1 + $0x540] ss:$16 sps:$4 sm:$0xff]  }
 0x401   :  { %14309 = vpow2.f32 %v11601_v51  ;;  %v11602_v15 = vmul.f32 -1.442695, %v1898_v58  ;;  %v11604_v9 = vmul.f32 -1.442695, %v1900_v62  ;;  %v16413_v48 = vld [vmem:[%s20694_s1 + $0x548] ss:$16 sps:$4 sm:$0xff]  }
 0x402   :  { %14311 = vpow2.f32 %v11603_v57  ;;  %v1854_v17 = vpop.f32.mrf.mxu0  ;;  %v1895_v18 = vpop.f32.mrf.mxu1  ;;  %v16419_v51 = vld [vmem:[%s20694_s1 + $0x524] ss:$16 sps:$4 sm:$0xff]   ;;  %v16425_v57 = vld [vmem:[%s20694_s1 + $0x52c] ss:$16 sps:$4 sm:$0xff]   ;;  %v16431_v58 = vld [vmem:[%s20694_s1 + $0x520] ss:$16 sps:$4 sm:$0xff]  }
 0x403   :  { %14313 = vpow2.f32 %v11602_v15  ;;  %v16437_v13 = vld [vmem:[%s20694_s1 + $0x528] ss:$16 sps:$4 sm:$0xff]   ;;  %v16443_v14 = vld [vmem:[%s20694_s1 + $0x504] ss:$16 sps:$4 sm:$0xff]   ;;  %v16449_v15 = vld [vmem:[%s20694_s1 + $0x50c] ss:$16 sps:$4 sm:$0xff]  }
 0x404   :  { %v16455_v17 = vld [vmem:[%s20694_s1 + $0x500] ss:$16 sps:$4 sm:$0xff]   ;;  %v16461_v18 = vld [vmem:[%s20694_s1 + $0x508] ss:$16 sps:$4 sm:$0xff]   ;;  %v16473_v5 = vld [vmem:[%s20694_s1 + $0x1ec] ss:$16 sps:$4 sm:$0xff]  }
 0x405   :  { %21344 = vst [vmem:[#allocation10_spill] sm:$0xff] %v16461_v18  ;;  %21346 = vst [vmem:[#allocation12_spill] sm:$0xff] %v16473_v5 }
 0x40e   :  { %v14310_v4 = vpop.eup %14309 }
 0x40f   :  { %v14312_v2 = vpop.eup %14311  ;;  %v1913_v12 = vadd.f32 1.0, %v14310_v4 }
 0x410   :  { %v14314_v3 = vpop.eup %14313  ;;  %v1915_v8 = vadd.f32 1.0, %v14312_v2 }
 0x411   :  { %v1914_v0 = vadd.f32 1.0, %v14314_v3 }
 0x412   :  { %14315 = vrcp.f32 %v1915_v8 }
 0x413   :  { %14317 = vpow2.f32 %v11604_v9 }
 0x414   :  { %14319 = vrcp.f32 %v1914_v0 }
 0x415   :  { %14321 = vrcp.f32 %v1913_v12 }
 0x41f   :  { %v14316_v63 = vpop.eup %14315 }
 0x420   :  { %v14318_v19 = vpop.eup %14317  ;;  %v1925_v20 = vmul.f32 2.0, %v14316_v63 }
 0x421   :  { %v14320_v52 = vpop.eup %14319  ;;  %v1916_v33 = vadd.f32 1.0, %v14318_v19 }
 0x422   :  { %v11605_v27 = vadd.f32 -1.0, %v1925_v20  ;;  %v14322_v28 = vpop.eup %14321  ;;  %v1927_v16 = vmul.f32 %v14320_v52, %v16149_v7  ;;  %v16291_v7 = vld [vmem:[%s20694_s1 + $0x5e8] ss:$16 sps:$4 sm:$0xff]  }
 0x423   :  { %14323 = vrcp.f32 %v1916_v33 }
 0x424   :  { %v1928_v34 = vmul.f32 %v14322_v28, %v11605_v27 }
 0x426   :  { %v16275_v37 = vadd.f32 %v1928_v34, %v1927_v16 }
 0x428   :  { %14325 = vtanh.f32 %v16275_v37 }
 0x430   :  { %v14324_v43 = vpop.eup %14323 }
 0x435   :  { %v14326_v44 = vpop.eup %14325 }
 0x436   :  { %v1931_v47 = vmul.f32 %v14326_v44, %v14324_v43 }
 0x438   :  { %v16278_v55 = vpack.c.bf16 %v1931_v47, %v1931_v47 }
 0x43a   :  { %2170 = vmatmul.mubr.bf16.vlgmr.msra.gmra.mxu0 %v16278_v55  ;;  %2211 = vmatmul.mubr.bf16.vlgmr.msra.gmra.mxu1 %v16278_v55 }
 0x43b   :  { %2256 = vmatpush1.bf16.msra.mxu0 %v16285_v22  ;;  %2297 = vmatpush1.bf16.msra.mxu1 %v16291_v7 }
 0x43c   :  { %2257 = vmatprep.subr.bf16.mxu0 %v16297_v42  ;;  %2298 = vmatprep.subr.bf16.mxu1 %v16303_v21 }
 0x43d   :  { %2287 = vmatprep.mubr.bf16.mxu0 %v21154_v53  ;;  %2328 = vmatprep.mubr.bf16.mxu1 %v21154_v53 }
 0x43f   :  { %2258 = vmatpush1.bf16.msra.mxu0 %v16311_v40  ;;  %2299 = vmatpush1.bf16.msra.mxu1 %v16317_v50 }
 0x440   :  { %2259 = vmatprep.subr.bf16.mxu0 %v16323_v49  ;;  %2300 = vmatprep.subr.bf16.mxu1 %v16329_v35 }
 0x443   :  { %2260 = vmatpush1.bf16.msra.mxu0 %v16335_v31  ;;  %2301 = vmatpush1.bf16.msra.mxu1 %v16341_v36 }
 0x444   :  { %2261 = vmatprep.subr.bf16.mxu0 %v16347_v41  ;;  %2302 = vmatprep.subr.bf16.mxu1 %v16353_v23 }
 0x447   :  { %2262 = vmatpush1.bf16.msra.mxu0 %v16359_v32  ;;  %2303 = vmatpush1.bf16.msra.mxu1 %v16365_v26 }
 0x448   :  { %2263 = vmatprep.subr.bf16.mxu0 %v16371_v59  ;;  %2304 = vmatprep.subr.bf16.mxu1 %v16377_v56 }
 0x44b   :  { %2264 = vmatpush1.bf16.msra.mxu0 %v16383_v54  ;;  %2305 = vmatpush1.bf16.msra.mxu1 %v16389_v24 }
 0x44c   :  { %2265 = vmatprep.subr.bf16.mxu0 %v16395_v25  ;;  %2306 = vmatprep.subr.bf16.mxu1 %v16401_v45 }
 0x44f   :  { %2266 = vmatpush1.bf16.msra.mxu0 %v16407_v10  ;;  %2307 = vmatpush1.bf16.msra.mxu1 %v16413_v48 }
 0x450   :  { %2267 = vmatprep.subr.bf16.mxu0 %v16419_v51  ;;  %2308 = vmatprep.subr.bf16.mxu1 %v16425_v57 }
 0x453   :  { %2268 = vmatpush1.bf16.msra.mxu0 %v16431_v58  ;;  %2309 = vmatpush1.bf16.msra.mxu1 %v16437_v13 }
 0x454   :  { %2269 = vmatprep.subr.bf16.mxu0 %v16443_v14  ;;  %2310 = vmatprep.subr.bf16.mxu1 %v16449_v15 }
 0x457   :  { %2270 = vmatpush1.bf16.msra.mxu0 %v16455_v17  ;;  %2311 = vmatpush1.bf16.msra.mxu1 %v16461_v18 }
 0x458   :  { %2337 = vmatprep.subr.bf16.mxu0 %v16467_v1  ;;  %2378 = vmatprep.subr.bf16.mxu1 %v16473_v5 }
 0x460   :  { %v1967_v62 = vpop.f32.mrf.mxu0  ;;  %v2008_v4 = vpop.f32.mrf.mxu1 }
 0x462   :  { %v1969_v2 = vpop.f32.mrf.mxu0  ;;  %v2010_v9 = vpop.f32.mrf.mxu1 }
 0x464   :  { %v1971_v3 = vpop.f32.mrf.mxu0  ;;  %v2012_v8 = vpop.f32.mrf.mxu1 }
 0x466   :  { %v1972_v0 = vpop.f32.mrf.mxu0  ;;  %v2013_v12 = vpop.f32.mrf.mxu1 }
 0x480   :  { %v2049_v63 = vpop.f32.mrf.mxu0  ;;  %v2090_v19 = vpop.f32.mrf.mxu1 }
 0x481   :  { %v2050_v20 = vadd.f32 %v2049_v63, %v1967_v62  ;;  %v2091_v52 = vadd.f32 %v2090_v19, %v2008_v4 }
 0x482   :  { %v2051_v27 = vpop.f32.mrf.mxu0  ;;  %v2092_v28 = vpop.f32.mrf.mxu1 }
 0x483   :  { %v2097_v33 = vadd.f32 %v2050_v20, %v16011_v38  ;;  %v2099_v34 = vadd.f32 %v2091_v52, %v16014_v46  ;;  %v2052_v16 = vadd.f32 %v2051_v27, %v1969_v2  ;;  %v2093_v62 = vadd.f32 %v2092_v28, %v2010_v9 }
 0x484   :  { %v2053_v43 = vpop.f32.mrf.mxu0  ;;  %v2094_v44 = vpop.f32.mrf.mxu1 }
 0x485   :  { %v11606_v47 = vmul.f32 -1.442695, %v2097_v33  ;;  %v11608_v61 = vmul.f32 -1.442695, %v2099_v34  ;;  %v2098_v3 = vadd.f32 %v2052_v16, %v16021_v6  ;;  %v2100_v4 = vadd.f32 %v2093_v62, %v16041_v29 }
 0x486   :  { %v2054_v8 = vpop.f32.mrf.mxu0  ;;  %v2095_v0 = vpop.f32.mrf.mxu1 }
 0x487   :  { %14327 = vpow2.f32 %v11606_v47  ;;  %v11607_v12 = vmul.f32 -1.442695, %v2098_v3  ;;  %v11609_v20 = vmul.f32 -1.442695, %v2100_v4 }
 0x488   :  { %14329 = vpow2.f32 %v11608_v61 }
 0x489   :  { %14331 = vpow2.f32 %v11607_v12 }
 0x494   :  { %v14328_v63 = vpop.eup %14327 }
 0x495   :  { %v14330_v19 = vpop.eup %14329  ;;  %v2113_v43 = vadd.f32 1.0, %v14328_v63  ;;  %v16487_v63 = vld [vmem:[%s20694_s1 + $0x1e0] ss:$16 sps:$4 sm:$0xff]  }
 0x496   :  { %v14332_v52 = vpop.eup %14331  ;;  %v2115_v2 = vadd.f32 1.0, %v14330_v19  ;;  %v16499_v19 = vld [vmem:[%s20694_s1 + $0x1c4] ss:$16 sps:$4 sm:$0xff]  }
 0x497   :  { %v2114_v27 = vadd.f32 1.0, %v14332_v52  ;;  %v16513_v52 = vld [vmem:[%s20694_s1 + $0x1c0] ss:$16 sps:$4 sm:$0xff]  }
 0x498   :  { %14333 = vrcp.f32 %v2115_v2  ;;  %v16519_v2 = vld [vmem:[%s20694_s1 + $0x1c8] ss:$16 sps:$4 sm:$0xff]  }
 0x499   :  { %14335 = vpow2.f32 %v11609_v20  ;;  %v16505_v20 = vld [vmem:[%s20694_s1 + $0x1cc] ss:$16 sps:$4 sm:$0xff]  }
 0x49a   :  { %14337 = vrcp.f32 %v2114_v27  ;;  %v16525_v27 = vld [vmem:[%s20694_s1 + $0x1a4] ss:$16 sps:$4 sm:$0xff]  }
 0x49b   :  { %14339 = vrcp.f32 %v2113_v43  ;;  %21347 = vst [vmem:[#allocation13_spill] sm:$0xff] %v16525_v27  ;;  %v16531_v43 = vld [vmem:[%s20694_s1 + $0x1ac] ss:$16 sps:$4 sm:$0xff]  }
 0x49c   :  { %21348 = vst [vmem:[#allocation34_spill] sm:$0xff] %v16531_v43 }
 0x4a5   :  { %v14334_v33 = vpop.eup %14333 }
 0x4a6   :  { %v14336_v34 = vpop.eup %14335  ;;  %v2125_v16 = vmul.f32 2.0, %v14334_v33  ;;  %v16537_v33 = vld [vmem:[%s20694_s1 + $0x1a0] ss:$16 sps:$4 sm:$0xff]  }
 0x4a7   :  { %v14338_v44 = vpop.eup %14337  ;;  %v2116_v9 = vadd.f32 1.0, %v14336_v34  ;;  %21349 = vst [vmem:[#allocation35_spill] sm:$0xff] %v16537_v33  ;;  %v16543_v34 = vld [vmem:[%s20694_s1 + $0x1a8] ss:$16 sps:$4 sm:$0xff]  }
 0x4a8   :  { %v11610_v61 = vadd.f32 -1.0, %v2125_v16  ;;  %v14340_v47 = vpop.eup %14339  ;;  %v2127_v3 = vmul.f32 %v14338_v44, %v16195_v11  ;;  %v16493_v11 = vld [vmem:[%s20694_s1 + $0x1e8] ss:$16 sps:$4 sm:$0xff]   ;;  %21350 = vst [vmem:[#allocation36_spill] sm:$0xff] %v16543_v34  ;;  %v16549_v16 = vld [vmem:[%s20694_s1 + $0x184] ss:$16 sps:$4 sm:$0xff]  }
 0x4a9   :  { %14341 = vrcp.f32 %v2116_v9  ;;  %21351 = vst [vmem:[#allocation37_spill] sm:$0xff] %v16549_v16  ;;  %v16555_v44 = vld [vmem:[%s20694_s1 + $0x18c] ss:$16 sps:$4 sm:$0xff]   ;;  %v16573_v9 = vld [vmem:[%s20694_s1 + $0x164] ss:$16 sps:$4 sm:$0xff]  }
 0x4aa   :  { %v2128_v28 = vmul.f32 %v14340_v47, %v11610_v61  ;;  %21352 = vst [vmem:[#allocation38_spill] sm:$0xff] %v16555_v44  ;;  %v16561_v61 = vld [vmem:[%s20694_s1 + $0x180] ss:$16 sps:$4 sm:$0xff]   ;;  %v16567_v47 = vld [vmem:[%s20694_s1 + $0x188] ss:$16 sps:$4 sm:$0xff]   ;;  %21355 = vst [vmem:[#allocation41_spill] sm:$0xff] %v16573_v9 }
 0x4ab   :  { %21353 = vst [vmem:[#allocation39_spill] sm:$0xff] %v16561_v61  ;;  %21354 = vst [vmem:[#allocation40_spill] sm:$0xff] %v16567_v47 }
 0x4ac   :  { %v16481_v8 = vadd.f32 %v2128_v28, %v2127_v3  ;;  %v16579_v28 = vld [vmem:[%s20694_s1 + $0x16c] ss:$16 sps:$4 sm:$0xff]   ;;  %v16585_v3 = vld [vmem:[%s20694_s1 + $0x160] ss:$16 sps:$4 sm:$0xff]  }
 0x4ad   :  { %21356 = vst [vmem:[#allocation42_spill] sm:$0xff] %v16579_v28  ;;  %21357 = vst [vmem:[#allocation43_spill] sm:$0xff] %v16585_v3 }
 0x4ae   :  { %14343 = vtanh.f32 %v16481_v8 }
 0x4b6   :  { %v14342_v0 = vpop.eup %14341 }
 0x4bb   :  { %v14344_v12 = vpop.eup %14343 }
 0x4bc   :  { %v2131_v62 = vmul.f32 %v14344_v12, %v14342_v0  ;;  %v16591_v0 = vld [vmem:[%s20694_s1 + $0x168] ss:$16 sps:$4 sm:$0xff]   ;;  %v16597_v12 = vld [vmem:[%s20694_s1 + $0x144] ss:$16 sps:$4 sm:$0xff]  }
 0x4bd   :  { %21358 = vst [vmem:[#allocation44_spill] sm:$0xff] %v16591_v0  ;;  %21359 = vst [vmem:[#allocation45_spill] sm:$0xff] %v16597_v12 }
 0x4be   :  { %v2254_v4 = vpack.c.bf16 %v2131_v62, %v2131_v62  ;;  %v16603_v62 = vld [vmem:[%s20694_s1 + $0x14c] ss:$16 sps:$4 sm:$0xff]  }
 0x4bf   :  { %21360 = vst [vmem:[#allocation46_spill] sm:$0xff] %v16603_v62 }
 0x4c0   :  { %2288 = vmatmul.mubr.bf16.vlgmr.msra.gmra.mxu0 %v2254_v4  ;;  %2329 = vmatmul.mubr.bf16.vlgmr.msra.gmra.mxu1 %v2254_v4  ;;  %v16609_v4 = vld [vmem:[%s20694_s1 + $0x140] ss:$16 sps:$4 sm:$0xff]  }
 0x4c1   :  { %2338 = vmatpush1.bf16.msra.mxu0 %v16487_v63  ;;  %2379 = vmatpush1.bf16.msra.mxu1 %v16493_v11  ;;  %21361 = vst [vmem:[#allocation47_spill] sm:$0xff] %v16609_v4 }
 0x4c2   :  { %2339 = vmatprep.subr.bf16.mxu0 %v16499_v19  ;;  %2380 = vmatprep.subr.bf16.mxu1 %v16505_v20 }
 0x4c3   :  { %2369 = vmatprep.mubr.bf16.mxu0 %v21154_v53  ;;  %2410 = vmatprep.mubr.bf16.mxu1 %v21154_v53 }
 0x4c5   :  { %2340 = vmatpush1.bf16.msra.mxu0 %v16513_v52  ;;  %2381 = vmatpush1.bf16.msra.mxu1 %v16519_v2 }
 0x4c6   :  { %2341 = vmatprep.subr.bf16.mxu0 %v16525_v27  ;;  %2382 = vmatprep.subr.bf16.mxu1 %v16531_v43 }
 0x4c9   :  { %2342 = vmatpush1.bf16.msra.mxu0 %v16537_v33  ;;  %2383 = vmatpush1.bf16.msra.mxu1 %v16543_v34 }
 0x4ca   :  { %2343 = vmatprep.subr.bf16.mxu0 %v16549_v16  ;;  %2384 = vmatprep.subr.bf16.mxu1 %v16555_v44  ;;  %v21403_v16 = vld [vmem:[#allocation20_spill] sm:$0xff] }
 0x4cd   :  { %2344 = vmatpush1.bf16.msra.mxu0 %v16561_v61  ;;  %2385 = vmatpush1.bf16.msra.mxu1 %v16567_v47 }
 0x4ce   :  { %2345 = vmatprep.subr.bf16.mxu0 %v16573_v9  ;;  %2386 = vmatprep.subr.bf16.mxu1 %v16579_v28  ;;  %v21402_v28 = vld [vmem:[#allocation19_spill] sm:$0xff] }
 0x4d1   :  { %2346 = vmatpush1.bf16.msra.mxu0 %v16585_v3  ;;  %2387 = vmatpush1.bf16.msra.mxu1 %v16591_v0  ;;  %v21401_v0 = vld [vmem:[#allocation18_spill] sm:$0xff] }
 0x4d2   :  { %2347 = vmatprep.subr.bf16.mxu0 %v16597_v12  ;;  %2388 = vmatprep.subr.bf16.mxu1 %v16603_v62  ;;  %v16621_v12 = vld [vmem:[%s20694_s1 + $0x124] ss:$16 sps:$4 sm:$0xff]   ;;  %v16627_v62 = vld [vmem:[%s20694_s1 + $0x12c] ss:$16 sps:$4 sm:$0xff]  }
 0x4d3   :  { %21363 = vst [vmem:[#allocation49_spill] sm:$0xff] %v16621_v12  ;;  %21364 = vst [vmem:[#allocation50_spill] sm:$0xff] %v16627_v62 }
 0x4d5   :  { %2348 = vmatpush1.bf16.msra.mxu0 %v16609_v4  ;;  %2389 = vmatpush1.bf16.msra.mxu1 %v16615_v60  ;;  %v16633_v4 = vld [vmem:[%s20694_s1 + $0x120] ss:$16 sps:$4 sm:$0xff]   ;;  %v16639_v60 = vld [vmem:[%s20694_s1 + $0x128] ss:$16 sps:$4 sm:$0xff]  }
 0x4d6   :  { %2349 = vmatprep.subr.bf16.mxu0 %v16621_v12  ;;  %2390 = vmatprep.subr.bf16.mxu1 %v16627_v62  ;;  %21365 = vst [vmem:[#allocation51_spill] sm:$0xff] %v16633_v4  ;;  %21366 = vst [vmem:[#allocation52_spill] sm:$0xff] %v16639_v60  ;;  %v16645_v12 = vld [vmem:[%s20694_s1 + $0x104] ss:$16 sps:$4 sm:$0xff]   ;;  %v16651_v62 = vld [vmem:[%s20694_s1 + $0x10c] ss:$16 sps:$4 sm:$0xff]  }
 0x4d7   :  { %21367 = vst [vmem:[#allocation53_spill] sm:$0xff] %v16645_v12  ;;  %21368 = vst [vmem:[#allocation54_spill] sm:$0xff] %v16651_v62 }
 0x4d9   :  { %2350 = vmatpush1.bf16.msra.mxu0 %v16633_v4  ;;  %2391 = vmatpush1.bf16.msra.mxu1 %v16639_v60  ;;  %v16657_v4 = vld [vmem:[%s20694_s1 + $0x100] ss:$16 sps:$4 sm:$0xff]   ;;  %v16663_v60 = vld [vmem:[%s20694_s1 + $0x108] ss:$16 sps:$4 sm:$0xff]  }
 0x4da   :  { %2351 = vmatprep.subr.bf16.mxu0 %v16645_v12  ;;  %2392 = vmatprep.subr.bf16.mxu1 %v16651_v62  ;;  %21369 = vst [vmem:[#allocation55_spill] sm:$0xff] %v16657_v4  ;;  %21370 = vst [vmem:[#allocation56_spill] sm:$0xff] %v16663_v60  ;;  %v16669_v12 = vld [vmem:[%s20694_s1 + $0x4e4] ss:$16 sps:$4 sm:$0xff]   ;;  %v16675_v62 = vld [vmem:[%s20694_s1 + $0x4ec] ss:$16 sps:$4 sm:$0xff]  }
 0x4db   :  { %21371 = vst [vmem:[#allocation57_spill] sm:$0xff] %v16669_v12  ;;  %21372 = vst [vmem:[#allocation58_spill] sm:$0xff] %v16675_v62 }
 0x4dd   :  { %2352 = vmatpush1.bf16.msra.mxu0 %v16657_v4  ;;  %2393 = vmatpush1.bf16.msra.mxu1 %v16663_v60  ;;  %v16683_v60 = vld [vmem:[%s20694_s1 + $0x4e0] ss:$16 sps:$4 sm:$0xff]  }
 0x4de   :  { %2459 = vmatprep.subr.bf16.mxu0 %v16669_v12  ;;  %2500 = vmatprep.subr.bf16.mxu1 %v16675_v62  ;;  %21373 = vst [vmem:[#allocation59_spill] sm:$0xff] %v16683_v60  ;;  %v16689_v12 = vld [vmem:[%s20694_s1 + $0x4e8] ss:$16 sps:$4 sm:$0xff]   ;;  %v16695_v62 = vld [vmem:[%s20694_s1 + $0x4c4] ss:$16 sps:$4 sm:$0xff]  }
 0x4df   :  { %21374 = vst [vmem:[#allocation60_spill] sm:$0xff] %v16689_v12  ;;  %21375 = vst [vmem:[#allocation61_spill] sm:$0xff] %v16695_v62 }
 0x4e0   :  { %2370 = vmatmul.mubr.bf16.vlgmr.msra.gmra.mxu0 %v16278_v55  ;;  %2411 = vmatmul.mubr.bf16.vlgmr.msra.gmra.mxu1 %v16278_v55  ;;  %v16701_v55 = vld [vmem:[%s20694_s1 + $0x4cc] ss:$16 sps:$4 sm:$0xff]  }
 0x4e1   :  { %2460 = vmatpush1.bf16.msra.mxu0 %v16683_v60  ;;  %2501 = vmatpush1.bf16.msra.mxu1 %v16689_v12  ;;  %21376 = vst [vmem:[#allocation62_spill] sm:$0xff] %v16701_v55  ;;  %v16709_v12 = vld [vmem:[%s20694_s1 + $0x4c0] ss:$16 sps:$4 sm:$0xff]   ;;  %v16727_v60 = vld [vmem:[%s20694_s1 + $0x4ac] ss:$16 sps:$4 sm:$0xff]  }
 0x4e2   :  { %2461 = vmatprep.subr.bf16.mxu0 %v16695_v62  ;;  %2502 = vmatprep.subr.bf16.mxu1 %v16701_v55  ;;  %21377 = vst [vmem:[#allocation63_spill] sm:$0xff] %v16709_v12  ;;  %v16715_v62 = vld [vmem:[%s20694_s1 + $0x4c8] ss:$16 sps:$4 sm:$0xff]   ;;  %v16721_v55 = vld [vmem:[%s20694_s1 + $0x4a4] ss:$16 sps:$4 sm:$0xff]   ;;  %21380 = vst [vmem:[#allocation66_spill] sm:$0xff] %v16727_v60 }
 0x4e3   :  { %2491 = vmatprep.mubr.bf16.mxu0 %v21154_v53  ;;  %2532 = vmatprep.mubr.bf16.mxu1 %v21154_v53  ;;  %21378 = vst [vmem:[#allocation64_spill] sm:$0xff] %v16715_v62  ;;  %21379 = vst [vmem:[#allocation65_spill] sm:$0xff] %v16721_v55 }
 0x4e5   :  { %2462 = vmatpush1.bf16.msra.mxu0 %v16709_v12  ;;  %2503 = vmatpush1.bf16.msra.mxu1 %v16715_v62  ;;  %v16733_v12 = vld [vmem:[%s20694_s1 + $0x4a0] ss:$16 sps:$4 sm:$0xff]   ;;  %v16739_v62 = vld [vmem:[%s20694_s1 + $0x4a8] ss:$16 sps:$4 sm:$0xff]  }
 0x4e6   :  { %2463 = vmatprep.subr.bf16.mxu0 %v16721_v55  ;;  %2504 = vmatprep.subr.bf16.mxu1 %v16727_v60  ;;  %21381 = vst [vmem:[#allocation67_spill] sm:$0xff] %v16733_v12  ;;  %21382 = vst [vmem:[#allocation68_spill] sm:$0xff] %v16739_v62  ;;  %v16745_v55 = vld [vmem:[%s20694_s1 + $0x484] ss:$16 sps:$4 sm:$0xff]   ;;  %v16751_v60 = vld [vmem:[%s20694_s1 + $0x48c] ss:$16 sps:$4 sm:$0xff]  }
 0x4e7   :  { %21383 = vst [vmem:[#allocation69_spill] sm:$0xff] %v16745_v55  ;;  %21384 = vst [vmem:[#allocation70_spill] sm:$0xff] %v16751_v60 }
 0x4e9   :  { %2464 = vmatpush1.bf16.msra.mxu0 %v16733_v12  ;;  %2505 = vmatpush1.bf16.msra.mxu1 %v16739_v62  ;;  %v16757_v12 = vld [vmem:[%s20694_s1 + $0x480] ss:$16 sps:$4 sm:$0xff]   ;;  %v16763_v62 = vld [vmem:[%s20694_s1 + $0x488] ss:$16 sps:$4 sm:$0xff]  }
 0x4ea   :  { %2465 = vmatprep.subr.bf16.mxu0 %v16745_v55  ;;  %2506 = vmatprep.subr.bf16.mxu1 %v16751_v60  ;;  %21385 = vst [vmem:[#allocation71_spill] sm:$0xff] %v16757_v12  ;;  %21386 = vst [vmem:[#allocation72_spill] sm:$0xff] %v16763_v62  ;;  %v16769_v55 = vld [vmem:[%s20694_s1 + $0x464] ss:$16 sps:$4 sm:$0xff]   ;;  %v16775_v60 = vld [vmem:[%s20694_s1 + $0x46c] ss:$16 sps:$4 sm:$0xff]  }
 0x4eb   :  { %21387 = vst [vmem:[#allocation73_spill] sm:$0xff] %v16769_v55  ;;  %21388 = vst [vmem:[#allocation74_spill] sm:$0xff] %v16775_v60 }
 0x4ed   :  { %2466 = vmatpush1.bf16.msra.mxu0 %v16757_v12  ;;  %2507 = vmatpush1.bf16.msra.mxu1 %v16763_v62  ;;  %v16781_v12 = vld [vmem:[%s20694_s1 + $0x460] ss:$16 sps:$4 sm:$0xff]   ;;  %v16787_v62 = vld [vmem:[%s20694_s1 + $0x468] ss:$16 sps:$4 sm:$0xff]  }
 0x4ee   :  { %2467 = vmatprep.subr.bf16.mxu0 %v16769_v55  ;;  %2508 = vmatprep.subr.bf16.mxu1 %v16775_v60  ;;  %21389 = vst [vmem:[#allocation75_spill] sm:$0xff] %v16781_v12  ;;  %21390 = vst [vmem:[#allocation76_spill] sm:$0xff] %v16787_v62  ;;  %v16793_v55 = vld [vmem:[%s20694_s1 + $0x444] ss:$16 sps:$4 sm:$0xff]   ;;  %v16799_v60 = vld [vmem:[%s20694_s1 + $0x44c] ss:$16 sps:$4 sm:$0xff]  }
 0x4ef   :  { %21391 = vst [vmem:[#allocation77_spill] sm:$0xff] %v16793_v55  ;;  %21392 = vst [vmem:[#allocation78_spill] sm:$0xff] %v16799_v60 }
 0x4f1   :  { %2468 = vmatpush1.bf16.msra.mxu0 %v16781_v12  ;;  %2509 = vmatpush1.bf16.msra.mxu1 %v16787_v62  ;;  %v16805_v12 = vld [vmem:[%s20694_s1 + $0x440] ss:$16 sps:$4 sm:$0xff]   ;;  %v16811_v62 = vld [vmem:[%s20694_s1 + $0x448] ss:$16 sps:$4 sm:$0xff]  }
 0x4f2   :  { %2469 = vmatprep.subr.bf16.mxu0 %v16793_v55  ;;  %2510 = vmatprep.subr.bf16.mxu1 %v16799_v60  ;;  %21393 = vst [vmem:[#allocation79_spill] sm:$0xff] %v16805_v12  ;;  %21394 = vst [vmem:[#allocation80_spill] sm:$0xff] %v16811_v62  ;;  %v16817_v55 = vld [vmem:[%s20694_s1 + $0x424] ss:$16 sps:$4 sm:$0xff]   ;;  %v16823_v60 = vld [vmem:[%s20694_s1 + $0x42c] ss:$16 sps:$4 sm:$0xff]  }
 0x4f3   :  { %21395 = vst [vmem:[#allocation81_spill] sm:$0xff] %v16817_v55  ;;  %21396 = vst [vmem:[#allocation82_spill] sm:$0xff] %v16823_v60 }
 0x4f5   :  { %2470 = vmatpush1.bf16.msra.mxu0 %v16805_v12  ;;  %2511 = vmatpush1.bf16.msra.mxu1 %v16811_v62  ;;  %v16829_v12 = vld [vmem:[%s20694_s1 + $0x420] ss:$16 sps:$4 sm:$0xff]   ;;  %v16835_v62 = vld [vmem:[%s20694_s1 + $0x428] ss:$16 sps:$4 sm:$0xff]  }
 0x4f6   :  { %2471 = vmatprep.subr.bf16.mxu0 %v16817_v55  ;;  %2512 = vmatprep.subr.bf16.mxu1 %v16823_v60  ;;  %21397 = vst [vmem:[#allocation83_spill] sm:$0xff] %v16829_v12  ;;  %21398 = vst [vmem:[#allocation84_spill] sm:$0xff] %v16835_v62  ;;  %v16841_v60 = vld [vmem:[%s20694_s1 + $0x404] ss:$16 sps:$4 sm:$0xff]  }
 0x4f7   :  { %21399 = vst [vmem:[#allocation85_spill] sm:$0xff] %v16841_v60 }
 0x4f9   :  { %2472 = vmatpush1.bf16.msra.mxu0 %v16829_v12  ;;  %2513 = vmatpush1.bf16.msra.mxu1 %v16835_v62  ;;  %v16847_v12 = vld [vmem:[%s20694_s1 + $0x40c] ss:$16 sps:$4 sm:$0xff]  }
 0x4fa   :  { %v2171_v55 = vpop.f32.mrf.mxu0  ;;  %v2212_v4 = vpop.f32.mrf.mxu1  ;;  %2473 = vmatprep.subr.bf16.mxu0 %v16841_v60  ;;  %21400 = vst [vmem:[#allocation86_spill] sm:$0xff] %v16847_v12  ;;  %2514 = vmatprep.subr.bf16.mxu1 %v16847_v12  ;;  %v16856_v60 = vld [vmem:[%s20694_s1 + $0x400] ss:$16 sps:$4 sm:$0xff]   ;;  %v16862_v12 = vld [vmem:[%s20694_s1 + $0x408] ss:$16 sps:$4 sm:$0xff]  }
 0x4fb   :  { %v2219_v3 = vadd.f32 %v2171_v55, %v21401_v0  ;;  %v2221_v62 = vadd.f32 %v2212_v4, %v21402_v28  ;;  %21404 = vst [vmem:[#allocation87_spill] sm:$0xff] %v16856_v60  ;;  %21405 = vst [vmem:[#allocation88_spill] sm:$0xff] %v16862_v12 }
 0x4fc   :  { %v2173_v9 = vpop.f32.mrf.mxu0  ;;  %v2214_v47 = vpop.f32.mrf.mxu1 }
 0x4fd   :  { %v11611_v61 = vmul.f32 -1.442695, %v2219_v3  ;;  %v11613_v44 = vmul.f32 -1.442695, %v2221_v62  ;;  %v2220_v34 = vadd.f32 %v2173_v9, %v21403_v16  ;;  %2474 = vmatpush1.bf16.msra.mxu0 %v16856_v60  ;;  %2515 = vmatpush1.bf16.msra.mxu1 %v16862_v12  ;;  %v21406_v62 = vld [vmem:[#allocation21_spill] sm:$0xff] }
 0x4fe   :  { %v2175_v28 = vpop.f32.mrf.mxu0  ;;  %v2216_v0 = vpop.f32.mrf.mxu1  ;;  %2577 = vmatprep.subr.bf16.mxu0 %v21336_v30  ;;  %2618 = vmatprep.subr.bf16.mxu1 %v21337_v39  ;;  %v2222_v4 = vadd.f32 %v2214_v47, %v21406_v62 }
 0x4ff   :  { %14345 = vpow2.f32 %v11611_v61  ;;  %v11612_v16 = vmul.f32 -1.442695, %v2220_v34 }
 0x500   :  { %14347 = vpow2.f32 %v11613_v44  ;;  %v2176_v9 = vpop.f32.mrf.mxu0  ;;  %v2217_v3 = vpop.f32.mrf.mxu1  ;;  %v11614_v33 = vmul.f32 -1.442695, %v2222_v4 }
 0x501   :  { %14349 = vpow2.f32 %v11612_v16 }
 0x50c   :  { %v14346_v55 = vpop.eup %14345 }
 0x50d   :  { %v14348_v60 = vpop.eup %14347  ;;  %v2235_v28 = vadd.f32 1.0, %v14346_v55 }
 0x50e   :  { %v14350_v43 = vpop.eup %14349  ;;  %v2237_v27 = vadd.f32 1.0, %v14348_v60 }
 0x50f   :  { %v2236_v12 = vadd.f32 1.0, %v14350_v43 }
 0x510   :  { %14351 = vrcp.f32 %v2237_v27 }
 0x511   :  { %14353 = vpow2.f32 %v11614_v33 }
 0x512   :  { %14355 = vrcp.f32 %v2236_v12 }
 0x513   :  { %14357 = vrcp.f32 %v2235_v28 }
 0x51d   :  { %v14352_v30 = vpop.eup %14351 }
 0x51e   :  { %v14354_v39 = vpop.eup %14353  ;;  %v2247_v34 = vmul.f32 2.0, %v14352_v30 }
 0x51f   :  { %v14356_v44 = vpop.eup %14355  ;;  %v2238_v16 = vadd.f32 1.0, %v14354_v39 }
 0x520   :  { %v11615_v61 = vadd.f32 -1.0, %v2247_v34  ;;  %v14358_v0 = vpop.eup %14357  ;;  %v2249_v47 = vmul.f32 %v14356_v44, %v16275_v37 }
 0x521   :  { %14359 = vrcp.f32 %v2238_v16 }
 0x522   :  { %v2250_v9 = vmul.f32 %v14358_v0, %v11615_v61 }
 0x524   :  { %v16869_v3 = vadd.f32 %v2250_v9, %v2249_v47 }
 0x526   :  { %14361 = vtanh.f32 %v16869_v3 }
 0x52e   :  { %v14360_v60 = vpop.eup %14359 }
 0x533   :  { %v14362_v27 = vpop.eup %14361 }
 0x534   :  { %v2253_v43 = vmul.f32 %v14362_v27, %v14360_v60 }
 0x536   :  { %v16872_v33 = vpack.c.bf16 %v2253_v43, %v2253_v43 }
 0x538   :  { %2492 = vmatmul.mubr.bf16.vlgmr.msra.gmra.mxu0 %v16872_v33  ;;  %2533 = vmatmul.mubr.bf16.vlgmr.msra.gmra.mxu1 %v16872_v33 }
 0x539   :  { %2578 = vmatpush1.bf16.msra.mxu0 %v16285_v22  ;;  %2619 = vmatpush1.bf16.msra.mxu1 %v16291_v7 }
 0x53a   :  { %2579 = vmatprep.subr.bf16.mxu0 %v16297_v42  ;;  %2620 = vmatprep.subr.bf16.mxu1 %v16303_v21 }
 0x53b   :  { %2609 = vmatprep.mubr.bf16.mxu0 %v21154_v53  ;;  %2650 = vmatprep.mubr.bf16.mxu1 %v21154_v53 }
 0x53d   :  { %2580 = vmatpush1.bf16.msra.mxu0 %v16311_v40  ;;  %2621 = vmatpush1.bf16.msra.mxu1 %v16317_v50 }
 0x53e   :  { %2581 = vmatprep.subr.bf16.mxu0 %v16323_v49  ;;  %2622 = vmatprep.subr.bf16.mxu1 %v16329_v35 }
 0x541   :  { %2582 = vmatpush1.bf16.msra.mxu0 %v16335_v31  ;;  %2623 = vmatpush1.bf16.msra.mxu1 %v16341_v36 }
 0x542   :  { %2583 = vmatprep.subr.bf16.mxu0 %v16347_v41  ;;  %2624 = vmatprep.subr.bf16.mxu1 %v16353_v23 }
 0x545   :  { %2584 = vmatpush1.bf16.msra.mxu0 %v16359_v32  ;;  %2625 = vmatpush1.bf16.msra.mxu1 %v16365_v26 }
 0x546   :  { %2585 = vmatprep.subr.bf16.mxu0 %v16371_v59  ;;  %2626 = vmatprep.subr.bf16.mxu1 %v16377_v56 }
 0x549   :  { %2586 = vmatpush1.bf16.msra.mxu0 %v16383_v54  ;;  %2627 = vmatpush1.bf16.msra.mxu1 %v16389_v24 }
 0x54a   :  { %2587 = vmatprep.subr.bf16.mxu0 %v16395_v25  ;;  %2628 = vmatprep.subr.bf16.mxu1 %v16401_v45 }
 0x54d   :  { %2588 = vmatpush1.bf16.msra.mxu0 %v16407_v10  ;;  %2629 = vmatpush1.bf16.msra.mxu1 %v16413_v48 }
 0x54e   :  { %2589 = vmatprep.subr.bf16.mxu0 %v16419_v51  ;;  %2630 = vmatprep.subr.bf16.mxu1 %v16425_v57 }
 0x551   :  { %2590 = vmatpush1.bf16.msra.mxu0 %v16431_v58  ;;  %2631 = vmatpush1.bf16.msra.mxu1 %v16437_v13 }
 0x552   :  { %2591 = vmatprep.subr.bf16.mxu0 %v16443_v14  ;;  %2632 = vmatprep.subr.bf16.mxu1 %v16449_v15 }
 0x555   :  { %2592 = vmatpush1.bf16.msra.mxu0 %v16455_v17  ;;  %2633 = vmatpush1.bf16.msra.mxu1 %v16461_v18 }
 0x556   :  { %2659 = vmatprep.subr.bf16.mxu0 %v16467_v1  ;;  %2700 = vmatprep.subr.bf16.mxu1 %v16473_v5 }
 0x580   :  { %v2289_v37 = vpop.f32.mrf.mxu0  ;;  %v2330_v12 = vpop.f32.mrf.mxu1 }
 0x582   :  { %v2291_v62 = vpop.f32.mrf.mxu0  ;;  %v2332_v4 = vpop.f32.mrf.mxu1 }
 0x584   :  { %v2293_v55 = vpop.f32.mrf.mxu0  ;;  %v2334_v28 = vpop.f32.mrf.mxu1 }
 0x586   :  { %v2294_v30 = vpop.f32.mrf.mxu0  ;;  %v2335_v39 = vpop.f32.mrf.mxu1 }
 0x5a0   :  { %v2371_v34 = vpop.f32.mrf.mxu0  ;;  %v2412_v44 = vpop.f32.mrf.mxu1 }
 0x5a1   :  { %v2372_v61 = vadd.f32 %v2371_v34, %v2289_v37  ;;  %v2413_v0 = vadd.f32 %v2412_v44, %v2330_v12 }
 0x5a2   :  { %v2373_v16 = vpop.f32.mrf.mxu0  ;;  %v2414_v9 = vpop.f32.mrf.mxu1 }
 0x5a3   :  { %v2419_v47 = vadd.f32 %v2372_v61, %v16011_v38  ;;  %v2421_v60 = vadd.f32 %v2413_v0, %v16014_v46  ;;  %v2374_v27 = vadd.f32 %v2373_v16, %v2291_v62  ;;  %v2415_v37 = vadd.f32 %v2414_v9, %v2332_v4 }
 0x5a4   :  { %v2375_v43 = vpop.f32.mrf.mxu0  ;;  %v2416_v5 = vpop.f32.mrf.mxu1 }
 0x5a5   :  { %v11616_v1 = vmul.f32 -1.442695, %v2419_v47  ;;  %v11618_v18 = vmul.f32 -1.442695, %v2421_v60  ;;  %v2420_v55 = vadd.f32 %v2374_v27, %v16021_v6  ;;  %v2422_v12 = vadd.f32 %v2415_v37, %v16041_v29 }
 0x5a6   :  { %v2376_v28 = vpop.f32.mrf.mxu0  ;;  %v2417_v30 = vpop.f32.mrf.mxu1 }
 0x5a7   :  { %14363 = vpow2.f32 %v11616_v1  ;;  %v11617_v39 = vmul.f32 -1.442695, %v2420_v55  ;;  %v11619_v61 = vmul.f32 -1.442695, %v2422_v12 }
 0x5a8   :  { %14365 = vpow2.f32 %v11618_v18 }
 0x5a9   :  { %14367 = vpow2.f32 %v11617_v39 }
 0x5b4   :  { %v14364_v34 = vpop.eup %14363 }
 0x5b5   :  { %v14366_v44 = vpop.eup %14365  ;;  %v2435_v5 = vadd.f32 1.0, %v14364_v34  ;;  %v21408_v34 = vld [vmem:[#allocation34_spill] sm:$0xff] }
 0x5b6   :  { %v14368_v0 = vpop.eup %14367  ;;  %v2437_v62 = vadd.f32 1.0, %v14366_v44  ;;  %v21409_v44 = vld [vmem:[#allocation35_spill] sm:$0xff] }
 0x5b7   :  { %v2436_v16 = vadd.f32 1.0, %v14368_v0  ;;  %v21411_v0 = vld [vmem:[#allocation37_spill] sm:$0xff] }
 0x5b8   :  { %14369 = vrcp.f32 %v2437_v62  ;;  %v21412_v62 = vld [vmem:[#allocation38_spill] sm:$0xff] }
 0x5b9   :  { %14371 = vpow2.f32 %v11619_v61  ;;  %v21410_v61 = vld [vmem:[#allocation36_spill] sm:$0xff] }
 0x5ba   :  { %14373 = vrcp.f32 %v2436_v16  ;;  %v21413_v16 = vld [vmem:[#allocation39_spill] sm:$0xff] }
 0x5bb   :  { %14375 = vrcp.f32 %v2435_v5  ;;  %v21414_v5 = vld [vmem:[#allocation40_spill] sm:$0xff] }
 0x5c5   :  { %v14370_v47 = vpop.eup %14369 }
 0x5c6   :  { %v14372_v60 = vpop.eup %14371  ;;  %v2447_v1 = vmul.f32 2.0, %v14370_v47  ;;  %v21415_v47 = vld [vmem:[#allocation41_spill] sm:$0xff] }
 0x5c7   :  { %v14374_v27 = vpop.eup %14373  ;;  %v2438_v4 = vadd.f32 1.0, %v14372_v60  ;;  %v21416_v60 = vld [vmem:[#allocation42_spill] sm:$0xff] }
 0x5c8   :  { %v11620_v18 = vadd.f32 -1.0, %v2447_v1  ;;  %v14376_v43 = vpop.eup %14375  ;;  %v2449_v55 = vmul.f32 %v14374_v27, %v16481_v8  ;;  %v21407_v8 = vld [vmem:[#allocation13_spill] sm:$0xff]  ;;  %v21417_v1 = vld [vmem:[#allocation43_spill] sm:$0xff]  ;;  %v21418_v27 = vld [vmem:[#allocation44_spill] sm:$0xff] }
 0x5c9   :  { %14377 = vrcp.f32 %v2438_v4  ;;  %v21421_v4 = vld [vmem:[#allocation47_spill] sm:$0xff] }
 0x5ca   :  { %v2450_v9 = vmul.f32 %v14376_v43, %v11620_v18  ;;  %v21419_v18 = vld [vmem:[#allocation45_spill] sm:$0xff]  ;;  %v21420_v43 = vld [vmem:[#allocation46_spill] sm:$0xff] }
 0x5cc   :  { %v16915_v28 = vadd.f32 %v2450_v9, %v2449_v55  ;;  %v21422_v9 = vld [vmem:[#allocation48_spill] sm:$0xff]  ;;  %v21423_v55 = vld [vmem:[#allocation49_spill] sm:$0xff] }
 0x5ce   :  { %14379 = vtanh.f32 %v16915_v28 }
 0x5d6   :  { %v14378_v30 = vpop.eup %14377 }
 0x5db   :  { %v14380_v39 = vpop.eup %14379 }
 0x5dc   :  { %v2453_v37 = vmul.f32 %v14380_v39, %v14378_v30  ;;  %v21424_v30 = vld [vmem:[#allocation50_spill] sm:$0xff] }
 0x5de   :  { %v2576_v12 = vpack.c.bf16 %v2453_v37, %v2453_v37 }
 0x5e0   :  { %2610 = vmatmul.mubr.bf16.vlgmr.msra.gmra.mxu0 %v2576_v12  ;;  %2651 = vmatmul.mubr.bf16.vlgmr.msra.gmra.mxu1 %v2576_v12  ;;  %v21425_v12 = vld [vmem:[#allocation8_spill] sm:$0xff] }
 0x5e1   :  { %2660 = vmatpush1.bf16.msra.mxu0 %v16487_v63  ;;  %2701 = vmatpush1.bf16.msra.mxu1 %v16493_v11 }
 0x5e2   :  { %2661 = vmatprep.subr.bf16.mxu0 %v16499_v19  ;;  %2702 = vmatprep.subr.bf16.mxu1 %v16505_v20 }
 0x5e3   :  { %2691 = vmatprep.mubr.bf16.mxu0 %v21154_v53  ;;  %2732 = vmatprep.mubr.bf16.mxu1 %v21154_v53 }
 0x5e5   :  { %2662 = vmatpush1.bf16.msra.mxu0 %v16513_v52  ;;  %2703 = vmatpush1.bf16.msra.mxu1 %v16519_v2 }
 0x5e6   :  { %2663 = vmatprep.subr.bf16.mxu0 %v21407_v8  ;;  %2704 = vmatprep.subr.bf16.mxu1 %v21408_v34 }
 0x5e9   :  { %2664 = vmatpush1.bf16.msra.mxu0 %v21409_v44  ;;  %2705 = vmatpush1.bf16.msra.mxu1 %v21410_v61 }
 0x5ea   :  { %2665 = vmatprep.subr.bf16.mxu0 %v21411_v0  ;;  %2706 = vmatprep.subr.bf16.mxu1 %v21412_v62 }
 0x5ed   :  { %2666 = vmatpush1.bf16.msra.mxu0 %v21413_v16  ;;  %2707 = vmatpush1.bf16.msra.mxu1 %v21414_v5 }
 0x5ee   :  { %2667 = vmatprep.subr.bf16.mxu0 %v21415_v47  ;;  %2708 = vmatprep.subr.bf16.mxu1 %v21416_v60  ;;  %v21426_v60 = vld [vmem:[#allocation24_spill] sm:$0xff] }
 0x5ef   :  { %v327_v47 = vadd.f32 %v21426_v60, %v21425_v12  ;;  %v21433_v60 = vld [vmem:[#allocation55_spill] sm:$0xff]  ;;  %v21434_v12 = vld [vmem:[#allocation56_spill] sm:$0xff] }
 0x5f1   :  { %2668 = vmatpush1.bf16.msra.mxu0 %v21417_v1  ;;  %2709 = vmatpush1.bf16.msra.mxu1 %v21418_v27  ;;  %v21427_v1 = vld [vmem:[#allocation51_spill] sm:$0xff]  ;;  %v21428_v27 = vld [vmem:[#allocation52_spill] sm:$0xff] }
 0x5f2   :  { %2669 = vmatprep.subr.bf16.mxu0 %v21419_v18  ;;  %2710 = vmatprep.subr.bf16.mxu1 %v21420_v43  ;;  %v21429_v18 = vld [vmem:[#allocation22_spill] sm:$0xff]  ;;  %v21430_v43 = vld [vmem:[#allocation23_spill] sm:$0xff] }
 0x5f5   :  { %2670 = vmatpush1.bf16.msra.mxu0 %v21421_v4  ;;  %2711 = vmatpush1.bf16.msra.mxu1 %v21422_v9  ;;  %v21431_v4 = vld [vmem:[#allocation53_spill] sm:$0xff]  ;;  %v21432_v9 = vld [vmem:[#allocation54_spill] sm:$0xff] }
 0x5f6   :  { %2671 = vmatprep.subr.bf16.mxu0 %v21423_v55  ;;  %2712 = vmatprep.subr.bf16.mxu1 %v21424_v30 }
 0x5f8   :  { %v2493_v39 = vpop.f32.mrf.mxu0  ;;  %v2534_v37 = vpop.f32.mrf.mxu1 }
 0x5f9   :  { %2672 = vmatpush1.bf16.msra.mxu0 %v21427_v1  ;;  %2713 = vmatpush1.bf16.msra.mxu1 %v21428_v27  ;;  %v2541_v5 = vadd.f32 %v2493_v39, %v21429_v18  ;;  %v2543_v16 = vadd.f32 %v2534_v37, %v21430_v43  ;;  %v21435_v39 = vld [vmem:[#allocation57_spill] sm:$0xff]  ;;  %v21436_v37 = vld [vmem:[#allocation58_spill] sm:$0xff] }
 0x5fa   :  { %2673 = vmatprep.subr.bf16.mxu0 %v21431_v4  ;;  %2714 = vmatprep.subr.bf16.mxu1 %v21432_v9  ;;  %v2495_v55 = vpop.f32.mrf.mxu0  ;;  %v2536_v62 = vpop.f32.mrf.mxu1 }
 0x5fb   :  { %v11621_v30 = vmul.f32 -1.442695, %v2541_v5  ;;  %v11623_v0 = vmul.f32 -1.442695, %v2543_v16  ;;  %v2542_v61 = vadd.f32 %v2495_v55, %v327_v47  ;;  %v21439_v16 = vld [vmem:[#allocation61_spill] sm:$0xff]  ;;  %v21440_v5 = vld [vmem:[#allocation62_spill] sm:$0xff] }
 0x5fc   :  { %v2497_v44 = vpop.f32.mrf.mxu0  ;;  %v2538_v34 = vpop.f32.mrf.mxu1  ;;  %v21444_v55 = vld [vmem:[#allocation64_spill] sm:$0xff] }
 0x5fd   :  { %14381 = vpow2.f32 %v11621_v30  ;;  %2674 = vmatpush1.bf16.msra.mxu0 %v21433_v60  ;;  %2715 = vmatpush1.bf16.msra.mxu1 %v21434_v12  ;;  %v11622_v27 = vmul.f32 -1.442695, %v2542_v61  ;;  %v21437_v44 = vld [vmem:[#allocation59_spill] sm:$0xff]  ;;  %v21438_v34 = vld [vmem:[#allocation60_spill] sm:$0xff]  ;;  %v21441_v61 = vld [vmem:[#allocation9_spill] sm:$0xff] }
 0x5fe   :  { %14383 = vpow2.f32 %v11623_v0  ;;  %v2498_v18 = vpop.f32.mrf.mxu0  ;;  %v2539_v43 = vpop.f32.mrf.mxu1  ;;  %2781 = vmatprep.subr.bf16.mxu0 %v21435_v39  ;;  %2822 = vmatprep.subr.bf16.mxu1 %v21436_v37  ;;  %v21442_v0 = vld [vmem:[#allocation25_spill] sm:$0xff]  ;;  %v21446_v30 = vld [vmem:[#allocation66_spill] sm:$0xff] }
 0x5ff   :  { %14385 = vpow2.f32 %v11622_v27  ;;  %v400_v47 = vadd.f32 %v21442_v0, %v21441_v61  ;;  %v21443_v27 = vld [vmem:[#allocation63_spill] sm:$0xff] }
 0x600   :  { %2692 = vmatmul.mubr.bf16.vlgmr.msra.gmra.mxu0 %v16872_v33  ;;  %2733 = vmatmul.mubr.bf16.vlgmr.msra.gmra.mxu1 %v16872_v33  ;;  %v21445_v33 = vld [vmem:[#allocation65_spill] sm:$0xff]  ;;  %v21447_v43 = vld [vmem:[#allocation67_spill] sm:$0xff] }
 0x601   :  { %2782 = vmatpush1.bf16.msra.mxu0 %v21437_v44  ;;  %2823 = vmatpush1.bf16.msra.mxu1 %v21438_v34  ;;  %v2544_v18 = vadd.f32 %v2536_v62, %v400_v47  ;;  %v21449_v34 = vld [vmem:[#allocation69_spill] sm:$0xff]  ;;  %v21450_v44 = vld [vmem:[#allocation70_spill] sm:$0xff] }
 0x602   :  { %2783 = vmatprep.subr.bf16.mxu0 %v21439_v16  ;;  %2824 = vmatprep.subr.bf16.mxu1 %v21440_v5  ;;  %v21448_v16 = vld [vmem:[#allocation68_spill] sm:$0xff]  ;;  %v21453_v62 = vld [vmem:[#allocation73_spill] sm:$0xff]  ;;  %v21454_v47 = vld [vmem:[#allocation74_spill] sm:$0xff] }
 0x603   :  { %2813 = vmatprep.mubr.bf16.mxu0 %v21154_v53  ;;  %2854 = vmatprep.mubr.bf16.mxu1 %v21154_v53  ;;  %v11624_v0 = vmul.f32 -1.442695, %v2544_v18  ;;  %v21457_v18 = vld [vmem:[#allocation77_spill] sm:$0xff] }
 0x605   :  { %2784 = vmatpush1.bf16.msra.mxu0 %v21443_v27  ;;  %2825 = vmatpush1.bf16.msra.mxu1 %v21444_v55  ;;  %v21451_v55 = vld [vmem:[#allocation71_spill] sm:$0xff] }
 0x606   :  { %2785 = vmatprep.subr.bf16.mxu0 %v21445_v33  ;;  %2826 = vmatprep.subr.bf16.mxu1 %v21446_v30  ;;  %v21452_v33 = vld [vmem:[#allocation72_spill] sm:$0xff] }
 0x609   :  { %2786 = vmatpush1.bf16.msra.mxu0 %v21447_v43  ;;  %2827 = vmatpush1.bf16.msra.mxu1 %v21448_v16 }
 0x60a   :  { %v14382_v5 = vpop.eup %14381  ;;  %2787 = vmatprep.subr.bf16.mxu0 %v21449_v34  ;;  %2828 = vmatprep.subr.bf16.mxu1 %v21450_v44  ;;  %v21455_v34 = vld [vmem:[#allocation75_spill] sm:$0xff]  ;;  %v21456_v44 = vld [vmem:[#allocation76_spill] sm:$0xff] }
 0x60b   :  { %v14384_v37 = vpop.eup %14383  ;;  %v2557_v30 = vadd.f32 1.0, %v14382_v5  ;;  %v21461_v5 = vld [vmem:[#allocation81_spill] sm:$0xff] }
 0x60c   :  { %v14386_v61 = vpop.eup %14385  ;;  %v2559_v27 = vadd.f32 1.0, %v14384_v37  ;;  %v21458_v37 = vld [vmem:[#allocation78_spill] sm:$0xff] }
 0x60d   :  { %v2558_v39 = vadd.f32 1.0, %v14386_v61  ;;  %2788 = vmatpush1.bf16.msra.mxu0 %v21451_v55  ;;  %2829 = vmatpush1.bf16.msra.mxu1 %v21452_v33  ;;  %v21459_v61 = vld [vmem:[#allocation79_spill] sm:$0xff]  ;;  %v21460_v33 = vld [vmem:[#allocation80_spill] sm:$0xff] }
 0x60e   :  { %14387 = vrcp.f32 %v2559_v27  ;;  %2789 = vmatprep.subr.bf16.mxu0 %v21453_v62  ;;  %2830 = vmatprep.subr.bf16.mxu1 %v21454_v47  ;;  %v21462_v27 = vld [vmem:[#allocation82_spill] sm:$0xff]  ;;  %v21463_v47 = vld [vmem:[#allocation83_spill] sm:$0xff] }
 0x60f   :  { %14389 = vpow2.f32 %v11624_v0  ;;  %v21465_v0 = vld [vmem:[#allocation85_spill] sm:$0xff]  ;;  %v21467_v62 = vld [vmem:[#allocation87_spill] sm:$0xff] }
 0x610   :  { %14391 = vrcp.f32 %v2558_v39  ;;  %v21464_v39 = vld [vmem:[#allocation84_spill] sm:$0xff] }
 0x611   :  { %2790 = vmatpush1.bf16.msra.mxu0 %v21455_v34  ;;  %2831 = vmatpush1.bf16.msra.mxu1 %v21456_v44  ;;  %14393 = vrcp.f32 %v2557_v30  ;;  %v21466_v44 = vld [vmem:[#allocation86_spill] sm:$0xff] }
 0x612   :  { %2791 = vmatprep.subr.bf16.mxu0 %v21457_v18  ;;  %2832 = vmatprep.subr.bf16.mxu1 %v21458_v37 }
 0x615   :  { %2792 = vmatpush1.bf16.msra.mxu0 %v21459_v61  ;;  %2833 = vmatpush1.bf16.msra.mxu1 %v21460_v33  ;;  %v21468_v61 = vld [vmem:[#allocation88_spill] sm:$0xff] }
 0x616   :  { %2793 = vmatprep.subr.bf16.mxu0 %v21461_v5  ;;  %2834 = vmatprep.subr.bf16.mxu1 %v21462_v27  ;;  %v16995_v27 = vld [vmem:[%s20694_s1 + $0x5e4] ss:$16 sps:$4 sm:$0xff]  }
 0x617   :  { %21469 = vst [vmem:[#allocation89_spill] sm:$0xff] %v16995_v27 }
 0x619   :  { %2794 = vmatpush1.bf16.msra.mxu0 %v21463_v47  ;;  %2835 = vmatpush1.bf16.msra.mxu1 %v21464_v39 }
 0x61a   :  { %2795 = vmatprep.subr.bf16.mxu0 %v21465_v0  ;;  %2836 = vmatprep.subr.bf16.mxu1 %v21466_v44  ;;  %v17001_v44 = vld [vmem:[%s20694_s1 + $0x5ec] ss:$16 sps:$4 sm:$0xff]  }
 0x61b   :  { %v14388_v30 = vpop.eup %14387 }
 0x61c   :  { %v14390_v18 = vpop.eup %14389  ;;  %v2569_v34 = vmul.f32 2.0, %v14388_v30 }
 0x61d   :  { %v14392_v37 = vpop.eup %14391  ;;  %2796 = vmatpush1.bf16.msra.mxu0 %v21467_v62  ;;  %2837 = vmatpush1.bf16.msra.mxu1 %v21468_v61  ;;  %v2560_v0 = vadd.f32 1.0, %v14390_v18 }
 0x61e   :  { %v11625_v33 = vadd.f32 -1.0, %v2569_v34  ;;  %2899 = vmatprep.subr.bf16.mxu0 %v16995_v27  ;;  %2940 = vmatprep.subr.bf16.mxu1 %v17001_v44  ;;  %v14394_v30 = vpop.eup %14393  ;;  %v2571_v61 = vmul.f32 %v14392_v37, %v16869_v3 }
 0x61f   :  { %14395 = vrcp.f32 %v2560_v0 }
 0x620   :  { %v2572_v62 = vmul.f32 %v14394_v30, %v11625_v33 }
 0x622   :  { %v17005_v34 = vadd.f32 %v2572_v62, %v2571_v61 }
 0x624   :  { %14397 = vtanh.f32 %v17005_v34 }
 0x62c   :  { %v14396_v39 = vpop.eup %14395 }
 0x631   :  { %v14398_v47 = vpop.eup %14397 }
 0x632   :  { %v2575_v27 = vmul.f32 %v14398_v47, %v14396_v39 }
 0x634   :  { %v17008_v5 = vpack.c.bf16 %v2575_v27, %v2575_v27 }
 0x636   :  { %2814 = vmatmul.mubr.bf16.vlgmr.msra.gmra.mxu0 %v17008_v5  ;;  %2855 = vmatmul.mubr.bf16.vlgmr.msra.gmra.mxu1 %v17008_v5 }
 0x637   :  { %2900 = vmatpush1.bf16.msra.mxu0 %v16285_v22  ;;  %2941 = vmatpush1.bf16.msra.mxu1 %v16291_v7  ;;  %v21470_v22 = vld [vmem:[#allocation10_spill] sm:$0xff]  ;;  %v21471_v7 = vld [vmem:[#allocation11_spill] sm:$0xff] }
 0x638   :  { %2901 = vmatprep.subr.bf16.mxu0 %v16297_v42  ;;  %2942 = vmatprep.subr.bf16.mxu1 %v16303_v21  ;;  %v21472_v42 = vld [vmem:[#allocation12_spill] sm:$0xff] }
 0x639   :  { %2931 = vmatprep.mubr.bf16.mxu0 %v21154_v53  ;;  %2972 = vmatprep.mubr.bf16.mxu1 %v21154_v53 }
 0x63b   :  { %2902 = vmatpush1.bf16.msra.mxu0 %v16311_v40  ;;  %2943 = vmatpush1.bf16.msra.mxu1 %v16317_v50 }
 0x63c   :  { %2903 = vmatprep.subr.bf16.mxu0 %v16323_v49  ;;  %2944 = vmatprep.subr.bf16.mxu1 %v16329_v35 }
 0x63f   :  { %2904 = vmatpush1.bf16.msra.mxu0 %v16335_v31  ;;  %2945 = vmatpush1.bf16.msra.mxu1 %v16341_v36 }
 0x640   :  { %2905 = vmatprep.subr.bf16.mxu0 %v16347_v41  ;;  %2946 = vmatprep.subr.bf16.mxu1 %v16353_v23 }
 0x643   :  { %2906 = vmatpush1.bf16.msra.mxu0 %v16359_v32  ;;  %2947 = vmatpush1.bf16.msra.mxu1 %v16365_v26 }
 0x644   :  { %2907 = vmatprep.subr.bf16.mxu0 %v16371_v59  ;;  %2948 = vmatprep.subr.bf16.mxu1 %v16377_v56 }
 0x647   :  { %2908 = vmatpush1.bf16.msra.mxu0 %v16383_v54  ;;  %2949 = vmatpush1.bf16.msra.mxu1 %v16389_v24 }
 0x648   :  { %2909 = vmatprep.subr.bf16.mxu0 %v16395_v25  ;;  %2950 = vmatprep.subr.bf16.mxu1 %v16401_v45 }
 0x64b   :  { %2910 = vmatpush1.bf16.msra.mxu0 %v16407_v10  ;;  %2951 = vmatpush1.bf16.msra.mxu1 %v16413_v48 }
 0x64c   :  { %2911 = vmatprep.subr.bf16.mxu0 %v16419_v51  ;;  %2952 = vmatprep.subr.bf16.mxu1 %v16425_v57 }
 0x64f   :  { %2912 = vmatpush1.bf16.msra.mxu0 %v16431_v58  ;;  %2953 = vmatpush1.bf16.msra.mxu1 %v16437_v13 }
 0x650   :  { %2913 = vmatprep.subr.bf16.mxu0 %v16443_v14  ;;  %2954 = vmatprep.subr.bf16.mxu1 %v16449_v15 }
 0x653   :  { %2914 = vmatpush1.bf16.msra.mxu0 %v16455_v17  ;;  %2955 = vmatpush1.bf16.msra.mxu1 %v21470_v22 }
 0x654   :  { %2981 = vmatprep.subr.bf16.mxu0 %v21471_v7  ;;  %3022 = vmatprep.subr.bf16.mxu1 %v21472_v42 }
 0x6a0   :  { %v2611_v21 = vpop.f32.mrf.mxu0  ;;  %v2652_v40 = vpop.f32.mrf.mxu1 }
 0x6a2   :  { %v2613_v50 = vpop.f32.mrf.mxu0  ;;  %v2654_v49 = vpop.f32.mrf.mxu1 }
 0x6a4   :  { %v2615_v35 = vpop.f32.mrf.mxu0  ;;  %v2656_v31 = vpop.f32.mrf.mxu1 }
 0x6a6   :  { %v2616_v36 = vpop.f32.mrf.mxu0  ;;  %v2657_v41 = vpop.f32.mrf.mxu1 }
 0x6a7   :  { %v21473_v36 = vld [vmem:[#allocation26_spill] sm:$0xff] }
 0x6c0   :  { %v2693_v23 = vpop.f32.mrf.mxu0  ;;  %v2734_v32 = vpop.f32.mrf.mxu1 }
 0x6c1   :  { %v2694_v26 = vadd.f32 %v2693_v23, %v2611_v21  ;;  %v2735_v59 = vadd.f32 %v2734_v32, %v2652_v40  ;;  %v21474_v23 = vld [vmem:[#allocation27_spill] sm:$0xff] }
 0x6c2   :  { %v2695_v56 = vpop.f32.mrf.mxu0  ;;  %v2736_v54 = vpop.f32.mrf.mxu1 }
 0x6c3   :  { %v2741_v24 = vadd.f32 %v2694_v26, %v16011_v38  ;;  %v2743_v25 = vadd.f32 %v2735_v59, %v16014_v46  ;;  %v2696_v45 = vadd.f32 %v2695_v56, %v2613_v50  ;;  %v2737_v17 = vadd.f32 %v2736_v54, %v2654_v49 }
 0x6c4   :  { %v2697_v10 = vpop.f32.mrf.mxu0  ;;  %v2738_v48 = vpop.f32.mrf.mxu1 }
 0x6c5   :  { %v11626_v51 = vmul.f32 -1.442695, %v2741_v24  ;;  %v11628_v57 = vmul.f32 -1.442695, %v2743_v25  ;;  %v2742_v58 = vadd.f32 %v2696_v45, %v16021_v6  ;;  %v2744_v3 = vadd.f32 %v2737_v17, %v16041_v29  ;;  %v21475_v24 = vld [vmem:[#allocation28_spill] sm:$0xff] }
 0x6c6   :  { %v2698_v13 = vpop.f32.mrf.mxu0  ;;  %v2739_v14 = vpop.f32.mrf.mxu1 }
 0x6c7   :  { %14399 = vpow2.f32 %v11626_v51  ;;  %v11627_v15 = vmul.f32 -1.442695, %v2742_v58  ;;  %v11629_v47 = vmul.f32 -1.442695, %v2744_v3  ;;  %v21477_v3 = vld [vmem:[#allocation35_spill] sm:$0xff] }
 0x6c8   :  { %14401 = vpow2.f32 %v11628_v57 }
 0x6c9   :  { %14403 = vpow2.f32 %v11627_v15  ;;  %v21476_v15 = vld [vmem:[#allocation34_spill] sm:$0xff] }
 0x6d4   :  { %v14400_v33 = vpop.eup %14399 }
 0x6d5   :  { %v14402_v62 = vpop.eup %14401  ;;  %v2757_v27 = vadd.f32 1.0, %v14400_v33  ;;  %v21479_v33 = vld [vmem:[#allocation37_spill] sm:$0xff] }
 0x6d6   :  { %v14404_v18 = vpop.eup %14403  ;;  %v2759_v37 = vadd.f32 1.0, %v14402_v62  ;;  %v21480_v62 = vld [vmem:[#allocation38_spill] sm:$0xff] }
 0x6d7   :  { %v2758_v61 = vadd.f32 1.0, %v14404_v18  ;;  %v21483_v18 = vld [vmem:[#allocation41_spill] sm:$0xff] }
 0x6d8   :  { %14405 = vrcp.f32 %v2759_v37  ;;  %v21484_v37 = vld [vmem:[#allocation42_spill] sm:$0xff] }
 0x6d9   :  { %14407 = vpow2.f32 %v11629_v47 }
 0x6da   :  { %14409 = vrcp.f32 %v2758_v61  ;;  %v21485_v61 = vld [vmem:[#allocation29_spill] sm:$0xff] }
 0x6db   :  { %14411 = vrcp.f32 %v2757_v27 }
 0x6e5   :  { %v14406_v39 = vpop.eup %14405 }
 0x6e6   :  { %v14408_v0 = vpop.eup %14407  ;;  %v2769_v30 = vmul.f32 2.0, %v14406_v39  ;;  %v21486_v39 = vld [vmem:[#allocation43_spill] sm:$0xff] }
 0x6e7   :  { %v14410_v22 = vpop.eup %14409  ;;  %v2760_v21 = vadd.f32 1.0, %v14408_v0  ;;  %v21487_v0 = vld [vmem:[#allocation44_spill] sm:$0xff] }
 0x6e8   :  { %v11630_v7 = vadd.f32 -1.0, %v2769_v30  ;;  %v14412_v42 = vpop.eup %14411  ;;  %v2771_v50 = vmul.f32 %v14410_v22, %v16915_v28  ;;  %v21488_v30 = vld [vmem:[#allocation45_spill] sm:$0xff]  ;;  %v21489_v22 = vld [vmem:[#allocation46_spill] sm:$0xff] }
 0x6e9   :  { %14413 = vrcp.f32 %v2760_v21  ;;  %v21491_v21 = vld [vmem:[#allocation48_spill] sm:$0xff] }
 0x6ea   :  { %v2772_v40 = vmul.f32 %v14412_v42, %v11630_v7  ;;  %v21490_v42 = vld [vmem:[#allocation47_spill] sm:$0xff] }
 0x6ec   :  { %v17051_v49 = vadd.f32 %v2772_v40, %v2771_v50  ;;  %v21492_v40 = vld [vmem:[#allocation49_spill] sm:$0xff]  ;;  %v21493_v50 = vld [vmem:[#allocation50_spill] sm:$0xff] }
 0x6ee   :  { %14415 = vtanh.f32 %v17051_v49 }
 0x6f6   :  { %v2815_v35 = vpop.f32.mrf.mxu0  ;;  %v2856_v31 = vpop.f32.mrf.mxu1 }
 0x6f7   :  { %v2863_v41 = vadd.f32 %v2815_v35, %v21473_v36  ;;  %v2865_v32 = vadd.f32 %v2856_v31, %v21474_v23  ;;  %v14414_v45 = vpop.eup %14413  ;;  %v21494_v31 = vld [vmem:[#allocation52_spill] sm:$0xff] }
 0x6f8   :  { %v2817_v26 = vpop.f32.mrf.mxu0  ;;  %v2858_v59 = vpop.f32.mrf.mxu1 }
 0x6f9   :  { %v11631_v56 = vmul.f32 -1.442695, %v2863_v41  ;;  %v11633_v54 = vmul.f32 -1.442695, %v2865_v32  ;;  %v2864_v25 = vadd.f32 %v2817_v26, %v21475_v24  ;;  %v2866_v27 = vadd.f32 %v2858_v59, %v21485_v61  ;;  %v21501_v24 = vld [vmem:[#allocation63_spill] sm:$0xff] }
 0x6fa   :  { %v2819_v10 = vpop.f32.mrf.mxu0  ;;  %v2860_v28 = vpop.f32.mrf.mxu1  ;;  %v17145_v61 = vld [vmem:[%s20694_s1 + $0x5e8] ss:$16 sps:$4 sm:$0xff]  }
 0x6fb   :  { %v14416_v48 = vpop.eup %14415  ;;  %14417 = vpow2.f32 %v11631_v56  ;;  %v11632_v51 = vmul.f32 -1.442695, %v2864_v25  ;;  %v11634_v7 = vmul.f32 -1.442695, %v2866_v27  ;;  %v21495_v56 = vld [vmem:[#allocation57_spill] sm:$0xff]  ;;  %v21502_v25 = vld [vmem:[#allocation64_spill] sm:$0xff] }
 0x6fc   :  { %14419 = vpow2.f32 %v11633_v54  ;;  %v2775_v57 = vmul.f32 %v14416_v48, %v14414_v45  ;;  %v2820_v58 = vpop.f32.mrf.mxu0  ;;  %v2861_v13 = vpop.f32.mrf.mxu1  ;;  %v21503_v45 = vld [vmem:[#allocation65_spill] sm:$0xff]  ;;  %v21506_v48 = vld [vmem:[#allocation70_spill] sm:$0xff] }
 0x6fd   :  { %14421 = vpow2.f32 %v11632_v51  ;;  %v21505_v28 = vld [vmem:[#allocation69_spill] sm:$0xff]  ;;  %v21507_v51 = vld [vmem:[#allocation72_spill] sm:$0xff]  ;;  %v21509_v58 = vld [vmem:[#allocation74_spill] sm:$0xff] }
 0x6fe   :  { %v2898_v14 = vpack.c.bf16 %v2775_v57, %v2775_v57  ;;  %v21508_v57 = vld [vmem:[#allocation73_spill] sm:$0xff]  ;;  %v21510_v13 = vld [vmem:[#allocation75_spill] sm:$0xff]  ;;  %v17151_v27 = vld [vmem:[%s20694_s1 + $0x5c4] ss:$16 sps:$4 sm:$0xff]  }
 0x700   :  { %2932 = vmatmul.mubr.bf16.vlgmr.msra.gmra.mxu0 %v2898_v14  ;;  %2973 = vmatmul.mubr.bf16.vlgmr.msra.gmra.mxu1 %v2898_v14  ;;  %v21513_v14 = vld [vmem:[#allocation78_spill] sm:$0xff] }
 0x701   :  { %2982 = vmatpush1.bf16.msra.mxu0 %v16487_v63  ;;  %3023 = vmatpush1.bf16.msra.mxu1 %v16493_v11  ;;  %v21478_v11 = vld [vmem:[#allocation36_spill] sm:$0xff] }
 0x702   :  { %2983 = vmatprep.subr.bf16.mxu0 %v16499_v19  ;;  %3024 = vmatprep.subr.bf16.mxu1 %v16505_v20 }
 0x703   :  { %3013 = vmatprep.mubr.bf16.mxu0 %v21154_v53  ;;  %3054 = vmatprep.mubr.bf16.mxu1 %v21154_v53 }
 0x705   :  { %2984 = vmatpush1.bf16.msra.mxu0 %v16513_v52  ;;  %3025 = vmatpush1.bf16.msra.mxu1 %v16519_v2  ;;  %v21481_v2 = vld [vmem:[#allocation39_spill] sm:$0xff] }
 0x706   :  { %2985 = vmatprep.subr.bf16.mxu0 %v21407_v8  ;;  %3026 = vmatprep.subr.bf16.mxu1 %v21476_v15  ;;  %v21482_v8 = vld [vmem:[#allocation40_spill] sm:$0xff]  ;;  %v21514_v15 = vld [vmem:[#allocation79_spill] sm:$0xff] }
 0x708   :  { %v14418_v17 = vpop.eup %14417 }
 0x709   :  { %v14420_v63 = vpop.eup %14419  ;;  %2986 = vmatpush1.bf16.msra.mxu0 %v21477_v3  ;;  %3027 = vmatpush1.bf16.msra.mxu1 %v21478_v11  ;;  %v2879_v52 = vadd.f32 1.0, %v14418_v17  ;;  %v21515_v17 = vld [vmem:[#allocation80_spill] sm:$0xff] }
 0x70a   :  { %v14422_v19 = vpop.eup %14421  ;;  %v2881_v20 = vadd.f32 1.0, %v14420_v63  ;;  %2987 = vmatprep.subr.bf16.mxu0 %v21479_v33  ;;  %3028 = vmatprep.subr.bf16.mxu1 %v21480_v62  ;;  %v21516_v63 = vld [vmem:[#allocation81_spill] sm:$0xff]  ;;  %v21521_v62 = vld [vmem:[#allocation86_spill] sm:$0xff] }
 0x70b   :  { %v2880_v47 = vadd.f32 1.0, %v14422_v19  ;;  %v21518_v19 = vld [vmem:[#allocation83_spill] sm:$0xff]  ;;  %v21520_v33 = vld [vmem:[#allocation85_spill] sm:$0xff] }
 0x70c   :  { %14423 = vrcp.f32 %v2881_v20  ;;  %v21519_v20 = vld [vmem:[#allocation84_spill] sm:$0xff] }
 0x70d   :  { %2988 = vmatpush1.bf16.msra.mxu0 %v21481_v2  ;;  %3029 = vmatpush1.bf16.msra.mxu1 %v21482_v8  ;;  %14425 = vrcp.f32 %v2880_v47  ;;  %v21523_v2 = vld [vmem:[#allocation88_spill] sm:$0xff] }
 0x70e   :  { %2989 = vmatprep.subr.bf16.mxu0 %v21483_v18  ;;  %3030 = vmatprep.subr.bf16.mxu1 %v21484_v37  ;;  %14427 = vrcp.f32 %v2879_v52  ;;  %v21522_v52 = vld [vmem:[#allocation87_spill] sm:$0xff]  ;;  %v21524_v18 = vld [vmem:[#allocation89_spill] sm:$0xff]  ;;  %v17139_v37 = vld [vmem:[%s20694_s1 + $0x5e0] ss:$16 sps:$4 sm:$0xff]  }
 0x70f   :  { %14429 = vpow2.f32 %v11634_v7  ;;  %v17183_v7 = vld [vmem:[%s20694_s1 + $0x5ac] ss:$16 sps:$4 sm:$0xff]  }
 0x711   :  { %2990 = vmatpush1.bf16.msra.mxu0 %v21486_v39  ;;  %3031 = vmatpush1.bf16.msra.mxu1 %v21487_v0  ;;  %v17157_v39 = vld [vmem:[%s20694_s1 + $0x5cc] ss:$16 sps:$4 sm:$0xff]   ;;  %v17165_v0 = vld [vmem:[%s20694_s1 + $0x5c0] ss:$16 sps:$4 sm:$0xff]  }
 0x712   :  { %2991 = vmatprep.subr.bf16.mxu0 %v21488_v30  ;;  %3032 = vmatprep.subr.bf16.mxu1 %v21489_v22  ;;  %v17171_v30 = vld [vmem:[%s20694_s1 + $0x5c8] ss:$16 sps:$4 sm:$0xff]   ;;  %v17177_v22 = vld [vmem:[%s20694_s1 + $0x5a4] ss:$16 sps:$4 sm:$0xff]  }
 0x715   :  { %2992 = vmatpush1.bf16.msra.mxu0 %v21490_v42  ;;  %3033 = vmatpush1.bf16.msra.mxu1 %v21491_v21  ;;  %v17189_v42 = vld [vmem:[%s20694_s1 + $0x5a0] ss:$16 sps:$4 sm:$0xff]   ;;  %v17195_v21 = vld [vmem:[%s20694_s1 + $0x5a8] ss:$16 sps:$4 sm:$0xff]  }
 0x716   :  { %2993 = vmatprep.subr.bf16.mxu0 %v21492_v40  ;;  %3034 = vmatprep.subr.bf16.mxu1 %v21493_v50  ;;  %v17201_v40 = vld [vmem:[%s20694_s1 + $0x584] ss:$16 sps:$4 sm:$0xff]   ;;  %v17207_v50 = vld [vmem:[%s20694_s1 + $0x58c] ss:$16 sps:$4 sm:$0xff]  }
 0x719   :  { %v14424_v35 = vpop.eup %14423  ;;  %2994 = vmatpush1.bf16.msra.mxu0 %v21427_v1  ;;  %3035 = vmatpush1.bf16.msra.mxu1 %v21494_v31  ;;  %v21496_v1 = vld [vmem:[#allocation58_spill] sm:$0xff]  ;;  %v17219_v31 = vld [vmem:[%s20694_s1 + $0x588] ss:$16 sps:$4 sm:$0xff]  }
 0x71a   :  { %v2891_v36 = vmul.f32 2.0, %v14424_v35  ;;  %2995 = vmatprep.subr.bf16.mxu0 %v21431_v4  ;;  %3036 = vmatprep.subr.bf16.mxu1 %v21432_v9  ;;  %v14426_v41 = vpop.eup %14425  ;;  %v21497_v4 = vld [vmem:[#allocation59_spill] sm:$0xff]  ;;  %v21498_v9 = vld [vmem:[#allocation60_spill] sm:$0xff] }
 0x71b   :  { %v14428_v32 = vpop.eup %14427  ;;  %v2893_v59 = vmul.f32 %v14426_v41, %v17005_v34  ;;  %v17213_v35 = vld [vmem:[%s20694_s1 + $0x580] ss:$16 sps:$4 sm:$0xff]   ;;  %v17231_v41 = vld [vmem:[%s20694_s1 + $0x56c] ss:$16 sps:$4 sm:$0xff]  }
 0x71c   :  { %v11635_v23 = vadd.f32 -1.0, %v2891_v36  ;;  %v14430_v34 = vpop.eup %14429  ;;  %v17225_v36 = vld [vmem:[%s20694_s1 + $0x564] ss:$16 sps:$4 sm:$0xff]  }
 0x71d   :  { %2996 = vmatpush1.bf16.msra.mxu0 %v21433_v60  ;;  %3037 = vmatpush1.bf16.msra.mxu1 %v21434_v12  ;;  %v21499_v60 = vld [vmem:[#allocation61_spill] sm:$0xff]  ;;  %v21500_v12 = vld [vmem:[#allocation62_spill] sm:$0xff]  ;;  %v2882_v10 = vadd.f32 1.0, %v14430_v34 }
 0x71e   :  { %v2894_v26 = vmul.f32 %v14428_v32, %v11635_v23  ;;  %3103 = vmatprep.subr.bf16.mxu0 %v21495_v56  ;;  %3144 = vmatprep.subr.bf16.mxu1 %v21496_v1  ;;  %v17237_v23 = vld [vmem:[%s20694_s1 + $0x560] ss:$16 sps:$4 sm:$0xff]   ;;  %v17243_v32 = vld [vmem:[%s20694_s1 + $0x568] ss:$16 sps:$4 sm:$0xff]   ;;  %v17297_v34 = vld [vmem:[%s20694_s1 + $0x504] ss:$16 sps:$4 sm:$0xff]  }
 0x71f   :  { %v17261_v56 = vld [vmem:[%s20694_s1 + $0x540] ss:$16 sps:$4 sm:$0xff]   ;;  %v17267_v1 = vld [vmem:[%s20694_s1 + $0x548] ss:$16 sps:$4 sm:$0xff]  }
 0x720   :  { %v17093_v54 = vadd.f32 %v2894_v26, %v2893_v59  ;;  %3014 = vmatmul.mubr.bf16.vlgmr.msra.gmra.mxu0 %v17008_v5  ;;  %3055 = vmatmul.mubr.bf16.vlgmr.msra.gmra.mxu1 %v17008_v5  ;;  %v21504_v5 = vld [vmem:[#allocation66_spill] sm:$0xff]  ;;  %v17255_v59 = vld [vmem:[%s20694_s1 + $0x54c] ss:$16 sps:$4 sm:$0xff]  }
 0x721   :  { %3104 = vmatpush1.bf16.msra.mxu0 %v21497_v4  ;;  %3145 = vmatpush1.bf16.msra.mxu1 %v21498_v9  ;;  %v17249_v26 = vld [vmem:[%s20694_s1 + $0x544] ss:$16 sps:$4 sm:$0xff]   ;;  %v17279_v9 = vld [vmem:[%s20694_s1 + $0x52c] ss:$16 sps:$4 sm:$0xff]  }
 0x722   :  { %3105 = vmatprep.subr.bf16.mxu0 %v21499_v60  ;;  %3146 = vmatprep.subr.bf16.mxu1 %v21500_v12  ;;  %14431 = vtanh.f32 %v17093_v54  ;;  %v17273_v4 = vld [vmem:[%s20694_s1 + $0x524] ss:$16 sps:$4 sm:$0xff]   ;;  %v17285_v60 = vld [vmem:[%s20694_s1 + $0x520] ss:$16 sps:$4 sm:$0xff]   ;;  %v17291_v12 = vld [vmem:[%s20694_s1 + $0x528] ss:$16 sps:$4 sm:$0xff]  }
 0x723   :  { %3135 = vmatprep.mubr.bf16.mxu0 %v21154_v53  ;;  %3176 = vmatprep.mubr.bf16.mxu1 %v21154_v53  ;;  %14433 = vrcp.f32 %v2882_v10  ;;  %v17327_v10 = vld [vmem:[%s20694_s1 + $0x1ec] ss:$16 sps:$4 sm:$0xff]  }
 0x725   :  { %3106 = vmatpush1.bf16.msra.mxu0 %v21501_v24  ;;  %3147 = vmatpush1.bf16.msra.mxu1 %v21502_v25  ;;  %v17303_v24 = vld [vmem:[%s20694_s1 + $0x50c] ss:$16 sps:$4 sm:$0xff]   ;;  %v17309_v25 = vld [vmem:[%s20694_s1 + $0x500] ss:$16 sps:$4 sm:$0xff]  }
 0x726   :  { %3107 = vmatprep.subr.bf16.mxu0 %v21503_v45  ;;  %3148 = vmatprep.subr.bf16.mxu1 %v21504_v5  ;;  %v17315_v45 = vld [vmem:[%s20694_s1 + $0x508] ss:$16 sps:$4 sm:$0xff]   ;;  %v17321_v5 = vld [vmem:[%s20694_s1 + $0x1e4] ss:$16 sps:$4 sm:$0xff]  }
 0x729   :  { %3108 = vmatpush1.bf16.msra.mxu0 %v21447_v43  ;;  %3149 = vmatpush1.bf16.msra.mxu1 %v21448_v16  ;;  %v21511_v43 = vld [vmem:[#allocation76_spill] sm:$0xff]  ;;  %v21512_v16 = vld [vmem:[#allocation77_spill] sm:$0xff] }
 0x72a   :  { %3109 = vmatprep.subr.bf16.mxu0 %v21505_v28  ;;  %3150 = vmatprep.subr.bf16.mxu1 %v21506_v48 }
 0x72d   :  { %3110 = vmatpush1.bf16.msra.mxu0 %v21451_v55  ;;  %3151 = vmatpush1.bf16.msra.mxu1 %v21507_v51  ;;  %v21517_v55 = vld [vmem:[#allocation82_spill] sm:$0xff] }
 0x72e   :  { %3111 = vmatprep.subr.bf16.mxu0 %v21508_v57  ;;  %3152 = vmatprep.subr.bf16.mxu1 %v21509_v58 }
 0x72f   :  { %v14432_v3 = vpop.eup %14431 }
 0x730   :  { %v14434_v11 = vpop.eup %14433 }
 0x731   :  { %3112 = vmatpush1.bf16.msra.mxu0 %v21510_v13  ;;  %3153 = vmatpush1.bf16.msra.mxu1 %v21511_v43  ;;  %v2897_v47 = vmul.f32 %v14434_v11, %v14432_v3 }
 0x732   :  { %3113 = vmatprep.subr.bf16.mxu0 %v21512_v16  ;;  %3154 = vmatprep.subr.bf16.mxu1 %v21513_v14 }
 0x733   :  { %v17130_v8 = vpack.c.bf16 %v2897_v47, %v2897_v47 }
 0x735   :  { %3114 = vmatpush1.bf16.msra.mxu0 %v21514_v15  ;;  %3155 = vmatpush1.bf16.msra.mxu1 %v21515_v17 }
 0x736   :  { %3115 = vmatprep.subr.bf16.mxu0 %v21516_v63  ;;  %3156 = vmatprep.subr.bf16.mxu1 %v21517_v55 }
 0x739   :  { %3116 = vmatpush1.bf16.msra.mxu0 %v21518_v19  ;;  %3157 = vmatpush1.bf16.msra.mxu1 %v21519_v20 }
 0x73a   :  { %3117 = vmatprep.subr.bf16.mxu0 %v21520_v33  ;;  %3158 = vmatprep.subr.bf16.mxu1 %v21521_v62 }
 0x73d   :  { %3118 = vmatpush1.bf16.msra.mxu0 %v21522_v52  ;;  %3159 = vmatpush1.bf16.msra.mxu1 %v21523_v2 }
 0x73e   :  { %3221 = vmatprep.subr.bf16.mxu0 %v21524_v18  ;;  %3262 = vmatprep.subr.bf16.mxu1 %v17001_v44 }
 0x740   :  { %3136 = vmatmul.mubr.bf16.vlgmr.msra.gmra.mxu0 %v17130_v8  ;;  %3177 = vmatmul.mubr.bf16.vlgmr.msra.gmra.mxu1 %v17130_v8 }
 0x741   :  { %3222 = vmatpush1.bf16.msra.mxu0 %v17139_v37  ;;  %3263 = vmatpush1.bf16.msra.mxu1 %v17145_v61 }
 0x742   :  { %3223 = vmatprep.subr.bf16.mxu0 %v17151_v27  ;;  %3264 = vmatprep.subr.bf16.mxu1 %v17157_v39 }
 0x743   :  { %3253 = vmatprep.mubr.bf16.mxu0 %v21154_v53  ;;  %3294 = vmatprep.mubr.bf16.mxu1 %v21154_v53 }
 0x745   :  { %3224 = vmatpush1.bf16.msra.mxu0 %v17165_v0  ;;  %3265 = vmatpush1.bf16.msra.mxu1 %v17171_v30 }
 0x746   :  { %3225 = vmatprep.subr.bf16.mxu0 %v17177_v22  ;;  %3266 = vmatprep.subr.bf16.mxu1 %v17183_v7 }
 0x749   :  { %3226 = vmatpush1.bf16.msra.mxu0 %v17189_v42  ;;  %3267 = vmatpush1.bf16.msra.mxu1 %v17195_v21 }
 0x74a   :  { %3227 = vmatprep.subr.bf16.mxu0 %v17201_v40  ;;  %3268 = vmatprep.subr.bf16.mxu1 %v17207_v50 }
 0x74d   :  { %3228 = vmatpush1.bf16.msra.mxu0 %v17213_v35  ;;  %3269 = vmatpush1.bf16.msra.mxu1 %v17219_v31 }
 0x74e   :  { %3229 = vmatprep.subr.bf16.mxu0 %v17225_v36  ;;  %3270 = vmatprep.subr.bf16.mxu1 %v17231_v41 }
 0x751   :  { %3230 = vmatpush1.bf16.msra.mxu0 %v17237_v23  ;;  %3271 = vmatpush1.bf16.msra.mxu1 %v17243_v32 }
 0x752   :  { %3231 = vmatprep.subr.bf16.mxu0 %v17249_v26  ;;  %3272 = vmatprep.subr.bf16.mxu1 %v17255_v59 }
 0x755   :  { %3232 = vmatpush1.bf16.msra.mxu0 %v17261_v56  ;;  %3273 = vmatpush1.bf16.msra.mxu1 %v17267_v1 }
 0x756   :  { %3233 = vmatprep.subr.bf16.mxu0 %v17273_v4  ;;  %3274 = vmatprep.subr.bf16.mxu1 %v17279_v9 }
 0x759   :  { %3234 = vmatpush1.bf16.msra.mxu0 %v17285_v60  ;;  %3275 = vmatpush1.bf16.msra.mxu1 %v17291_v12 }
 0x75a   :  { %3235 = vmatprep.subr.bf16.mxu0 %v17297_v34  ;;  %3276 = vmatprep.subr.bf16.mxu1 %v17303_v24 }
 0x75d   :  { %3236 = vmatpush1.bf16.msra.mxu0 %v17309_v25  ;;  %3277 = vmatpush1.bf16.msra.mxu1 %v17315_v45 }
 0x75e   :  { %3303 = vmatprep.subr.bf16.mxu0 %v17321_v5  ;;  %3344 = vmatprep.subr.bf16.mxu1 %v17327_v10 }
 0x7c0   :  { %v2933_v28 = vpop.f32.mrf.mxu0  ;;  %v2974_v48 = vpop.f32.mrf.mxu1 }
 0x7c2   :  { %v2935_v51 = vpop.f32.mrf.mxu0  ;;  %v2976_v57 = vpop.f32.mrf.mxu1 }
 0x7c4   :  { %v2937_v58 = vpop.f32.mrf.mxu0  ;;  %v2978_v13 = vpop.f32.mrf.mxu1 }
 0x7c6   :  { %v2938_v43 = vpop.f32.mrf.mxu0  ;;  %v2979_v16 = vpop.f32.mrf.mxu1 }
 0x7e0   :  { %v3015_v14 = vpop.f32.mrf.mxu0  ;;  %v3056_v15 = vpop.f32.mrf.mxu1 }
 0x7e1   :  { %v3016_v17 = vadd.f32 %v3015_v14, %v2933_v28  ;;  %v3057_v63 = vadd.f32 %v3056_v15, %v2974_v48 }
 0x7e2   :  { %v3017_v55 = vpop.f32.mrf.mxu0  ;;  %v3058_v3 = vpop.f32.mrf.mxu1 }
 0x7e3   :  { %v3063_v11 = vadd.f32 %v3016_v17, %v16011_v38  ;;  %v3065_v19 = vadd.f32 %v3057_v63, %v16014_v46  ;;  %v3018_v20 = vadd.f32 %v3017_v55, %v2935_v51  ;;  %v3059_v28 = vadd.f32 %v3058_v3, %v2976_v57  ;;  %v21528_v57 = vld [vmem:[#allocation33_spill] sm:$0xff] }
 0x7e4   :  { %v3019_v33 = vpop.f32.mrf.mxu0  ;;  %v3060_v62 = vpop.f32.mrf.mxu1 }
 0x7e5   :  { %v11636_v47 = vmul.f32 -1.442695, %v3063_v11  ;;  %v11638_v52 = vmul.f32 -1.442695, %v3065_v19  ;;  %v3064_v2 = vadd.f32 %v3018_v20, %v16021_v6  ;;  %v3066_v48 = vadd.f32 %v3059_v28, %v16041_v29  ;;  %v21525_v20 = vld [vmem:[#allocation8_spill] sm:$0xff] }
 0x7e6   :  { %v3020_v58 = vpop.f32.mrf.mxu0  ;;  %v3061_v13 = vpop.f32.mrf.mxu1  ;;  %v21526_v33 = vld [vmem:[#allocation32_spill] sm:$0xff] }
 0x7e7   :  { %14435 = vpow2.f32 %v11636_v47  ;;  %v11637_v43 = vmul.f32 -1.442695, %v3064_v2  ;;  %v11639_v15 = vmul.f32 -1.442695, %v3066_v48  ;;  %v337_v62 = vadd.f32 %v21526_v33, %v21525_v20  ;;  %v21527_v47 = vld [vmem:[#allocation9_spill] sm:$0xff]  ;;  %v21530_v58 = vld [vmem:[#allocation31_spill] sm:$0xff] }
 0x7e8   :  { %14437 = vpow2.f32 %v11638_v52  ;;  %v410_v3 = vadd.f32 %v21528_v57, %v21527_v47  ;;  %v21529_v52 = vld [vmem:[#allocation30_spill] sm:$0xff] }
 0x7e9   :  { %14439 = vpow2.f32 %v11637_v43 }
 0x7f4   :  { %v14436_v16 = vpop.eup %14435 }
 0x7f5   :  { %v14438_v14 = vpop.eup %14437  ;;  %v3079_v55 = vadd.f32 1.0, %v14436_v16 }
 0x7f6   :  { %v14440_v17 = vpop.eup %14439  ;;  %v3081_v51 = vadd.f32 1.0, %v14438_v14 }
 0x7f7   :  { %v3080_v63 = vadd.f32 1.0, %v14440_v17 }
 0x7f8   :  { %14441 = vrcp.f32 %v3081_v51 }
 0x7f9   :  { %14443 = vpow2.f32 %v11639_v15 }
 0x7fa   :  { %14445 = vrcp.f32 %v3080_v63 }
 0x7fb   :  { %14447 = vrcp.f32 %v3079_v55 }
 0x800   :  { %v3137_v11 = vpop.f32.mrf.mxu0  ;;  %v3178_v19 = vpop.f32.mrf.mxu1 }
 0x801   :  { %v3185_v2 = vadd.f32 %v3137_v11, %v21529_v52  ;;  %v3187_v13 = vadd.f32 %v3178_v19, %v21530_v58 }
 0x802   :  { %v3139_v43 = vpop.f32.mrf.mxu0  ;;  %v3180_v28 = vpop.f32.mrf.mxu1 }
 0x803   :  { %v11641_v48 = vmul.f32 -1.442695, %v3185_v2  ;;  %v11643_v16 = vmul.f32 -1.442695, %v3187_v13  ;;  %v3186_v14 = vadd.f32 %v3139_v43, %v337_v62  ;;  %v3188_v15 = vadd.f32 %v3180_v28, %v410_v3 }
 0x804   :  { %v3141_v17 = vpop.f32.mrf.mxu0  ;;  %v3182_v51 = vpop.f32.mrf.mxu1 }
 0x805   :  { %v14442_v63 = vpop.eup %14441  ;;  %14449 = vpow2.f32 %v11641_v48  ;;  %v11642_v55 = vmul.f32 -1.442695, %v3186_v14  ;;  %v11644_v43 = vmul.f32 -1.442695, %v3188_v15  ;;  %v17353_v15 = vld [vmem:[%s20694_s1 + $0x1e8] ss:$16 sps:$4 sm:$0xff]  }
 0x806   :  { %v14444_v29 = vpop.eup %14443  ;;  %v3091_v20 = vmul.f32 2.0, %v14442_v63  ;;  %14451 = vpow2.f32 %v11643_v16  ;;  %v3142_v33 = vpop.f32.mrf.mxu0  ;;  %v17347_v63 = vld [vmem:[%s20694_s1 + $0x1e0] ss:$16 sps:$4 sm:$0xff]  }
 0x807   :  { %v3183_v47 = vpop.f32.mrf.mxu1  ;;  %v14446_v57 = vpop.eup %14445  ;;  %14453 = vpow2.f32 %v11642_v55  ;;  %v3082_v52 = vadd.f32 1.0, %v14444_v29  ;;  %v17359_v55 = vld [vmem:[%s20694_s1 + $0x1c4] ss:$16 sps:$4 sm:$0xff]  }
 0x808   :  { %v11640_v11 = vadd.f32 -1.0, %v3091_v20  ;;  %v14448_v19 = vpop.eup %14447  ;;  %v3093_v2 = vmul.f32 %v14446_v57, %v17051_v49  ;;  %v17365_v20 = vld [vmem:[%s20694_s1 + $0x1cc] ss:$16 sps:$4 sm:$0xff]  }
 0x809   :  { %14455 = vrcp.f32 %v3082_v52  ;;  %v17379_v52 = vld [vmem:[%s20694_s1 + $0x1c8] ss:$16 sps:$4 sm:$0xff]  }
 0x80a   :  { %v3094_v58 = vmul.f32 %v14448_v19, %v11640_v11  ;;  %v17373_v19 = vld [vmem:[%s20694_s1 + $0x1c0] ss:$16 sps:$4 sm:$0xff]  }
 0x80c   :  { %v17341_v62 = vadd.f32 %v3094_v58, %v3093_v2  ;;  %v17385_v2 = vld [vmem:[%s20694_s1 + $0x1a4] ss:$16 sps:$4 sm:$0xff]  }
 0x80e   :  { %14457 = vtanh.f32 %v17341_v62 }
 0x812   :  { %v14450_v3 = vpop.eup %14449 }
 0x813   :  { %v14452_v13 = vpop.eup %14451  ;;  %v3201_v14 = vadd.f32 1.0, %v14450_v3  ;;  %v17391_v3 = vld [vmem:[%s20694_s1 + $0x1ac] ss:$16 sps:$4 sm:$0xff]  }
 0x814   :  { %v14454_v28 = vpop.eup %14453  ;;  %v3203_v48 = vadd.f32 1.0, %v14452_v13 }
 0x815   :  { %v3202_v16 = vadd.f32 1.0, %v14454_v28 }
 0x816   :  { %14459 = vrcp.f32 %v3203_v48  ;;  %v14456_v17 = vpop.eup %14455 }
 0x817   :  { %14461 = vpow2.f32 %v11644_v43 }
 0x818   :  { %14463 = vrcp.f32 %v3202_v16  ;;  %v17398_v16 = vld [vmem:[%s20694_s1 + $0x1a0] ss:$16 sps:$4 sm:$0xff]  }
 0x819   :  { %14465 = vrcp.f32 %v3201_v14  ;;  %v17404_v14 = vld [vmem:[%s20694_s1 + $0x1a8] ss:$16 sps:$4 sm:$0xff]  }
 0x81b   :  { %v14458_v29 = vpop.eup %14457 }
 0x81c   :  { %v3097_v51 = vmul.f32 %v14458_v29, %v14456_v17  ;;  %v17410_v29 = vld [vmem:[%s20694_s1 + $0x184] ss:$16 sps:$4 sm:$0xff]  }
 0x81e   :  { %v3220_v49 = vpack.c.bf16 %v3097_v51, %v3097_v51  ;;  %v17422_v51 = vld [vmem:[%s20694_s1 + $0x180] ss:$16 sps:$4 sm:$0xff]  }
 0x820   :  { %3254 = vmatmul.mubr.bf16.vlgmr.msra.gmra.mxu0 %v3220_v49  ;;  %3295 = vmatmul.mubr.bf16.vlgmr.msra.gmra.mxu1 %v3220_v49  ;;  %v17428_v49 = vld [vmem:[%s20694_s1 + $0x188] ss:$16 sps:$4 sm:$0xff]  }
 0x821   :  { %3304 = vmatpush1.bf16.msra.mxu0 %v17347_v63  ;;  %3345 = vmatpush1.bf16.msra.mxu1 %v17353_v15 }
 0x822   :  { %3305 = vmatprep.subr.bf16.mxu0 %v17359_v55  ;;  %3346 = vmatprep.subr.bf16.mxu1 %v17365_v20 }
 0x823   :  { %v14460_v33 = vpop.eup %14459  ;;  %3335 = vmatprep.mubr.bf16.mxu0 %v21154_v53  ;;  %3376 = vmatprep.mubr.bf16.mxu1 %v21154_v53 }
 0x824   :  { %v14462_v47 = vpop.eup %14461  ;;  %v3213_v57 = vmul.f32 2.0, %v14460_v33  ;;  %v17434_v33 = vld [vmem:[%s20694_s1 + $0x164] ss:$16 sps:$4 sm:$0xff]  }
 0x825   :  { %v14464_v11 = vpop.eup %14463  ;;  %3306 = vmatpush1.bf16.msra.mxu0 %v17373_v19  ;;  %3347 = vmatpush1.bf16.msra.mxu1 %v17379_v52  ;;  %v3204_v43 = vadd.f32 1.0, %v14462_v47  ;;  %v17440_v47 = vld [vmem:[%s20694_s1 + $0x16c] ss:$16 sps:$4 sm:$0xff]  }
 0x826   :  { %v11645_v58 = vadd.f32 -1.0, %v3213_v57  ;;  %3307 = vmatprep.subr.bf16.mxu0 %v17385_v2  ;;  %3348 = vmatprep.subr.bf16.mxu1 %v17391_v3  ;;  %v14466_v13 = vpop.eup %14465  ;;  %v3215_v48 = vmul.f32 %v14464_v11, %v17093_v54  ;;  %v17416_v54 = vld [vmem:[%s20694_s1 + $0x18c] ss:$16 sps:$4 sm:$0xff]   ;;  %v17446_v57 = vld [vmem:[%s20694_s1 + $0x160] ss:$16 sps:$4 sm:$0xff]  }
 0x827   :  { %14467 = vrcp.f32 %v3204_v43  ;;  %v17452_v11 = vld [vmem:[%s20694_s1 + $0x168] ss:$16 sps:$4 sm:$0xff]   ;;  %v17470_v43 = vld [vmem:[%s20694_s1 + $0x140] ss:$16 sps:$4 sm:$0xff]  }
 0x828   :  { %v3216_v28 = vmul.f32 %v14466_v13, %v11645_v58  ;;  %v17458_v58 = vld [vmem:[%s20694_s1 + $0x144] ss:$16 sps:$4 sm:$0xff]   ;;  %v17464_v13 = vld [vmem:[%s20694_s1 + $0x14c] ss:$16 sps:$4 sm:$0xff]   ;;  %21533 = vst [vmem:[#allocation93_spill] sm:$0xff] %v17470_v43 }
 0x829   :  { %3308 = vmatpush1.bf16.msra.mxu0 %v17398_v16  ;;  %3349 = vmatpush1.bf16.msra.mxu1 %v17404_v14  ;;  %21531 = vst [vmem:[#allocation90_spill] sm:$0xff] %v17458_v58  ;;  %21532 = vst [vmem:[#allocation91_spill] sm:$0xff] %v17464_v13 }
 0x82a   :  { %v3217_v17 = vadd.f32 %v3216_v28, %v3215_v48  ;;  %3309 = vmatprep.subr.bf16.mxu0 %v17410_v29  ;;  %3350 = vmatprep.subr.bf16.mxu1 %v17416_v54  ;;  %v17476_v28 = vld [vmem:[%s20694_s1 + $0x148] ss:$16 sps:$4 sm:$0xff]   ;;  %v17482_v48 = vld [vmem:[%s20694_s1 + $0x124] ss:$16 sps:$4 sm:$0xff]  }
 0x82b   :  { %21534 = vst [vmem:[#allocation94_spill] sm:$0xff] %v17476_v28  ;;  %21535 = vst [vmem:[#allocation16_spill] sm:$0xff] %v17482_v48 }
 0x82c   :  { %14469 = vtanh.f32 %v3217_v17  ;;  %v17488_v17 = vld [vmem:[%s20694_s1 + $0x12c] ss:$16 sps:$4 sm:$0xff]  }
 0x82d   :  { %3310 = vmatpush1.bf16.msra.mxu0 %v17422_v51  ;;  %3351 = vmatpush1.bf16.msra.mxu1 %v17428_v49  ;;  %21536 = vst [vmem:[#allocation14_spill] sm:$0xff] %v17488_v17 }
 0x82e   :  { %3311 = vmatprep.subr.bf16.mxu0 %v17434_v33  ;;  %3352 = vmatprep.subr.bf16.mxu1 %v17440_v47 }
 0x831   :  { %3312 = vmatpush1.bf16.msra.mxu0 %v17446_v57  ;;  %3353 = vmatpush1.bf16.msra.mxu1 %v17452_v11 }
 0x832   :  { %3313 = vmatprep.subr.bf16.mxu0 %v17458_v58  ;;  %3354 = vmatprep.subr.bf16.mxu1 %v17464_v13  ;;  %v17512_v58 = vld [vmem:[%s20694_s1 + $0x10c] ss:$16 sps:$4 sm:$0xff]  }
 0x835   :  { %3314 = vmatpush1.bf16.msra.mxu0 %v17470_v43  ;;  %3355 = vmatpush1.bf16.msra.mxu1 %v17476_v28  ;;  %v14468_v43 = vpop.eup %14467  ;;  %v17494_v28 = vld [vmem:[%s20694_s1 + $0x120] ss:$16 sps:$4 sm:$0xff]  }
 0x836   :  { %3315 = vmatprep.subr.bf16.mxu0 %v17482_v48  ;;  %3356 = vmatprep.subr.bf16.mxu1 %v17488_v17  ;;  %21537 = vst [vmem:[#allocation15_spill] sm:$0xff] %v17494_v28  ;;  %v17500_v48 = vld [vmem:[%s20694_s1 + $0x128] ss:$16 sps:$4 sm:$0xff]   ;;  %v17506_v17 = vld [vmem:[%s20694_s1 + $0x104] ss:$16 sps:$4 sm:$0xff]  }
 0x837   :  { %21538 = vst [vmem:[#allocation17_spill] sm:$0xff] %v17500_v48  ;;  %21539 = vst [vmem:[#allocation18_spill] sm:$0xff] %v17506_v17 }
 0x839   :  { %v14470_v13 = vpop.eup %14469  ;;  %3316 = vmatpush1.bf16.msra.mxu0 %v17494_v28  ;;  %3357 = vmatpush1.bf16.msra.mxu1 %v17500_v48  ;;  %v17520_v48 = vld [vmem:[%s20694_s1 + $0x100] ss:$16 sps:$4 sm:$0xff]  }
 0x83a   :  { %3317 = vmatprep.subr.bf16.mxu0 %v17506_v17  ;;  %3358 = vmatprep.subr.bf16.mxu1 %v17512_v58  ;;  %v17515_v28 = vmul.f32 %v14470_v13, %v14468_v43  ;;  %v17526_v17 = vld [vmem:[%s20694_s1 + $0x108] ss:$16 sps:$4 sm:$0xff]  }
 0x83d   :  { %3318 = vmatpush1.bf16.msra.mxu0 %v17520_v48  ;;  %3359 = vmatpush1.bf16.msra.mxu1 %v17526_v17 }
 0x83e   :  { %3422 = vmatprep.subr.bf16.mxu0 %v21524_v18  ;;  %3463 = vmatprep.subr.bf16.mxu1 %v17001_v44 }
 0x840   :  { %3336 = vmatmul.mubr.bf16.vlgmr.msra.gmra.mxu0 %v17130_v8  ;;  %3377 = vmatmul.mubr.bf16.vlgmr.msra.gmra.mxu1 %v17130_v8 }
 0x841   :  { %3423 = vmatpush1.bf16.msra.mxu0 %v17139_v37  ;;  %3464 = vmatpush1.bf16.msra.mxu1 %v17145_v61 }
 0x842   :  { %3424 = vmatprep.subr.bf16.mxu0 %v17151_v27  ;;  %3465 = vmatprep.subr.bf16.mxu1 %v17157_v39 }
 0x843   :  { %3454 = vmatprep.mubr.bf16.mxu0 %v21154_v53  ;;  %3495 = vmatprep.mubr.bf16.mxu1 %v21154_v53 }
 0x845   :  { %3425 = vmatpush1.bf16.msra.mxu0 %v17165_v0  ;;  %3466 = vmatpush1.bf16.msra.mxu1 %v17171_v30 }
 0x846   :  { %3426 = vmatprep.subr.bf16.mxu0 %v17177_v22  ;;  %3467 = vmatprep.subr.bf16.mxu1 %v17183_v7 }
 0x849   :  { %3427 = vmatpush1.bf16.msra.mxu0 %v17189_v42  ;;  %3468 = vmatpush1.bf16.msra.mxu1 %v17195_v21 }
 0x84a   :  { %3428 = vmatprep.subr.bf16.mxu0 %v17201_v40  ;;  %3469 = vmatprep.subr.bf16.mxu1 %v17207_v50 }
 0x84d   :  { %3429 = vmatpush1.bf16.msra.mxu0 %v17213_v35  ;;  %3470 = vmatpush1.bf16.msra.mxu1 %v17219_v31 }
 0x84e   :  { %3430 = vmatprep.subr.bf16.mxu0 %v17225_v36  ;;  %3471 = vmatprep.subr.bf16.mxu1 %v17231_v41 }
 0x851   :  { %3431 = vmatpush1.bf16.msra.mxu0 %v17237_v23  ;;  %3472 = vmatpush1.bf16.msra.mxu1 %v17243_v32 }
 0x852   :  { %3432 = vmatprep.subr.bf16.mxu0 %v17249_v26  ;;  %3473 = vmatprep.subr.bf16.mxu1 %v17255_v59 }
 0x855   :  { %3433 = vmatpush1.bf16.msra.mxu0 %v17261_v56  ;;  %3474 = vmatpush1.bf16.msra.mxu1 %v17267_v1 }
 0x856   :  { %3434 = vmatprep.subr.bf16.mxu0 %v17273_v4  ;;  %3475 = vmatprep.subr.bf16.mxu1 %v17279_v9  ;;  %v21540_v9 = vld [vmem:[#allocation92_spill] sm:$0xff] }
 0x859   :  { %3435 = vmatpush1.bf16.msra.mxu0 %v17285_v60  ;;  %3476 = vmatpush1.bf16.msra.mxu1 %v17291_v12 }
 0x85a   :  { %3436 = vmatprep.subr.bf16.mxu0 %v17297_v34  ;;  %3477 = vmatprep.subr.bf16.mxu1 %v17303_v24 }
 0x85d   :  { %3437 = vmatpush1.bf16.msra.mxu0 %v17309_v25  ;;  %3478 = vmatpush1.bf16.msra.mxu1 %v17315_v45 }
 0x85e   :  { %3504 = vmatprep.subr.bf16.mxu0 %v17321_v5  ;;  %3545 = vmatprep.subr.bf16.mxu1 %v17327_v10 }
 0x8e0   :  { %v3255_v44 = vpop.f32.mrf.mxu0  ;;  %v3296_v8 = vpop.f32.mrf.mxu1 }
 0x8e2   :  { %v3257_v18 = vpop.f32.mrf.mxu0  ;;  %v3298_v37 = vpop.f32.mrf.mxu1 }
 0x8e4   :  { %v3259_v61 = vpop.f32.mrf.mxu0  ;;  %v3300_v27 = vpop.f32.mrf.mxu1 }
 0x8e6   :  { %v3260_v39 = vpop.f32.mrf.mxu0  ;;  %v3301_v0 = vpop.f32.mrf.mxu1 }
 0x900   :  { %v3337_v30 = vpop.f32.mrf.mxu0  ;;  %v3378_v22 = vpop.f32.mrf.mxu1 }
 0x901   :  { %v3338_v7 = vadd.f32 %v3337_v30, %v3255_v44  ;;  %v3379_v42 = vadd.f32 %v3378_v22, %v3296_v8 }
 0x902   :  { %v3339_v21 = vpop.f32.mrf.mxu0  ;;  %v3380_v40 = vpop.f32.mrf.mxu1 }
 0x903   :  { %v3385_v50 = vadd.f32 %v3338_v7, %v16011_v38  ;;  %v3387_v35 = vadd.f32 %v3379_v42, %v16014_v46  ;;  %v3340_v31 = vadd.f32 %v3339_v21, %v3257_v18  ;;  %v3381_v4 = vadd.f32 %v3380_v40, %v3298_v37  ;;  %v13593_v21 = vld [vmem:[%s20694_s1 + $0x2c0] ss:$16 sps:$4 sm:$0xff]   ;;  %v13601_v40 = vld [vmem:[%s20694_s1 + $0x2a4] ss:$16 sps:$4 sm:$0xff]  }
 0x904   :  { %v3341_v36 = vpop.f32.mrf.mxu0  ;;  %v3382_v41 = vpop.f32.mrf.mxu1 }
 0x905   :  { %v11646_v23 = vmul.f32 -1.442695, %v3385_v50  ;;  %v11648_v32 = vmul.f32 -1.442695, %v3387_v35  ;;  %v3386_v26 = vadd.f32 %v3340_v31, %v16021_v6  ;;  %v3388_v60 = vadd.f32 %v3381_v4, %v21540_v9  ;;  %v13599_v50 = vld [vmem:[%s20694_s1 + $0x2a0] ss:$16 sps:$4 sm:$0xff]  }
 0x906   :  { %v3342_v59 = vpop.f32.mrf.mxu0  ;;  %v3383_v56 = vpop.f32.mrf.mxu1  ;;  %v13607_v35 = vld [vmem:[%s20694_s1 + $0x284] ss:$16 sps:$4 sm:$0xff]   ;;  %v13605_v31 = vld [vmem:[%s20694_s1 + $0x280] ss:$16 sps:$4 sm:$0xff]  }
 0x907   :  { %14471 = vpow2.f32 %v11646_v23  ;;  %v11647_v1 = vmul.f32 -1.442695, %v3386_v26  ;;  %v11649_v24 = vmul.f32 -1.442695, %v3388_v60  ;;  %v13613_v36 = vld [vmem:[%s20694_s1 + $0x264] ss:$16 sps:$4 sm:$0xff]  }
 0x908   :  { %14473 = vpow2.f32 %v11648_v32  ;;  %v13611_v41 = vld [vmem:[%s20694_s1 + $0x260] ss:$16 sps:$4 sm:$0xff]   ;;  %v13619_v23 = vld [vmem:[%s20694_s1 + $0x244] ss:$16 sps:$4 sm:$0xff]  }
 0x909   :  { %14475 = vpow2.f32 %v11647_v1  ;;  %v13617_v32 = vld [vmem:[%s20694_s1 + $0x240] ss:$16 sps:$4 sm:$0xff]   ;;  %v13625_v26 = vld [vmem:[%s20694_s1 + $0x224] ss:$16 sps:$4 sm:$0xff]  }
 0x90a   :  { %v13623_v59 = vld [vmem:[%s20694_s1 + $0x220] ss:$16 sps:$4 sm:$0xff]  }
 0x914   :  { %v14472_v12 = vpop.eup %14471 }
 0x915   :  { %v14474_v34 = vpop.eup %14473  ;;  %v3401_v10 = vadd.f32 1.0, %v14472_v12 }
 0x916   :  { %v14476_v25 = vpop.eup %14475  ;;  %v3403_v45 = vadd.f32 1.0, %v14474_v34 }
 0x917   :  { %v3402_v5 = vadd.f32 1.0, %v14476_v25 }
 0x918   :  { %14477 = vrcp.f32 %v3403_v45 }
 0x919   :  { %14479 = vpow2.f32 %v11649_v24 }
 0x91a   :  { %14481 = vrcp.f32 %v3402_v5 }
 0x91b   :  { %14483 = vrcp.f32 %v3401_v10 }
 0x925   :  { %v14478_v13 = vpop.eup %14477 }
 0x926   :  { %v14480_v43 = vpop.eup %14479  ;;  %v3413_v44 = vmul.f32 2.0, %v14478_v13 }
 0x927   :  { %v14482_v8 = vpop.eup %14481  ;;  %v3404_v37 = vadd.f32 1.0, %v14480_v43 }
 0x928   :  { %v11650_v18 = vadd.f32 -1.0, %v3413_v44  ;;  %v14484_v61 = vpop.eup %14483  ;;  %v3415_v39 = vmul.f32 %v14482_v8, %v17341_v62  ;;  %v21541_v62 = vld [vmem:[#allocation90_spill] sm:$0xff] }
 0x929   :  { %14485 = vrcp.f32 %v3404_v37 }
 0x92a   :  { %v3416_v27 = vmul.f32 %v14484_v61, %v11650_v18 }
 0x92c   :  { %v17572_v0 = vadd.f32 %v3416_v27, %v3415_v39 }
 0x92e   :  { %14487 = vtanh.f32 %v17572_v0 }
 0x936   :  { %v14486_v30 = vpop.eup %14485 }
 0x93b   :  { %v14488_v22 = vpop.eup %14487 }
 0x93c   :  { %v3419_v7 = vmul.f32 %v14488_v22, %v14486_v30 }
 0x93e   :  { %v3421_v42 = vpack.c.bf16 %v3419_v7, %v3419_v7 }
 0x940   :  { %3455 = vmatmul.mubr.bf16.vlgmr.msra.gmra.mxu0 %v3421_v42  ;;  %3496 = vmatmul.mubr.bf16.vlgmr.msra.gmra.mxu1 %v3421_v42 }
 0x941   :  { %3505 = vmatpush1.bf16.msra.mxu0 %v17347_v63  ;;  %3546 = vmatpush1.bf16.msra.mxu1 %v17353_v15  ;;  %v21542_v63 = vld [vmem:[#allocation91_spill] sm:$0xff]  ;;  %v21543_v15 = vld [vmem:[#allocation93_spill] sm:$0xff] }
 0x942   :  { %3506 = vmatprep.subr.bf16.mxu0 %v17359_v55  ;;  %3547 = vmatprep.subr.bf16.mxu1 %v17365_v20  ;;  %v21544_v55 = vld [vmem:[#allocation94_spill] sm:$0xff]  ;;  %v21545_v20 = vld [vmem:[#allocation16_spill] sm:$0xff] }
 0x943   :  { %3536 = vmatprep.mubr.bf16.mxu0 %v21154_v53  ;;  %3577 = vmatprep.mubr.bf16.mxu1 %v21154_v53 }
 0x945   :  { %3507 = vmatpush1.bf16.msra.mxu0 %v17373_v19  ;;  %3548 = vmatpush1.bf16.msra.mxu1 %v17379_v52  ;;  %v21546_v19 = vld [vmem:[#allocation14_spill] sm:$0xff]  ;;  %v21547_v52 = vld [vmem:[#allocation15_spill] sm:$0xff] }
 0x946   :  { %3508 = vmatprep.subr.bf16.mxu0 %v17385_v2  ;;  %3549 = vmatprep.subr.bf16.mxu1 %v17391_v3  ;;  %v21548_v2 = vld [vmem:[#allocation17_spill] sm:$0xff]  ;;  %v21549_v3 = vld [vmem:[#allocation18_spill] sm:$0xff] }
 0x949   :  { %3509 = vmatpush1.bf16.msra.mxu0 %v17398_v16  ;;  %3550 = vmatpush1.bf16.msra.mxu1 %v17404_v14  ;;  %v3420_v16 = vpack.c.bf16 %v17515_v28, %v17515_v28  ;;  %v13579_v14 = vld [vmem:[%s20697_s2 + $0x38] sm:$0xff]   ;;  %v13589_v28 = vld [vmem:[%s20694_s1 + $0x2e4] ss:$16 sps:$4 sm:$0xff]  }
 0x94a   :  { %3510 = vmatprep.subr.bf16.mxu0 %v17410_v29  ;;  %3551 = vmatprep.subr.bf16.mxu1 %v17416_v54  ;;  %v14988_v29 = vmov 0.0   ;;  %v13580_v54 = vld [vmem:[%s20697_s2 + $0x30] sm:$0xff]  }
 0x94d   :  { %3511 = vmatpush1.bf16.msra.mxu0 %v17422_v51  ;;  %3552 = vmatpush1.bf16.msra.mxu1 %v17428_v49  ;;  %v13581_v51 = vld [vmem:[%s20697_s2 + $0x28] sm:$0xff]   ;;  %v13582_v49 = vld [vmem:[%s20697_s2 + $0x20] sm:$0xff]  }
 0x94e   :  { %3512 = vmatprep.subr.bf16.mxu0 %v17434_v33  ;;  %3553 = vmatprep.subr.bf16.mxu1 %v17440_v47  ;;  %v13583_v33 = vld [vmem:[%s20697_s2 + $0x18] sm:$0xff]   ;;  %v13584_v47 = vld [vmem:[%s20697_s2 + $0x10] sm:$0xff]  }
 0x951   :  { %3513 = vmatpush1.bf16.msra.mxu0 %v17446_v57  ;;  %3554 = vmatpush1.bf16.msra.mxu1 %v17452_v11  ;;  %v13585_v57 = vld [vmem:[%s20697_s2 + $0x8] sm:$0xff]   ;;  %v13586_v11 = vld [vmem:[%s20697_s2] sm:$0xff]  }
 0x952   :  { %3514 = vmatprep.subr.bf16.mxu0 %v21541_v62  ;;  %3555 = vmatprep.subr.bf16.mxu1 %v21542_v63 }
 0x955   :  { %3515 = vmatpush1.bf16.msra.mxu0 %v21543_v15  ;;  %3556 = vmatpush1.bf16.msra.mxu1 %v21544_v55 }
 0x956   :  { %3516 = vmatprep.subr.bf16.mxu0 %v21545_v20  ;;  %3557 = vmatprep.subr.bf16.mxu1 %v21546_v19 }
 0x959   :  { %3517 = vmatpush1.bf16.msra.mxu0 %v21547_v52  ;;  %3558 = vmatpush1.bf16.msra.mxu1 %v21548_v2 }
 0x95a   :  { %3518 = vmatprep.subr.bf16.mxu0 %v21549_v3  ;;  %3559 = vmatprep.subr.bf16.mxu1 %v17512_v58  ;;  %v13587_v58 = vld [vmem:[%s20694_s1 + $0x2e0] ss:$16 sps:$4 sm:$0xff]  }
 0x95d   :  { %3519 = vmatpush1.bf16.msra.mxu0 %v17520_v48  ;;  %3560 = vmatpush1.bf16.msra.mxu1 %v17526_v17  ;;  %v13592_v48 = vld [vmem:[%s20694_s1 + $0x2ec] ss:$16 sps:$4 sm:$0xff]   ;;  %v13595_v17 = vld [vmem:[%s20694_s1 + $0x2c4] ss:$16 sps:$4 sm:$0xff]  }
 0x95e   :  { %13336 = vmatprep.subr.bf16.mxu0 %v14988_v29  ;;  %3952 = vmatprep.subr.bf16.mxu1 %v13589_v28 }
 0x960   :  { %3537 = vmatmul.mubr.bf16.vlgmr.msra.gmra.mxu0 %v3420_v16  ;;  %3578 = vmatmul.mubr.bf16.vlgmr.msra.gmra.mxu1 %v3420_v16 }
 0x961   :  { %3984 = vmatprep.mubr.bf16.mxu1 %v21154_v53  ;;  %13337 = vmatpush3.bf16.msra.mxu0 %v13579_v14 }
 0x962   :  { %13338 = vmatprep.subr.bf16.mxu0 %v14988_v29  ;;  %13352 = vmatprep.mubr.msk.bf16.mxu0 %vm14989_vm0, %v14988_v29 }
 0x963   :  { %3953 = vmatpush1.bf16.msra.mxu1 %v13587_v58  ;;  %v13590_v58 = vld [vmem:[%s20694_s1 + $0x2e8] ss:$16 sps:$4 sm:$0xff]  }
 0x964   :  { %3954 = vmatprep.subr.bf16.mxu1 %v13595_v17  ;;  %v13604_v17 = vld [vmem:[%s20694_s1 + $0x2ac] ss:$16 sps:$4 sm:$0xff]  }
 0x965   :  { %13339 = vmatpush3.bf16.msra.mxu0 %v13580_v54 }
 0x966   :  { %13340 = vmatprep.subr.bf16.mxu0 %v14988_v29 }
 0x967   :  { %3955 = vmatpush1.bf16.msra.mxu1 %v13593_v21  ;;  %v13602_v21 = vld [vmem:[%s20694_s1 + $0x2a8] ss:$16 sps:$4 sm:$0xff]  }
 0x968   :  { %3956 = vmatprep.subr.bf16.mxu1 %v13601_v40  ;;  %v13610_v40 = vld [vmem:[%s20694_s1 + $0x28c] ss:$16 sps:$4 sm:$0xff]  }
 0x969   :  { %13341 = vmatpush3.bf16.msra.mxu0 %v13581_v51 }
 0x96a   :  { %13342 = vmatprep.subr.bf16.mxu0 %v14988_v29 }
 0x96b   :  { %3957 = vmatpush1.bf16.msra.mxu1 %v13599_v50  ;;  %v13608_v50 = vld [vmem:[%s20694_s1 + $0x288] ss:$16 sps:$4 sm:$0xff]  }
 0x96c   :  { %3958 = vmatprep.subr.bf16.mxu1 %v13607_v35  ;;  %v13616_v35 = vld [vmem:[%s20694_s1 + $0x26c] ss:$16 sps:$4 sm:$0xff]  }
 0x96d   :  { %13343 = vmatpush3.bf16.msra.mxu0 %v13582_v49 }
 0x96e   :  { %13344 = vmatprep.subr.bf16.mxu0 %v14988_v29 }
 0x96f   :  { %3959 = vmatpush1.bf16.msra.mxu1 %v13605_v31  ;;  %v13614_v31 = vld [vmem:[%s20694_s1 + $0x268] ss:$16 sps:$4 sm:$0xff]  }
 0x970   :  { %3960 = vmatprep.subr.bf16.mxu1 %v13613_v36  ;;  %v13622_v36 = vld [vmem:[%s20694_s1 + $0x24c] ss:$16 sps:$4 sm:$0xff]  }
 0x971   :  { %13345 = vmatpush3.bf16.msra.mxu0 %v13583_v33 }
 0x972   :  { %13346 = vmatprep.subr.bf16.mxu0 %v14988_v29 }
 0x973   :  { %3961 = vmatpush1.bf16.msra.mxu1 %v13611_v41  ;;  %v13620_v41 = vld [vmem:[%s20694_s1 + $0x248] ss:$16 sps:$4 sm:$0xff]  }
 0x974   :  { %3962 = vmatprep.subr.bf16.mxu1 %v13619_v23  ;;  %v13628_v23 = vld [vmem:[%s20694_s1 + $0x22c] ss:$16 sps:$4 sm:$0xff]  }
 0x975   :  { %13347 = vmatpush3.bf16.msra.mxu0 %v13584_v47 }
 0x976   :  { %13348 = vmatprep.subr.bf16.mxu0 %v14988_v29 }
 0x977   :  { %3963 = vmatpush1.bf16.msra.mxu1 %v13617_v32  ;;  %v13626_v32 = vld [vmem:[%s20694_s1 + $0x228] ss:$16 sps:$4 sm:$0xff]  }
 0x978   :  { %3964 = vmatprep.subr.bf16.mxu1 %v13625_v26  ;;  %v13631_v26 = vld [vmem:[%s20694_s1 + $0x204] ss:$16 sps:$4 sm:$0xff]  }
 0x979   :  { %13349 = vmatpush3.bf16.msra.mxu0 %v13585_v57 }
 0x97a   :  { %13350 = vmatprep.subr.bf16.mxu0 %v14988_v29 }
 0x97b   :  { %3965 = vmatpush1.bf16.msra.mxu1 %v13623_v59  ;;  %v13634_v59 = vld [vmem:[%s20694_s1 + $0x20c] ss:$16 sps:$4 sm:$0xff]  }
 0x97c   :  { %3966 = vmatprep.subr.bf16.mxu1 %v13631_v26 }
 0x97d   :  { %13351 = vmatpush3.bf16.msra.mxu0 %v13586_v11 }
 0x97e   :  { %3993 = vmatprep.subr.bf16.mxu0 %v13592_v48  ;;  %v13598_v48 = vld [vmem:[%s20694_s1 + $0x2cc] ss:$16 sps:$4 sm:$0xff]  }
 0xa00   :  { %v3456_v56 = vpop.f32.mrf.mxu0  ;;  %v3497_v1 = vpop.f32.mrf.mxu1 }
 0xa02   :  { %v3458_v4 = vpop.f32.mrf.mxu0  ;;  %v3499_v60 = vpop.f32.mrf.mxu1 }
 0xa04   :  { %v3460_v12 = vpop.f32.mrf.mxu0  ;;  %v3501_v34 = vpop.f32.mrf.mxu1 }
 0xa05   :  { %v11656_v12 = vld [vmem:[%s20696_s3 + $0x10] sm:$0xf]  ;;  %v21550_v34 = vld [vmem:[#allocation4_spill] sm:$0xff] }
 0xa06   :  { %v3461_v24 = vpop.f32.mrf.mxu0  ;;  %v3502_v25 = vpop.f32.mrf.mxu1 }
 0xa07   :  { %v3644_v24 = vrot.slane %v11656_v12, %v21550_v34 }
 0xa20   :  { %v3538_v45 = vpop.f32.mrf.mxu0  ;;  %v3579_v5 = vpop.f32.mrf.mxu1 }
 0xa21   :  { %v3539_v10 = vadd.f32 %v3538_v45, %v3456_v56  ;;  %v3580_v13 = vadd.f32 %v3579_v5, %v3497_v1  ;;  %v13629_v56 = vld [vmem:[%s20694_s1 + $0x200] ss:$16 sps:$4 sm:$0xff]   ;;  %v13632_v1 = vld [vmem:[%s20694_s1 + $0x208] ss:$16 sps:$4 sm:$0xff]  }
 0xa22   :  { %v3540_v43 = vpop.f32.mrf.mxu0  ;;  %v3581_v44 = vpop.f32.mrf.mxu1  ;;  %3967 = vmatpush1.bf16.msra.mxu1 %v13629_v56 }
 0xa23   :  { %v3586_v8 = vadd.f32 %v3539_v10, %v16011_v38  ;;  %v3588_v18 = vadd.f32 %v3580_v13, %v16014_v46  ;;  %v3541_v61 = vadd.f32 %v3540_v43, %v3458_v4  ;;  %v3582_v63 = vadd.f32 %v3581_v44, %v3499_v60  ;;  %v17739_v4 = vld [vmem:[%s20694_s1 + $0x6e4] ss:$16 sps:$4 sm:$0xff]   ;;  %v17744_v60 = vld [vmem:[%s20694_s1 + $0x6ec] ss:$16 sps:$4 sm:$0xff]   ;;  %v17755_v10 = vld [vmem:[%s20694_s1 + $0x6e0] ss:$16 sps:$4 sm:$0xff]  }
 0xa24   :  { %v3542_v37 = vpop.f32.mrf.mxu0  ;;  %v3583_v27 = vpop.f32.mrf.mxu1  ;;  %4227 = vmatprep.subr.bf16.mxu1 %v17739_v4  ;;  %v17760_v13 = vld [vmem:[%s20694_s1 + $0x6e8] ss:$16 sps:$4 sm:$0xff]   ;;  %v17768_v44 = vld [vmem:[%s20694_s1 + $0x6c4] ss:$16 sps:$4 sm:$0xff]  }
 0xa25   :  { %v11651_v39 = vmul.f32 -1.442695, %v3586_v8  ;;  %v11653_v30 = vmul.f32 -1.442695, %v3588_v18  ;;  %v3587_v22 = vadd.f32 %v3541_v61, %v16021_v6  ;;  %v3589_v15 = vadd.f32 %v3582_v63, %v21540_v9  ;;  %v17773_v8 = vld [vmem:[%s20694_s1 + $0x6cc] ss:$16 sps:$4 sm:$0xff]  }
 0xa26   :  { %v3543_v7 = vpop.f32.mrf.mxu0  ;;  %v3584_v42 = vpop.f32.mrf.mxu1  ;;  %v17780_v37 = vld [vmem:[%s20694_s1 + $0x6c0] ss:$16 sps:$4 sm:$0xff]   ;;  %v17785_v27 = vld [vmem:[%s20694_s1 + $0x6c8] ss:$16 sps:$4 sm:$0xff]  }
 0xa27   :  { %14489 = vpow2.f32 %v11651_v39  ;;  %v11652_v62 = vmul.f32 -1.442695, %v3587_v22  ;;  %v11654_v20 = vmul.f32 -1.442695, %v3589_v15  ;;  %v17792_v39 = vld [vmem:[%s20694_s1 + $0x6a4] ss:$16 sps:$4 sm:$0xff]  }
 0xa28   :  { %14491 = vpow2.f32 %v11653_v30  ;;  %v17797_v30 = vld [vmem:[%s20694_s1 + $0x6ac] ss:$16 sps:$4 sm:$0xff]   ;;  %v17806_v22 = vld [vmem:[%s20694_s1 + $0x6a0] ss:$16 sps:$4 sm:$0xff]   ;;  %v17811_v7 = vld [vmem:[%s20694_s1 + $0x6a8] ss:$16 sps:$4 sm:$0xff]  }
 0xa29   :  { %14493 = vpow2.f32 %v11652_v62  ;;  %v17818_v42 = vld [vmem:[%s20694_s1 + $0x684] ss:$16 sps:$4 sm:$0xff]   ;;  %v17823_v62 = vld [vmem:[%s20694_s1 + $0x68c] ss:$16 sps:$4 sm:$0xff]   ;;  %v17830_v63 = vld [vmem:[%s20694_s1 + $0x680] ss:$16 sps:$4 sm:$0xff]  }
 0xa2a   :  { %v17835_v15 = vld [vmem:[%s20694_s1 + $0x688] ss:$16 sps:$4 sm:$0xff]  }
 0xa34   :  { %v14490_v55 = vpop.eup %14489 }
 0xa35   :  { %v14492_v38 = vpop.eup %14491  ;;  %v3602_v2 = vadd.f32 1.0, %v14490_v55  ;;  %v17842_v55 = vld [vmem:[%s20694_s1 + $0x664] ss:$16 sps:$4 sm:$0xff]  }
 0xa36   :  { %v14494_v46 = vpop.eup %14493  ;;  %v3604_v19 = vadd.f32 1.0, %v14492_v38  ;;  %v17847_v38 = vld [vmem:[%s20694_s1 + $0x66c] ss:$16 sps:$4 sm:$0xff]  }
 0xa37   :  { %v3603_v52 = vadd.f32 1.0, %v14494_v46  ;;  %v17859_v46 = vld [vmem:[%s20694_s1 + $0x668] ss:$16 sps:$4 sm:$0xff]  }
 0xa38   :  { %14495 = vrcp.f32 %v3604_v19  ;;  %v17866_v19 = vld [vmem:[%s20694_s1 + $0x644] ss:$16 sps:$4 sm:$0xff]  }
 0xa39   :  { %14497 = vpow2.f32 %v11654_v20  ;;  %v17854_v20 = vld [vmem:[%s20694_s1 + $0x660] ss:$16 sps:$4 sm:$0xff]  }
 0xa3a   :  { %14499 = vrcp.f32 %v3603_v52  ;;  %v17871_v52 = vld [vmem:[%s20694_s1 + $0x64c] ss:$16 sps:$4 sm:$0xff]  }
 0xa3b   :  { %14501 = vrcp.f32 %v3602_v2  ;;  %v17878_v2 = vld [vmem:[%s20694_s1 + $0x640] ss:$16 sps:$4 sm:$0xff]  }
 0xa45   :  { %v14496_v6 = vpop.eup %14495 }
 0xa46   :  { %v14498_v3 = vpop.eup %14497  ;;  %v3614_v16 = vmul.f32 2.0, %v14496_v6  ;;  %v17883_v6 = vld [vmem:[%s20694_s1 + $0x648] ss:$16 sps:$4 sm:$0xff]  }
 0xa47   :  { %v14500_v14 = vpop.eup %14499  ;;  %v3605_v51 = vadd.f32 1.0, %v14498_v3  ;;  %v17890_v3 = vld [vmem:[%s20694_s1 + $0x624] ss:$16 sps:$4 sm:$0xff]  }
 0xa48   :  { %v11655_v29 = vadd.f32 -1.0, %v3614_v16  ;;  %v14502_v54 = vpop.eup %14501  ;;  %v3616_v9 = vmul.f32 %v14500_v14, %v17572_v0  ;;  %v13596_v0 = vld [vmem:[%s20694_s1 + $0x2c8] ss:$16 sps:$4 sm:$0xff]   ;;  %v17895_v16 = vld [vmem:[%s20694_s1 + $0x62c] ss:$16 sps:$4 sm:$0xff]  }
 0xa49   :  { %14503 = vrcp.f32 %v3605_v51  ;;  %v17902_v14 = vld [vmem:[%s20694_s1 + $0x620] ss:$16 sps:$4 sm:$0xff]   ;;  %v17919_v51 = vld [vmem:[%s20694_s1 + $0x60c] ss:$16 sps:$4 sm:$0xff]  }
 0xa4a   :  { %v3617_v49 = vmul.f32 %v14502_v54, %v11655_v29  ;;  %v17907_v29 = vld [vmem:[%s20694_s1 + $0x628] ss:$16 sps:$4 sm:$0xff]   ;;  %v17914_v54 = vld [vmem:[%s20694_s1 + $0x604] ss:$16 sps:$4 sm:$0xff]  }
 0xa4c   :  { %v3618_v33 = vadd.f32 %v3617_v49, %v3616_v9  ;;  %v17926_v49 = vld [vmem:[%s20694_s1 + $0x600] ss:$16 sps:$4 sm:$0xff]   ;;  %v17931_v9 = vld [vmem:[%s20694_s1 + $0x608] ss:$16 sps:$4 sm:$0xff]  }
 0xa4e   :  { %14505 = vtanh.f32 %v3618_v33  ;;  %v17976_v33 = vld [vmem:[%s20694_s1 + $0x7e4] ss:$16 sps:$4 sm:$0xff]  }
 0xa56   :  { %v14504_v47 = vpop.eup %14503 }
 0xa5b   :  { %v14506_v57 = vpop.eup %14505 }
 0xa5c   :  { %v3620_v11 = vmul.f32 %v14506_v57, %v14504_v47  ;;  %v17981_v47 = vld [vmem:[%s20694_s1 + $0x7ec] ss:$16 sps:$4 sm:$0xff]  }
 0xa5e   :  { %v3621_v28 = vpack.c.bf16 %v3620_v11, %v3620_v11 }
 0xa60   :  { %13353 = vmatmul.mubr.bf16.vlgmr.msra.gmra.mxu0 %v3621_v28 }
 0xa61   :  { %3994 = vmatpush1.bf16.msra.mxu0 %v13590_v58  ;;  %4025 = vmatprep.mubr.bf16.mxu0 %v21154_v53 }
 0xa62   :  { %3995 = vmatprep.subr.bf16.mxu0 %v13598_v48 }
 0xa65   :  { %3996 = vmatpush1.bf16.msra.mxu0 %v13596_v0 }
 0xa66   :  { %3997 = vmatprep.subr.bf16.mxu0 %v13604_v17 }
 0xa69   :  { %3998 = vmatpush1.bf16.msra.mxu0 %v13602_v21 }
 0xa6a   :  { %3999 = vmatprep.subr.bf16.mxu0 %v13610_v40  ;;  %v11697_v40 = vld [vmem:[%s20696_s3 + $0x8] sm:$0xf] }
 0xa6d   :  { %4000 = vmatpush1.bf16.msra.mxu0 %v13608_v50  ;;  %v3775_v50 = vrot.slane %v11697_v40, %v21550_v34 }
 0xa6e   :  { %4001 = vmatprep.subr.bf16.mxu0 %v13616_v35  ;;  %v21551_v35 = vld [vmem:[#allocation5_spill] sm:$0xff] }
 0xa71   :  { %4002 = vmatpush1.bf16.msra.mxu0 %v13614_v31  ;;  %v3783_v31 = vrot.slane %v11697_v40, %v21551_v35 }
 0xa72   :  { %4003 = vmatprep.subr.bf16.mxu0 %v13622_v36  ;;  %v21552_v36 = vld [vmem:[#allocation6_spill] sm:$0xff] }
 0xa75   :  { %4004 = vmatpush1.bf16.msra.mxu0 %v13620_v41  ;;  %v3779_v41 = vrot.slane %v11697_v40, %v21552_v36 }
 0xa76   :  { %4005 = vmatprep.subr.bf16.mxu0 %v13628_v23 }
 0xa79   :  { %4006 = vmatpush1.bf16.msra.mxu0 %v13626_v32 }
 0xa7a   :  { %4007 = vmatprep.subr.bf16.mxu0 %v13634_v59 }
 0xa7d   :  { %4008 = vmatpush1.bf16.msra.mxu0 %v13632_v1 }
 0xa7e   :  { %4268 = vmatprep.subr.bf16.mxu0 %v17744_v60 }
 0xb20   :  { %v3728_v25 = vpop.f32.mrf.mxu0 }
 0xb21   :  { %v3729_v45 = vadd.f32 %v3728_v25, %v3644_v24 }
 0xb22   :  { %v13354_v5 = vpop.f32.mrf.mxu0 }
 0xb23   :  { %3734 = vst [vmem:[%s20698_s5] sm:$0xff] %v3729_v45  ;;  %v3735_v43 = vpack.c.bf16 %v3729_v45, %v3729_v45 }
 0xb24   :  { %v3731_v18 = vpop.f32.mrf.mxu0 }
 0xb25   :  { %3985 = vmatmul.mubr.bf16.vlgmr.msra.gmra.mxu1 %v3735_v43  ;;  %4026 = vmatmul.mubr.bf16.vlgmr.msra.gmra.mxu0 %v3735_v43 }
 0xb26   :  { %4228 = vmatpush1.bf16.msra.mxu1 %v17755_v10  ;;  %4269 = vmatpush1.bf16.msra.mxu0 %v17760_v13  ;;  %v13355_v61 = vpop.f32.mrf.mxu0 }
 0xb27   :  { %4229 = vmatprep.subr.bf16.mxu1 %v17768_v44  ;;  %4270 = vmatprep.subr.bf16.mxu0 %v17773_v8 }
 0xb28   :  { %4259 = vmatprep.mubr.bf16.mxu1 %v21154_v53  ;;  %4300 = vmatprep.mubr.bf16.mxu0 %v21154_v53 }
 0xb2a   :  { %4230 = vmatpush1.bf16.msra.mxu1 %v17780_v37  ;;  %4271 = vmatpush1.bf16.msra.mxu0 %v17785_v27 }
 0xb2b   :  { %4231 = vmatprep.subr.bf16.mxu1 %v17792_v39  ;;  %4272 = vmatprep.subr.bf16.mxu0 %v17797_v30 }
 0xb2e   :  { %4232 = vmatpush1.bf16.msra.mxu1 %v17806_v22  ;;  %4273 = vmatpush1.bf16.msra.mxu0 %v17811_v7 }
 0xb2f   :  { %4233 = vmatprep.subr.bf16.mxu1 %v17818_v42  ;;  %4274 = vmatprep.subr.bf16.mxu0 %v17823_v62 }
 0xb32   :  { %4234 = vmatpush1.bf16.msra.mxu1 %v17830_v63  ;;  %4275 = vmatpush1.bf16.msra.mxu0 %v17835_v15 }
 0xb33   :  { %4235 = vmatprep.subr.bf16.mxu1 %v17842_v55  ;;  %4276 = vmatprep.subr.bf16.mxu0 %v17847_v38 }
 0xb36   :  { %4236 = vmatpush1.bf16.msra.mxu1 %v17854_v20  ;;  %4277 = vmatpush1.bf16.msra.mxu0 %v17859_v46 }
 0xb37   :  { %4237 = vmatprep.subr.bf16.mxu1 %v17866_v19  ;;  %4278 = vmatprep.subr.bf16.mxu0 %v17871_v52 }
 0xb3a   :  { %4238 = vmatpush1.bf16.msra.mxu1 %v17878_v2  ;;  %4279 = vmatpush1.bf16.msra.mxu0 %v17883_v6 }
 0xb3b   :  { %4239 = vmatprep.subr.bf16.mxu1 %v17890_v3  ;;  %4280 = vmatprep.subr.bf16.mxu0 %v17895_v16 }
 0xb3e   :  { %4240 = vmatpush1.bf16.msra.mxu1 %v17902_v14  ;;  %4281 = vmatpush1.bf16.msra.mxu0 %v17907_v29 }
 0xb3f   :  { %4241 = vmatprep.subr.bf16.mxu1 %v17914_v54  ;;  %4282 = vmatprep.subr.bf16.mxu0 %v17919_v51 }
 0xb42   :  { %4242 = vmatpush1.bf16.msra.mxu1 %v17926_v49  ;;  %4283 = vmatpush1.bf16.msra.mxu0 %v17931_v9 }
 0xb43   :  { %4345 = vmatprep.subr.bf16.mxu1 %v17739_v4  ;;  %4386 = vmatprep.subr.bf16.mxu0 %v17744_v60 }
 0xb45   :  { %4260 = vmatmul.mubr.bf16.vlgmr.msra.gmra.mxu1 %v21154_v53  ;;  %4301 = vmatmul.mubr.bf16.vlgmr.msra.gmra.mxu0 %v21154_v53 }
 0xb46   :  { %4346 = vmatpush1.bf16.msra.mxu1 %v17755_v10  ;;  %4387 = vmatpush1.bf16.msra.mxu0 %v17760_v13 }
 0xb47   :  { %4347 = vmatprep.subr.bf16.mxu1 %v17768_v44  ;;  %4388 = vmatprep.subr.bf16.mxu0 %v17773_v8 }
 0xb48   :  { %4377 = vmatprep.mubr.bf16.mxu1 %v21154_v53  ;;  %4418 = vmatprep.mubr.bf16.mxu0 %v21154_v53 }
 0xb4a   :  { %4348 = vmatpush1.bf16.msra.mxu1 %v17780_v37  ;;  %4389 = vmatpush1.bf16.msra.mxu0 %v17785_v27 }
 0xb4b   :  { %4349 = vmatprep.subr.bf16.mxu1 %v17792_v39  ;;  %4390 = vmatprep.subr.bf16.mxu0 %v17797_v30 }
 0xb4e   :  { %4350 = vmatpush1.bf16.msra.mxu1 %v17806_v22  ;;  %4391 = vmatpush1.bf16.msra.mxu0 %v17811_v7 }
 0xb4f   :  { %4351 = vmatprep.subr.bf16.mxu1 %v17818_v42  ;;  %4392 = vmatprep.subr.bf16.mxu0 %v17823_v62 }
 0xb52   :  { %4352 = vmatpush1.bf16.msra.mxu1 %v17830_v63  ;;  %4393 = vmatpush1.bf16.msra.mxu0 %v17835_v15 }
 0xb53   :  { %4353 = vmatprep.subr.bf16.mxu1 %v17842_v55  ;;  %4394 = vmatprep.subr.bf16.mxu0 %v17847_v38 }
 0xb56   :  { %4354 = vmatpush1.bf16.msra.mxu1 %v17854_v20  ;;  %4395 = vmatpush1.bf16.msra.mxu0 %v17859_v46 }
 0xb57   :  { %4355 = vmatprep.subr.bf16.mxu1 %v17866_v19  ;;  %4396 = vmatprep.subr.bf16.mxu0 %v17871_v52 }
 0xb5a   :  { %4356 = vmatpush1.bf16.msra.mxu1 %v17878_v2  ;;  %4397 = vmatpush1.bf16.msra.mxu0 %v17883_v6 }
 0xb5b   :  { %4357 = vmatprep.subr.bf16.mxu1 %v17890_v3  ;;  %4398 = vmatprep.subr.bf16.mxu0 %v17895_v16 }
 0xb5e   :  { %4358 = vmatpush1.bf16.msra.mxu1 %v17902_v14  ;;  %4399 = vmatpush1.bf16.msra.mxu0 %v17907_v29 }
 0xb5f   :  { %4359 = vmatprep.subr.bf16.mxu1 %v17914_v54  ;;  %4400 = vmatprep.subr.bf16.mxu0 %v17919_v51 }
 0xb62   :  { %4360 = vmatpush1.bf16.msra.mxu1 %v17926_v49  ;;  %4401 = vmatpush1.bf16.msra.mxu0 %v17931_v9 }
 0xb63   :  { %4688 = vmatprep.subr.bf16.mxu1 %v17976_v33  ;;  %4729 = vmatprep.subr.bf16.mxu0 %v17981_v47 }
 0xbe5   :  { %v3986_v57 = vpop.f32.mrf.mxu1  ;;  %v4027_v11 = vpop.f32.mrf.mxu0 }
 0xbe6   :  { %v17991_v23 = vadd.f32 %v3986_v57, %v3775_v50  ;;  %v17993_v32 = vadd.f32 %v4027_v11, %v3783_v31 }
 0xbe7   :  { %v3988_v58 = vpop.f32.mrf.mxu1  ;;  %v4029_v28 = vpop.f32.mrf.mxu0 }
 0xbe8   :  { %21553 = vst [vmem:[#allocation19_spill] sm:$0xff] %v17991_v23  ;;  %21554 = vst [vmem:[#allocation20_spill] sm:$0xff] %v17993_v32  ;;  %v17995_v56 = vadd.f32 %v3988_v58, %v3779_v41  ;;  %v21556_v58 = vld [vmem:[#allocation7_spill] sm:$0xff] }
 0xbe9   :  { %v3990_v48 = vpop.f32.mrf.mxu1  ;;  %v4031_v0 = vpop.f32.mrf.mxu0 }
 0xbea   :  { %21555 = vst [vmem:[#allocation21_spill] sm:$0xff] %v17995_v56  ;;  %v3787_v0 = vrot.slane %v11697_v40, %v21556_v58  ;;  %v18127_v58 = vld [vmem:[%s20694_s1 + $0x74c] ss:$16 sps:$4 sm:$0xff]  }
 0xbeb   :  { %v3991_v17 = vpop.f32.mrf.mxu1  ;;  %v4032_v21 = vpop.f32.mrf.mxu0  ;;  %21563 = vst [vmem:[#allocation54_spill] sm:$0xff] %v18127_v58 }
 0xbec   :  { %v18001_v17 = vadd.f32 %v4029_v28, %v3787_v0 }
 0xbee   :  { %21557 = vst [vmem:[#allocation13_spill] sm:$0xff] %v18001_v17 }
 0xc05   :  { %v4261_v26 = vpop.f32.mrf.mxu1  ;;  %v4302_v59 = vpop.f32.mrf.mxu0 }
 0xc06   :  { %v4309_v1 = vadd.f32 %v4261_v26, %v17991_v23  ;;  %v4311_v12 = vadd.f32 %v4302_v59, %v17993_v32 }
 0xc07   :  { %v4263_v24 = vpop.f32.mrf.mxu1  ;;  %v4304_v25 = vpop.f32.mrf.mxu0 }
 0xc08   :  { %v11794_v45 = vmul.f32 -1.442695, %v4309_v1  ;;  %v11796_v5 = vmul.f32 -1.442695, %v4311_v12  ;;  %v4310_v43 = vadd.f32 %v4263_v24, %v17995_v56  ;;  %v4312_v21 = vadd.f32 %v4304_v25, %v18001_v17 }
 0xc09   :  { %v4265_v18 = vpop.f32.mrf.mxu1  ;;  %v4306_v61 = vpop.f32.mrf.mxu0 }
 0xc0a   :  { %14507 = vpow2.f32 %v11794_v45  ;;  %v11795_v57 = vmul.f32 -1.442695, %v4310_v43  ;;  %v11797_v41 = vmul.f32 -1.442695, %v4312_v21  ;;  %v18010_v21 = vld [vmem:[%s20694_s1 + $0x7e0] ss:$16 sps:$4 sm:$0xff]  }
 0xc0b   :  { %14509 = vpow2.f32 %v11796_v5  ;;  %v4266_v11 = vpop.f32.mrf.mxu1  ;;  %v4307_v48 = vpop.f32.mrf.mxu0 }
 0xc0c   :  { %14511 = vpow2.f32 %v11795_v57 }
 0xc17   :  { %v14508_v50 = vpop.eup %14507 }
 0xc18   :  { %v14510_v31 = vpop.eup %14509  ;;  %v4325_v12 = vadd.f32 1.0, %v14508_v50  ;;  %v18015_v50 = vld [vmem:[%s20694_s1 + $0x7e8] ss:$16 sps:$4 sm:$0xff]  }
 0xc19   :  { %v14512_v26 = vpop.eup %14511  ;;  %v4327_v59 = vadd.f32 1.0, %v14510_v31 }
 0xc1a   :  { %v4326_v1 = vadd.f32 1.0, %v14512_v26  ;;  %v18027_v26 = vld [vmem:[%s20694_s1 + $0x7cc] ss:$16 sps:$4 sm:$0xff]  }
 0xc1b   :  { %14513 = vrcp.f32 %v4327_v59  ;;  %v18036_v59 = vld [vmem:[%s20694_s1 + $0x7c0] ss:$16 sps:$4 sm:$0xff]  }
 0xc1c   :  { %14515 = vpow2.f32 %v11797_v41  ;;  %v18022_v41 = vld [vmem:[%s20694_s1 + $0x7c4] ss:$16 sps:$4 sm:$0xff]  }
 0xc1d   :  { %14517 = vrcp.f32 %v4326_v1  ;;  %v18041_v1 = vld [vmem:[%s20694_s1 + $0x7c8] ss:$16 sps:$4 sm:$0xff]  }
 0xc1e   :  { %14519 = vrcp.f32 %v4325_v12  ;;  %v18048_v12 = vld [vmem:[%s20694_s1 + $0x7a4] ss:$16 sps:$4 sm:$0xff]  }
 0xc28   :  { %v14514_v24 = vpop.eup %14513 }
 0xc29   :  { %v14516_v45 = vpop.eup %14515  ;;  %v4337_v5 = vmul.f32 2.0, %v14514_v24  ;;  %v18053_v24 = vld [vmem:[%s20694_s1 + $0x7ac] ss:$16 sps:$4 sm:$0xff]  }
 0xc2a   :  { %v14518_v43 = vpop.eup %14517  ;;  %v4328_v18 = vadd.f32 1.0, %v14516_v45  ;;  %v18062_v45 = vld [vmem:[%s20694_s1 + $0x7a0] ss:$16 sps:$4 sm:$0xff]  }
 0xc2b   :  { %v11798_v40 = vadd.f32 -1.0, %v4337_v5  ;;  %v14520_v28 = vpop.eup %14519  ;;  %v4339_v25 = vmul.f32 0.0, %v14518_v43  ;;  %v18067_v5 = vld [vmem:[%s20694_s1 + $0x7a8] ss:$16 sps:$4 sm:$0xff]   ;;  %v18074_v43 = vld [vmem:[%s20694_s1 + $0x784] ss:$16 sps:$4 sm:$0xff]  }
 0xc2c   :  { %14521 = vrcp.f32 %v4328_v18  ;;  %v18091_v18 = vld [vmem:[%s20694_s1 + $0x788] ss:$16 sps:$4 sm:$0xff]  }
 0xc2d   :  { %v4340_v61 = vmul.f32 %v14520_v28, %v11798_v40  ;;  %v18079_v40 = vld [vmem:[%s20694_s1 + $0x78c] ss:$16 sps:$4 sm:$0xff]   ;;  %v18086_v28 = vld [vmem:[%s20694_s1 + $0x780] ss:$16 sps:$4 sm:$0xff]  }
 0xc2f   :  { %v18004_v57 = vadd.f32 %v4340_v61, %v4339_v25  ;;  %v18098_v61 = vld [vmem:[%s20694_s1 + $0x764] ss:$16 sps:$4 sm:$0xff]   ;;  %v18103_v25 = vld [vmem:[%s20694_s1 + $0x76c] ss:$16 sps:$4 sm:$0xff]  }
 0xc30   :  { %21558 = vst [vmem:[#allocation24_spill] sm:$0xff] %v18098_v61  ;;  %21559 = vst [vmem:[#allocation51_spill] sm:$0xff] %v18103_v25 }
 0xc31   :  { %14523 = vtanh.f32 %v18004_v57 }
 0xc39   :  { %v14522_v11 = vpop.eup %14521 }
 0xc3e   :  { %v14524_v48 = vpop.eup %14523 }
 0xc3f   :  { %v4343_v0 = vmul.f32 %v14524_v48, %v14522_v11  ;;  %v18110_v11 = vld [vmem:[%s20694_s1 + $0x760] ss:$16 sps:$4 sm:$0xff]   ;;  %v18115_v48 = vld [vmem:[%s20694_s1 + $0x768] ss:$16 sps:$4 sm:$0xff]  }
 0xc40   :  { %21560 = vst [vmem:[#allocation22_spill] sm:$0xff] %v18110_v11  ;;  %21561 = vst [vmem:[#allocation23_spill] sm:$0xff] %v18115_v48 }
 0xc41   :  { %v18017_v31 = vpack.c.bf16 %v4343_v0, %v4343_v0  ;;  %v18122_v0 = vld [vmem:[%s20694_s1 + $0x744] ss:$16 sps:$4 sm:$0xff]  }
 0xc42   :  { %21562 = vst [vmem:[#allocation53_spill] sm:$0xff] %v18122_v0 }
 0xc43   :  { %4378 = vmatmul.mubr.bf16.vlgmr.msra.gmra.mxu1 %v18017_v31  ;;  %4419 = vmatmul.mubr.bf16.vlgmr.msra.gmra.mxu0 %v18017_v31 }
 0xc44   :  { %4689 = vmatpush1.bf16.msra.mxu1 %v18010_v21  ;;  %4730 = vmatpush1.bf16.msra.mxu0 %v18015_v50 }
 0xc45   :  { %4690 = vmatprep.subr.bf16.mxu1 %v18022_v41  ;;  %4731 = vmatprep.subr.bf16.mxu0 %v18027_v26 }
 0xc46   :  { %4720 = vmatprep.mubr.bf16.mxu1 %v21154_v53  ;;  %4761 = vmatprep.mubr.bf16.mxu0 %v21154_v53 }
 0xc48   :  { %4691 = vmatpush1.bf16.msra.mxu1 %v18036_v59  ;;  %4732 = vmatpush1.bf16.msra.mxu0 %v18041_v1 }
 0xc49   :  { %4692 = vmatprep.subr.bf16.mxu1 %v18048_v12  ;;  %4733 = vmatprep.subr.bf16.mxu0 %v18053_v24 }
 0xc4c   :  { %4693 = vmatpush1.bf16.msra.mxu1 %v18062_v45  ;;  %4734 = vmatpush1.bf16.msra.mxu0 %v18067_v5 }
 0xc4d   :  { %4694 = vmatprep.subr.bf16.mxu1 %v18074_v43  ;;  %4735 = vmatprep.subr.bf16.mxu0 %v18079_v40 }
 0xc50   :  { %4695 = vmatpush1.bf16.msra.mxu1 %v18086_v28  ;;  %4736 = vmatpush1.bf16.msra.mxu0 %v18091_v18 }
 0xc51   :  { %4696 = vmatprep.subr.bf16.mxu1 %v18098_v61  ;;  %4737 = vmatprep.subr.bf16.mxu0 %v18103_v25  ;;  %v18134_v61 = vld [vmem:[%s20694_s1 + $0x740] ss:$16 sps:$4 sm:$0xff]   ;;  %v18139_v25 = vld [vmem:[%s20694_s1 + $0x748] ss:$16 sps:$4 sm:$0xff]  }
 0xc52   :  { %21564 = vst [vmem:[#allocation55_spill] sm:$0xff] %v18134_v61  ;;  %21565 = vst [vmem:[#allocation56_spill] sm:$0xff] %v18139_v25 }
 0xc54   :  { %4697 = vmatpush1.bf16.msra.mxu1 %v18110_v11  ;;  %4738 = vmatpush1.bf16.msra.mxu0 %v18115_v48  ;;  %v18146_v11 = vld [vmem:[%s20694_s1 + $0x724] ss:$16 sps:$4 sm:$0xff]   ;;  %v18151_v48 = vld [vmem:[%s20694_s1 + $0x72c] ss:$16 sps:$4 sm:$0xff]  }
 0xc55   :  { %4698 = vmatprep.subr.bf16.mxu1 %v18122_v0  ;;  %4739 = vmatprep.subr.bf16.mxu0 %v18127_v58  ;;  %21566 = vst [vmem:[#allocation25_spill] sm:$0xff] %v18146_v11  ;;  %21567 = vst [vmem:[#allocation67_spill] sm:$0xff] %v18151_v48  ;;  %v18158_v0 = vld [vmem:[%s20694_s1 + $0x720] ss:$16 sps:$4 sm:$0xff]   ;;  %v18163_v58 = vld [vmem:[%s20694_s1 + $0x728] ss:$16 sps:$4 sm:$0xff]  }
 0xc56   :  { %21568 = vst [vmem:[#allocation68_spill] sm:$0xff] %v18158_v0  ;;  %21569 = vst [vmem:[#allocation71_spill] sm:$0xff] %v18163_v58 }
 0xc58   :  { %4699 = vmatpush1.bf16.msra.mxu1 %v18134_v61  ;;  %4740 = vmatpush1.bf16.msra.mxu0 %v18139_v25  ;;  %v18170_v61 = vld [vmem:[%s20694_s1 + $0x704] ss:$16 sps:$4 sm:$0xff]   ;;  %v18175_v25 = vld [vmem:[%s20694_s1 + $0x70c] ss:$16 sps:$4 sm:$0xff]  }
 0xc59   :  { %4700 = vmatprep.subr.bf16.mxu1 %v18146_v11  ;;  %4741 = vmatprep.subr.bf16.mxu0 %v18151_v48  ;;  %21570 = vst [vmem:[#allocation10_spill] sm:$0xff] %v18170_v61  ;;  %21571 = vst [vmem:[#allocation11_spill] sm:$0xff] %v18175_v25  ;;  %v18182_v11 = vld [vmem:[%s20694_s1 + $0x700] ss:$16 sps:$4 sm:$0xff]   ;;  %v18187_v48 = vld [vmem:[%s20694_s1 + $0x708] ss:$16 sps:$4 sm:$0xff]  }
 0xc5a   :  { %21572 = vst [vmem:[#allocation12_spill] sm:$0xff] %v18182_v11  ;;  %21573 = vst [vmem:[#allocation26_spill] sm:$0xff] %v18187_v48 }
 0xc5c   :  { %4701 = vmatpush1.bf16.msra.mxu1 %v18158_v0  ;;  %4742 = vmatpush1.bf16.msra.mxu0 %v18163_v58  ;;  %v18194_v0 = vld [vmem:[%s20694_s1 + $0x3e4] ss:$16 sps:$4 sm:$0xff]   ;;  %v18199_v58 = vld [vmem:[%s20694_s1 + $0x3ec] ss:$16 sps:$4 sm:$0xff]  }
 0xc5d   :  { %4702 = vmatprep.subr.bf16.mxu1 %v18170_v61  ;;  %4743 = vmatprep.subr.bf16.mxu0 %v18175_v25  ;;  %21574 = vst [vmem:[#allocation27_spill] sm:$0xff] %v18194_v0  ;;  %21575 = vst [vmem:[#allocation28_spill] sm:$0xff] %v18199_v58  ;;  %v18206_v61 = vld [vmem:[%s20694_s1 + $0x3e0] ss:$16 sps:$4 sm:$0xff]   ;;  %v18211_v25 = vld [vmem:[%s20694_s1 + $0x3e8] ss:$16 sps:$4 sm:$0xff]  }
 0xc5e   :  { %21576 = vst [vmem:[#allocation34_spill] sm:$0xff] %v18206_v61  ;;  %21577 = vst [vmem:[#allocation35_spill] sm:$0xff] %v18211_v25 }
 0xc60   :  { %4703 = vmatpush1.bf16.msra.mxu1 %v18182_v11  ;;  %4744 = vmatpush1.bf16.msra.mxu0 %v18187_v48  ;;  %v18218_v11 = vld [vmem:[%s20694_s1 + $0x3c4] ss:$16 sps:$4 sm:$0xff]   ;;  %v18223_v48 = vld [vmem:[%s20694_s1 + $0x3cc] ss:$16 sps:$4 sm:$0xff]  }
 0xc61   :  { %4930 = vmatprep.subr.bf16.mxu1 %v18194_v0  ;;  %4971 = vmatprep.subr.bf16.mxu0 %v18199_v58  ;;  %21578 = vst [vmem:[#allocation36_spill] sm:$0xff] %v18218_v11  ;;  %21579 = vst [vmem:[#allocation37_spill] sm:$0xff] %v18223_v48  ;;  %v18232_v58 = vld [vmem:[%s20694_s1 + $0x3c0] ss:$16 sps:$4 sm:$0xff]   ;;  %v18237_v0 = vld [vmem:[%s20694_s1 + $0x3c8] ss:$16 sps:$4 sm:$0xff]  }
 0xc62   :  { %21580 = vst [vmem:[#allocation38_spill] sm:$0xff] %v18232_v58  ;;  %21581 = vst [vmem:[#allocation39_spill] sm:$0xff] %v18237_v0 }
 0xc63   :  { %4721 = vmatmul.mubr.bf16.vlgmr.msra.gmra.mxu1 %v21154_v53  ;;  %4762 = vmatmul.mubr.bf16.vlgmr.msra.gmra.mxu0 %v21154_v53 }
 0xc64   :  { %4931 = vmatpush1.bf16.msra.mxu1 %v18206_v61  ;;  %4972 = vmatpush1.bf16.msra.mxu0 %v18211_v25  ;;  %v18244_v61 = vld [vmem:[%s20694_s1 + $0x3a4] ss:$16 sps:$4 sm:$0xff]   ;;  %v18249_v25 = vld [vmem:[%s20694_s1 + $0x3ac] ss:$16 sps:$4 sm:$0xff]  }
 0xc65   :  { %4932 = vmatprep.subr.bf16.mxu1 %v18218_v11  ;;  %4973 = vmatprep.subr.bf16.mxu0 %v18223_v48  ;;  %21582 = vst [vmem:[#allocation40_spill] sm:$0xff] %v18244_v61  ;;  %21583 = vst [vmem:[#allocation41_spill] sm:$0xff] %v18249_v25  ;;  %v18258_v48 = vld [vmem:[%s20694_s1 + $0x3a0] ss:$16 sps:$4 sm:$0xff]   ;;  %v18263_v11 = vld [vmem:[%s20694_s1 + $0x3a8] ss:$16 sps:$4 sm:$0xff]  }
 0xc66   :  { %4962 = vmatprep.mubr.bf16.mxu1 %v21154_v53  ;;  %5003 = vmatprep.mubr.bf16.mxu0 %v21154_v53  ;;  %21584 = vst [vmem:[#allocation42_spill] sm:$0xff] %v18258_v48  ;;  %21585 = vst [vmem:[#allocation29_spill] sm:$0xff] %v18263_v11 }
 0xc68   :  { %4933 = vmatpush1.bf16.msra.mxu1 %v18232_v58  ;;  %4974 = vmatpush1.bf16.msra.mxu0 %v18237_v0  ;;  %v18270_v58 = vld [vmem:[%s20694_s1 + $0x384] ss:$16 sps:$4 sm:$0xff]   ;;  %v18275_v0 = vld [vmem:[%s20694_s1 + $0x38c] ss:$16 sps:$4 sm:$0xff]  }
 0xc69   :  { %4934 = vmatprep.subr.bf16.mxu1 %v18244_v61  ;;  %4975 = vmatprep.subr.bf16.mxu0 %v18249_v25  ;;  %21586 = vst [vmem:[#allocation43_spill] sm:$0xff] %v18270_v58  ;;  %21587 = vst [vmem:[#allocation44_spill] sm:$0xff] %v18275_v0  ;;  %v18282_v61 = vld [vmem:[%s20694_s1 + $0x380] ss:$16 sps:$4 sm:$0xff]   ;;  %v18287_v25 = vld [vmem:[%s20694_s1 + $0x388] ss:$16 sps:$4 sm:$0xff]  }
 0xc6a   :  { %21588 = vst [vmem:[#allocation45_spill] sm:$0xff] %v18282_v61  ;;  %21589 = vst [vmem:[#allocation46_spill] sm:$0xff] %v18287_v25 }
 0xc6c   :  { %4935 = vmatpush1.bf16.msra.mxu1 %v18258_v48  ;;  %4976 = vmatpush1.bf16.msra.mxu0 %v18263_v11  ;;  %v18294_v48 = vld [vmem:[%s20694_s1 + $0x364] ss:$16 sps:$4 sm:$0xff]   ;;  %v18299_v11 = vld [vmem:[%s20694_s1 + $0x36c] ss:$16 sps:$4 sm:$0xff]  }
 0xc6d   :  { %4936 = vmatprep.subr.bf16.mxu1 %v18270_v58  ;;  %4977 = vmatprep.subr.bf16.mxu0 %v18275_v0  ;;  %21590 = vst [vmem:[#allocation47_spill] sm:$0xff] %v18294_v48  ;;  %21591 = vst [vmem:[#allocation48_spill] sm:$0xff] %v18299_v11  ;;  %v18306_v58 = vld [vmem:[%s20694_s1 + $0x360] ss:$16 sps:$4 sm:$0xff]   ;;  %v18311_v0 = vld [vmem:[%s20694_s1 + $0x368] ss:$16 sps:$4 sm:$0xff]  }
 0xc6e   :  { %21592 = vst [vmem:[#allocation49_spill] sm:$0xff] %v18306_v58  ;;  %21593 = vst [vmem:[#allocation50_spill] sm:$0xff] %v18311_v0 }
 0xc70   :  { %4937 = vmatpush1.bf16.msra.mxu1 %v18282_v61  ;;  %4978 = vmatpush1.bf16.msra.mxu0 %v18287_v25  ;;  %v18318_v61 = vld [vmem:[%s20694_s1 + $0x344] ss:$16 sps:$4 sm:$0xff]   ;;  %v18323_v25 = vld [vmem:[%s20694_s1 + $0x34c] ss:$16 sps:$4 sm:$0xff]  }
 0xc71   :  { %4938 = vmatprep.subr.bf16.mxu1 %v18294_v48  ;;  %4979 = vmatprep.subr.bf16.mxu0 %v18299_v11  ;;  %21594 = vst [vmem:[#allocation52_spill] sm:$0xff] %v18318_v61  ;;  %21595 = vst [vmem:[#allocation57_spill] sm:$0xff] %v18323_v25  ;;  %v18330_v48 = vld [vmem:[%s20694_s1 + $0x340] ss:$16 sps:$4 sm:$0xff]   ;;  %v18335_v11 = vld [vmem:[%s20694_s1 + $0x348] ss:$16 sps:$4 sm:$0xff]  }
 0xc72   :  { %21596 = vst [vmem:[#allocation58_spill] sm:$0xff] %v18330_v48  ;;  %21597 = vst [vmem:[#allocation59_spill] sm:$0xff] %v18335_v11 }
 0xc74   :  { %4939 = vmatpush1.bf16.msra.mxu1 %v18306_v58  ;;  %4980 = vmatpush1.bf16.msra.mxu0 %v18311_v0  ;;  %v18342_v58 = vld [vmem:[%s20694_s1 + $0x324] ss:$16 sps:$4 sm:$0xff]   ;;  %v18347_v0 = vld [vmem:[%s20694_s1 + $0x32c] ss:$16 sps:$4 sm:$0xff]  }
 0xc75   :  { %4940 = vmatprep.subr.bf16.mxu1 %v18318_v61  ;;  %4981 = vmatprep.subr.bf16.mxu0 %v18323_v25  ;;  %21598 = vst [vmem:[#allocation60_spill] sm:$0xff] %v18342_v58  ;;  %21599 = vst [vmem:[#allocation61_spill] sm:$0xff] %v18347_v0  ;;  %v18354_v61 = vld [vmem:[%s20694_s1 + $0x320] ss:$16 sps:$4 sm:$0xff]   ;;  %v18359_v25 = vld [vmem:[%s20694_s1 + $0x328] ss:$16 sps:$4 sm:$0xff]  }
 0xc78   :  { %4941 = vmatpush1.bf16.msra.mxu1 %v18330_v48  ;;  %4982 = vmatpush1.bf16.msra.mxu0 %v18335_v11  ;;  %v18366_v48 = vld [vmem:[%s20694_s1 + $0x304] ss:$16 sps:$4 sm:$0xff]   ;;  %v18371_v11 = vld [vmem:[%s20694_s1 + $0x30c] ss:$16 sps:$4 sm:$0xff]  }
 0xc79   :  { %4942 = vmatprep.subr.bf16.mxu1 %v18342_v58  ;;  %4983 = vmatprep.subr.bf16.mxu0 %v18347_v0  ;;  %v18378_v58 = vld [vmem:[%s20694_s1 + $0x300] ss:$16 sps:$4 sm:$0xff]   ;;  %v18383_v0 = vld [vmem:[%s20694_s1 + $0x308] ss:$16 sps:$4 sm:$0xff]  }
 0xc7c   :  { %4943 = vmatpush1.bf16.msra.mxu1 %v18354_v61  ;;  %4984 = vmatpush1.bf16.msra.mxu0 %v18359_v25 }
 0xc7d   :  { %4944 = vmatprep.subr.bf16.mxu1 %v18366_v48  ;;  %4985 = vmatprep.subr.bf16.mxu0 %v18371_v11 }
 0xc80   :  { %4945 = vmatpush1.bf16.msra.mxu1 %v18378_v58  ;;  %4986 = vmatpush1.bf16.msra.mxu0 %v18383_v0 }
 0xc81   :  { %5264 = vmatprep.subr.bf16.mxu1 %v17739_v4  ;;  %5305 = vmatprep.subr.bf16.mxu0 %v17744_v60 }
 0xc83   :  { %4963 = vmatmul.mubr.bf16.vlgmr.msra.gmra.mxu1 %v18017_v31  ;;  %5004 = vmatmul.mubr.bf16.vlgmr.msra.gmra.mxu0 %v18017_v31 }
 0xc84   :  { %5265 = vmatpush1.bf16.msra.mxu1 %v17755_v10  ;;  %5306 = vmatpush1.bf16.msra.mxu0 %v17760_v13 }
 0xc85   :  { %5266 = vmatprep.subr.bf16.mxu1 %v17768_v44  ;;  %5307 = vmatprep.subr.bf16.mxu0 %v17773_v8 }
 0xc86   :  { %5296 = vmatprep.mubr.bf16.mxu1 %v21154_v53  ;;  %5337 = vmatprep.mubr.bf16.mxu0 %v21154_v53 }
 0xc88   :  { %5267 = vmatpush1.bf16.msra.mxu1 %v17780_v37  ;;  %5308 = vmatpush1.bf16.msra.mxu0 %v17785_v27 }
 0xc89   :  { %5268 = vmatprep.subr.bf16.mxu1 %v17792_v39  ;;  %5309 = vmatprep.subr.bf16.mxu0 %v17797_v30 }
 0xc8c   :  { %5269 = vmatpush1.bf16.msra.mxu1 %v17806_v22  ;;  %5310 = vmatpush1.bf16.msra.mxu0 %v17811_v7 }
 0xc8d   :  { %5270 = vmatprep.subr.bf16.mxu1 %v17818_v42  ;;  %5311 = vmatprep.subr.bf16.mxu0 %v17823_v62 }
 0xc90   :  { %5271 = vmatpush1.bf16.msra.mxu1 %v17830_v63  ;;  %5312 = vmatpush1.bf16.msra.mxu0 %v17835_v15 }
 0xc91   :  { %5272 = vmatprep.subr.bf16.mxu1 %v17842_v55  ;;  %5313 = vmatprep.subr.bf16.mxu0 %v17847_v38 }
 0xc94   :  { %5273 = vmatpush1.bf16.msra.mxu1 %v17854_v20  ;;  %5314 = vmatpush1.bf16.msra.mxu0 %v17859_v46 }
 0xc95   :  { %5274 = vmatprep.subr.bf16.mxu1 %v17866_v19  ;;  %5315 = vmatprep.subr.bf16.mxu0 %v17871_v52 }
 0xc98   :  { %5275 = vmatpush1.bf16.msra.mxu1 %v17878_v2  ;;  %5316 = vmatpush1.bf16.msra.mxu0 %v17883_v6 }
 0xc99   :  { %5276 = vmatprep.subr.bf16.mxu1 %v17890_v3  ;;  %5317 = vmatprep.subr.bf16.mxu0 %v17895_v16 }
 0xc9c   :  { %5277 = vmatpush1.bf16.msra.mxu1 %v17902_v14  ;;  %5318 = vmatpush1.bf16.msra.mxu0 %v17907_v29 }
 0xc9d   :  { %5278 = vmatprep.subr.bf16.mxu1 %v17914_v54  ;;  %5319 = vmatprep.subr.bf16.mxu0 %v17919_v51 }
 0xca0   :  { %5279 = vmatpush1.bf16.msra.mxu1 %v17926_v49  ;;  %5320 = vmatpush1.bf16.msra.mxu0 %v17931_v9 }
 0xca1   :  { %5606 = vmatprep.subr.bf16.mxu1 %v17976_v33  ;;  %5647 = vmatprep.subr.bf16.mxu0 %v17981_v47 }
 0xd03   :  { %v4379_v4 = vpop.f32.mrf.mxu1  ;;  %v4420_v60 = vpop.f32.mrf.mxu0 }
 0xd04   :  { %v4427_v10 = vadd.f32 %v4379_v4, %v17991_v23  ;;  %v4429_v13 = vadd.f32 %v4420_v60, %v17993_v32 }
 0xd05   :  { %v4381_v44 = vpop.f32.mrf.mxu1  ;;  %v4422_v8 = vpop.f32.mrf.mxu0 }
 0xd06   :  { %v11799_v37 = vmul.f32 -1.442695, %v4427_v10  ;;  %v11801_v27 = vmul.f32 -1.442695, %v4429_v13  ;;  %v4428_v39 = vadd.f32 %v4381_v44, %v17995_v56  ;;  %v4430_v63 = vadd.f32 %v4422_v8, %v18001_v17 }
 0xd07   :  { %v4383_v30 = vpop.f32.mrf.mxu1  ;;  %v4424_v22 = vpop.f32.mrf.mxu0 }
 0xd08   :  { %14525 = vpow2.f32 %v11799_v37  ;;  %v11800_v7 = vmul.f32 -1.442695, %v4428_v39  ;;  %v11802_v38 = vmul.f32 -1.442695, %v4430_v63  ;;  %v11932_v30 = vld [vmem:[%s20696_s3 + $0xc] sm:$0xf] }
 0xd09   :  { %14527 = vpow2.f32 %v11801_v27  ;;  %v4384_v42 = vpop.f32.mrf.mxu1  ;;  %v4425_v62 = vpop.f32.mrf.mxu0  ;;  %v5026_v22 = vrot.slane %v11932_v30, %v21551_v35 }
 0xd0a   :  { %14529 = vpow2.f32 %v11800_v7 }
 0xd15   :  { %v14526_v15 = vpop.eup %14525 }
 0xd16   :  { %v14528_v55 = vpop.eup %14527  ;;  %v4443_v52 = vadd.f32 1.0, %v14526_v15  ;;  %v5022_v15 = vrot.slane %v11932_v30, %v21552_v36 }
 0xd17   :  { %v14530_v20 = vpop.eup %14529  ;;  %v4445_v46 = vadd.f32 1.0, %v14528_v55 }
 0xd18   :  { %v4444_v19 = vadd.f32 1.0, %v14530_v20 }
 0xd19   :  { %14531 = vrcp.f32 %v4445_v46 }
 0xd1a   :  { %14533 = vpow2.f32 %v11802_v38 }
 0xd1b   :  { %14535 = vrcp.f32 %v4444_v19 }
 0xd1c   :  { %14537 = vrcp.f32 %v4443_v52 }
 0xd23   :  { %v4722_v2 = vpop.f32.mrf.mxu1  ;;  %v4763_v6 = vpop.f32.mrf.mxu0 }
 0xd25   :  { %v4724_v3 = vpop.f32.mrf.mxu1  ;;  %v18431_v16 = vpop.f32.mrf.mxu0 }
 0xd26   :  { %v14532_v14 = vpop.eup %14531 }
 0xd27   :  { %v14534_v29 = vpop.eup %14533  ;;  %v4455_v54 = vmul.f32 2.0, %v14532_v14  ;;  %v4726_v51 = vpop.f32.mrf.mxu1 }
 0xd28   :  { %v4767_v49 = vpop.f32.mrf.mxu0  ;;  %v14536_v9 = vpop.eup %14535  ;;  %v4446_v60 = vadd.f32 1.0, %v14534_v29  ;;  %v21609_v51 = vld [vmem:[#allocation25_spill] sm:$0xff] }
 0xd29   :  { %v11803_v33 = vadd.f32 -1.0, %v4455_v54  ;;  %v4727_v47 = vpop.f32.mrf.mxu1  ;;  %v14538_v4 = vpop.eup %14537  ;;  %v4457_v13 = vmul.f32 %v14536_v9, %v18004_v57  ;;  %v5018_v57 = vrot.slane %v11932_v30, %v21550_v34  ;;  %v21608_v54 = vld [vmem:[#allocation56_spill] sm:$0xff]  ;;  %v21610_v9 = vld [vmem:[#allocation67_spill] sm:$0xff] }
 0xd2a   :  { %v4768_v31 = vpop.f32.mrf.mxu0  ;;  %14539 = vrcp.f32 %v4446_v60 }
 0xd2b   :  { %v4458_v10 = vmul.f32 %v14538_v4, %v11803_v33  ;;  %v21611_v4 = vld [vmem:[#allocation68_spill] sm:$0xff] }
 0xd2d   :  { %v18434_v44 = vadd.f32 %v4458_v10, %v4457_v13  ;;  %v21612_v10 = vld [vmem:[#allocation71_spill] sm:$0xff]  ;;  %v21613_v13 = vld [vmem:[#allocation10_spill] sm:$0xff] }
 0xd2f   :  { %14541 = vtanh.f32 %v18434_v44 }
 0xd37   :  { %v14540_v8 = vpop.eup %14539 }
 0xd3c   :  { %v14542_v37 = vpop.eup %14541 }
 0xd3d   :  { %v4461_v27 = vmul.f32 %v14542_v37, %v14540_v8  ;;  %v21614_v8 = vld [vmem:[#allocation11_spill] sm:$0xff]  ;;  %v21615_v37 = vld [vmem:[#allocation12_spill] sm:$0xff] }
 0xd3f   :  { %v18437_v39 = vpack.c.bf16 %v4461_v27, %v4461_v27  ;;  %v21616_v27 = vld [vmem:[#allocation26_spill] sm:$0xff] }
 0xd41   :  { %5297 = vmatmul.mubr.bf16.vlgmr.msra.gmra.mxu1 %v18437_v39  ;;  %5338 = vmatmul.mubr.bf16.vlgmr.msra.gmra.mxu0 %v18437_v39 }
 0xd42   :  { %5607 = vmatpush1.bf16.msra.mxu1 %v18010_v21  ;;  %5648 = vmatpush1.bf16.msra.mxu0 %v18015_v50 }
 0xd43   :  { %v4964_v7 = vpop.f32.mrf.mxu1  ;;  %v5005_v42 = vpop.f32.mrf.mxu0  ;;  %5608 = vmatprep.subr.bf16.mxu1 %v18022_v41  ;;  %5649 = vmatprep.subr.bf16.mxu0 %v18027_v26 }
 0xd44   :  { %v4965_v62 = vadd.f32 %v4964_v7, %v4722_v2  ;;  %v5006_v63 = vadd.f32 %v5005_v42, %v4763_v6  ;;  %5638 = vmatprep.mubr.bf16.mxu1 %v21154_v53  ;;  %5679 = vmatprep.mubr.bf16.mxu0 %v21154_v53 }
 0xd45   :  { %v4966_v55 = vpop.f32.mrf.mxu1  ;;  %v5007_v38 = vpop.f32.mrf.mxu0 }
 0xd46   :  { %v5035_v20 = vadd.f32 %v5018_v57, %v4965_v62  ;;  %v5037_v21 = vadd.f32 %v5026_v22, %v5006_v63  ;;  %v4967_v46 = vadd.f32 %v4966_v55, %v4724_v3  ;;  %5609 = vmatpush1.bf16.msra.mxu1 %v18036_v59  ;;  %5650 = vmatpush1.bf16.msra.mxu0 %v18041_v1  ;;  %v21600_v59 = vld [vmem:[#allocation24_spill] sm:$0xff]  ;;  %v21602_v3 = vld [vmem:[#allocation51_spill] sm:$0xff] }
 0xd47   :  { %v4968_v50 = vpop.f32.mrf.mxu1  ;;  %v5009_v19 = vpop.f32.mrf.mxu0  ;;  %5610 = vmatprep.subr.bf16.mxu1 %v18048_v12  ;;  %5651 = vmatprep.subr.bf16.mxu0 %v18053_v24  ;;  %v5008_v1 = vadd.f32 %v5007_v38, %v18431_v16  ;;  %v21601_v12 = vld [vmem:[#allocation7_spill] sm:$0xff]  ;;  %v21618_v57 = vld [vmem:[#allocation28_spill] sm:$0xff] }
 0xd48   :  { %v11933_v41 = vmul.f32 -1.442695, %v5035_v20  ;;  %v11935_v26 = vmul.f32 -1.442695, %v5037_v21  ;;  %v5036_v52 = vadd.f32 %v5022_v15, %v4967_v46  ;;  %v5030_v24 = vrot.slane %v11932_v30, %v21601_v12  ;;  %v21617_v30 = vld [vmem:[#allocation27_spill] sm:$0xff] }
 0xd49   :  { %v4969_v2 = vpop.f32.mrf.mxu1  ;;  %v5010_v6 = vpop.f32.mrf.mxu0 }
 0xd4a   :  { %14543 = vpow2.f32 %v11933_v41  ;;  %v11934_v14 = vmul.f32 -1.442695, %v5036_v52  ;;  %5611 = vmatpush1.bf16.msra.mxu1 %v18062_v45  ;;  %5652 = vmatpush1.bf16.msra.mxu0 %v18067_v5  ;;  %v21603_v45 = vld [vmem:[#allocation22_spill] sm:$0xff]  ;;  %v21604_v5 = vld [vmem:[#allocation23_spill] sm:$0xff]  ;;  %v5038_v29 = vadd.f32 %v5030_v24, %v5008_v1  ;;  %v21622_v2 = vld [vmem:[#allocation36_spill] sm:$0xff] }
 0xd4b   :  { %14545 = vpow2.f32 %v11935_v26  ;;  %5612 = vmatprep.subr.bf16.mxu1 %v18074_v43  ;;  %5653 = vmatprep.subr.bf16.mxu0 %v18079_v40  ;;  %v21605_v43 = vld [vmem:[#allocation53_spill] sm:$0xff]  ;;  %v21606_v40 = vld [vmem:[#allocation54_spill] sm:$0xff]  ;;  %v21621_v52 = vld [vmem:[#allocation35_spill] sm:$0xff] }
 0xd4c   :  { %14547 = vpow2.f32 %v11934_v14  ;;  %v11936_v49 = vmul.f32 -1.442695, %v5038_v29  ;;  %v21620_v26 = vld [vmem:[#allocation34_spill] sm:$0xff]  ;;  %v21623_v6 = vld [vmem:[#allocation37_spill] sm:$0xff]  ;;  %v21626_v1 = vld [vmem:[#allocation40_spill] sm:$0xff] }
 0xd4d   :  { %v21624_v14 = vld [vmem:[#allocation38_spill] sm:$0xff]  ;;  %v21627_v24 = vld [vmem:[#allocation41_spill] sm:$0xff] }
 0xd4e   :  { %5613 = vmatpush1.bf16.msra.mxu1 %v18086_v28  ;;  %5654 = vmatpush1.bf16.msra.mxu0 %v18091_v18  ;;  %v21607_v28 = vld [vmem:[#allocation55_spill] sm:$0xff]  ;;  %v21632_v29 = vld [vmem:[#allocation45_spill] sm:$0xff] }
 0xd4f   :  { %5614 = vmatprep.subr.bf16.mxu1 %v21600_v59  ;;  %5655 = vmatprep.subr.bf16.mxu0 %v21602_v3  ;;  %v21625_v59 = vld [vmem:[#allocation39_spill] sm:$0xff]  ;;  %v21628_v3 = vld [vmem:[#allocation42_spill] sm:$0xff] }
 0xd52   :  { %5615 = vmatpush1.bf16.msra.mxu1 %v21603_v45  ;;  %5656 = vmatpush1.bf16.msra.mxu0 %v21604_v5  ;;  %v21629_v45 = vld [vmem:[#allocation29_spill] sm:$0xff]  ;;  %v21630_v5 = vld [vmem:[#allocation43_spill] sm:$0xff] }
 0xd53   :  { %5616 = vmatprep.subr.bf16.mxu1 %v21605_v43  ;;  %5657 = vmatprep.subr.bf16.mxu0 %v21606_v40  ;;  %v21631_v43 = vld [vmem:[#allocation44_spill] sm:$0xff]  ;;  %v21633_v40 = vld [vmem:[#allocation46_spill] sm:$0xff] }
 0xd56   :  { %5617 = vmatpush1.bf16.msra.mxu1 %v21607_v28  ;;  %5658 = vmatpush1.bf16.msra.mxu0 %v21608_v54  ;;  %v21634_v28 = vld [vmem:[#allocation47_spill] sm:$0xff]  ;;  %v21636_v54 = vld [vmem:[#allocation49_spill] sm:$0xff] }
 0xd57   :  { %v14544_v18 = vpop.eup %14543  ;;  %5618 = vmatprep.subr.bf16.mxu1 %v21609_v51  ;;  %5659 = vmatprep.subr.bf16.mxu0 %v21610_v9  ;;  %v21637_v51 = vld [vmem:[#allocation50_spill] sm:$0xff] }
 0xd58   :  { %v14546_v16 = vpop.eup %14545  ;;  %v5051_v60 = vadd.f32 1.0, %v14544_v18  ;;  %v21635_v18 = vld [vmem:[#allocation48_spill] sm:$0xff]  ;;  %v21640_v9 = vld [vmem:[#allocation58_spill] sm:$0xff] }
 0xd59   :  { %v14548_v33 = vpop.eup %14547  ;;  %v5053_v47 = vadd.f32 1.0, %v14546_v16  ;;  %v21638_v16 = vld [vmem:[#allocation52_spill] sm:$0xff] }
 0xd5a   :  { %v5052_v31 = vadd.f32 1.0, %v14548_v33  ;;  %5619 = vmatpush1.bf16.msra.mxu1 %v21611_v4  ;;  %5660 = vmatpush1.bf16.msra.mxu0 %v21612_v10  ;;  %v21641_v33 = vld [vmem:[#allocation59_spill] sm:$0xff]  ;;  %v18523_v4 = vld [vmem:[%s20694_s1 + $0x6e4] ss:$16 sps:$4 sm:$0xff]  }
 0xd5b   :  { %14549 = vrcp.f32 %v5053_v47  ;;  %5620 = vmatprep.subr.bf16.mxu1 %v21613_v13  ;;  %5661 = vmatprep.subr.bf16.mxu0 %v21614_v8  ;;  %v21642_v47 = vld [vmem:[#allocation60_spill] sm:$0xff]  ;;  %v18578_v10 = vld [vmem:[%s20694_s1 + $0x6ac] ss:$16 sps:$4 sm:$0xff]   ;;  %v18592_v8 = vld [vmem:[%s20694_s1 + $0x6a8] ss:$16 sps:$4 sm:$0xff]  }
 0xd5c   :  { %14551 = vpow2.f32 %v11936_v49  ;;  %v21639_v49 = vld [vmem:[#allocation57_spill] sm:$0xff]  ;;  %v18587_v13 = vld [vmem:[%s20694_s1 + $0x6a0] ss:$16 sps:$4 sm:$0xff]  }
 0xd5d   :  { %14553 = vrcp.f32 %v5052_v31  ;;  %v21643_v31 = vld [vmem:[#allocation61_spill] sm:$0xff] }
 0xd5e   :  { %5621 = vmatpush1.bf16.msra.mxu1 %v21615_v37  ;;  %14555 = vrcp.f32 %v5051_v60  ;;  %5662 = vmatpush1.bf16.msra.mxu0 %v21616_v27  ;;  %v18528_v60 = vld [vmem:[%s20694_s1 + $0x6ec] ss:$16 sps:$4 sm:$0xff]   ;;  %v18599_v37 = vld [vmem:[%s20694_s1 + $0x684] ss:$16 sps:$4 sm:$0xff]  }
 0xd5f   :  { %5848 = vmatprep.subr.bf16.mxu1 %v21617_v30  ;;  %5889 = vmatprep.subr.bf16.mxu0 %v21618_v57  ;;  %v18604_v27 = vld [vmem:[%s20694_s1 + $0x68c] ss:$16 sps:$4 sm:$0xff]   ;;  %v18611_v30 = vld [vmem:[%s20694_s1 + $0x680] ss:$16 sps:$4 sm:$0xff]   ;;  %v18616_v57 = vld [vmem:[%s20694_s1 + $0x688] ss:$16 sps:$4 sm:$0xff]  }
 0xd68   :  { %v14550_v22 = vpop.eup %14549 }
 0xd69   :  { %v14552_v7 = vpop.eup %14551  ;;  %v5063_v42 = vmul.f32 2.0, %v14550_v22  ;;  %v18623_v22 = vld [vmem:[%s20694_s1 + $0x664] ss:$16 sps:$4 sm:$0xff]  }
 0xd6a   :  { %v14554_v62 = vpop.eup %14553  ;;  %v5054_v55 = vadd.f32 1.0, %v14552_v7  ;;  %v18628_v7 = vld [vmem:[%s20694_s1 + $0x66c] ss:$16 sps:$4 sm:$0xff]  }
 0xd6b   :  { %v11937_v63 = vadd.f32 -1.0, %v5063_v42  ;;  %v14556_v15 = vpop.eup %14555  ;;  %v5065_v20 = vmul.f32 0.0, %v14554_v62  ;;  %v18635_v42 = vld [vmem:[%s20694_s1 + $0x660] ss:$16 sps:$4 sm:$0xff]   ;;  %v18640_v62 = vld [vmem:[%s20694_s1 + $0x668] ss:$16 sps:$4 sm:$0xff]  }
 0xd6c   :  { %14557 = vrcp.f32 %v5054_v55  ;;  %v18659_v55 = vld [vmem:[%s20694_s1 + $0x640] ss:$16 sps:$4 sm:$0xff]  }
 0xd6d   :  { %v5066_v38 = vmul.f32 %v14556_v15, %v11937_v63  ;;  %v18647_v63 = vld [vmem:[%s20694_s1 + $0x644] ss:$16 sps:$4 sm:$0xff]   ;;  %v18652_v15 = vld [vmem:[%s20694_s1 + $0x64c] ss:$16 sps:$4 sm:$0xff]  }
 0xd6f   :  { %v18483_v21 = vadd.f32 %v5066_v38, %v5065_v20  ;;  %v18664_v38 = vld [vmem:[%s20694_s1 + $0x648] ss:$16 sps:$4 sm:$0xff]   ;;  %v18671_v20 = vld [vmem:[%s20694_s1 + $0x624] ss:$16 sps:$4 sm:$0xff]  }
 0xd71   :  { %14559 = vtanh.f32 %v18483_v21 }
 0xd79   :  { %v14558_v46 = vpop.eup %14557 }
 0xd7e   :  { %v14560_v50 = vpop.eup %14559 }
 0xd7f   :  { %v18486_v19 = vmul.f32 %v14560_v50, %v14558_v46  ;;  %v18676_v46 = vld [vmem:[%s20694_s1 + $0x62c] ss:$16 sps:$4 sm:$0xff]   ;;  %v18683_v50 = vld [vmem:[%s20694_s1 + $0x620] ss:$16 sps:$4 sm:$0xff]  }
 0xd81   :  { %21619 = vst [vmem:[#allocation62_spill] sm:$0xff] %v18486_v19  ;;  %v5413_v41 = vpack.c.bf16 %v18486_v19, %v18486_v19 }
 0xd83   :  { %5639 = vmatmul.mubr.bf16.vlgmr.msra.gmra.mxu1 %v5413_v41  ;;  %5680 = vmatmul.mubr.bf16.vlgmr.msra.gmra.mxu0 %v5413_v41  ;;  %v18688_v41 = vld [vmem:[%s20694_s1 + $0x628] ss:$16 sps:$4 sm:$0xff]  }
 0xd84   :  { %5849 = vmatpush1.bf16.msra.mxu1 %v21620_v26  ;;  %5890 = vmatpush1.bf16.msra.mxu0 %v21621_v52  ;;  %v18695_v26 = vld [vmem:[%s20694_s1 + $0x604] ss:$16 sps:$4 sm:$0xff]   ;;  %v18700_v52 = vld [vmem:[%s20694_s1 + $0x60c] ss:$16 sps:$4 sm:$0xff]  }
 0xd85   :  { %5850 = vmatprep.subr.bf16.mxu1 %v21622_v2  ;;  %5891 = vmatprep.subr.bf16.mxu0 %v21623_v6  ;;  %v18707_v2 = vld [vmem:[%s20694_s1 + $0x600] ss:$16 sps:$4 sm:$0xff]   ;;  %v18712_v6 = vld [vmem:[%s20694_s1 + $0x608] ss:$16 sps:$4 sm:$0xff]  }
 0xd86   :  { %5880 = vmatprep.mubr.bf16.mxu1 %v21154_v53  ;;  %5921 = vmatprep.mubr.bf16.mxu0 %v21154_v53 }
 0xd88   :  { %5851 = vmatpush1.bf16.msra.mxu1 %v21624_v14  ;;  %5892 = vmatpush1.bf16.msra.mxu0 %v21625_v59  ;;  %v18721_v14 = vld [vmem:[%s20694_s1 + $0x7e4] ss:$16 sps:$4 sm:$0xff]   ;;  %v18726_v59 = vld [vmem:[%s20694_s1 + $0x7ec] ss:$16 sps:$4 sm:$0xff]  }
 0xd89   :  { %5852 = vmatprep.subr.bf16.mxu1 %v21626_v1  ;;  %5893 = vmatprep.subr.bf16.mxu0 %v21627_v24 }
 0xd8c   :  { %5853 = vmatpush1.bf16.msra.mxu1 %v21628_v3  ;;  %5894 = vmatpush1.bf16.msra.mxu0 %v21629_v45 }
 0xd8d   :  { %5854 = vmatprep.subr.bf16.mxu1 %v21630_v5  ;;  %5895 = vmatprep.subr.bf16.mxu0 %v21631_v43 }
 0xd90   :  { %5855 = vmatpush1.bf16.msra.mxu1 %v21632_v29  ;;  %5896 = vmatpush1.bf16.msra.mxu0 %v21633_v40 }
 0xd91   :  { %5856 = vmatprep.subr.bf16.mxu1 %v21634_v28  ;;  %5897 = vmatprep.subr.bf16.mxu0 %v21635_v18 }
 0xd94   :  { %5857 = vmatpush1.bf16.msra.mxu1 %v21636_v54  ;;  %5898 = vmatpush1.bf16.msra.mxu0 %v21637_v51 }
 0xd95   :  { %5858 = vmatprep.subr.bf16.mxu1 %v21638_v16  ;;  %5899 = vmatprep.subr.bf16.mxu0 %v21639_v49 }
 0xd98   :  { %5859 = vmatpush1.bf16.msra.mxu1 %v21640_v9  ;;  %5900 = vmatpush1.bf16.msra.mxu0 %v21641_v33 }
 0xd99   :  { %5860 = vmatprep.subr.bf16.mxu1 %v21642_v47  ;;  %5901 = vmatprep.subr.bf16.mxu0 %v21643_v31 }
 0xd9c   :  { %5861 = vmatpush1.bf16.msra.mxu1 %v18354_v61  ;;  %5902 = vmatpush1.bf16.msra.mxu0 %v18359_v25  ;;  %v18535_v61 = vld [vmem:[%s20694_s1 + $0x6e0] ss:$16 sps:$4 sm:$0xff]   ;;  %v18540_v25 = vld [vmem:[%s20694_s1 + $0x6e8] ss:$16 sps:$4 sm:$0xff]  }
 0xd9d   :  { %5862 = vmatprep.subr.bf16.mxu1 %v18366_v48  ;;  %5903 = vmatprep.subr.bf16.mxu0 %v18371_v11  ;;  %v18552_v11 = vld [vmem:[%s20694_s1 + $0x6cc] ss:$16 sps:$4 sm:$0xff]   ;;  %v18561_v48 = vld [vmem:[%s20694_s1 + $0x6c0] ss:$16 sps:$4 sm:$0xff]  }
 0xda0   :  { %5863 = vmatpush1.bf16.msra.mxu1 %v18378_v58  ;;  %5904 = vmatpush1.bf16.msra.mxu0 %v18383_v0  ;;  %v18547_v58 = vld [vmem:[%s20694_s1 + $0x6c4] ss:$16 sps:$4 sm:$0xff]   ;;  %v18566_v0 = vld [vmem:[%s20694_s1 + $0x6c8] ss:$16 sps:$4 sm:$0xff]  }
 0xda1   :  { %6181 = vmatprep.subr.bf16.mxu1 %v18523_v4  ;;  %6222 = vmatprep.subr.bf16.mxu0 %v18528_v60 }
 0xda3   :  { %5881 = vmatmul.mubr.bf16.vlgmr.msra.gmra.mxu1 %v18437_v39  ;;  %5922 = vmatmul.mubr.bf16.vlgmr.msra.gmra.mxu0 %v18437_v39  ;;  %v18573_v39 = vld [vmem:[%s20694_s1 + $0x6a4] ss:$16 sps:$4 sm:$0xff]  }
 0xda4   :  { %6182 = vmatpush1.bf16.msra.mxu1 %v18535_v61  ;;  %6223 = vmatpush1.bf16.msra.mxu0 %v18540_v25 }
 0xda5   :  { %6183 = vmatprep.subr.bf16.mxu1 %v18547_v58  ;;  %6224 = vmatprep.subr.bf16.mxu0 %v18552_v11 }
 0xda6   :  { %6213 = vmatprep.mubr.bf16.mxu1 %v21154_v53  ;;  %6254 = vmatprep.mubr.bf16.mxu0 %v21154_v53 }
 0xda8   :  { %6184 = vmatpush1.bf16.msra.mxu1 %v18561_v48  ;;  %6225 = vmatpush1.bf16.msra.mxu0 %v18566_v0 }
 0xda9   :  { %6185 = vmatprep.subr.bf16.mxu1 %v18573_v39  ;;  %6226 = vmatprep.subr.bf16.mxu0 %v18578_v10 }
 0xdac   :  { %6186 = vmatpush1.bf16.msra.mxu1 %v18587_v13  ;;  %6227 = vmatpush1.bf16.msra.mxu0 %v18592_v8 }
 0xdad   :  { %6187 = vmatprep.subr.bf16.mxu1 %v18599_v37  ;;  %6228 = vmatprep.subr.bf16.mxu0 %v18604_v27 }
 0xdb0   :  { %6188 = vmatpush1.bf16.msra.mxu1 %v18611_v30  ;;  %6229 = vmatpush1.bf16.msra.mxu0 %v18616_v57 }
 0xdb1   :  { %6189 = vmatprep.subr.bf16.mxu1 %v18623_v22  ;;  %6230 = vmatprep.subr.bf16.mxu0 %v18628_v7 }
 0xdb4   :  { %6190 = vmatpush1.bf16.msra.mxu1 %v18635_v42  ;;  %6231 = vmatpush1.bf16.msra.mxu0 %v18640_v62 }
 0xdb5   :  { %6191 = vmatprep.subr.bf16.mxu1 %v18647_v63  ;;  %6232 = vmatprep.subr.bf16.mxu0 %v18652_v15 }
 0xdb8   :  { %6192 = vmatpush1.bf16.msra.mxu1 %v18659_v55  ;;  %6233 = vmatpush1.bf16.msra.mxu0 %v18664_v38 }
 0xdb9   :  { %6193 = vmatprep.subr.bf16.mxu1 %v18671_v20  ;;  %6234 = vmatprep.subr.bf16.mxu0 %v18676_v46 }
 0xdbc   :  { %6194 = vmatpush1.bf16.msra.mxu1 %v18683_v50  ;;  %6235 = vmatpush1.bf16.msra.mxu0 %v18688_v41 }
 0xdbd   :  { %6195 = vmatprep.subr.bf16.mxu1 %v18695_v26  ;;  %6236 = vmatprep.subr.bf16.mxu0 %v18700_v52 }
 0xdc0   :  { %6196 = vmatpush1.bf16.msra.mxu1 %v18707_v2  ;;  %6237 = vmatpush1.bf16.msra.mxu0 %v18712_v6 }
 0xdc1   :  { %6523 = vmatprep.subr.bf16.mxu1 %v18721_v14  ;;  %6564 = vmatprep.subr.bf16.mxu0 %v18726_v59 }
 0xe01   :  { %v5298_v1 = vpop.f32.mrf.mxu1  ;;  %v5339_v24 = vpop.f32.mrf.mxu0 }
 0xe02   :  { %v5346_v3 = vadd.f32 %v5298_v1, %v17991_v23  ;;  %v5348_v45 = vadd.f32 %v5339_v24, %v17993_v32 }
 0xe03   :  { %v5300_v5 = vpop.f32.mrf.mxu1  ;;  %v5341_v43 = vpop.f32.mrf.mxu0 }
 0xe04   :  { %v12002_v29 = vmul.f32 -1.442695, %v5346_v3  ;;  %v12004_v40 = vmul.f32 -1.442695, %v5348_v45  ;;  %v5347_v28 = vadd.f32 %v5300_v5, %v17995_v56  ;;  %v5349_v9 = vadd.f32 %v5341_v43, %v18001_v17 }
 0xe05   :  { %v5302_v18 = vpop.f32.mrf.mxu1  ;;  %v5343_v54 = vpop.f32.mrf.mxu0 }
 0xe06   :  { %14561 = vpow2.f32 %v12002_v29  ;;  %v12003_v51 = vmul.f32 -1.442695, %v5347_v28  ;;  %v12005_v31 = vmul.f32 -1.442695, %v5349_v9 }
 0xe07   :  { %14563 = vpow2.f32 %v12004_v40  ;;  %v5303_v16 = vpop.f32.mrf.mxu1  ;;  %v5344_v49 = vpop.f32.mrf.mxu0 }
 0xe08   :  { %14565 = vpow2.f32 %v12003_v51 }
 0xe13   :  { %v14562_v33 = vpop.eup %14561 }
 0xe14   :  { %v14564_v47 = vpop.eup %14563  ;;  %v5362_v3 = vadd.f32 1.0, %v14562_v33 }
 0xe15   :  { %v14566_v1 = vpop.eup %14565  ;;  %v5364_v24 = vadd.f32 1.0, %v14564_v47  ;;  %v18746_v47 = vld [vmem:[%s20694_s1 + $0x7e8] ss:$16 sps:$4 sm:$0xff]  }
 0xe16   :  { %v5363_v19 = vadd.f32 1.0, %v14566_v1  ;;  %21646 = vst [vmem:[#allocation65_spill] sm:$0xff] %v18746_v47  ;;  %v18758_v1 = vld [vmem:[%s20694_s1 + $0x7cc] ss:$16 sps:$4 sm:$0xff]  }
 0xe17   :  { %14567 = vrcp.f32 %v5364_v24  ;;  %21648 = vst [vmem:[#allocation69_spill] sm:$0xff] %v18758_v1  ;;  %v18767_v24 = vld [vmem:[%s20694_s1 + $0x7c0] ss:$16 sps:$4 sm:$0xff]  }
 0xe18   :  { %14569 = vpow2.f32 %v12005_v31  ;;  %21649 = vst [vmem:[#allocation70_spill] sm:$0xff] %v18767_v24 }
 0xe19   :  { %14571 = vrcp.f32 %v5363_v19  ;;  %v18741_v19 = vld [vmem:[%s20694_s1 + $0x7e0] ss:$16 sps:$4 sm:$0xff]  }
 0xe1a   :  { %14573 = vrcp.f32 %v5362_v3  ;;  %21645 = vst [vmem:[#allocation64_spill] sm:$0xff] %v18741_v19  ;;  %v18772_v3 = vld [vmem:[%s20694_s1 + $0x7c8] ss:$16 sps:$4 sm:$0xff]  }
 0xe1b   :  { %21650 = vst [vmem:[#allocation72_spill] sm:$0xff] %v18772_v3 }
 0xe24   :  { %v14568_v45 = vpop.eup %14567 }
 0xe25   :  { %v14570_v5 = vpop.eup %14569  ;;  %v5374_v29 = vmul.f32 2.0, %v14568_v45  ;;  %v18779_v45 = vld [vmem:[%s20694_s1 + $0x7a4] ss:$16 sps:$4 sm:$0xff]  }
 0xe26   :  { %v14572_v40 = vpop.eup %14571  ;;  %v5365_v54 = vadd.f32 1.0, %v14570_v5  ;;  %21651 = vst [vmem:[#allocation73_spill] sm:$0xff] %v18779_v45  ;;  %v18784_v5 = vld [vmem:[%s20694_s1 + $0x7ac] ss:$16 sps:$4 sm:$0xff]  }
 0xe27   :  { %v12006_v28 = vadd.f32 -1.0, %v5374_v29  ;;  %v14574_v18 = vpop.eup %14573  ;;  %v5376_v43 = vmul.f32 %v14572_v40, %v18434_v44  ;;  %v18753_v44 = vld [vmem:[%s20694_s1 + $0x7c4] ss:$16 sps:$4 sm:$0xff]   ;;  %21652 = vst [vmem:[#allocation74_spill] sm:$0xff] %v18784_v5 }
 0xe28   :  { %14575 = vrcp.f32 %v5365_v54  ;;  %21647 = vst [vmem:[#allocation66_spill] sm:$0xff] %v18753_v44 }
 0xe29   :  { %v5377_v51 = vmul.f32 %v14574_v18, %v12006_v28  ;;  %v18797_v28 = vld [vmem:[%s20694_s1 + $0x7a0] ss:$16 sps:$4 sm:$0xff]   ;;  %v18802_v18 = vld [vmem:[%s20694_s1 + $0x7a8] ss:$16 sps:$4 sm:$0xff]  }
 0xe2a   :  { %21653 = vst [vmem:[#allocation75_spill] sm:$0xff] %v18797_v28  ;;  %21654 = vst [vmem:[#allocation76_spill] sm:$0xff] %v18802_v18 }
 0xe2b   :  { %v18735_v16 = vadd.f32 %v5377_v51, %v5376_v43  ;;  %v18813_v43 = vld [vmem:[%s20694_s1 + $0x784] ss:$16 sps:$4 sm:$0xff]  }
 0xe2c   :  { %21655 = vst [vmem:[#allocation77_spill] sm:$0xff] %v18813_v43 }
 0xe2d   :  { %21644 = vst [vmem:[#allocation63_spill] sm:$0xff] %v18735_v16  ;;  %14577 = vtanh.f32 %v18735_v16 }
 0xe35   :  { %v14576_v49 = vpop.eup %14575 }
 0xe3a   :  { %v14578_v9 = vpop.eup %14577 }
 0xe3b   :  { %v5380_v33 = vmul.f32 %v14578_v9, %v14576_v49  ;;  %v18818_v49 = vld [vmem:[%s20694_s1 + $0x78c] ss:$16 sps:$4 sm:$0xff]  }
 0xe3c   :  { %21656 = vst [vmem:[#allocation78_spill] sm:$0xff] %v18818_v49 }
 0xe3d   :  { %v18748_v31 = vpack.c.bf16 %v5380_v33, %v5380_v33 }
 0xe3f   :  { %6214 = vmatmul.mubr.bf16.vlgmr.msra.gmra.mxu1 %v18748_v31  ;;  %6255 = vmatmul.mubr.bf16.vlgmr.msra.gmra.mxu0 %v18748_v31 }
 0xe40   :  { %6524 = vmatpush1.bf16.msra.mxu1 %v18741_v19  ;;  %6565 = vmatpush1.bf16.msra.mxu0 %v18746_v47 }
 0xe41   :  { %6525 = vmatprep.subr.bf16.mxu1 %v18753_v44  ;;  %6566 = vmatprep.subr.bf16.mxu0 %v18758_v1 }
 0xe42   :  { %6555 = vmatprep.mubr.bf16.mxu1 %v21154_v53  ;;  %6596 = vmatprep.mubr.bf16.mxu0 %v21154_v53 }
 0xe43   :  { %v18788_v29 = vpop.f32.mrf.mxu1  ;;  %v18790_v40 = vpop.f32.mrf.mxu0 }
 0xe44   :  { %6526 = vmatpush1.bf16.msra.mxu1 %v18767_v24  ;;  %6567 = vmatpush1.bf16.msra.mxu0 %v18772_v3 }
 0xe45   :  { %v18804_v54 = vpop.f32.mrf.mxu1  ;;  %v18806_v51 = vpop.f32.mrf.mxu0  ;;  %6527 = vmatprep.subr.bf16.mxu1 %v18779_v45  ;;  %6568 = vmatprep.subr.bf16.mxu0 %v18784_v5  ;;  %v18825_v5 = vld [vmem:[%s20694_s1 + $0x780] ss:$16 sps:$4 sm:$0xff]   ;;  %v18830_v45 = vld [vmem:[%s20694_s1 + $0x788] ss:$16 sps:$4 sm:$0xff]  }
 0xe46   :  { %21657 = vst [vmem:[#allocation79_spill] sm:$0xff] %v18825_v5  ;;  %21658 = vst [vmem:[#allocation80_spill] sm:$0xff] %v18830_v45 }
 0xe47   :  { %v5644_v9 = vpop.f32.mrf.mxu1  ;;  %v5685_v33 = vpop.f32.mrf.mxu0 }
 0xe48   :  { %6528 = vmatpush1.bf16.msra.mxu1 %v18797_v28  ;;  %6569 = vmatpush1.bf16.msra.mxu0 %v18802_v18  ;;  %v18837_v9 = vld [vmem:[%s20694_s1 + $0x764] ss:$16 sps:$4 sm:$0xff]   ;;  %v18842_v33 = vld [vmem:[%s20694_s1 + $0x76c] ss:$16 sps:$4 sm:$0xff]  }
 0xe49   :  { %v5645_v3 = vpop.f32.mrf.mxu1  ;;  %v5686_v24 = vpop.f32.mrf.mxu0  ;;  %6529 = vmatprep.subr.bf16.mxu1 %v18813_v43  ;;  %6570 = vmatprep.subr.bf16.mxu0 %v18818_v49  ;;  %21659 = vst [vmem:[#allocation81_spill] sm:$0xff] %v18837_v9  ;;  %21660 = vst [vmem:[#allocation82_spill] sm:$0xff] %v18842_v33 }
 0xe4a   :  { %v18849_v24 = vld [vmem:[%s20694_s1 + $0x760] ss:$16 sps:$4 sm:$0xff]   ;;  %v18854_v3 = vld [vmem:[%s20694_s1 + $0x768] ss:$16 sps:$4 sm:$0xff]  }
 0xe4b   :  { %21661 = vst [vmem:[#allocation83_spill] sm:$0xff] %v18849_v24  ;;  %21662 = vst [vmem:[#allocation84_spill] sm:$0xff] %v18854_v3 }
 0xe4c   :  { %6530 = vmatpush1.bf16.msra.mxu1 %v18825_v5  ;;  %6571 = vmatpush1.bf16.msra.mxu0 %v18830_v45  ;;  %v18861_v5 = vld [vmem:[%s20694_s1 + $0x744] ss:$16 sps:$4 sm:$0xff]   ;;  %v18866_v45 = vld [vmem:[%s20694_s1 + $0x74c] ss:$16 sps:$4 sm:$0xff]  }
 0xe4d   :  { %6531 = vmatprep.subr.bf16.mxu1 %v18837_v9  ;;  %6572 = vmatprep.subr.bf16.mxu0 %v18842_v33  ;;  %21663 = vst [vmem:[#allocation85_spill] sm:$0xff] %v18861_v5  ;;  %21664 = vst [vmem:[#allocation86_spill] sm:$0xff] %v18866_v45  ;;  %v18873_v9 = vld [vmem:[%s20694_s1 + $0x740] ss:$16 sps:$4 sm:$0xff]   ;;  %v18878_v33 = vld [vmem:[%s20694_s1 + $0x748] ss:$16 sps:$4 sm:$0xff]  }
 0xe4e   :  { %21665 = vst [vmem:[#allocation87_spill] sm:$0xff] %v18873_v9  ;;  %21666 = vst [vmem:[#allocation88_spill] sm:$0xff] %v18878_v33 }
 0xe50   :  { %6532 = vmatpush1.bf16.msra.mxu1 %v18849_v24  ;;  %6573 = vmatpush1.bf16.msra.mxu0 %v18854_v3  ;;  %v18885_v24 = vld [vmem:[%s20694_s1 + $0x724] ss:$16 sps:$4 sm:$0xff]   ;;  %v18890_v3 = vld [vmem:[%s20694_s1 + $0x72c] ss:$16 sps:$4 sm:$0xff]  }
 0xe51   :  { %6533 = vmatprep.subr.bf16.mxu1 %v18861_v5  ;;  %6574 = vmatprep.subr.bf16.mxu0 %v18866_v45  ;;  %21667 = vst [vmem:[#allocation89_spill] sm:$0xff] %v18885_v24  ;;  %21668 = vst [vmem:[#allocation8_spill] sm:$0xff] %v18890_v3  ;;  %v18897_v5 = vld [vmem:[%s20694_s1 + $0x720] ss:$16 sps:$4 sm:$0xff]   ;;  %v18902_v45 = vld [vmem:[%s20694_s1 + $0x728] ss:$16 sps:$4 sm:$0xff]  }
 0xe52   :  { %21669 = vst [vmem:[#allocation32_spill] sm:$0xff] %v18897_v5  ;;  %21670 = vst [vmem:[#allocation9_spill] sm:$0xff] %v18902_v45 }
 0xe54   :  { %6534 = vmatpush1.bf16.msra.mxu1 %v18873_v9  ;;  %6575 = vmatpush1.bf16.msra.mxu0 %v18878_v33  ;;  %v18909_v9 = vld [vmem:[%s20694_s1 + $0x704] ss:$16 sps:$4 sm:$0xff]   ;;  %v18914_v33 = vld [vmem:[%s20694_s1 + $0x70c] ss:$16 sps:$4 sm:$0xff]  }
 0xe55   :  { %6535 = vmatprep.subr.bf16.mxu1 %v18885_v24  ;;  %6576 = vmatprep.subr.bf16.mxu0 %v18890_v3  ;;  %21671 = vst [vmem:[#allocation33_spill] sm:$0xff] %v18909_v9  ;;  %21672 = vst [vmem:[#allocation30_spill] sm:$0xff] %v18914_v33  ;;  %v18921_v24 = vld [vmem:[%s20694_s1 + $0x700] ss:$16 sps:$4 sm:$0xff]   ;;  %v18926_v3 = vld [vmem:[%s20694_s1 + $0x708] ss:$16 sps:$4 sm:$0xff]  }
 0xe56   :  { %21673 = vst [vmem:[#allocation31_spill] sm:$0xff] %v18921_v24  ;;  %21674 = vst [vmem:[#allocation92_spill] sm:$0xff] %v18926_v3 }
 0xe58   :  { %6536 = vmatpush1.bf16.msra.mxu1 %v18897_v5  ;;  %6577 = vmatpush1.bf16.msra.mxu0 %v18902_v45  ;;  %v18933_v5 = vld [vmem:[%s20694_s1 + $0x3e4] ss:$16 sps:$4 sm:$0xff]   ;;  %v18938_v45 = vld [vmem:[%s20694_s1 + $0x3ec] ss:$16 sps:$4 sm:$0xff]  }
 0xe59   :  { %6537 = vmatprep.subr.bf16.mxu1 %v18909_v9  ;;  %6578 = vmatprep.subr.bf16.mxu0 %v18914_v33  ;;  %21675 = vst [vmem:[#allocation90_spill] sm:$0xff] %v18933_v5  ;;  %21676 = vst [vmem:[#allocation91_spill] sm:$0xff] %v18938_v45  ;;  %v12135_v33 = vld [vmem:[%s20696_s3 + $0xc] sm:$0xf] }
 0xe5a   :  { %v5935_v9 = vrot.slane %v12135_v33, %v21550_v34  ;;  %v5943_v49 = vrot.slane %v12135_v33, %v21551_v35 }
 0xe5c   :  { %6538 = vmatpush1.bf16.msra.mxu1 %v18921_v24  ;;  %6579 = vmatpush1.bf16.msra.mxu0 %v18926_v3  ;;  %v5939_v3 = vrot.slane %v12135_v33, %v21552_v36 }
 0xe5d   :  { %6765 = vmatprep.subr.bf16.mxu1 %v18933_v5  ;;  %6806 = vmatprep.subr.bf16.mxu0 %v18938_v45 }
 0xe63   :  { %v5882_v43 = vpop.f32.mrf.mxu1  ;;  %v5923_v18 = vpop.f32.mrf.mxu0 }
 0xe64   :  { %v5883_v28 = vadd.f32 %v5882_v43, %v18788_v29  ;;  %v5924_v24 = vadd.f32 %v5923_v18, %v18790_v40  ;;  %v5947_v40 = vrot.slane %v12135_v33, %v21601_v12 }
 0xe65   :  { %v5884_v1 = vpop.f32.mrf.mxu1  ;;  %v5925_v5 = vpop.f32.mrf.mxu0 }
 0xe66   :  { %v5952_v44 = vadd.f32 %v5935_v9, %v5883_v28  ;;  %v5954_v45 = vadd.f32 %v5943_v49, %v5924_v24  ;;  %v5885_v47 = vadd.f32 %v5884_v1, %v18804_v54  ;;  %v5926_v29 = vadd.f32 %v5925_v5, %v18806_v51  ;;  %v18964_v24 = vld [vmem:[%s20694_s1 + $0x3e0] ss:$16 sps:$4 sm:$0xff]  }
 0xe67   :  { %v5886_v19 = vpop.f32.mrf.mxu1  ;;  %v5927_v16 = vpop.f32.mrf.mxu0 }
 0xe68   :  { %v12136_v17 = vmul.f32 -1.442695, %v5952_v44  ;;  %v12138_v34 = vmul.f32 -1.442695, %v5954_v45  ;;  %v5953_v56 = vadd.f32 %v5939_v3, %v5885_v47  ;;  %v5955_v18 = vadd.f32 %v5947_v40, %v5926_v29  ;;  %v18969_v3 = vld [vmem:[%s20694_s1 + $0x3e8] ss:$16 sps:$4 sm:$0xff]  }
 0xe69   :  { %v5887_v35 = vpop.f32.mrf.mxu1  ;;  %v5928_v32 = vpop.f32.mrf.mxu0  ;;  %v18976_v29 = vld [vmem:[%s20694_s1 + $0x3c4] ss:$16 sps:$4 sm:$0xff]   ;;  %v18981_v40 = vld [vmem:[%s20694_s1 + $0x3cc] ss:$16 sps:$4 sm:$0xff]  }
 0xe6a   :  { %14579 = vpow2.f32 %v12136_v17  ;;  %v12137_v23 = vmul.f32 -1.442695, %v5953_v56  ;;  %v12139_v49 = vmul.f32 -1.442695, %v5955_v18  ;;  %v18988_v18 = vld [vmem:[%s20694_s1 + $0x3c0] ss:$16 sps:$4 sm:$0xff]  }
 0xe6b   :  { %14581 = vpow2.f32 %v12138_v34 }
 0xe6c   :  { %14583 = vpow2.f32 %v12137_v23 }
 0xe77   :  { %v14580_v28 = vpop.eup %14579 }
 0xe78   :  { %v14582_v43 = vpop.eup %14581  ;;  %v5968_v44 = vadd.f32 1.0, %v14580_v28  ;;  %v18993_v28 = vld [vmem:[%s20694_s1 + $0x3c8] ss:$16 sps:$4 sm:$0xff]  }
 0xe79   :  { %v14584_v1 = vpop.eup %14583  ;;  %v5970_v19 = vadd.f32 1.0, %v14582_v43  ;;  %v19000_v43 = vld [vmem:[%s20694_s1 + $0x3a4] ss:$16 sps:$4 sm:$0xff]  }
 0xe7a   :  { %v5969_v16 = vadd.f32 1.0, %v14584_v1  ;;  %v19014_v1 = vld [vmem:[%s20694_s1 + $0x3a0] ss:$16 sps:$4 sm:$0xff]  }
 0xe7b   :  { %14585 = vrcp.f32 %v5970_v19  ;;  %v19019_v19 = vld [vmem:[%s20694_s1 + $0x3a8] ss:$16 sps:$4 sm:$0xff]  }
 0xe7c   :  { %14587 = vpow2.f32 %v12139_v49  ;;  %v19005_v49 = vld [vmem:[%s20694_s1 + $0x3ac] ss:$16 sps:$4 sm:$0xff]  }
 0xe7d   :  { %14589 = vrcp.f32 %v5969_v16  ;;  %v19026_v16 = vld [vmem:[%s20694_s1 + $0x384] ss:$16 sps:$4 sm:$0xff]  }
 0xe7e   :  { %14591 = vrcp.f32 %v5968_v44  ;;  %v19031_v44 = vld [vmem:[%s20694_s1 + $0x38c] ss:$16 sps:$4 sm:$0xff]  }
 0xe88   :  { %v14586_v35 = vpop.eup %14585 }
 0xe89   :  { %v14588_v32 = vpop.eup %14587  ;;  %v5980_v34 = vmul.f32 2.0, %v14586_v35  ;;  %v19038_v35 = vld [vmem:[%s20694_s1 + $0x380] ss:$16 sps:$4 sm:$0xff]  }
 0xe8a   :  { %v14590_v23 = vpop.eup %14589  ;;  %v5971_v47 = vadd.f32 1.0, %v14588_v32  ;;  %v19043_v32 = vld [vmem:[%s20694_s1 + $0x388] ss:$16 sps:$4 sm:$0xff]  }
 0xe8b   :  { %v12140_v56 = vadd.f32 -1.0, %v5980_v34  ;;  %v14592_v17 = vpop.eup %14591  ;;  %v5982_v5 = vmul.f32 %v14590_v23, %v18483_v21  ;;  %v19050_v34 = vld [vmem:[%s20694_s1 + $0x364] ss:$16 sps:$4 sm:$0xff]   ;;  %v19055_v23 = vld [vmem:[%s20694_s1 + $0x36c] ss:$16 sps:$4 sm:$0xff]  }
 0xe8c   :  { %14593 = vrcp.f32 %v5971_v47  ;;  %v19074_v47 = vld [vmem:[%s20694_s1 + $0x344] ss:$16 sps:$4 sm:$0xff]  }
 0xe8d   :  { %v5983_v45 = vmul.f32 %v14592_v17, %v12140_v56  ;;  %v19062_v56 = vld [vmem:[%s20694_s1 + $0x360] ss:$16 sps:$4 sm:$0xff]   ;;  %v19067_v17 = vld [vmem:[%s20694_s1 + $0x368] ss:$16 sps:$4 sm:$0xff]  }
 0xe8f   :  { %v18956_v54 = vadd.f32 %v5983_v45, %v5982_v5  ;;  %v19079_v45 = vld [vmem:[%s20694_s1 + $0x34c] ss:$16 sps:$4 sm:$0xff]   ;;  %v19086_v5 = vld [vmem:[%s20694_s1 + $0x340] ss:$16 sps:$4 sm:$0xff]  }
 0xe90   :  { %21678 = vst [vmem:[#allocation94_spill] sm:$0xff] %v19079_v45  ;;  %21679 = vst [vmem:[#allocation16_spill] sm:$0xff] %v19086_v5 }
 0xe91   :  { %14595 = vtanh.f32 %v18956_v54 }
 0xe99   :  { %v14594_v51 = vpop.eup %14593 }
 0xe9e   :  { %v14596_v9 = vpop.eup %14595 }
 0xe9f   :  { %v18959_v33 = vmul.f32 %v14596_v9, %v14594_v51  ;;  %v19091_v51 = vld [vmem:[%s20694_s1 + $0x348] ss:$16 sps:$4 sm:$0xff]   ;;  %v19098_v9 = vld [vmem:[%s20694_s1 + $0x324] ss:$16 sps:$4 sm:$0xff]  }
 0xea0   :  { %21680 = vst [vmem:[#allocation14_spill] sm:$0xff] %v19091_v51  ;;  %21681 = vst [vmem:[#allocation15_spill] sm:$0xff] %v19098_v9 }
 0xea1   :  { %21677 = vst [vmem:[#allocation93_spill] sm:$0xff] %v18959_v33  ;;  %v6330_v21 = vpack.c.bf16 %v18959_v33, %v18959_v33  ;;  %v19110_v33 = vld [vmem:[%s20694_s1 + $0x320] ss:$16 sps:$4 sm:$0xff]  }
 0xea3   :  { %6556 = vmatmul.mubr.bf16.vlgmr.msra.gmra.mxu1 %v6330_v21  ;;  %6597 = vmatmul.mubr.bf16.vlgmr.msra.gmra.mxu0 %v6330_v21  ;;  %v19103_v21 = vld [vmem:[%s20694_s1 + $0x32c] ss:$16 sps:$4 sm:$0xff]  }
 0xea4   :  { %6766 = vmatpush1.bf16.msra.mxu1 %v18964_v24  ;;  %6807 = vmatpush1.bf16.msra.mxu0 %v18969_v3  ;;  %21682 = vst [vmem:[#allocation17_spill] sm:$0xff] %v19103_v21 }
 0xea5   :  { %6767 = vmatprep.subr.bf16.mxu1 %v18976_v29  ;;  %6808 = vmatprep.subr.bf16.mxu0 %v18981_v40 }
 0xea6   :  { %6797 = vmatprep.mubr.bf16.mxu1 %v21154_v53  ;;  %6838 = vmatprep.mubr.bf16.mxu0 %v21154_v53 }
 0xea8   :  { %6768 = vmatpush1.bf16.msra.mxu1 %v18988_v18  ;;  %6809 = vmatpush1.bf16.msra.mxu0 %v18993_v28 }
 0xea9   :  { %6769 = vmatprep.subr.bf16.mxu1 %v19000_v43  ;;  %6810 = vmatprep.subr.bf16.mxu0 %v19005_v49 }
 0xeac   :  { %6770 = vmatpush1.bf16.msra.mxu1 %v19014_v1  ;;  %6811 = vmatpush1.bf16.msra.mxu0 %v19019_v19 }
 0xead   :  { %6771 = vmatprep.subr.bf16.mxu1 %v19026_v16  ;;  %6812 = vmatprep.subr.bf16.mxu0 %v19031_v44 }
 0xeb0   :  { %6772 = vmatpush1.bf16.msra.mxu1 %v19038_v35  ;;  %6813 = vmatpush1.bf16.msra.mxu0 %v19043_v32 }
 0xeb1   :  { %6773 = vmatprep.subr.bf16.mxu1 %v19050_v34  ;;  %6814 = vmatprep.subr.bf16.mxu0 %v19055_v23 }
 0xeb4   :  { %6774 = vmatpush1.bf16.msra.mxu1 %v19062_v56  ;;  %6815 = vmatpush1.bf16.msra.mxu0 %v19067_v17 }
 0xeb5   :  { %6775 = vmatprep.subr.bf16.mxu1 %v19074_v47  ;;  %6816 = vmatprep.subr.bf16.mxu0 %v19079_v45  ;;  %v19115_v45 = vld [vmem:[%s20694_s1 + $0x328] ss:$16 sps:$4 sm:$0xff]  }
 0xeb8   :  { %6776 = vmatpush1.bf16.msra.mxu1 %v19086_v5  ;;  %6817 = vmatpush1.bf16.msra.mxu0 %v19091_v51  ;;  %v19122_v5 = vld [vmem:[%s20694_s1 + $0x304] ss:$16 sps:$4 sm:$0xff]   ;;  %v19127_v51 = vld [vmem:[%s20694_s1 + $0x30c] ss:$16 sps:$4 sm:$0xff]  }
 0xeb9   :  { %6777 = vmatprep.subr.bf16.mxu1 %v19098_v9  ;;  %6818 = vmatprep.subr.bf16.mxu0 %v19103_v21  ;;  %v19134_v9 = vld [vmem:[%s20694_s1 + $0x300] ss:$16 sps:$4 sm:$0xff]   ;;  %v19139_v21 = vld [vmem:[%s20694_s1 + $0x308] ss:$16 sps:$4 sm:$0xff]  }
 0xebc   :  { %6778 = vmatpush1.bf16.msra.mxu1 %v19110_v33  ;;  %6819 = vmatpush1.bf16.msra.mxu0 %v19115_v45 }
 0xebd   :  { %6779 = vmatprep.subr.bf16.mxu1 %v19122_v5  ;;  %6820 = vmatprep.subr.bf16.mxu0 %v19127_v51 }
 0xec0   :  { %6780 = vmatpush1.bf16.msra.mxu1 %v19134_v9  ;;  %6821 = vmatpush1.bf16.msra.mxu0 %v19139_v21 }
 0xec1   :  { %7098 = vmatprep.subr.bf16.mxu1 %v18523_v4  ;;  %7139 = vmatprep.subr.bf16.mxu0 %v18528_v60 }
 0xec3   :  { %6798 = vmatmul.mubr.bf16.vlgmr.msra.gmra.mxu1 %v18748_v31  ;;  %6839 = vmatmul.mubr.bf16.vlgmr.msra.gmra.mxu0 %v18748_v31  ;;  %v21687_v31 = vld [vmem:[#allocation63_spill] sm:$0xff] }
 0xec4   :  { %7099 = vmatpush1.bf16.msra.mxu1 %v18535_v61  ;;  %7140 = vmatpush1.bf16.msra.mxu0 %v18540_v25  ;;  %v21683_v61 = vld [vmem:[#allocation19_spill] sm:$0xff] }
 0xec5   :  { %7100 = vmatprep.subr.bf16.mxu1 %v18547_v58  ;;  %7141 = vmatprep.subr.bf16.mxu0 %v18552_v11  ;;  %v21684_v58 = vld [vmem:[#allocation20_spill] sm:$0xff] }
 0xec6   :  { %7130 = vmatprep.mubr.bf16.mxu1 %v21154_v53  ;;  %7171 = vmatprep.mubr.bf16.mxu0 %v21154_v53 }
 0xec8   :  { %7101 = vmatpush1.bf16.msra.mxu1 %v18561_v48  ;;  %7142 = vmatpush1.bf16.msra.mxu0 %v18566_v0 }
 0xec9   :  { %7102 = vmatprep.subr.bf16.mxu1 %v18573_v39  ;;  %7143 = vmatprep.subr.bf16.mxu0 %v18578_v10 }
 0xecc   :  { %7103 = vmatpush1.bf16.msra.mxu1 %v18587_v13  ;;  %7144 = vmatpush1.bf16.msra.mxu0 %v18592_v8  ;;  %v21685_v13 = vld [vmem:[#allocation21_spill] sm:$0xff] }
 0xecd   :  { %7104 = vmatprep.subr.bf16.mxu1 %v18599_v37  ;;  %7145 = vmatprep.subr.bf16.mxu0 %v18604_v27 }
 0xed0   :  { %7105 = vmatpush1.bf16.msra.mxu1 %v18611_v30  ;;  %7146 = vmatpush1.bf16.msra.mxu0 %v18616_v57 }
 0xed1   :  { %7106 = vmatprep.subr.bf16.mxu1 %v18623_v22  ;;  %7147 = vmatprep.subr.bf16.mxu0 %v18628_v7  ;;  %v21686_v7 = vld [vmem:[#allocation13_spill] sm:$0xff] }
 0xed4   :  { %7107 = vmatpush1.bf16.msra.mxu1 %v18635_v42  ;;  %7148 = vmatpush1.bf16.msra.mxu0 %v18640_v62 }
 0xed5   :  { %7108 = vmatprep.subr.bf16.mxu1 %v18647_v63  ;;  %7149 = vmatprep.subr.bf16.mxu0 %v18652_v15 }
 0xed8   :  { %7109 = vmatpush1.bf16.msra.mxu1 %v18659_v55  ;;  %7150 = vmatpush1.bf16.msra.mxu0 %v18664_v38 }
 0xed9   :  { %7110 = vmatprep.subr.bf16.mxu1 %v18671_v20  ;;  %7151 = vmatprep.subr.bf16.mxu0 %v18676_v46 }
 0xedc   :  { %7111 = vmatpush1.bf16.msra.mxu1 %v18683_v50  ;;  %7152 = vmatpush1.bf16.msra.mxu0 %v18688_v41 }
 0xedd   :  { %7112 = vmatprep.subr.bf16.mxu1 %v18695_v26  ;;  %7153 = vmatprep.subr.bf16.mxu0 %v18700_v52 }
 0xee0   :  { %7113 = vmatpush1.bf16.msra.mxu1 %v18707_v2  ;;  %7154 = vmatpush1.bf16.msra.mxu0 %v18712_v6 }
 0xee1   :  { %7440 = vmatprep.subr.bf16.mxu1 %v18721_v14  ;;  %7481 = vmatprep.subr.bf16.mxu0 %v18726_v59 }
 0xeff   :  { %v6215_v4 = vpop.f32.mrf.mxu1  ;;  %v6256_v60 = vpop.f32.mrf.mxu0 }
 0xf00   :  { %v6263_v25 = vadd.f32 %v6215_v4, %v21683_v61  ;;  %v6265_v11 = vadd.f32 %v6256_v60, %v21684_v58 }
 0xf01   :  { %v6217_v48 = vpop.f32.mrf.mxu1  ;;  %v6258_v0 = vpop.f32.mrf.mxu0 }
 0xf02   :  { %v12205_v39 = vmul.f32 -1.442695, %v6263_v25  ;;  %v12207_v10 = vmul.f32 -1.442695, %v6265_v11  ;;  %v6264_v8 = vadd.f32 %v6217_v48, %v21685_v13  ;;  %v6266_v42 = vadd.f32 %v6258_v0, %v21686_v7 }
 0xf03   :  { %v6219_v37 = vpop.f32.mrf.mxu1  ;;  %v6260_v27 = vpop.f32.mrf.mxu0 }
 0xf04   :  { %14597 = vpow2.f32 %v12205_v39  ;;  %v12206_v30 = vmul.f32 -1.442695, %v6264_v8  ;;  %v12208_v15 = vmul.f32 -1.442695, %v6266_v42  ;;  %v21688_v39 = vld [vmem:[#allocation64_spill] sm:$0xff]  ;;  %v21690_v8 = vld [vmem:[#allocation66_spill] sm:$0xff] }
 0xf05   :  { %14599 = vpow2.f32 %v12207_v10  ;;  %v6220_v57 = vpop.f32.mrf.mxu1  ;;  %v6261_v22 = vpop.f32.mrf.mxu0  ;;  %v21689_v10 = vld [vmem:[#allocation65_spill] sm:$0xff]  ;;  %v21692_v27 = vld [vmem:[#allocation70_spill] sm:$0xff]  ;;  %v21696_v42 = vld [vmem:[#allocation75_spill] sm:$0xff] }
 0xf06   :  { %14601 = vpow2.f32 %v12206_v30  ;;  %v21691_v37 = vld [vmem:[#allocation69_spill] sm:$0xff]  ;;  %v21693_v30 = vld [vmem:[#allocation72_spill] sm:$0xff]  ;;  %v21695_v22 = vld [vmem:[#allocation74_spill] sm:$0xff] }
 0xf07   :  { %v21694_v57 = vld [vmem:[#allocation73_spill] sm:$0xff] }
 0xf11   :  { %v14598_v62 = vpop.eup %14597 }
 0xf12   :  { %v14600_v63 = vpop.eup %14599  ;;  %v6279_v46 = vadd.f32 1.0, %v14598_v62  ;;  %v21697_v62 = vld [vmem:[#allocation76_spill] sm:$0xff] }
 0xf13   :  { %v14602_v55 = vpop.eup %14601  ;;  %v6281_v38 = vadd.f32 1.0, %v14600_v63  ;;  %v21698_v63 = vld [vmem:[#allocation77_spill] sm:$0xff] }
 0xf14   :  { %v6280_v20 = vadd.f32 1.0, %v14602_v55  ;;  %v21700_v55 = vld [vmem:[#allocation79_spill] sm:$0xff] }
 0xf15   :  { %14603 = vrcp.f32 %v6281_v38  ;;  %v21701_v38 = vld [vmem:[#allocation80_spill] sm:$0xff] }
 0xf16   :  { %14605 = vpow2.f32 %v12208_v15  ;;  %v21699_v15 = vld [vmem:[#allocation78_spill] sm:$0xff] }
 0xf17   :  { %14607 = vrcp.f32 %v6280_v20  ;;  %v21702_v20 = vld [vmem:[#allocation81_spill] sm:$0xff] }
 0xf18   :  { %14609 = vrcp.f32 %v6279_v46  ;;  %v21703_v46 = vld [vmem:[#allocation82_spill] sm:$0xff] }
 0xf22   :  { %v14604_v50 = vpop.eup %14603 }
 0xf23   :  { %v14606_v41 = vpop.eup %14605  ;;  %v6291_v26 = vmul.f32 2.0, %v14604_v50  ;;  %v21704_v50 = vld [vmem:[#allocation83_spill] sm:$0xff] }
 0xf24   :  { %v14608_v52 = vpop.eup %14607  ;;  %v6282_v14 = vadd.f32 1.0, %v14606_v41  ;;  %v21705_v41 = vld [vmem:[#allocation84_spill] sm:$0xff] }
 0xf25   :  { %v12209_v2 = vadd.f32 -1.0, %v6291_v26  ;;  %v14610_v6 = vpop.eup %14609  ;;  %v6293_v4 = vmul.f32 %v14608_v52, %v21687_v31  ;;  %v21706_v26 = vld [vmem:[#allocation85_spill] sm:$0xff]  ;;  %v21707_v52 = vld [vmem:[#allocation86_spill] sm:$0xff]  ;;  %v21712_v31 = vld [vmem:[#allocation32_spill] sm:$0xff] }
 0xf26   :  { %14611 = vrcp.f32 %v6282_v14  ;;  %v21710_v14 = vld [vmem:[#allocation89_spill] sm:$0xff] }
 0xf27   :  { %v6294_v59 = vmul.f32 %v14610_v6, %v12209_v2  ;;  %v21708_v2 = vld [vmem:[#allocation87_spill] sm:$0xff]  ;;  %v21709_v6 = vld [vmem:[#allocation88_spill] sm:$0xff] }
 0xf29   :  { %v19188_v60 = vadd.f32 %v6294_v59, %v6293_v4  ;;  %v21711_v59 = vld [vmem:[#allocation8_spill] sm:$0xff]  ;;  %v21713_v4 = vld [vmem:[#allocation9_spill] sm:$0xff] }
 0xf2b   :  { %14613 = vtanh.f32 %v19188_v60 }
 0xf33   :  { %v14612_v25 = vpop.eup %14611 }
 0xf38   :  { %v14614_v11 = vpop.eup %14613 }
 0xf39   :  { %v6297_v48 = vmul.f32 %v14614_v11, %v14612_v25  ;;  %v21714_v25 = vld [vmem:[#allocation33_spill] sm:$0xff]  ;;  %v21715_v11 = vld [vmem:[#allocation30_spill] sm:$0xff] }
 0xf3b   :  { %v19191_v0 = vpack.c.bf16 %v6297_v48, %v6297_v48  ;;  %v21716_v48 = vld [vmem:[#allocation31_spill] sm:$0xff] }
 0xf3d   :  { %7131 = vmatmul.mubr.bf16.vlgmr.msra.gmra.mxu1 %v19191_v0  ;;  %7172 = vmatmul.mubr.bf16.vlgmr.msra.gmra.mxu0 %v19191_v0 }
 0xf3e   :  { %7441 = vmatpush1.bf16.msra.mxu1 %v21688_v39  ;;  %7482 = vmatpush1.bf16.msra.mxu0 %v21689_v10  ;;  %v21717_v39 = vld [vmem:[#allocation92_spill] sm:$0xff]  ;;  %v21718_v10 = vld [vmem:[#allocation90_spill] sm:$0xff] }
 0xf3f   :  { %7442 = vmatprep.subr.bf16.mxu1 %v21690_v8  ;;  %7483 = vmatprep.subr.bf16.mxu0 %v21691_v37  ;;  %v21719_v8 = vld [vmem:[#allocation91_spill] sm:$0xff] }
 0xf40   :  { %7472 = vmatprep.mubr.bf16.mxu1 %v21154_v53  ;;  %7513 = vmatprep.mubr.bf16.mxu0 %v21154_v53 }
 0xf42   :  { %7443 = vmatpush1.bf16.msra.mxu1 %v21692_v27  ;;  %7484 = vmatpush1.bf16.msra.mxu0 %v21693_v30 }
 0xf43   :  { %7444 = vmatprep.subr.bf16.mxu1 %v21694_v57  ;;  %7485 = vmatprep.subr.bf16.mxu0 %v21695_v22 }
 0xf46   :  { %7445 = vmatpush1.bf16.msra.mxu1 %v21696_v42  ;;  %7486 = vmatpush1.bf16.msra.mxu0 %v21697_v62 }
 0xf47   :  { %7446 = vmatprep.subr.bf16.mxu1 %v21698_v63  ;;  %7487 = vmatprep.subr.bf16.mxu0 %v21699_v15  ;;  %v12338_v15 = vld [vmem:[%s20696_s3 + $0xc] sm:$0xf] }
 0xf4a   :  { %7447 = vmatpush1.bf16.msra.mxu1 %v21700_v55  ;;  %7488 = vmatpush1.bf16.msra.mxu0 %v21701_v38  ;;  %v21720_v55 = vld [vmem:[#allocation4_spill] sm:$0xff] }
 0xf4b   :  { %7448 = vmatprep.subr.bf16.mxu1 %v21702_v20  ;;  %7489 = vmatprep.subr.bf16.mxu0 %v21703_v46  ;;  %v6852_v38 = vrot.slane %v12338_v15, %v21720_v55  ;;  %v21721_v20 = vld [vmem:[#allocation5_spill] sm:$0xff] }
 0xf4c   :  { %v6860_v46 = vrot.slane %v12338_v15, %v21721_v20 }
 0xf4e   :  { %7449 = vmatpush1.bf16.msra.mxu1 %v21704_v50  ;;  %7490 = vmatpush1.bf16.msra.mxu0 %v21705_v41 }
 0xf4f   :  { %7450 = vmatprep.subr.bf16.mxu1 %v21706_v26  ;;  %7491 = vmatprep.subr.bf16.mxu0 %v21707_v52 }
 0xf52   :  { %7451 = vmatpush1.bf16.msra.mxu1 %v21708_v2  ;;  %7492 = vmatpush1.bf16.msra.mxu0 %v21709_v6  ;;  %v6856_v2 = vrot.slane %v12338_v15, %v21552_v36 }
 0xf53   :  { %7452 = vmatprep.subr.bf16.mxu1 %v21710_v14  ;;  %7493 = vmatprep.subr.bf16.mxu0 %v21711_v59 }
 0xf56   :  { %7453 = vmatpush1.bf16.msra.mxu1 %v21712_v31  ;;  %7494 = vmatpush1.bf16.msra.mxu0 %v21713_v4 }
 0xf57   :  { %7454 = vmatprep.subr.bf16.mxu1 %v21714_v25  ;;  %7495 = vmatprep.subr.bf16.mxu0 %v21715_v11 }
 0xf5a   :  { %7455 = vmatpush1.bf16.msra.mxu1 %v21716_v48  ;;  %7496 = vmatpush1.bf16.msra.mxu0 %v21717_v39 }
 0xf5b   :  { %7682 = vmatprep.subr.bf16.mxu1 %v21718_v10  ;;  %7723 = vmatprep.subr.bf16.mxu0 %v21719_v8 }
 0xf63   :  { %v6557_v37 = vpop.f32.mrf.mxu1  ;;  %v6598_v27 = vpop.f32.mrf.mxu0 }
 0xf65   :  { %v6559_v30 = vpop.f32.mrf.mxu1  ;;  %v6600_v57 = vpop.f32.mrf.mxu0 }
 0xf67   :  { %v6561_v22 = vpop.f32.mrf.mxu1  ;;  %v6602_v42 = vpop.f32.mrf.mxu0 }
 0xf69   :  { %v6562_v62 = vpop.f32.mrf.mxu1  ;;  %v6603_v63 = vpop.f32.mrf.mxu0 }
 0xf83   :  { %v6799_v50 = vpop.f32.mrf.mxu1  ;;  %v6840_v41 = vpop.f32.mrf.mxu0 }
 0xf84   :  { %v6800_v26 = vadd.f32 %v6799_v50, %v6557_v37  ;;  %v6841_v52 = vadd.f32 %v6840_v41, %v6598_v27  ;;  %v6864_v27 = vrot.slane %v12338_v15, %v21601_v12 }
 0xf85   :  { %v6801_v6 = vpop.f32.mrf.mxu1  ;;  %v6842_v14 = vpop.f32.mrf.mxu0 }
 0xf86   :  { %v6869_v59 = vadd.f32 %v6852_v38, %v6800_v26  ;;  %v6871_v31 = vadd.f32 %v6860_v46, %v6841_v52  ;;  %v6802_v4 = vadd.f32 %v6801_v6, %v6559_v30  ;;  %v6843_v37 = vadd.f32 %v6842_v14, %v6600_v57 }
 0xf87   :  { %v6803_v25 = vpop.f32.mrf.mxu1  ;;  %v6844_v11 = vpop.f32.mrf.mxu0 }
 0xf88   :  { %v12339_v48 = vmul.f32 -1.442695, %v6869_v59  ;;  %v12341_v39 = vmul.f32 -1.442695, %v6871_v31  ;;  %v6870_v10 = vadd.f32 %v6856_v2, %v6802_v4  ;;  %v6872_v62 = vadd.f32 %v6864_v27, %v6843_v37  ;;  %v19430_v37 = vld [vmem:[%s20694_s1 + $0x62c] ss:$16 sps:$4 sm:$0xff]  }
 0xf89   :  { %v6804_v8 = vpop.f32.mrf.mxu1  ;;  %v6845_v22 = vpop.f32.mrf.mxu0  ;;  %v19437_v27 = vld [vmem:[%s20694_s1 + $0x620] ss:$16 sps:$4 sm:$0xff]  }
 0xf8a   :  { %14615 = vpow2.f32 %v12339_v48  ;;  %v12340_v42 = vmul.f32 -1.442695, %v6870_v10  ;;  %v12342_v38 = vmul.f32 -1.442695, %v6872_v62  ;;  %v19413_v8 = vld [vmem:[%s20694_s1 + $0x640] ss:$16 sps:$4 sm:$0xff]  }
 0xf8b   :  { %14617 = vpow2.f32 %v12341_v39  ;;  %v19418_v22 = vld [vmem:[%s20694_s1 + $0x648] ss:$16 sps:$4 sm:$0xff]  }
 0xf8c   :  { %14619 = vpow2.f32 %v12340_v42  ;;  %v19425_v42 = vld [vmem:[%s20694_s1 + $0x624] ss:$16 sps:$4 sm:$0xff]   ;;  %v19442_v62 = vld [vmem:[%s20694_s1 + $0x628] ss:$16 sps:$4 sm:$0xff]  }
 0xf97   :  { %v14616_v63 = vpop.eup %14615 }
 0xf98   :  { %v14618_v50 = vpop.eup %14617  ;;  %v6885_v26 = vadd.f32 1.0, %v14616_v63  ;;  %v19449_v63 = vld [vmem:[%s20694_s1 + $0x604] ss:$16 sps:$4 sm:$0xff]  }
 0xf99   :  { %v14620_v46 = vpop.eup %14619  ;;  %v6887_v30 = vadd.f32 1.0, %v14618_v50  ;;  %v19454_v50 = vld [vmem:[%s20694_s1 + $0x60c] ss:$16 sps:$4 sm:$0xff]  }
 0xf9a   :  { %v6886_v41 = vadd.f32 1.0, %v14620_v46  ;;  %v19466_v46 = vld [vmem:[%s20694_s1 + $0x608] ss:$16 sps:$4 sm:$0xff]  }
 0xf9b   :  { %14621 = vrcp.f32 %v6887_v30  ;;  %21729 = vst [vmem:[#allocation7_spill] sm:$0xff] %v19466_v46 }
 0xf9c   :  { %14623 = vpow2.f32 %v12342_v38  ;;  %v19461_v38 = vld [vmem:[%s20694_s1 + $0x600] ss:$16 sps:$4 sm:$0xff]  }
 0xf9d   :  { %14625 = vrcp.f32 %v6886_v41  ;;  %21728 = vst [vmem:[#allocation24_spill] sm:$0xff] %v19461_v38 }
 0xf9e   :  { %14627 = vrcp.f32 %v6885_v26 }
 0xfa8   :  { %v14622_v52 = vpop.eup %14621 }
 0xfa9   :  { %v14624_v2 = vpop.eup %14623  ;;  %v6897_v6 = vmul.f32 2.0, %v14622_v52 }
 0xfaa   :  { %v14626_v59 = vpop.eup %14625  ;;  %v6888_v14 = vadd.f32 1.0, %v14624_v2 }
 0xfab   :  { %v12343_v31 = vadd.f32 -1.0, %v6897_v6  ;;  %v14628_v57 = vpop.eup %14627  ;;  %v6899_v4 = vmul.f32 %v14626_v59, %v18956_v54  ;;  %v21723_v54 = vld [vmem:[#allocation94_spill] sm:$0xff] }
 0xfac   :  { %14629 = vrcp.f32 %v6888_v14 }
 0xfad   :  { %v6900_v15 = vmul.f32 %v14628_v57, %v12343_v31 }
 0xfaf   :  { %v19237_v25 = vadd.f32 %v6900_v15, %v6899_v4 }
 0xfb1   :  { %14631 = vtanh.f32 %v19237_v25 }
 0xfb9   :  { %v14630_v11 = vpop.eup %14629 }
 0xfbe   :  { %v14632_v48 = vpop.eup %14631 }
 0xfbf   :  { %v19240_v39 = vmul.f32 %v14632_v48, %v14630_v11 }
 0xfc1   :  { %21722 = vst [vmem:[#allocation18_spill] sm:$0xff] %v19240_v39  ;;  %v7247_v10 = vpack.c.bf16 %v19240_v39, %v19240_v39  ;;  %v19600_v39 = vld [vmem:[%s20694_s1 + $0x768] ss:$16 sps:$4 sm:$0xff]  }
 0xfc2   :  { %21750 = vst [vmem:[#allocation37_spill] sm:$0xff] %v19600_v39 }
 0xfc3   :  { %7473 = vmatmul.mubr.bf16.vlgmr.msra.gmra.mxu1 %v7247_v10  ;;  %7514 = vmatmul.mubr.bf16.vlgmr.msra.gmra.mxu0 %v7247_v10 }
 0xfc4   :  { %7683 = vmatpush1.bf16.msra.mxu1 %v18964_v24  ;;  %7724 = vmatpush1.bf16.msra.mxu0 %v18969_v3  ;;  %v21724_v24 = vld [vmem:[#allocation16_spill] sm:$0xff]  ;;  %v21725_v3 = vld [vmem:[#allocation14_spill] sm:$0xff] }
 0xfc5   :  { %7684 = vmatprep.subr.bf16.mxu1 %v18976_v29  ;;  %7725 = vmatprep.subr.bf16.mxu0 %v18981_v40  ;;  %v21726_v29 = vld [vmem:[#allocation15_spill] sm:$0xff]  ;;  %v21727_v40 = vld [vmem:[#allocation17_spill] sm:$0xff] }
 0xfc6   :  { %7714 = vmatprep.mubr.bf16.mxu1 %v21154_v53  ;;  %7755 = vmatprep.mubr.bf16.mxu0 %v21154_v53 }
 0xfc8   :  { %7685 = vmatpush1.bf16.msra.mxu1 %v18988_v18  ;;  %7726 = vmatpush1.bf16.msra.mxu0 %v18993_v28  ;;  %v19277_v18 = vld [vmem:[%s20694_s1 + $0x6e4] ss:$16 sps:$4 sm:$0xff]   ;;  %v19282_v28 = vld [vmem:[%s20694_s1 + $0x6ec] ss:$16 sps:$4 sm:$0xff]  }
 0xfc9   :  { %7686 = vmatprep.subr.bf16.mxu1 %v19000_v43  ;;  %7727 = vmatprep.subr.bf16.mxu0 %v19005_v49  ;;  %v19294_v43 = vld [vmem:[%s20694_s1 + $0x6e8] ss:$16 sps:$4 sm:$0xff]   ;;  %v19301_v49 = vld [vmem:[%s20694_s1 + $0x6c4] ss:$16 sps:$4 sm:$0xff]  }
 0xfcc   :  { %7687 = vmatpush1.bf16.msra.mxu1 %v19014_v1  ;;  %7728 = vmatpush1.bf16.msra.mxu0 %v19019_v19  ;;  %v19306_v1 = vld [vmem:[%s20694_s1 + $0x6cc] ss:$16 sps:$4 sm:$0xff]   ;;  %v19315_v19 = vld [vmem:[%s20694_s1 + $0x6c0] ss:$16 sps:$4 sm:$0xff]  }
 0xfcd   :  { %7688 = vmatprep.subr.bf16.mxu1 %v19026_v16  ;;  %7729 = vmatprep.subr.bf16.mxu0 %v19031_v44  ;;  %v19320_v16 = vld [vmem:[%s20694_s1 + $0x6c8] ss:$16 sps:$4 sm:$0xff]   ;;  %v19327_v44 = vld [vmem:[%s20694_s1 + $0x6a4] ss:$16 sps:$4 sm:$0xff]  }
 0xfd0   :  { %7689 = vmatpush1.bf16.msra.mxu1 %v19038_v35  ;;  %7730 = vmatpush1.bf16.msra.mxu0 %v19043_v32  ;;  %v19332_v35 = vld [vmem:[%s20694_s1 + $0x6ac] ss:$16 sps:$4 sm:$0xff]   ;;  %v19341_v32 = vld [vmem:[%s20694_s1 + $0x6a0] ss:$16 sps:$4 sm:$0xff]  }
 0xfd1   :  { %7690 = vmatprep.subr.bf16.mxu1 %v19050_v34  ;;  %7731 = vmatprep.subr.bf16.mxu0 %v19055_v23  ;;  %v19346_v34 = vld [vmem:[%s20694_s1 + $0x6a8] ss:$16 sps:$4 sm:$0xff]   ;;  %v19353_v23 = vld [vmem:[%s20694_s1 + $0x684] ss:$16 sps:$4 sm:$0xff]  }
 0xfd4   :  { %7691 = vmatpush1.bf16.msra.mxu1 %v19062_v56  ;;  %7732 = vmatpush1.bf16.msra.mxu0 %v19067_v17  ;;  %v19358_v56 = vld [vmem:[%s20694_s1 + $0x68c] ss:$16 sps:$4 sm:$0xff]   ;;  %v19365_v17 = vld [vmem:[%s20694_s1 + $0x680] ss:$16 sps:$4 sm:$0xff]  }
 0xfd5   :  { %7692 = vmatprep.subr.bf16.mxu1 %v19074_v47  ;;  %7733 = vmatprep.subr.bf16.mxu0 %v21723_v54  ;;  %v19370_v47 = vld [vmem:[%s20694_s1 + $0x688] ss:$16 sps:$4 sm:$0xff]  }
 0xfd8   :  { %7693 = vmatpush1.bf16.msra.mxu1 %v21724_v24  ;;  %7734 = vmatpush1.bf16.msra.mxu0 %v21725_v3 }
 0xfd9   :  { %7694 = vmatprep.subr.bf16.mxu1 %v21726_v29  ;;  %7735 = vmatprep.subr.bf16.mxu0 %v21727_v40 }
 0xfdc   :  { %7695 = vmatpush1.bf16.msra.mxu1 %v19110_v33  ;;  %7736 = vmatpush1.bf16.msra.mxu0 %v19115_v45  ;;  %v19289_v33 = vld [vmem:[%s20694_s1 + $0x6e0] ss:$16 sps:$4 sm:$0xff]   ;;  %v19377_v45 = vld [vmem:[%s20694_s1 + $0x664] ss:$16 sps:$4 sm:$0xff]  }
 0xfdd   :  { %7696 = vmatprep.subr.bf16.mxu1 %v19122_v5  ;;  %7737 = vmatprep.subr.bf16.mxu0 %v19127_v51  ;;  %v19382_v5 = vld [vmem:[%s20694_s1 + $0x66c] ss:$16 sps:$4 sm:$0xff]   ;;  %v19389_v51 = vld [vmem:[%s20694_s1 + $0x660] ss:$16 sps:$4 sm:$0xff]  }
 0xfe0   :  { %7697 = vmatpush1.bf16.msra.mxu1 %v19134_v9  ;;  %7738 = vmatpush1.bf16.msra.mxu0 %v19139_v21  ;;  %v19394_v9 = vld [vmem:[%s20694_s1 + $0x668] ss:$16 sps:$4 sm:$0xff]   ;;  %v19401_v21 = vld [vmem:[%s20694_s1 + $0x644] ss:$16 sps:$4 sm:$0xff]  }
 0xfe1   :  { %8015 = vmatprep.subr.bf16.mxu1 %v19277_v18  ;;  %8056 = vmatprep.subr.bf16.mxu0 %v19282_v28 }
 0xfe3   :  { %7715 = vmatmul.mubr.bf16.vlgmr.msra.gmra.mxu1 %v19191_v0  ;;  %7756 = vmatmul.mubr.bf16.vlgmr.msra.gmra.mxu0 %v19191_v0  ;;  %v19406_v0 = vld [vmem:[%s20694_s1 + $0x64c] ss:$16 sps:$4 sm:$0xff]  }
 0xfe4   :  { %8016 = vmatpush1.bf16.msra.mxu1 %v19289_v33  ;;  %8057 = vmatpush1.bf16.msra.mxu0 %v19294_v43 }
 0xfe5   :  { %8017 = vmatprep.subr.bf16.mxu1 %v19301_v49  ;;  %8058 = vmatprep.subr.bf16.mxu0 %v19306_v1 }
 0xfe6   :  { %8047 = vmatprep.mubr.bf16.mxu1 %v21154_v53  ;;  %8088 = vmatprep.mubr.bf16.mxu0 %v21154_v53 }
 0xfe8   :  { %8018 = vmatpush1.bf16.msra.mxu1 %v19315_v19  ;;  %8059 = vmatpush1.bf16.msra.mxu0 %v19320_v16 }
 0xfe9   :  { %8019 = vmatprep.subr.bf16.mxu1 %v19327_v44  ;;  %8060 = vmatprep.subr.bf16.mxu0 %v19332_v35 }
 0xfec   :  { %8020 = vmatpush1.bf16.msra.mxu1 %v19341_v32  ;;  %8061 = vmatpush1.bf16.msra.mxu0 %v19346_v34 }
 0xfed   :  { %8021 = vmatprep.subr.bf16.mxu1 %v19353_v23  ;;  %8062 = vmatprep.subr.bf16.mxu0 %v19358_v56 }
 0xff0   :  { %8022 = vmatpush1.bf16.msra.mxu1 %v19365_v17  ;;  %8063 = vmatpush1.bf16.msra.mxu0 %v19370_v47 }
 0xff1   :  { %8023 = vmatprep.subr.bf16.mxu1 %v19377_v45  ;;  %8064 = vmatprep.subr.bf16.mxu0 %v19382_v5 }
 0xff4   :  { %8024 = vmatpush1.bf16.msra.mxu1 %v19389_v51  ;;  %8065 = vmatpush1.bf16.msra.mxu0 %v19394_v9 }
 0xff5   :  { %8025 = vmatprep.subr.bf16.mxu1 %v19401_v21  ;;  %8066 = vmatprep.subr.bf16.mxu0 %v19406_v0 }
 0xff8   :  { %8026 = vmatpush1.bf16.msra.mxu1 %v19413_v8  ;;  %8067 = vmatpush1.bf16.msra.mxu0 %v19418_v22 }
 0xff9   :  { %8027 = vmatprep.subr.bf16.mxu1 %v19425_v42  ;;  %8068 = vmatprep.subr.bf16.mxu0 %v19430_v37 }
 0xffc   :  { %8028 = vmatpush1.bf16.msra.mxu1 %v19437_v27  ;;  %8069 = vmatpush1.bf16.msra.mxu0 %v19442_v62 }
 0xffd   :  { %v7132_v30 = vpop.f32.mrf.mxu1  ;;  %v7173_v41 = vpop.f32.mrf.mxu0  ;;  %8029 = vmatprep.subr.bf16.mxu1 %v19449_v63  ;;  %8070 = vmatprep.subr.bf16.mxu0 %v19454_v50 }
 0xffe   :  { %v7180_v26 = vadd.f32 %v7132_v30, %v21683_v61  ;;  %v7182_v52 = vadd.f32 %v7173_v41, %v21684_v58 }
 0xfff   :  { %v7134_v2 = vpop.f32.mrf.mxu1  ;;  %v7175_v6 = vpop.f32.mrf.mxu0 }
0x1000   :  { %v12408_v59 = vmul.f32 -1.442695, %v7180_v26  ;;  %v12410_v31 = vmul.f32 -1.442695, %v7182_v52  ;;  %v7181_v57 = vadd.f32 %v7134_v2, %v21685_v13  ;;  %8030 = vmatpush1.bf16.msra.mxu1 %v19461_v38  ;;  %8071 = vmatpush1.bf16.msra.mxu0 %v19466_v46  ;;  %v7183_v10 = vadd.f32 %v7175_v6, %v21686_v7 }
0x1001   :  { %v7136_v14 = vpop.f32.mrf.mxu1  ;;  %v7177_v15 = vpop.f32.mrf.mxu0 }
0x1002   :  { %14633 = vpow2.f32 %v12408_v59  ;;  %v12409_v4 = vmul.f32 -1.442695, %v7181_v57  ;;  %v12411_v3 = vmul.f32 -1.442695, %v7183_v10 }
0x1003   :  { %14635 = vpow2.f32 %v12410_v31  ;;  %v7137_v11 = vpop.f32.mrf.mxu1  ;;  %v7178_v48 = vpop.f32.mrf.mxu0 }
0x1004   :  { %14637 = vpow2.f32 %v12409_v4 }
0x100f   :  { %v14634_v54 = vpop.eup %14633 }
0x1010   :  { %v14636_v24 = vpop.eup %14635  ;;  %v7196_v41 = vadd.f32 1.0, %v14634_v54 }
0x1011   :  { %v14638_v29 = vpop.eup %14637  ;;  %v7198_v40 = vadd.f32 1.0, %v14636_v24  ;;  %v19494_v24 = vld [vmem:[%s20694_s1 + $0x7ec] ss:$16 sps:$4 sm:$0xff]  }
0x1012   :  { %v7197_v30 = vadd.f32 1.0, %v14638_v29  ;;  %21732 = vst [vmem:[#allocation23_spill] sm:$0xff] %v19494_v24  ;;  %v19504_v29 = vld [vmem:[%s20694_s1 + $0x7e8] ss:$16 sps:$4 sm:$0xff]   ;;  %8398 = vmatprep.subr.bf16.mxu0 %v19494_v24 }
0x1013   :  { %14639 = vrcp.f32 %v7198_v40  ;;  %21734 = vst [vmem:[#allocation54_spill] sm:$0xff] %v19504_v29  ;;  %v19513_v40 = vld [vmem:[%s20694_s1 + $0x7c4] ss:$16 sps:$4 sm:$0xff]  }
0x1014   :  { %14641 = vpow2.f32 %v12411_v3  ;;  %v19499_v3 = vld [vmem:[%s20694_s1 + $0x7e0] ss:$16 sps:$4 sm:$0xff]   ;;  %21735 = vst [vmem:[#allocation55_spill] sm:$0xff] %v19513_v40 }
0x1015   :  { %14643 = vrcp.f32 %v7197_v30  ;;  %21733 = vst [vmem:[#allocation53_spill] sm:$0xff] %v19499_v3  ;;  %v19518_v30 = vld [vmem:[%s20694_s1 + $0x7cc] ss:$16 sps:$4 sm:$0xff]  }
0x1016   :  { %14645 = vrcp.f32 %v7196_v41  ;;  %21736 = vst [vmem:[#allocation56_spill] sm:$0xff] %v19518_v30  ;;  %v19523_v41 = vld [vmem:[%s20694_s1 + $0x7c0] ss:$16 sps:$4 sm:$0xff]  }
0x1017   :  { %21737 = vst [vmem:[#allocation25_spill] sm:$0xff] %v19523_v41 }
0x1020   :  { %v14640_v26 = vpop.eup %14639 }
0x1021   :  { %v14642_v52 = vpop.eup %14641  ;;  %v7208_v2 = vmul.f32 2.0, %v14640_v26  ;;  %v19528_v26 = vld [vmem:[%s20694_s1 + $0x7c8] ss:$16 sps:$4 sm:$0xff]  }
0x1022   :  { %v14644_v59 = vpop.eup %14643  ;;  %v7199_v14 = vadd.f32 1.0, %v14642_v52  ;;  %21738 = vst [vmem:[#allocation67_spill] sm:$0xff] %v19528_v26  ;;  %v19537_v52 = vld [vmem:[%s20694_s1 + $0x7a4] ss:$16 sps:$4 sm:$0xff]  }
0x1023   :  { %v12412_v31 = vadd.f32 -1.0, %v7208_v2  ;;  %v14646_v57 = vpop.eup %14645  ;;  %v7210_v6 = vmul.f32 %v14644_v59, %v19188_v60  ;;  %v19489_v60 = vld [vmem:[%s20694_s1 + $0x7e4] ss:$16 sps:$4 sm:$0xff]   ;;  %21739 = vst [vmem:[#allocation68_spill] sm:$0xff] %v19537_v52  ;;  %v19542_v2 = vld [vmem:[%s20694_s1 + $0x7ac] ss:$16 sps:$4 sm:$0xff]  }
0x1024   :  { %14647 = vrcp.f32 %v7199_v14  ;;  %21731 = vst [vmem:[#allocation22_spill] sm:$0xff] %v19489_v60  ;;  %8357 = vmatprep.subr.bf16.mxu1 %v19489_v60  ;;  %21740 = vst [vmem:[#allocation71_spill] sm:$0xff] %v19542_v2  ;;  %v19547_v59 = vld [vmem:[%s20694_s1 + $0x7a0] ss:$16 sps:$4 sm:$0xff]   ;;  %v19566_v14 = vld [vmem:[%s20694_s1 + $0x78c] ss:$16 sps:$4 sm:$0xff]  }
0x1025   :  { %v7211_v15 = vmul.f32 %v14646_v57, %v12412_v31  ;;  %21741 = vst [vmem:[#allocation10_spill] sm:$0xff] %v19547_v59  ;;  %v19552_v31 = vld [vmem:[%s20694_s1 + $0x7a8] ss:$16 sps:$4 sm:$0xff]   ;;  %v19561_v57 = vld [vmem:[%s20694_s1 + $0x784] ss:$16 sps:$4 sm:$0xff]   ;;  %21744 = vst [vmem:[#allocation26_spill] sm:$0xff] %v19566_v14 }
0x1026   :  { %21742 = vst [vmem:[#allocation11_spill] sm:$0xff] %v19552_v31  ;;  %21743 = vst [vmem:[#allocation12_spill] sm:$0xff] %v19561_v57 }
0x1027   :  { %v19477_v4 = vadd.f32 %v7211_v15, %v7210_v6  ;;  %v19571_v15 = vld [vmem:[%s20694_s1 + $0x780] ss:$16 sps:$4 sm:$0xff]   ;;  %v19576_v6 = vld [vmem:[%s20694_s1 + $0x788] ss:$16 sps:$4 sm:$0xff]  }
0x1028   :  { %21745 = vst [vmem:[#allocation27_spill] sm:$0xff] %v19571_v15  ;;  %21746 = vst [vmem:[#allocation28_spill] sm:$0xff] %v19576_v6 }
0x1029   :  { %21730 = vst [vmem:[#allocation51_spill] sm:$0xff] %v19477_v4  ;;  %14649 = vtanh.f32 %v19477_v4 }
0x1031   :  { %v14648_v11 = vpop.eup %14647 }
0x1036   :  { %v14650_v48 = vpop.eup %14649 }
0x1037   :  { %v7214_v10 = vmul.f32 %v14650_v48, %v14648_v11  ;;  %v19585_v11 = vld [vmem:[%s20694_s1 + $0x764] ss:$16 sps:$4 sm:$0xff]   ;;  %v19590_v48 = vld [vmem:[%s20694_s1 + $0x76c] ss:$16 sps:$4 sm:$0xff]  }
0x1038   :  { %21747 = vst [vmem:[#allocation34_spill] sm:$0xff] %v19585_v11  ;;  %21748 = vst [vmem:[#allocation35_spill] sm:$0xff] %v19590_v48 }
0x1039   :  { %v19480_v54 = vpack.c.bf16 %v7214_v10, %v7214_v10  ;;  %v19595_v10 = vld [vmem:[%s20694_s1 + $0x760] ss:$16 sps:$4 sm:$0xff]  }
0x103a   :  { %21749 = vst [vmem:[#allocation36_spill] sm:$0xff] %v19595_v10 }
0x103b   :  { %8048 = vmatmul.mubr.bf16.vlgmr.msra.gmra.mxu1 %v19480_v54  ;;  %8089 = vmatmul.mubr.bf16.vlgmr.msra.gmra.mxu0 %v19480_v54 }
0x103c   :  { %8389 = vmatprep.mubr.bf16.mxu1 %v21154_v53  ;;  %8430 = vmatprep.mubr.bf16.mxu0 %v21154_v53 }
0x103d   :  { %8358 = vmatpush1.bf16.msra.mxu1 %v19499_v3  ;;  %8399 = vmatpush1.bf16.msra.mxu0 %v19504_v29 }
0x103e   :  { %8359 = vmatprep.subr.bf16.mxu1 %v19513_v40  ;;  %8400 = vmatprep.subr.bf16.mxu0 %v19518_v30 }
0x1041   :  { %8360 = vmatpush1.bf16.msra.mxu1 %v19523_v41  ;;  %8401 = vmatpush1.bf16.msra.mxu0 %v19528_v26  ;;  %v12541_v26 = vld [vmem:[%s20696_s3 + $0xc] sm:$0xf] }
0x1042   :  { %8361 = vmatprep.subr.bf16.mxu1 %v19537_v52  ;;  %8402 = vmatprep.subr.bf16.mxu0 %v19542_v2  ;;  %v7773_v40 = vrot.slane %v12541_v26, %v21552_v36 }
0x1045   :  { %8362 = vmatpush1.bf16.msra.mxu1 %v19547_v59  ;;  %8403 = vmatpush1.bf16.msra.mxu0 %v19552_v31 }
0x1046   :  { %8363 = vmatprep.subr.bf16.mxu1 %v19561_v57  ;;  %8404 = vmatprep.subr.bf16.mxu0 %v19566_v14 }
0x1049   :  { %8364 = vmatpush1.bf16.msra.mxu1 %v19571_v15  ;;  %8405 = vmatpush1.bf16.msra.mxu0 %v19576_v6  ;;  %v19607_v6 = vld [vmem:[%s20694_s1 + $0x744] ss:$16 sps:$4 sm:$0xff]   ;;  %v19612_v15 = vld [vmem:[%s20694_s1 + $0x74c] ss:$16 sps:$4 sm:$0xff]  }
0x104a   :  { %8365 = vmatprep.subr.bf16.mxu1 %v19585_v11  ;;  %8406 = vmatprep.subr.bf16.mxu0 %v19590_v48  ;;  %21751 = vst [vmem:[#allocation38_spill] sm:$0xff] %v19607_v6  ;;  %21752 = vst [vmem:[#allocation39_spill] sm:$0xff] %v19612_v15  ;;  %v19619_v11 = vld [vmem:[%s20694_s1 + $0x740] ss:$16 sps:$4 sm:$0xff]   ;;  %v19624_v48 = vld [vmem:[%s20694_s1 + $0x748] ss:$16 sps:$4 sm:$0xff]  }
0x104b   :  { %21753 = vst [vmem:[#allocation40_spill] sm:$0xff] %v19619_v11  ;;  %21754 = vst [vmem:[#allocation41_spill] sm:$0xff] %v19624_v48 }
0x104d   :  { %8366 = vmatpush1.bf16.msra.mxu1 %v19595_v10  ;;  %8407 = vmatpush1.bf16.msra.mxu0 %v19600_v39  ;;  %v19631_v10 = vld [vmem:[%s20694_s1 + $0x724] ss:$16 sps:$4 sm:$0xff]   ;;  %v19636_v39 = vld [vmem:[%s20694_s1 + $0x72c] ss:$16 sps:$4 sm:$0xff]  }
0x104e   :  { %8367 = vmatprep.subr.bf16.mxu1 %v19607_v6  ;;  %8408 = vmatprep.subr.bf16.mxu0 %v19612_v15  ;;  %21755 = vst [vmem:[#allocation42_spill] sm:$0xff] %v19631_v10  ;;  %21756 = vst [vmem:[#allocation29_spill] sm:$0xff] %v19636_v39  ;;  %v19643_v6 = vld [vmem:[%s20694_s1 + $0x720] ss:$16 sps:$4 sm:$0xff]   ;;  %v19648_v15 = vld [vmem:[%s20694_s1 + $0x728] ss:$16 sps:$4 sm:$0xff]  }
0x104f   :  { %21757 = vst [vmem:[#allocation43_spill] sm:$0xff] %v19643_v6  ;;  %21758 = vst [vmem:[#allocation44_spill] sm:$0xff] %v19648_v15 }
0x1051   :  { %8368 = vmatpush1.bf16.msra.mxu1 %v19619_v11  ;;  %8409 = vmatpush1.bf16.msra.mxu0 %v19624_v48  ;;  %v19655_v11 = vld [vmem:[%s20694_s1 + $0x704] ss:$16 sps:$4 sm:$0xff]   ;;  %v19660_v48 = vld [vmem:[%s20694_s1 + $0x70c] ss:$16 sps:$4 sm:$0xff]  }
0x1052   :  { %8369 = vmatprep.subr.bf16.mxu1 %v19631_v10  ;;  %8410 = vmatprep.subr.bf16.mxu0 %v19636_v39  ;;  %21759 = vst [vmem:[#allocation45_spill] sm:$0xff] %v19655_v11  ;;  %21760 = vst [vmem:[#allocation46_spill] sm:$0xff] %v19660_v48  ;;  %v19667_v10 = vld [vmem:[%s20694_s1 + $0x700] ss:$16 sps:$4 sm:$0xff]   ;;  %v19672_v39 = vld [vmem:[%s20694_s1 + $0x708] ss:$16 sps:$4 sm:$0xff]  }
0x1053   :  { %21761 = vst [vmem:[#allocation47_spill] sm:$0xff] %v19667_v10  ;;  %21762 = vst [vmem:[#allocation48_spill] sm:$0xff] %v19672_v39 }
0x1055   :  { %8370 = vmatpush1.bf16.msra.mxu1 %v19643_v6  ;;  %8411 = vmatpush1.bf16.msra.mxu0 %v19648_v15  ;;  %v19679_v6 = vld [vmem:[%s20694_s1 + $0x3e4] ss:$16 sps:$4 sm:$0xff]   ;;  %v19684_v15 = vld [vmem:[%s20694_s1 + $0x3ec] ss:$16 sps:$4 sm:$0xff]  }
0x1056   :  { %8371 = vmatprep.subr.bf16.mxu1 %v19655_v11  ;;  %8412 = vmatprep.subr.bf16.mxu0 %v19660_v48  ;;  %21763 = vst [vmem:[#allocation49_spill] sm:$0xff] %v19679_v6  ;;  %21764 = vst [vmem:[#allocation50_spill] sm:$0xff] %v19684_v15 }
0x1059   :  { %8372 = vmatpush1.bf16.msra.mxu1 %v19667_v10  ;;  %8413 = vmatpush1.bf16.msra.mxu0 %v19672_v39  ;;  %v7769_v10 = vrot.slane %v12541_v26, %v21720_v55  ;;  %v7777_v39 = vrot.slane %v12541_v26, %v21721_v20 }
0x105a   :  { %8599 = vmatprep.subr.bf16.mxu1 %v19679_v6  ;;  %8640 = vmatprep.subr.bf16.mxu0 %v19684_v15 }
0x1083   :  { %v7474_v11 = vpop.f32.mrf.mxu1  ;;  %v7515_v48 = vpop.f32.mrf.mxu0 }
0x1085   :  { %v7476_v14 = vpop.f32.mrf.mxu1  ;;  %v7517_v57 = vpop.f32.mrf.mxu0 }
0x1087   :  { %v7478_v31 = vpop.f32.mrf.mxu1  ;;  %v7519_v59 = vpop.f32.mrf.mxu0 }
0x1089   :  { %v7479_v2 = vpop.f32.mrf.mxu1  ;;  %v7520_v52 = vpop.f32.mrf.mxu0 }
0x10a3   :  { %v7716_v41 = vpop.f32.mrf.mxu1  ;;  %v7757_v6 = vpop.f32.mrf.mxu0 }
0x10a4   :  { %v7717_v30 = vadd.f32 %v7716_v41, %v7474_v11  ;;  %v7758_v15 = vadd.f32 %v7757_v6, %v7515_v48  ;;  %v7781_v6 = vrot.slane %v12541_v26, %v21601_v12 }
0x10a5   :  { %v7718_v29 = vpop.f32.mrf.mxu1  ;;  %v7759_v3 = vpop.f32.mrf.mxu0 }
0x10a6   :  { %v7786_v31 = vadd.f32 %v7769_v10, %v7717_v30  ;;  %v7788_v59 = vadd.f32 %v7777_v39, %v7758_v15  ;;  %v7719_v2 = vadd.f32 %v7718_v29, %v7476_v14  ;;  %v7760_v41 = vadd.f32 %v7759_v3, %v7517_v57 }
0x10a7   :  { %v7720_v52 = vpop.f32.mrf.mxu1  ;;  %v7761_v4 = vpop.f32.mrf.mxu0 }
0x10a8   :  { %v12542_v24 = vmul.f32 -1.442695, %v7786_v31  ;;  %v12544_v60 = vmul.f32 -1.442695, %v7788_v59  ;;  %v7787_v46 = vadd.f32 %v7773_v40, %v7719_v2  ;;  %v7789_v11 = vadd.f32 %v7781_v6, %v7760_v41  ;;  %v19706_v31 = vld [vmem:[%s20694_s1 + $0x3e0] ss:$16 sps:$4 sm:$0xff]  }
0x10a9   :  { %v7721_v38 = vpop.f32.mrf.mxu1  ;;  %v7762_v55 = vpop.f32.mrf.mxu0  ;;  %v19711_v59 = vld [vmem:[%s20694_s1 + $0x3e8] ss:$16 sps:$4 sm:$0xff]   ;;  %v19718_v2 = vld [vmem:[%s20694_s1 + $0x3c4] ss:$16 sps:$4 sm:$0xff]   ;;  %v19723_v52 = vld [vmem:[%s20694_s1 + $0x3cc] ss:$16 sps:$4 sm:$0xff]  }
0x10aa   :  { %14651 = vpow2.f32 %v12542_v24  ;;  %v12543_v20 = vmul.f32 -1.442695, %v7787_v46  ;;  %v12545_v30 = vmul.f32 -1.442695, %v7789_v11  ;;  %v19730_v41 = vld [vmem:[%s20694_s1 + $0x3c0] ss:$16 sps:$4 sm:$0xff]  }
0x10ab   :  { %14653 = vpow2.f32 %v12544_v60  ;;  %v19735_v6 = vld [vmem:[%s20694_s1 + $0x3c8] ss:$16 sps:$4 sm:$0xff]   ;;  %v19742_v11 = vld [vmem:[%s20694_s1 + $0x3a4] ss:$16 sps:$4 sm:$0xff]  }
0x10ac   :  { %14655 = vpow2.f32 %v12543_v20 }
0x10b7   :  { %v14652_v48 = vpop.eup %14651 }
0x10b8   :  { %v14654_v36 = vpop.eup %14653  ;;  %v7802_v4 = vadd.f32 1.0, %v14652_v48  ;;  %v19747_v48 = vld [vmem:[%s20694_s1 + $0x3ac] ss:$16 sps:$4 sm:$0xff]  }
0x10b9   :  { %v14656_v39 = vpop.eup %14655  ;;  %v7804_v29 = vadd.f32 1.0, %v14654_v36 }
0x10ba   :  { %v7803_v14 = vadd.f32 1.0, %v14656_v39  ;;  %v19761_v39 = vld [vmem:[%s20694_s1 + $0x3a8] ss:$16 sps:$4 sm:$0xff]  }
0x10bb   :  { %14657 = vrcp.f32 %v7804_v29  ;;  %v19768_v29 = vld [vmem:[%s20694_s1 + $0x384] ss:$16 sps:$4 sm:$0xff]  }
0x10bc   :  { %14659 = vpow2.f32 %v12545_v30  ;;  %v19756_v30 = vld [vmem:[%s20694_s1 + $0x3a0] ss:$16 sps:$4 sm:$0xff]   ;;  %21766 = vst [vmem:[#allocation57_spill] sm:$0xff] %v19768_v29 }
0x10bd   :  { %14661 = vrcp.f32 %v7803_v14  ;;  %v19773_v14 = vld [vmem:[%s20694_s1 + $0x38c] ss:$16 sps:$4 sm:$0xff]  }
0x10be   :  { %14663 = vrcp.f32 %v7802_v4  ;;  %21767 = vst [vmem:[#allocation58_spill] sm:$0xff] %v19773_v14  ;;  %v19780_v4 = vld [vmem:[%s20694_s1 + $0x380] ss:$16 sps:$4 sm:$0xff]  }
0x10bf   :  { %21768 = vst [vmem:[#allocation59_spill] sm:$0xff] %v19780_v4 }
0x10c8   :  { %v14658_v55 = vpop.eup %14657 }
0x10c9   :  { %v14660_v38 = vpop.eup %14659  ;;  %v7814_v46 = vmul.f32 2.0, %v14658_v55  ;;  %v19785_v55 = vld [vmem:[%s20694_s1 + $0x388] ss:$16 sps:$4 sm:$0xff]  }
0x10ca   :  { %v14662_v60 = vpop.eup %14661  ;;  %v7805_v3 = vadd.f32 1.0, %v14660_v38  ;;  %21769 = vst [vmem:[#allocation60_spill] sm:$0xff] %v19785_v55  ;;  %v19792_v38 = vld [vmem:[%s20694_s1 + $0x364] ss:$16 sps:$4 sm:$0xff]  }
0x10cb   :  { %v12546_v20 = vadd.f32 -1.0, %v7814_v46  ;;  %v14664_v24 = vpop.eup %14663  ;;  %v7816_v26 = vmul.f32 %v14662_v60, %v19237_v25  ;;  %21770 = vst [vmem:[#allocation61_spill] sm:$0xff] %v19792_v38  ;;  %v19797_v46 = vld [vmem:[%s20694_s1 + $0x36c] ss:$16 sps:$4 sm:$0xff]   ;;  %v19804_v60 = vld [vmem:[%s20694_s1 + $0x360] ss:$16 sps:$4 sm:$0xff]  }
0x10cc   :  { %14665 = vrcp.f32 %v7805_v3  ;;  %21771 = vst [vmem:[#allocation19_spill] sm:$0xff] %v19797_v46  ;;  %21772 = vst [vmem:[#allocation20_spill] sm:$0xff] %v19804_v60  ;;  %v19821_v3 = vld [vmem:[%s20694_s1 + $0x34c] ss:$16 sps:$4 sm:$0xff]  }
0x10cd   :  { %v7817_v40 = vmul.f32 %v14664_v24, %v12546_v20  ;;  %v19809_v20 = vld [vmem:[%s20694_s1 + $0x368] ss:$16 sps:$4 sm:$0xff]   ;;  %v19816_v24 = vld [vmem:[%s20694_s1 + $0x344] ss:$16 sps:$4 sm:$0xff]   ;;  %21775 = vst [vmem:[#allocation63_spill] sm:$0xff] %v19821_v3 }
0x10ce   :  { %21773 = vst [vmem:[#allocation21_spill] sm:$0xff] %v19809_v20  ;;  %21774 = vst [vmem:[#allocation13_spill] sm:$0xff] %v19816_v24 }
0x10cf   :  { %v19698_v57 = vadd.f32 %v7817_v40, %v7816_v26  ;;  %v19828_v40 = vld [vmem:[%s20694_s1 + $0x340] ss:$16 sps:$4 sm:$0xff]   ;;  %v19833_v26 = vld [vmem:[%s20694_s1 + $0x348] ss:$16 sps:$4 sm:$0xff]  }
0x10d0   :  { %21776 = vst [vmem:[#allocation64_spill] sm:$0xff] %v19828_v40  ;;  %21777 = vst [vmem:[#allocation65_spill] sm:$0xff] %v19833_v26 }
0x10d1   :  { %14667 = vtanh.f32 %v19698_v57 }
0x10d9   :  { %v14666_v36 = vpop.eup %14665 }
0x10de   :  { %v14668_v15 = vpop.eup %14667 }
0x10df   :  { %v19701_v10 = vmul.f32 %v14668_v15, %v14666_v36  ;;  %v19840_v36 = vld [vmem:[%s20694_s1 + $0x324] ss:$16 sps:$4 sm:$0xff]   ;;  %v19845_v15 = vld [vmem:[%s20694_s1 + $0x32c] ss:$16 sps:$4 sm:$0xff]  }
0x10e0   :  { %21778 = vst [vmem:[#allocation66_spill] sm:$0xff] %v19840_v36  ;;  %21779 = vst [vmem:[#allocation69_spill] sm:$0xff] %v19845_v15 }
0x10e1   :  { %21765 = vst [vmem:[#allocation52_spill] sm:$0xff] %v19701_v10  ;;  %v8164_v25 = vpack.c.bf16 %v19701_v10, %v19701_v10  ;;  %v19857_v10 = vld [vmem:[%s20694_s1 + $0x328] ss:$16 sps:$4 sm:$0xff]  }
0x10e2   :  { %21781 = vst [vmem:[#allocation72_spill] sm:$0xff] %v19857_v10 }
0x10e3   :  { %8390 = vmatmul.mubr.bf16.vlgmr.msra.gmra.mxu1 %v8164_v25  ;;  %8431 = vmatmul.mubr.bf16.vlgmr.msra.gmra.mxu0 %v8164_v25  ;;  %v19852_v25 = vld [vmem:[%s20694_s1 + $0x320] ss:$16 sps:$4 sm:$0xff]  }
0x10e4   :  { %8600 = vmatpush1.bf16.msra.mxu1 %v19706_v31  ;;  %8641 = vmatpush1.bf16.msra.mxu0 %v19711_v59  ;;  %21780 = vst [vmem:[#allocation70_spill] sm:$0xff] %v19852_v25 }
0x10e5   :  { %8601 = vmatprep.subr.bf16.mxu1 %v19718_v2  ;;  %8642 = vmatprep.subr.bf16.mxu0 %v19723_v52 }
0x10e6   :  { %8631 = vmatprep.mubr.bf16.mxu1 %v21154_v53  ;;  %8672 = vmatprep.mubr.bf16.mxu0 %v21154_v53 }
0x10e8   :  { %8602 = vmatpush1.bf16.msra.mxu1 %v19730_v41  ;;  %8643 = vmatpush1.bf16.msra.mxu0 %v19735_v6 }
0x10e9   :  { %8603 = vmatprep.subr.bf16.mxu1 %v19742_v11  ;;  %8644 = vmatprep.subr.bf16.mxu0 %v19747_v48 }
0x10ec   :  { %8604 = vmatpush1.bf16.msra.mxu1 %v19756_v30  ;;  %8645 = vmatpush1.bf16.msra.mxu0 %v19761_v39 }
0x10ed   :  { %8605 = vmatprep.subr.bf16.mxu1 %v19768_v29  ;;  %8646 = vmatprep.subr.bf16.mxu0 %v19773_v14 }
0x10f0   :  { %8606 = vmatpush1.bf16.msra.mxu1 %v19780_v4  ;;  %8647 = vmatpush1.bf16.msra.mxu0 %v19785_v55 }
0x10f1   :  { %8607 = vmatprep.subr.bf16.mxu1 %v19792_v38  ;;  %8648 = vmatprep.subr.bf16.mxu0 %v19797_v46 }
0x10f4   :  { %8608 = vmatpush1.bf16.msra.mxu1 %v19804_v60  ;;  %8649 = vmatpush1.bf16.msra.mxu0 %v19809_v20 }
0x10f5   :  { %8609 = vmatprep.subr.bf16.mxu1 %v19816_v24  ;;  %8650 = vmatprep.subr.bf16.mxu0 %v19821_v3 }
0x10f8   :  { %8610 = vmatpush1.bf16.msra.mxu1 %v19828_v40  ;;  %8651 = vmatpush1.bf16.msra.mxu0 %v19833_v26  ;;  %v19864_v40 = vld [vmem:[%s20694_s1 + $0x304] ss:$16 sps:$4 sm:$0xff]   ;;  %v19869_v26 = vld [vmem:[%s20694_s1 + $0x30c] ss:$16 sps:$4 sm:$0xff]  }
0x10f9   :  { %8611 = vmatprep.subr.bf16.mxu1 %v19840_v36  ;;  %8652 = vmatprep.subr.bf16.mxu0 %v19845_v15  ;;  %v19876_v15 = vld [vmem:[%s20694_s1 + $0x300] ss:$16 sps:$4 sm:$0xff]   ;;  %v19881_v36 = vld [vmem:[%s20694_s1 + $0x308] ss:$16 sps:$4 sm:$0xff]  }
0x10fb   :  { %v8049_v3 = vpop.f32.mrf.mxu1  ;;  %v8090_v24 = vpop.f32.mrf.mxu0 }
0x10fc   :  { %8612 = vmatpush1.bf16.msra.mxu1 %v19852_v25  ;;  %8653 = vmatpush1.bf16.msra.mxu0 %v19857_v10  ;;  %v8097_v20 = vadd.f32 %v8049_v3, %v21683_v61  ;;  %v8099_v60 = vadd.f32 %v8090_v24, %v21684_v58 }
0x10fd   :  { %8613 = vmatprep.subr.bf16.mxu1 %v19864_v40  ;;  %8654 = vmatprep.subr.bf16.mxu0 %v19869_v26  ;;  %v8051_v25 = vpop.f32.mrf.mxu1  ;;  %v8092_v10 = vpop.f32.mrf.mxu0 }
0x10fe   :  { %v12611_v46 = vmul.f32 -1.442695, %v8097_v20  ;;  %v12613_v38 = vmul.f32 -1.442695, %v8099_v60  ;;  %v8098_v55 = vadd.f32 %v8051_v25, %v21685_v13  ;;  %v21798_v60 = vld [vmem:[#allocation26_spill] sm:$0xff]  ;;  %v21799_v20 = vld [vmem:[#allocation27_spill] sm:$0xff] }
0x10ff   :  { %v8053_v4 = vpop.f32.mrf.mxu1  ;;  %v8094_v14 = vpop.f32.mrf.mxu0  ;;  %v21800_v25 = vld [vmem:[#allocation28_spill] sm:$0xff] }
0x1100   :  { %14669 = vpow2.f32 %v12611_v46  ;;  %8614 = vmatpush1.bf16.msra.mxu1 %v19876_v15  ;;  %8655 = vmatpush1.bf16.msra.mxu0 %v19881_v36  ;;  %v12612_v3 = vmul.f32 -1.442695, %v8098_v55  ;;  %v21793_v14 = vld [vmem:[#allocation68_spill] sm:$0xff]  ;;  %v21794_v4 = vld [vmem:[#allocation71_spill] sm:$0xff]  ;;  %v21795_v55 = vld [vmem:[#allocation10_spill] sm:$0xff] }
0x1101   :  { %14671 = vpow2.f32 %v12613_v38  ;;  %v8054_v24 = vpop.f32.mrf.mxu1  ;;  %v8095_v29 = vpop.f32.mrf.mxu0  ;;  %8932 = vmatprep.subr.bf16.mxu1 %v19277_v18  ;;  %8973 = vmatprep.subr.bf16.mxu0 %v19282_v28  ;;  %v8100_v18 = vadd.f32 %v8092_v10, %v21686_v7  ;;  %v21791_v10 = vld [vmem:[#allocation25_spill] sm:$0xff]  ;;  %v21796_v38 = vld [vmem:[#allocation11_spill] sm:$0xff]  ;;  %v21797_v46 = vld [vmem:[#allocation12_spill] sm:$0xff] }
0x1102   :  { %14673 = vpow2.f32 %v12612_v3  ;;  %v21792_v29 = vld [vmem:[#allocation67_spill] sm:$0xff]  ;;  %v21801_v3 = vld [vmem:[#allocation34_spill] sm:$0xff] }
0x1103   :  { %8632 = vmatmul.mubr.bf16.vlgmr.msra.gmra.mxu1 %v19480_v54  ;;  %8673 = vmatmul.mubr.bf16.vlgmr.msra.gmra.mxu0 %v19480_v54  ;;  %v21790_v54 = vld [vmem:[#allocation56_spill] sm:$0xff]  ;;  %v21802_v24 = vld [vmem:[#allocation35_spill] sm:$0xff] }
0x1104   :  { %8933 = vmatpush1.bf16.msra.mxu1 %v19289_v33  ;;  %8974 = vmatpush1.bf16.msra.mxu0 %v19294_v43  ;;  %v12614_v43 = vmul.f32 -1.442695, %v8100_v18  ;;  %v21803_v18 = vld [vmem:[#allocation36_spill] sm:$0xff] }
0x1105   :  { %8934 = vmatprep.subr.bf16.mxu1 %v19301_v49  ;;  %8975 = vmatprep.subr.bf16.mxu0 %v19306_v1 }
0x1106   :  { %8964 = vmatprep.mubr.bf16.mxu1 %v21154_v53  ;;  %9005 = vmatprep.mubr.bf16.mxu0 %v21154_v53 }
0x1108   :  { %8935 = vmatpush1.bf16.msra.mxu1 %v19315_v19  ;;  %8976 = vmatpush1.bf16.msra.mxu0 %v19320_v16 }
0x1109   :  { %8936 = vmatprep.subr.bf16.mxu1 %v19327_v44  ;;  %8977 = vmatprep.subr.bf16.mxu0 %v19332_v35 }
0x110c   :  { %8937 = vmatpush1.bf16.msra.mxu1 %v19341_v32  ;;  %8978 = vmatpush1.bf16.msra.mxu0 %v19346_v34 }
0x110d   :  { %v14670_v28 = vpop.eup %14669  ;;  %8938 = vmatprep.subr.bf16.mxu1 %v19353_v23  ;;  %8979 = vmatprep.subr.bf16.mxu0 %v19358_v56  ;;  %v21782_v23 = vld [vmem:[#allocation24_spill] sm:$0xff]  ;;  %v21783_v56 = vld [vmem:[#allocation7_spill] sm:$0xff] }
0x110e   :  { %v14672_v33 = vpop.eup %14671  ;;  %v8113_v16 = vadd.f32 1.0, %v14670_v28  ;;  %v21804_v28 = vld [vmem:[#allocation37_spill] sm:$0xff] }
0x110f   :  { %v14674_v49 = vpop.eup %14673  ;;  %v8115_v1 = vadd.f32 1.0, %v14672_v33  ;;  %v21805_v33 = vld [vmem:[#allocation38_spill] sm:$0xff] }
0x1110   :  { %v8114_v19 = vadd.f32 1.0, %v14674_v49  ;;  %8939 = vmatpush1.bf16.msra.mxu1 %v19365_v17  ;;  %8980 = vmatpush1.bf16.msra.mxu0 %v19370_v47  ;;  %v21784_v47 = vld [vmem:[#allocation22_spill] sm:$0xff]  ;;  %v21807_v49 = vld [vmem:[#allocation40_spill] sm:$0xff] }
0x1111   :  { %14675 = vrcp.f32 %v8115_v1  ;;  %8940 = vmatprep.subr.bf16.mxu1 %v19377_v45  ;;  %8981 = vmatprep.subr.bf16.mxu0 %v19382_v5  ;;  %v21785_v45 = vld [vmem:[#allocation23_spill] sm:$0xff]  ;;  %v21808_v1 = vld [vmem:[#allocation41_spill] sm:$0xff] }
0x1112   :  { %14677 = vpow2.f32 %v12614_v43  ;;  %v21806_v43 = vld [vmem:[#allocation39_spill] sm:$0xff] }
0x1113   :  { %14679 = vrcp.f32 %v8114_v19  ;;  %v21809_v19 = vld [vmem:[#allocation42_spill] sm:$0xff] }
0x1114   :  { %8941 = vmatpush1.bf16.msra.mxu1 %v19389_v51  ;;  %8982 = vmatpush1.bf16.msra.mxu0 %v19394_v9  ;;  %14681 = vrcp.f32 %v8113_v16  ;;  %v21810_v16 = vld [vmem:[#allocation29_spill] sm:$0xff] }
0x1115   :  { %8942 = vmatprep.subr.bf16.mxu1 %v19401_v21  ;;  %8983 = vmatprep.subr.bf16.mxu0 %v19406_v0  ;;  %v21786_v21 = vld [vmem:[#allocation51_spill] sm:$0xff] }
0x1118   :  { %8943 = vmatpush1.bf16.msra.mxu1 %v19413_v8  ;;  %8984 = vmatpush1.bf16.msra.mxu0 %v19418_v22 }
0x1119   :  { %8944 = vmatprep.subr.bf16.mxu1 %v19425_v42  ;;  %8985 = vmatprep.subr.bf16.mxu0 %v19430_v37 }
0x111c   :  { %8945 = vmatpush1.bf16.msra.mxu1 %v19437_v27  ;;  %8986 = vmatpush1.bf16.msra.mxu0 %v19442_v62  ;;  %v21787_v62 = vld [vmem:[#allocation53_spill] sm:$0xff] }
0x111d   :  { %8946 = vmatprep.subr.bf16.mxu1 %v19449_v63  ;;  %8987 = vmatprep.subr.bf16.mxu0 %v19454_v50  ;;  %v21788_v63 = vld [vmem:[#allocation54_spill] sm:$0xff]  ;;  %v21789_v50 = vld [vmem:[#allocation55_spill] sm:$0xff] }
0x111e   :  { %v14676_v44 = vpop.eup %14675 }
0x111f   :  { %v14678_v35 = vpop.eup %14677  ;;  %v8125_v32 = vmul.f32 2.0, %v14676_v44  ;;  %v21811_v44 = vld [vmem:[#allocation43_spill] sm:$0xff] }
0x1120   :  { %v14680_v34 = vpop.eup %14679  ;;  %8947 = vmatpush1.bf16.msra.mxu1 %v21782_v23  ;;  %8988 = vmatpush1.bf16.msra.mxu0 %v21783_v56  ;;  %v8116_v51 = vadd.f32 1.0, %v14678_v35  ;;  %v21812_v35 = vld [vmem:[#allocation44_spill] sm:$0xff]  ;;  %v21815_v23 = vld [vmem:[#allocation47_spill] sm:$0xff] }
0x1121   :  { %v12615_v17 = vadd.f32 -1.0, %v8125_v32  ;;  %9274 = vmatprep.subr.bf16.mxu1 %v21784_v47  ;;  %9315 = vmatprep.subr.bf16.mxu0 %v21785_v45  ;;  %v14682_v5 = vpop.eup %14681  ;;  %v8127_v0 = vmul.f32 %v14680_v34, %v21786_v21  ;;  %v21813_v32 = vld [vmem:[#allocation45_spill] sm:$0xff]  ;;  %v21814_v34 = vld [vmem:[#allocation46_spill] sm:$0xff]  ;;  %v21816_v56 = vld [vmem:[#allocation48_spill] sm:$0xff] }
0x1122   :  { %14683 = vrcp.f32 %v8116_v51  ;;  %v21818_v47 = vld [vmem:[#allocation50_spill] sm:$0xff] }
0x1123   :  { %v8128_v9 = vmul.f32 %v14682_v5, %v12615_v17  ;;  %v21817_v17 = vld [vmem:[#allocation49_spill] sm:$0xff] }
0x1125   :  { %v19930_v8 = vadd.f32 %v8128_v9, %v8127_v0 }
0x1127   :  { %14685 = vtanh.f32 %v19930_v8 }
0x112f   :  { %v14684_v22 = vpop.eup %14683 }
0x1134   :  { %v14686_v42 = vpop.eup %14685 }
0x1135   :  { %v8131_v37 = vmul.f32 %v14686_v42, %v14684_v22 }
0x1137   :  { %v19933_v27 = vpack.c.bf16 %v8131_v37, %v8131_v37  ;;  %v12744_v37 = vld [vmem:[%s20696_s3 + $0xc] sm:$0xf] }
0x1139   :  { %8965 = vmatmul.mubr.bf16.vlgmr.msra.gmra.mxu1 %v19933_v27  ;;  %9006 = vmatmul.mubr.bf16.vlgmr.msra.gmra.mxu0 %v19933_v27 }
0x113a   :  { %9275 = vmatpush1.bf16.msra.mxu1 %v21787_v62  ;;  %9316 = vmatpush1.bf16.msra.mxu0 %v21788_v63  ;;  %v21819_v62 = vld [vmem:[#allocation4_spill] sm:$0xff] }
0x113b   :  { %9276 = vmatprep.subr.bf16.mxu1 %v21789_v50  ;;  %9317 = vmatprep.subr.bf16.mxu0 %v21790_v54  ;;  %v8686_v63 = vrot.slane %v12744_v37, %v21819_v62  ;;  %v21820_v50 = vld [vmem:[#allocation5_spill] sm:$0xff] }
0x113c   :  { %9306 = vmatprep.mubr.bf16.mxu1 %v21154_v53  ;;  %9347 = vmatprep.mubr.bf16.mxu0 %v21154_v53  ;;  %v8694_v54 = vrot.slane %v12744_v37, %v21820_v50 }
0x113e   :  { %9277 = vmatpush1.bf16.msra.mxu1 %v21791_v10  ;;  %9318 = vmatpush1.bf16.msra.mxu0 %v21792_v29 }
0x113f   :  { %9278 = vmatprep.subr.bf16.mxu1 %v21793_v14  ;;  %9319 = vmatprep.subr.bf16.mxu0 %v21794_v4 }
0x1142   :  { %9279 = vmatpush1.bf16.msra.mxu1 %v21795_v55  ;;  %9320 = vmatpush1.bf16.msra.mxu0 %v21796_v38  ;;  %v21821_v55 = vld [vmem:[#allocation6_spill] sm:$0xff] }
0x1143   :  { %9280 = vmatprep.subr.bf16.mxu1 %v21797_v46  ;;  %9321 = vmatprep.subr.bf16.mxu0 %v21798_v60  ;;  %v8690_v38 = vrot.slane %v12744_v37, %v21821_v55 }
0x1146   :  { %9281 = vmatpush1.bf16.msra.mxu1 %v21799_v20  ;;  %9322 = vmatpush1.bf16.msra.mxu0 %v21800_v25 }
0x1147   :  { %9282 = vmatprep.subr.bf16.mxu1 %v21801_v3  ;;  %9323 = vmatprep.subr.bf16.mxu0 %v21802_v24 }
0x114a   :  { %9283 = vmatpush1.bf16.msra.mxu1 %v21803_v18  ;;  %9324 = vmatpush1.bf16.msra.mxu0 %v21804_v28 }
0x114b   :  { %9284 = vmatprep.subr.bf16.mxu1 %v21805_v33  ;;  %9325 = vmatprep.subr.bf16.mxu0 %v21806_v43 }
0x114e   :  { %9285 = vmatpush1.bf16.msra.mxu1 %v21807_v49  ;;  %9326 = vmatpush1.bf16.msra.mxu0 %v21808_v1 }
0x114f   :  { %9286 = vmatprep.subr.bf16.mxu1 %v21809_v19  ;;  %9327 = vmatprep.subr.bf16.mxu0 %v21810_v16 }
0x1152   :  { %9287 = vmatpush1.bf16.msra.mxu1 %v21811_v44  ;;  %9328 = vmatpush1.bf16.msra.mxu0 %v21812_v35  ;;  %v8698_v44 = vrot.slane %v12744_v37, %v21601_v12 }
0x1153   :  { %9288 = vmatprep.subr.bf16.mxu1 %v21813_v32  ;;  %9329 = vmatprep.subr.bf16.mxu0 %v21814_v34 }
0x1156   :  { %9289 = vmatpush1.bf16.msra.mxu1 %v21815_v23  ;;  %9330 = vmatpush1.bf16.msra.mxu0 %v21816_v56 }
0x1157   :  { %9516 = vmatprep.subr.bf16.mxu1 %v21817_v17  ;;  %9557 = vmatprep.subr.bf16.mxu0 %v21818_v47 }
0x11a3   :  { %v8391_v45 = vpop.f32.mrf.mxu1  ;;  %v8432_v5 = vpop.f32.mrf.mxu0 }
0x11a5   :  { %v8393_v51 = vpop.f32.mrf.mxu1  ;;  %v8434_v9 = vpop.f32.mrf.mxu0 }
0x11a7   :  { %v8395_v21 = vpop.f32.mrf.mxu1  ;;  %v8436_v0 = vpop.f32.mrf.mxu0 }
0x11a9   :  { %v8396_v22 = vpop.f32.mrf.mxu1  ;;  %v8437_v42 = vpop.f32.mrf.mxu0 }
0x11c3   :  { %v8633_v10 = vpop.f32.mrf.mxu1  ;;  %v8674_v29 = vpop.f32.mrf.mxu0 }
0x11c4   :  { %v8634_v14 = vadd.f32 %v8633_v10, %v8391_v45  ;;  %v8675_v4 = vadd.f32 %v8674_v29, %v8432_v5 }
0x11c5   :  { %v8635_v46 = vpop.f32.mrf.mxu1  ;;  %v8676_v60 = vpop.f32.mrf.mxu0 }
0x11c6   :  { %v8703_v20 = vadd.f32 %v8686_v63, %v8634_v14  ;;  %v8705_v25 = vadd.f32 %v8694_v54, %v8675_v4  ;;  %v8636_v3 = vadd.f32 %v8635_v46, %v8393_v51  ;;  %v8677_v16 = vadd.f32 %v8676_v60, %v8434_v9 }
0x11c7   :  { %v8637_v24 = vpop.f32.mrf.mxu1  ;;  %v8678_v18 = vpop.f32.mrf.mxu0 }
0x11c8   :  { %v12745_v28 = vmul.f32 -1.442695, %v8703_v20  ;;  %v12747_v33 = vmul.f32 -1.442695, %v8705_v25  ;;  %v8704_v43 = vadd.f32 %v8690_v38, %v8636_v3  ;;  %v8706_v35 = vadd.f32 %v8698_v44, %v8677_v16 }
0x11c9   :  { %v8638_v49 = vpop.f32.mrf.mxu1  ;;  %v8679_v1 = vpop.f32.mrf.mxu0 }
0x11ca   :  { %14687 = vpow2.f32 %v12745_v28  ;;  %v12746_v19 = vmul.f32 -1.442695, %v8704_v43  ;;  %v12748_v23 = vmul.f32 -1.442695, %v8706_v35  ;;  %v21829_v35 = vld [vmem:[#allocation20_spill] sm:$0xff] }
0x11cb   :  { %14689 = vpow2.f32 %v12747_v33 }
0x11cc   :  { %14691 = vpow2.f32 %v12746_v19 }
0x11d7   :  { %v14688_v32 = vpop.eup %14687 }
0x11d8   :  { %v14690_v34 = vpop.eup %14689  ;;  %v8719_v45 = vadd.f32 1.0, %v14688_v32  ;;  %v21830_v32 = vld [vmem:[#allocation21_spill] sm:$0xff] }
0x11d9   :  { %v14692_v56 = vpop.eup %14691  ;;  %v8721_v17 = vadd.f32 1.0, %v14690_v34  ;;  %v21831_v34 = vld [vmem:[#allocation13_spill] sm:$0xff] }
0x11da   :  { %v8720_v47 = vadd.f32 1.0, %v14692_v56 }
0x11db   :  { %14693 = vrcp.f32 %v8721_v17  ;;  %v21833_v17 = vld [vmem:[#allocation64_spill] sm:$0xff] }
0x11dc   :  { %14695 = vpow2.f32 %v12748_v23  ;;  %v21832_v23 = vld [vmem:[#allocation63_spill] sm:$0xff] }
0x11dd   :  { %14697 = vrcp.f32 %v8720_v47  ;;  %v21834_v47 = vld [vmem:[#allocation65_spill] sm:$0xff] }
0x11de   :  { %14699 = vrcp.f32 %v8719_v45  ;;  %v21835_v45 = vld [vmem:[#allocation66_spill] sm:$0xff] }
0x11e8   :  { %v14694_v5 = vpop.eup %14693 }
0x11e9   :  { %v14696_v51 = vpop.eup %14695  ;;  %v8731_v21 = vmul.f32 2.0, %v14694_v5  ;;  %v21836_v5 = vld [vmem:[#allocation69_spill] sm:$0xff] }
0x11ea   :  { %v14698_v0 = vpop.eup %14697  ;;  %v8722_v42 = vadd.f32 1.0, %v14696_v51 }
0x11eb   :  { %v12749_v22 = vadd.f32 -1.0, %v8731_v21  ;;  %v14700_v9 = vpop.eup %14699  ;;  %v8733_v63 = vmul.f32 %v14698_v0, %v19698_v57  ;;  %v21837_v21 = vld [vmem:[#allocation70_spill] sm:$0xff]  ;;  %v21838_v0 = vld [vmem:[#allocation72_spill] sm:$0xff] }
0x11ec   :  { %14701 = vrcp.f32 %v8722_v42  ;;  %v14072_v42 = vld [vmem:[%s20694_s1 + $0x6ec] ss:$16 sps:$4 sm:$0xff]  }
0x11ed   :  { %v8734_v37 = vmul.f32 %v14700_v9, %v12749_v22  ;;  %v14069_v9 = vld [vmem:[%s20694_s1 + $0x6e4] ss:$16 sps:$4 sm:$0xff]  }
0x11ef   :  { %v19979_v54 = vadd.f32 %v8734_v37, %v8733_v63  ;;  %v14067_v37 = vld [vmem:[%s20694_s1 + $0x6e0] ss:$16 sps:$4 sm:$0xff]   ;;  %v14075_v63 = vld [vmem:[%s20694_s1 + $0x6c4] ss:$16 sps:$4 sm:$0xff]  }
0x11f1   :  { %14703 = vtanh.f32 %v19979_v54 }
0x11f9   :  { %v8966_v10 = vpop.f32.mrf.mxu1  ;;  %v9007_v29 = vpop.f32.mrf.mxu0 }
0x11fa   :  { %v9014_v14 = vadd.f32 %v8966_v10, %v21683_v61  ;;  %v9016_v4 = vadd.f32 %v9007_v29, %v21684_v58  ;;  %v14702_v25 = vpop.eup %14701  ;;  %v14073_v29 = vld [vmem:[%s20694_s1 + $0x6c0] ss:$16 sps:$4 sm:$0xff]  }
0x11fb   :  { %v8968_v38 = vpop.f32.mrf.mxu1  ;;  %v9009_v46 = vpop.f32.mrf.mxu0 }
0x11fc   :  { %v12816_v60 = vmul.f32 -1.442695, %v9016_v4  ;;  %v9015_v20 = vadd.f32 %v8968_v38, %v21685_v13  ;;  %v12814_v18 = vmul.f32 -1.442695, %v9014_v14  ;;  %v14076_v14 = vld [vmem:[%s20694_s1 + $0x6c8] ss:$16 sps:$4 sm:$0xff]  }
0x11fd   :  { %v8970_v3 = vpop.f32.mrf.mxu1  ;;  %v9011_v24 = vpop.f32.mrf.mxu0  ;;  %v14081_v38 = vld [vmem:[%s20694_s1 + $0x6a4] ss:$16 sps:$4 sm:$0xff]  }
0x11fe   :  { %v14704_v57 = vpop.eup %14703  ;;  %14705 = vpow2.f32 %v12816_v60  ;;  %v12815_v28 = vmul.f32 -1.442695, %v9015_v20  ;;  %v14079_v20 = vld [vmem:[%s20694_s1 + $0x6a0] ss:$16 sps:$4 sm:$0xff]   ;;  %v14087_v24 = vld [vmem:[%s20694_s1 + $0x684] ss:$16 sps:$4 sm:$0xff]  }
0x11ff   :  { %v19985_v33 = vmul.f32 %v14704_v57, %v14702_v25  ;;  %v8971_v43 = vpop.f32.mrf.mxu1  ;;  %v9012_v49 = vpop.f32.mrf.mxu0  ;;  %14707 = vpow2.f32 %v12814_v18  ;;  %v14082_v25 = vld [vmem:[%s20694_s1 + $0x6a8] ss:$16 sps:$4 sm:$0xff]   ;;  %v14085_v18 = vld [vmem:[%s20694_s1 + $0x680] ss:$16 sps:$4 sm:$0xff]  }
0x1200   :  { %14709 = vpow2.f32 %v12815_v28  ;;  %v14088_v28 = vld [vmem:[%s20694_s1 + $0x688] ss:$16 sps:$4 sm:$0xff]   ;;  %v14093_v43 = vld [vmem:[%s20694_s1 + $0x664] ss:$16 sps:$4 sm:$0xff]   ;;  %v14096_v49 = vld [vmem:[%s20694_s1 + $0x66c] ss:$16 sps:$4 sm:$0xff]  }
0x1201   :  { %21822 = vst [vmem:[#allocation73_spill] sm:$0xff] %v19985_v33  ;;  %v9081_v1 = vpack.c.bf16 %v19985_v33, %v19985_v33 }
0x1203   :  { %9307 = vmatmul.mubr.bf16.vlgmr.msra.gmra.mxu1 %v9081_v1  ;;  %9348 = vmatmul.mubr.bf16.vlgmr.msra.gmra.mxu0 %v9081_v1  ;;  %v14091_v1 = vld [vmem:[%s20694_s1 + $0x660] ss:$16 sps:$4 sm:$0xff]  }
0x1204   :  { %9517 = vmatpush1.bf16.msra.mxu1 %v19706_v31  ;;  %9558 = vmatpush1.bf16.msra.mxu0 %v19711_v59  ;;  %v21823_v59 = vld [vmem:[#allocation57_spill] sm:$0xff] }
0x1205   :  { %9518 = vmatprep.subr.bf16.mxu1 %v19718_v2  ;;  %9559 = vmatprep.subr.bf16.mxu0 %v19723_v52  ;;  %v21824_v2 = vld [vmem:[#allocation58_spill] sm:$0xff] }
0x1206   :  { %9548 = vmatprep.mubr.bf16.mxu1 %v21154_v53  ;;  %9589 = vmatprep.mubr.bf16.mxu0 %v21154_v53 }
0x1208   :  { %9519 = vmatpush1.bf16.msra.mxu1 %v19730_v41  ;;  %9560 = vmatpush1.bf16.msra.mxu0 %v19735_v6  ;;  %v21825_v41 = vld [vmem:[#allocation59_spill] sm:$0xff]  ;;  %v21826_v6 = vld [vmem:[#allocation60_spill] sm:$0xff] }
0x1209   :  { %9520 = vmatprep.subr.bf16.mxu1 %v19742_v11  ;;  %9561 = vmatprep.subr.bf16.mxu0 %v19747_v48  ;;  %v21827_v11 = vld [vmem:[#allocation61_spill] sm:$0xff]  ;;  %v21828_v48 = vld [vmem:[#allocation19_spill] sm:$0xff] }
0x120b   :  { %v14706_v19 = vpop.eup %14705 }
0x120c   :  { %9521 = vmatpush1.bf16.msra.mxu1 %v19756_v30  ;;  %9562 = vmatpush1.bf16.msra.mxu0 %v19761_v39  ;;  %v9032_v31 = vadd.f32 1.0, %v14706_v19  ;;  %v14708_v52 = vpop.eup %14707  ;;  %v9017_v39 = vadd.f32 %v9009_v46, %v21686_v7  ;;  %v14094_v19 = vld [vmem:[%s20694_s1 + $0x668] ss:$16 sps:$4 sm:$0xff]  }
0x120d   :  { %9522 = vmatprep.subr.bf16.mxu1 %v21823_v59  ;;  %9563 = vmatprep.subr.bf16.mxu0 %v21824_v2  ;;  %v14710_v16 = vpop.eup %14709  ;;  %v9030_v44 = vadd.f32 1.0, %v14708_v52  ;;  %v14102_v59 = vld [vmem:[%s20694_s1 + $0x64c] ss:$16 sps:$4 sm:$0xff]   ;;  %v14097_v2 = vld [vmem:[%s20694_s1 + $0x640] ss:$16 sps:$4 sm:$0xff]  }
0x120e   :  { %14711 = vrcp.f32 %v9032_v31  ;;  %v9031_v30 = vadd.f32 1.0, %v14710_v16  ;;  %v12817_v56 = vmul.f32 -1.442695, %v9017_v39  ;;  %v14099_v31 = vld [vmem:[%s20694_s1 + $0x644] ss:$16 sps:$4 sm:$0xff]  }
0x120f   :  { %14713 = vrcp.f32 %v9030_v44  ;;  %v14100_v52 = vld [vmem:[%s20694_s1 + $0x648] ss:$16 sps:$4 sm:$0xff]   ;;  %v14105_v16 = vld [vmem:[%s20694_s1 + $0x624] ss:$16 sps:$4 sm:$0xff]   ;;  %v14114_v44 = vld [vmem:[%s20694_s1 + $0x60c] ss:$16 sps:$4 sm:$0xff]  }
0x1210   :  { %9523 = vmatpush1.bf16.msra.mxu1 %v21825_v41  ;;  %9564 = vmatpush1.bf16.msra.mxu0 %v21826_v6  ;;  %14715 = vrcp.f32 %v9031_v30  ;;  %v14108_v41 = vld [vmem:[%s20694_s1 + $0x62c] ss:$16 sps:$4 sm:$0xff]   ;;  %v14103_v6 = vld [vmem:[%s20694_s1 + $0x620] ss:$16 sps:$4 sm:$0xff]  }
0x1211   :  { %9524 = vmatprep.subr.bf16.mxu1 %v21827_v11  ;;  %9565 = vmatprep.subr.bf16.mxu0 %v21828_v48  ;;  %14717 = vpow2.f32 %v12817_v56  ;;  %v14106_v11 = vld [vmem:[%s20694_s1 + $0x628] ss:$16 sps:$4 sm:$0xff]   ;;  %v14111_v48 = vld [vmem:[%s20694_s1 + $0x604] ss:$16 sps:$4 sm:$0xff]  }
0x1212   :  { %v20135_v56 = vld [vmem:[%s20694_s1 + $0x7e4] ss:$16 sps:$4 sm:$0xff]  }
0x1214   :  { %9525 = vmatpush1.bf16.msra.mxu1 %v21829_v35  ;;  %9566 = vmatpush1.bf16.msra.mxu0 %v21830_v32  ;;  %v14109_v35 = vld [vmem:[%s20694_s1 + $0x600] ss:$16 sps:$4 sm:$0xff]   ;;  %v14112_v32 = vld [vmem:[%s20694_s1 + $0x608] ss:$16 sps:$4 sm:$0xff]  }
0x1215   :  { %9526 = vmatprep.subr.bf16.mxu1 %v21831_v34  ;;  %9567 = vmatprep.subr.bf16.mxu0 %v21832_v23 }
0x1218   :  { %9527 = vmatpush1.bf16.msra.mxu1 %v21833_v17  ;;  %9568 = vmatpush1.bf16.msra.mxu0 %v21834_v47  ;;  %v20140_v17 = vld [vmem:[%s20694_s1 + $0x7ec] ss:$16 sps:$4 sm:$0xff]   ;;  %v20145_v47 = vld [vmem:[%s20694_s1 + $0x7e0] ss:$16 sps:$4 sm:$0xff]  }
0x1219   :  { %9528 = vmatprep.subr.bf16.mxu1 %v21835_v45  ;;  %9569 = vmatprep.subr.bf16.mxu0 %v21836_v5  ;;  %v20150_v45 = vld [vmem:[%s20694_s1 + $0x7e8] ss:$16 sps:$4 sm:$0xff]   ;;  %v20159_v5 = vld [vmem:[%s20694_s1 + $0x7c4] ss:$16 sps:$4 sm:$0xff]  }
0x121b   :  { %v14712_v51 = vpop.eup %14711 }
0x121c   :  { %9529 = vmatpush1.bf16.msra.mxu1 %v21837_v21  ;;  %9570 = vmatpush1.bf16.msra.mxu0 %v21838_v0  ;;  %v9042_v22 = vmul.f32 2.0, %v14712_v51  ;;  %v20164_v51 = vld [vmem:[%s20694_s1 + $0x7cc] ss:$16 sps:$4 sm:$0xff]   ;;  %v20169_v21 = vld [vmem:[%s20694_s1 + $0x7c0] ss:$16 sps:$4 sm:$0xff]  }
0x121d   :  { %9530 = vmatprep.subr.bf16.mxu1 %v19864_v40  ;;  %9571 = vmatprep.subr.bf16.mxu0 %v19869_v26  ;;  %v14070_v40 = vld [vmem:[%s20694_s1 + $0x6e8] ss:$16 sps:$4 sm:$0xff]  }
0x121e   :  { %v12818_v26 = vadd.f32 -1.0, %v9042_v22  ;;  %v20174_v0 = vld [vmem:[%s20694_s1 + $0x7c8] ss:$16 sps:$4 sm:$0xff]   ;;  %v20183_v22 = vld [vmem:[%s20694_s1 + $0x7a4] ss:$16 sps:$4 sm:$0xff]  }
0x1220   :  { %9531 = vmatpush1.bf16.msra.mxu1 %v19876_v15  ;;  %9572 = vmatpush1.bf16.msra.mxu0 %v19881_v36  ;;  %v14078_v15 = vld [vmem:[%s20694_s1 + $0x6cc] ss:$16 sps:$4 sm:$0xff]   ;;  %v14714_v36 = vpop.eup %14713 }
0x1221   :  { %9849 = vmatprep.subr.bf16.mxu1 %v14069_v9  ;;  %9890 = vmatprep.subr.bf16.mxu0 %v14072_v42  ;;  %v14716_v10 = vpop.eup %14715  ;;  %v9045_v4 = vmul.f32 %v14714_v36, %v12818_v26  ;;  %v20188_v9 = vld [vmem:[%s20694_s1 + $0x7ac] ss:$16 sps:$4 sm:$0xff]   ;;  %v20193_v42 = vld [vmem:[%s20694_s1 + $0x7a0] ss:$16 sps:$4 sm:$0xff]   ;;  %v20231_v36 = vld [vmem:[%s20694_s1 + $0x764] ss:$16 sps:$4 sm:$0xff]  }
0x1222   :  { %v9044_v46 = vmul.f32 %v14716_v10, %v19930_v8  ;;  %v14718_v60 = vpop.eup %14717  ;;  %v14090_v8 = vld [vmem:[%s20694_s1 + $0x68c] ss:$16 sps:$4 sm:$0xff]  }
0x1223   :  { %9549 = vmatmul.mubr.bf16.vlgmr.msra.gmra.mxu1 %v19933_v27  ;;  %9590 = vmatmul.mubr.bf16.vlgmr.msra.gmra.mxu0 %v19933_v27  ;;  %v14084_v27 = vld [vmem:[%s20694_s1 + $0x6ac] ss:$16 sps:$4 sm:$0xff]   ;;  %v9033_v57 = vadd.f32 1.0, %v14718_v60  ;;  %v20279_v60 = vld [vmem:[%s20694_s1 + $0x724] ss:$16 sps:$4 sm:$0xff]  }
0x1224   :  { %9850 = vmatpush1.bf16.msra.mxu1 %v14067_v37  ;;  %9891 = vmatpush1.bf16.msra.mxu0 %v14070_v40  ;;  %v20063_v3 = vadd.f32 %v9045_v4, %v9044_v46  ;;  %v20198_v37 = vld [vmem:[%s20694_s1 + $0x7a8] ss:$16 sps:$4 sm:$0xff]   ;;  %v20207_v40 = vld [vmem:[%s20694_s1 + $0x784] ss:$16 sps:$4 sm:$0xff]   ;;  %v20212_v26 = vld [vmem:[%s20694_s1 + $0x78c] ss:$16 sps:$4 sm:$0xff]  }
0x1225   :  { %9851 = vmatprep.subr.bf16.mxu1 %v14075_v63  ;;  %9892 = vmatprep.subr.bf16.mxu0 %v14078_v15  ;;  %v20217_v63 = vld [vmem:[%s20694_s1 + $0x780] ss:$16 sps:$4 sm:$0xff]   ;;  %v20222_v15 = vld [vmem:[%s20694_s1 + $0x788] ss:$16 sps:$4 sm:$0xff]   ;;  %v20236_v10 = vld [vmem:[%s20694_s1 + $0x76c] ss:$16 sps:$4 sm:$0xff]  }
0x1226   :  { %9881 = vmatprep.mubr.bf16.mxu1 %v21154_v53  ;;  %9922 = vmatprep.mubr.bf16.mxu0 %v21154_v53  ;;  %14719 = vtanh.f32 %v20063_v3  ;;  %v20255_v4 = vld [vmem:[%s20694_s1 + $0x744] ss:$16 sps:$4 sm:$0xff]   ;;  %v20270_v46 = vld [vmem:[%s20694_s1 + $0x748] ss:$16 sps:$4 sm:$0xff]  }
0x1227   :  { %14721 = vrcp.f32 %v9033_v57  ;;  %v20308_v57 = vld [vmem:[%s20694_s1 + $0x70c] ss:$16 sps:$4 sm:$0xff]  }
0x1228   :  { %9852 = vmatpush1.bf16.msra.mxu1 %v14073_v29  ;;  %9893 = vmatpush1.bf16.msra.mxu0 %v14076_v14  ;;  %v20241_v29 = vld [vmem:[%s20694_s1 + $0x760] ss:$16 sps:$4 sm:$0xff]   ;;  %v20246_v14 = vld [vmem:[%s20694_s1 + $0x768] ss:$16 sps:$4 sm:$0xff]   ;;  %21839 = vst [vmem:[#allocation74_spill] sm:$0xff] %v20308_v57 }
0x1229   :  { %9853 = vmatprep.subr.bf16.mxu1 %v14081_v38  ;;  %9894 = vmatprep.subr.bf16.mxu0 %v14084_v27  ;;  %v20260_v38 = vld [vmem:[%s20694_s1 + $0x74c] ss:$16 sps:$4 sm:$0xff]   ;;  %v20265_v27 = vld [vmem:[%s20694_s1 + $0x740] ss:$16 sps:$4 sm:$0xff]  }
0x122c   :  { %9854 = vmatpush1.bf16.msra.mxu1 %v14079_v20  ;;  %9895 = vmatpush1.bf16.msra.mxu0 %v14082_v25  ;;  %v20284_v20 = vld [vmem:[%s20694_s1 + $0x72c] ss:$16 sps:$4 sm:$0xff]   ;;  %v20289_v25 = vld [vmem:[%s20694_s1 + $0x720] ss:$16 sps:$4 sm:$0xff]  }
0x122d   :  { %9855 = vmatprep.subr.bf16.mxu1 %v14087_v24  ;;  %9896 = vmatprep.subr.bf16.mxu0 %v14090_v8  ;;  %v20294_v24 = vld [vmem:[%s20694_s1 + $0x728] ss:$16 sps:$4 sm:$0xff]   ;;  %v20303_v8 = vld [vmem:[%s20694_s1 + $0x704] ss:$16 sps:$4 sm:$0xff]  }
0x1230   :  { %9856 = vmatpush1.bf16.msra.mxu1 %v14085_v18  ;;  %9897 = vmatpush1.bf16.msra.mxu0 %v14088_v28  ;;  %v20313_v18 = vld [vmem:[%s20694_s1 + $0x700] ss:$16 sps:$4 sm:$0xff]   ;;  %v20318_v28 = vld [vmem:[%s20694_s1 + $0x708] ss:$16 sps:$4 sm:$0xff]  }
0x1231   :  { %9857 = vmatprep.subr.bf16.mxu1 %v14093_v43  ;;  %9898 = vmatprep.subr.bf16.mxu0 %v14096_v49  ;;  %21840 = vst [vmem:[#allocation75_spill] sm:$0xff] %v20313_v18  ;;  %21841 = vst [vmem:[#allocation76_spill] sm:$0xff] %v20318_v28  ;;  %v20327_v43 = vld [vmem:[%s20694_s1 + $0x3e4] ss:$16 sps:$4 sm:$0xff]   ;;  %v20332_v49 = vld [vmem:[%s20694_s1 + $0x3ec] ss:$16 sps:$4 sm:$0xff]  }
0x1232   :  { %21842 = vst [vmem:[#allocation77_spill] sm:$0xff] %v20327_v43  ;;  %21843 = vst [vmem:[#allocation78_spill] sm:$0xff] %v20332_v49 }
0x1233   :  { %v14720_v30 = vpop.eup %14719 }
0x1234   :  { %9858 = vmatpush1.bf16.msra.mxu1 %v14091_v1  ;;  %9899 = vmatpush1.bf16.msra.mxu0 %v14094_v19  ;;  %v14722_v39 = vpop.eup %14721 }
0x1235   :  { %9859 = vmatprep.subr.bf16.mxu1 %v14099_v31  ;;  %9900 = vmatprep.subr.bf16.mxu0 %v14102_v59  ;;  %v9048_v34 = vmul.f32 %v14722_v39, %v14720_v30 }
0x1237   :  { %v20126_v23 = vpack.c.bf16 %v9048_v34, %v9048_v34 }
0x1238   :  { %9860 = vmatpush1.bf16.msra.mxu1 %v14097_v2  ;;  %9901 = vmatpush1.bf16.msra.mxu0 %v14100_v52 }
0x1239   :  { %9861 = vmatprep.subr.bf16.mxu1 %v14105_v16  ;;  %9902 = vmatprep.subr.bf16.mxu0 %v14108_v41 }
0x123c   :  { %9862 = vmatpush1.bf16.msra.mxu1 %v14103_v6  ;;  %9903 = vmatpush1.bf16.msra.mxu0 %v14106_v11  ;;  %v12947_v6 = vld [vmem:[%s20696_s3 + $0xc] sm:$0xf] }
0x123d   :  { %9863 = vmatprep.subr.bf16.mxu1 %v14111_v48  ;;  %9904 = vmatprep.subr.bf16.mxu0 %v14114_v44  ;;  %v9603_v11 = vrot.slane %v12947_v6, %v21819_v62  ;;  %v9611_v48 = vrot.slane %v12947_v6, %v21820_v50 }
0x1240   :  { %9864 = vmatpush1.bf16.msra.mxu1 %v14109_v35  ;;  %9905 = vmatpush1.bf16.msra.mxu0 %v14112_v32  ;;  %v9607_v32 = vrot.slane %v12947_v6, %v21821_v55 }
0x1241   :  { %10191 = vmatprep.subr.bf16.mxu1 %v20135_v56  ;;  %10232 = vmatprep.subr.bf16.mxu0 %v20140_v17 }
0x1243   :  { %9882 = vmatmul.mubr.bf16.vlgmr.msra.gmra.mxu1 %v20126_v23  ;;  %9923 = vmatmul.mubr.bf16.vlgmr.msra.gmra.mxu0 %v20126_v23 }
0x1244   :  { %10223 = vmatprep.mubr.bf16.mxu1 %v21154_v53  ;;  %10264 = vmatprep.mubr.bf16.mxu0 %v21154_v53 }
0x1245   :  { %10192 = vmatpush1.bf16.msra.mxu1 %v20145_v47  ;;  %10233 = vmatpush1.bf16.msra.mxu0 %v20150_v45 }
0x1246   :  { %10193 = vmatprep.subr.bf16.mxu1 %v20159_v5  ;;  %10234 = vmatprep.subr.bf16.mxu0 %v20164_v51 }
0x1249   :  { %10194 = vmatpush1.bf16.msra.mxu1 %v20169_v21  ;;  %10235 = vmatpush1.bf16.msra.mxu0 %v20174_v0 }
0x124a   :  { %10195 = vmatprep.subr.bf16.mxu1 %v20183_v22  ;;  %10236 = vmatprep.subr.bf16.mxu0 %v20188_v9 }
0x124d   :  { %10196 = vmatpush1.bf16.msra.mxu1 %v20193_v42  ;;  %10237 = vmatpush1.bf16.msra.mxu0 %v20198_v37 }
0x124e   :  { %10197 = vmatprep.subr.bf16.mxu1 %v20207_v40  ;;  %10238 = vmatprep.subr.bf16.mxu0 %v20212_v26 }
0x1251   :  { %10198 = vmatpush1.bf16.msra.mxu1 %v20217_v63  ;;  %10239 = vmatpush1.bf16.msra.mxu0 %v20222_v15 }
0x1252   :  { %10199 = vmatprep.subr.bf16.mxu1 %v20231_v36  ;;  %10240 = vmatprep.subr.bf16.mxu0 %v20236_v10 }
0x1255   :  { %10200 = vmatpush1.bf16.msra.mxu1 %v20241_v29  ;;  %10241 = vmatpush1.bf16.msra.mxu0 %v20246_v14 }
0x1256   :  { %10201 = vmatprep.subr.bf16.mxu1 %v20255_v4  ;;  %10242 = vmatprep.subr.bf16.mxu0 %v20260_v38 }
0x1259   :  { %10202 = vmatpush1.bf16.msra.mxu1 %v20265_v27  ;;  %10243 = vmatpush1.bf16.msra.mxu0 %v20270_v46 }
0x125a   :  { %10203 = vmatprep.subr.bf16.mxu1 %v20279_v60  ;;  %10244 = vmatprep.subr.bf16.mxu0 %v20284_v20 }
0x125d   :  { %10204 = vmatpush1.bf16.msra.mxu1 %v20289_v25  ;;  %10245 = vmatpush1.bf16.msra.mxu0 %v20294_v24 }
0x125e   :  { %10205 = vmatprep.subr.bf16.mxu1 %v20303_v8  ;;  %10246 = vmatprep.subr.bf16.mxu0 %v20308_v57 }
0x1261   :  { %10206 = vmatpush1.bf16.msra.mxu1 %v20313_v18  ;;  %10247 = vmatpush1.bf16.msra.mxu0 %v20318_v28 }
0x1262   :  { %10433 = vmatprep.subr.bf16.mxu1 %v20327_v43  ;;  %10474 = vmatprep.subr.bf16.mxu0 %v20332_v49 }
0x12c3   :  { %v9308_v1 = vpop.f32.mrf.mxu1  ;;  %v9349_v19 = vpop.f32.mrf.mxu0 }
0x12c5   :  { %v9310_v31 = vpop.f32.mrf.mxu1  ;;  %v9351_v59 = vpop.f32.mrf.mxu0 }
0x12c7   :  { %v9312_v2 = vpop.f32.mrf.mxu1  ;;  %v9353_v52 = vpop.f32.mrf.mxu0 }
0x12c9   :  { %v9313_v16 = vpop.f32.mrf.mxu1  ;;  %v9354_v41 = vpop.f32.mrf.mxu0 }
0x12e3   :  { %v9550_v44 = vpop.f32.mrf.mxu1  ;;  %v9591_v30 = vpop.f32.mrf.mxu0 }
0x12e4   :  { %v9551_v39 = vadd.f32 %v9550_v44, %v9308_v1  ;;  %v9592_v35 = vadd.f32 %v9591_v30, %v9349_v19  ;;  %v9615_v19 = vrot.slane %v12947_v6, %v21601_v12 }
0x12e5   :  { %v9552_v34 = vpop.f32.mrf.mxu1  ;;  %v9593_v33 = vpop.f32.mrf.mxu0 }
0x12e6   :  { %v9620_v2 = vadd.f32 %v9603_v11, %v9551_v39  ;;  %v9622_v52 = vadd.f32 %v9611_v48, %v9592_v35  ;;  %v9553_v16 = vadd.f32 %v9552_v34, %v9310_v31  ;;  %v9594_v1 = vadd.f32 %v9593_v33, %v9351_v59 }
0x12e7   :  { %v9554_v41 = vpop.f32.mrf.mxu1  ;;  %v9595_v49 = vpop.f32.mrf.mxu0 }
0x12e8   :  { %v12948_v43 = vmul.f32 -1.442695, %v9620_v2  ;;  %v12950_v28 = vmul.f32 -1.442695, %v9622_v52  ;;  %v9621_v18 = vadd.f32 %v9607_v32, %v9553_v16  ;;  %v9623_v44 = vadd.f32 %v9615_v19, %v9594_v1 }
0x12e9   :  { %v9555_v57 = vpop.f32.mrf.mxu1  ;;  %v9596_v62 = vpop.f32.mrf.mxu0 }
0x12ea   :  { %14723 = vpow2.f32 %v12948_v43  ;;  %v12949_v50 = vmul.f32 -1.442695, %v9621_v18  ;;  %v12951_v11 = vmul.f32 -1.442695, %v9623_v44 }
0x12eb   :  { %14725 = vpow2.f32 %v12950_v28 }
0x12ec   :  { %14727 = vpow2.f32 %v12949_v50 }
0x12f7   :  { %v14724_v30 = vpop.eup %14723 }
0x12f8   :  { %v14726_v55 = vpop.eup %14725  ;;  %v9636_v49 = vadd.f32 1.0, %v14724_v30 }
0x12f9   :  { %v14728_v48 = vpop.eup %14727  ;;  %v9638_v31 = vadd.f32 1.0, %v14726_v55 }
0x12fa   :  { %v9637_v39 = vadd.f32 1.0, %v14728_v48 }
0x12fb   :  { %14729 = vrcp.f32 %v9638_v31 }
0x12fc   :  { %14731 = vpow2.f32 %v12951_v11 }
0x12fd   :  { %14733 = vrcp.f32 %v9637_v39 }
0x12fe   :  { %14735 = vrcp.f32 %v9636_v49 }
0x1303   :  { %v9883_v62 = vpop.f32.mrf.mxu1  ;;  %v9924_v57 = vpop.f32.mrf.mxu0 }
0x1304   :  { %v9931_v18 = vadd.f32 %v9883_v62, %v21683_v61  ;;  %v9933_v50 = vadd.f32 %v9924_v57, %v21684_v58 }
0x1305   :  { %v9885_v33 = vpop.f32.mrf.mxu1  ;;  %v9926_v28 = vpop.f32.mrf.mxu0 }
0x1306   :  { %v13017_v43 = vmul.f32 -1.442695, %v9931_v18  ;;  %v13019_v59 = vmul.f32 -1.442695, %v9933_v50  ;;  %v9932_v6 = vadd.f32 %v9885_v33, %v21685_v13  ;;  %v9934_v13 = vadd.f32 %v9926_v28, %v21686_v7  ;;  %v20361_v7 = vld [vmem:[%s20694_s1 + $0x3e8] ss:$16 sps:$4 sm:$0xff]  }
0x1307   :  { %v9887_v35 = vpop.f32.mrf.mxu1  ;;  %v9928_v55 = vpop.f32.mrf.mxu0 }
0x1308   :  { %v14730_v32 = vpop.eup %14729  ;;  %14737 = vpow2.f32 %v13017_v43  ;;  %v13018_v34 = vmul.f32 -1.442695, %v9932_v6  ;;  %v13020_v39 = vmul.f32 -1.442695, %v9934_v13  ;;  %v20356_v43 = vld [vmem:[%s20694_s1 + $0x3e0] ss:$16 sps:$4 sm:$0xff]  }
0x1309   :  { %v14732_v2 = vpop.eup %14731  ;;  %v9648_v52 = vmul.f32 2.0, %v14730_v32  ;;  %14739 = vpow2.f32 %v13019_v59  ;;  %v9888_v16 = vpop.f32.mrf.mxu1  ;;  %v20368_v59 = vld [vmem:[%s20694_s1 + $0x3c4] ss:$16 sps:$4 sm:$0xff]   ;;  %v20373_v6 = vld [vmem:[%s20694_s1 + $0x3cc] ss:$16 sps:$4 sm:$0xff]  }
0x130a   :  { %v9929_v41 = vpop.f32.mrf.mxu0  ;;  %v14734_v1 = vpop.eup %14733  ;;  %14741 = vpow2.f32 %v13018_v34  ;;  %v9639_v19 = vadd.f32 1.0, %v14732_v2  ;;  %v20380_v35 = vld [vmem:[%s20694_s1 + $0x3c0] ss:$16 sps:$4 sm:$0xff]   ;;  %v20385_v55 = vld [vmem:[%s20694_s1 + $0x3c8] ss:$16 sps:$4 sm:$0xff]  }
0x130b   :  { %v12952_v61 = vadd.f32 -1.0, %v9648_v52  ;;  %v14736_v58 = vpop.eup %14735  ;;  %v9650_v30 = vmul.f32 %v14734_v1, %v19979_v54  ;;  %v20392_v32 = vld [vmem:[%s20694_s1 + $0x3a4] ss:$16 sps:$4 sm:$0xff]   ;;  %v20397_v34 = vld [vmem:[%s20694_s1 + $0x3ac] ss:$16 sps:$4 sm:$0xff]  }
0x130c   :  { %14743 = vrcp.f32 %v9639_v19  ;;  %v20406_v1 = vld [vmem:[%s20694_s1 + $0x3a0] ss:$16 sps:$4 sm:$0xff]   ;;  %v20418_v19 = vld [vmem:[%s20694_s1 + $0x384] ss:$16 sps:$4 sm:$0xff]  }
0x130d   :  { %v9651_v44 = vmul.f32 %v14736_v58, %v12952_v61  ;;  %v20411_v61 = vld [vmem:[%s20694_s1 + $0x3a8] ss:$16 sps:$4 sm:$0xff]  }
0x130f   :  { %v20347_v11 = vadd.f32 %v9651_v44, %v9650_v30  ;;  %v20423_v44 = vld [vmem:[%s20694_s1 + $0x38c] ss:$16 sps:$4 sm:$0xff]  }
0x1311   :  { %14745 = vtanh.f32 %v20347_v11 }
0x1315   :  { %v14738_v48 = vpop.eup %14737 }
0x1316   :  { %v14740_v31 = vpop.eup %14739  ;;  %v9947_v18 = vadd.f32 1.0, %v14738_v48 }
0x1317   :  { %v14742_v49 = vpop.eup %14741  ;;  %v9949_v62 = vadd.f32 1.0, %v14740_v31 }
0x1318   :  { %v9948_v57 = vadd.f32 1.0, %v14742_v49  ;;  %v20436_v49 = vld [vmem:[%s20694_s1 + $0x388] ss:$16 sps:$4 sm:$0xff]  }
0x1319   :  { %14747 = vrcp.f32 %v9949_v62  ;;  %v14744_v50 = vpop.eup %14743 }
0x131a   :  { %14749 = vpow2.f32 %v13020_v39  ;;  %v20431_v39 = vld [vmem:[%s20694_s1 + $0x380] ss:$16 sps:$4 sm:$0xff]  }
0x131b   :  { %14751 = vrcp.f32 %v9948_v57  ;;  %v20448_v57 = vld [vmem:[%s20694_s1 + $0x36c] ss:$16 sps:$4 sm:$0xff]  }
0x131c   :  { %14753 = vrcp.f32 %v9947_v18  ;;  %v20455_v18 = vld [vmem:[%s20694_s1 + $0x360] ss:$16 sps:$4 sm:$0xff]  }
0x131e   :  { %v14746_v54 = vpop.eup %14745 }
0x131f   :  { %v20351_v33 = vmul.f32 %v14746_v54, %v14744_v50  ;;  %v20460_v50 = vld [vmem:[%s20694_s1 + $0x368] ss:$16 sps:$4 sm:$0xff]   ;;  %v20467_v54 = vld [vmem:[%s20694_s1 + $0x344] ss:$16 sps:$4 sm:$0xff]  }
0x1321   :  { %21844 = vst [vmem:[#allocation79_spill] sm:$0xff] %v20351_v33  ;;  %v9998_v28 = vpack.c.bf16 %v20351_v33, %v20351_v33  ;;  %v20527_v33 = vld [vmem:[%s20694_s1 + $0x300] ss:$16 sps:$4 sm:$0xff]  }
0x1323   :  { %10224 = vmatmul.mubr.bf16.vlgmr.msra.gmra.mxu1 %v9998_v28  ;;  %10265 = vmatmul.mubr.bf16.vlgmr.msra.gmra.mxu0 %v9998_v28  ;;  %v20472_v28 = vld [vmem:[%s20694_s1 + $0x34c] ss:$16 sps:$4 sm:$0xff]  }
0x1324   :  { %10434 = vmatpush1.bf16.msra.mxu1 %v20356_v43  ;;  %10475 = vmatpush1.bf16.msra.mxu0 %v20361_v7 }
0x1325   :  { %10435 = vmatprep.subr.bf16.mxu1 %v20368_v59  ;;  %10476 = vmatprep.subr.bf16.mxu0 %v20373_v6 }
0x1326   :  { %v14748_v2 = vpop.eup %14747  ;;  %10465 = vmatprep.mubr.bf16.mxu1 %v21154_v53  ;;  %10506 = vmatprep.mubr.bf16.mxu0 %v21154_v53 }
0x1327   :  { %v14750_v52 = vpop.eup %14749  ;;  %v9959_v16 = vmul.f32 2.0, %v14748_v2  ;;  %v20479_v2 = vld [vmem:[%s20694_s1 + $0x340] ss:$16 sps:$4 sm:$0xff]  }
0x1328   :  { %v14752_v41 = vpop.eup %14751  ;;  %10436 = vmatpush1.bf16.msra.mxu1 %v20380_v35  ;;  %10477 = vmatpush1.bf16.msra.mxu0 %v20385_v55  ;;  %v9950_v13 = vadd.f32 1.0, %v14750_v52  ;;  %v20484_v52 = vld [vmem:[%s20694_s1 + $0x348] ss:$16 sps:$4 sm:$0xff]  }
0x1329   :  { %v13021_v58 = vadd.f32 -1.0, %v9959_v16  ;;  %10437 = vmatprep.subr.bf16.mxu1 %v20392_v32  ;;  %10478 = vmatprep.subr.bf16.mxu0 %v20397_v34  ;;  %v14754_v30 = vpop.eup %14753  ;;  %v9961_v31 = vmul.f32 %v14752_v41, %v20063_v3  ;;  %v20443_v3 = vld [vmem:[%s20694_s1 + $0x364] ss:$16 sps:$4 sm:$0xff]   ;;  %v20496_v41 = vld [vmem:[%s20694_s1 + $0x32c] ss:$16 sps:$4 sm:$0xff]  }
0x132a   :  { %14755 = vrcp.f32 %v9950_v13  ;;  %v20491_v16 = vld [vmem:[%s20694_s1 + $0x324] ss:$16 sps:$4 sm:$0xff]   ;;  %21846 = vst [vmem:[#allocation81_spill] sm:$0xff] %v20496_v41 }
0x132b   :  { %v9962_v48 = vmul.f32 %v14754_v30, %v13021_v58  ;;  %21845 = vst [vmem:[#allocation80_spill] sm:$0xff] %v20491_v16  ;;  %v20503_v58 = vld [vmem:[%s20694_s1 + $0x320] ss:$16 sps:$4 sm:$0xff]   ;;  %v20508_v30 = vld [vmem:[%s20694_s1 + $0x328] ss:$16 sps:$4 sm:$0xff]  }
0x132c   :  { %10438 = vmatpush1.bf16.msra.mxu1 %v20406_v1  ;;  %10479 = vmatpush1.bf16.msra.mxu0 %v20411_v61  ;;  %v20515_v13 = vld [vmem:[%s20694_s1 + $0x304] ss:$16 sps:$4 sm:$0xff]  }
0x132d   :  { %v9963_v62 = vadd.f32 %v9962_v48, %v9961_v31  ;;  %10439 = vmatprep.subr.bf16.mxu1 %v20418_v19  ;;  %10480 = vmatprep.subr.bf16.mxu0 %v20423_v44  ;;  %v20520_v48 = vld [vmem:[%s20694_s1 + $0x30c] ss:$16 sps:$4 sm:$0xff]  }
0x132f   :  { %14757 = vtanh.f32 %v9963_v62 }
0x1330   :  { %10440 = vmatpush1.bf16.msra.mxu1 %v20431_v39  ;;  %10481 = vmatpush1.bf16.msra.mxu0 %v20436_v49 }
0x1331   :  { %10441 = vmatprep.subr.bf16.mxu1 %v20443_v3  ;;  %10482 = vmatprep.subr.bf16.mxu0 %v20448_v57 }
0x1334   :  { %10442 = vmatpush1.bf16.msra.mxu1 %v20455_v18  ;;  %10483 = vmatpush1.bf16.msra.mxu0 %v20460_v50 }
0x1335   :  { %10443 = vmatprep.subr.bf16.mxu1 %v20467_v54  ;;  %10484 = vmatprep.subr.bf16.mxu0 %v20472_v28 }
0x1337   :  { %v14756_v31 = vpop.eup %14755 }
0x1338   :  { %10444 = vmatpush1.bf16.msra.mxu1 %v20479_v2  ;;  %10485 = vmatpush1.bf16.msra.mxu0 %v20484_v52 }
0x1339   :  { %10445 = vmatprep.subr.bf16.mxu1 %v20491_v16  ;;  %10486 = vmatprep.subr.bf16.mxu0 %v20496_v41  ;;  %v20532_v41 = vld [vmem:[%s20694_s1 + $0x308] ss:$16 sps:$4 sm:$0xff]  }
0x133c   :  { %v14758_v62 = vpop.eup %14757  ;;  %10446 = vmatpush1.bf16.msra.mxu1 %v20503_v58  ;;  %10487 = vmatpush1.bf16.msra.mxu0 %v20508_v30 }
0x133d   :  { %10447 = vmatprep.subr.bf16.mxu1 %v20515_v13  ;;  %10488 = vmatprep.subr.bf16.mxu0 %v20520_v48  ;;  %v20536_v16 = vmul.f32 %v14758_v62, %v14756_v31 }
0x1340   :  { %10448 = vmatpush1.bf16.msra.mxu1 %v20527_v33  ;;  %10489 = vmatpush1.bf16.msra.mxu0 %v20532_v41 }
0x1341   :  { %10799 = vmatprep.subr.bf16.mxu1 %v20135_v56  ;;  %10840 = vmatprep.subr.bf16.mxu0 %v20140_v17  ;;  %v21848_v56 = vld [vmem:[#allocation75_spill] sm:$0xff]  ;;  %v21849_v17 = vld [vmem:[#allocation76_spill] sm:$0xff] }
0x1343   :  { %10466 = vmatmul.mubr.bf16.vlgmr.msra.gmra.mxu1 %v20126_v23  ;;  %10507 = vmatmul.mubr.bf16.vlgmr.msra.gmra.mxu0 %v20126_v23  ;;  %v21847_v23 = vld [vmem:[#allocation74_spill] sm:$0xff] }
0x1344   :  { %10800 = vmatpush1.bf16.msra.mxu1 %v20145_v47  ;;  %10841 = vmatpush1.bf16.msra.mxu0 %v20150_v45  ;;  %v21850_v47 = vld [vmem:[#allocation77_spill] sm:$0xff]  ;;  %v21851_v45 = vld [vmem:[#allocation78_spill] sm:$0xff] }
0x1345   :  { %10801 = vmatprep.subr.bf16.mxu1 %v20159_v5  ;;  %10842 = vmatprep.subr.bf16.mxu0 %v20164_v51 }
0x1346   :  { %10831 = vmatprep.mubr.bf16.mxu1 %v21154_v53  ;;  %10872 = vmatprep.mubr.bf16.mxu0 %v21154_v53 }
0x1348   :  { %10802 = vmatpush1.bf16.msra.mxu1 %v20169_v21  ;;  %10843 = vmatpush1.bf16.msra.mxu0 %v20174_v0 }
0x1349   :  { %10803 = vmatprep.subr.bf16.mxu1 %v20183_v22  ;;  %10844 = vmatprep.subr.bf16.mxu0 %v20188_v9 }
0x134c   :  { %10804 = vmatpush1.bf16.msra.mxu1 %v20193_v42  ;;  %10845 = vmatpush1.bf16.msra.mxu0 %v20198_v37 }
0x134d   :  { %10805 = vmatprep.subr.bf16.mxu1 %v20207_v40  ;;  %10846 = vmatprep.subr.bf16.mxu0 %v20212_v26  ;;  %v13150_v40 = vld [vmem:[%s20696_s3 + $0xc] sm:$0xf]  ;;  %v21852_v26 = vld [vmem:[#allocation4_spill] sm:$0xff] }
0x1350   :  { %10806 = vmatpush1.bf16.msra.mxu1 %v20217_v63  ;;  %10847 = vmatpush1.bf16.msra.mxu0 %v20222_v15  ;;  %v10520_v63 = vrot.slane %v13150_v40, %v21852_v26  ;;  %v21853_v15 = vld [vmem:[#allocation5_spill] sm:$0xff] }
0x1351   :  { %10807 = vmatprep.subr.bf16.mxu1 %v20231_v36  ;;  %10848 = vmatprep.subr.bf16.mxu0 %v20236_v10  ;;  %v10528_v36 = vrot.slane %v13150_v40, %v21853_v15 }
0x1354   :  { %10808 = vmatpush1.bf16.msra.mxu1 %v20241_v29  ;;  %10849 = vmatpush1.bf16.msra.mxu0 %v20246_v14 }
0x1355   :  { %10809 = vmatprep.subr.bf16.mxu1 %v20255_v4  ;;  %10850 = vmatprep.subr.bf16.mxu0 %v20260_v38  ;;  %v21854_v38 = vld [vmem:[#allocation6_spill] sm:$0xff] }
0x1358   :  { %10810 = vmatpush1.bf16.msra.mxu1 %v20265_v27  ;;  %10851 = vmatpush1.bf16.msra.mxu0 %v20270_v46  ;;  %v10524_v27 = vrot.slane %v13150_v40, %v21854_v38 }
0x1359   :  { %10811 = vmatprep.subr.bf16.mxu1 %v20279_v60  ;;  %10852 = vmatprep.subr.bf16.mxu0 %v20284_v20 }
0x135c   :  { %10812 = vmatpush1.bf16.msra.mxu1 %v20289_v25  ;;  %10853 = vmatpush1.bf16.msra.mxu0 %v20294_v24 }
0x135d   :  { %10813 = vmatprep.subr.bf16.mxu1 %v20303_v8  ;;  %10854 = vmatprep.subr.bf16.mxu0 %v21847_v23 }
0x1360   :  { %10814 = vmatpush1.bf16.msra.mxu1 %v21848_v56  ;;  %10855 = vmatpush1.bf16.msra.mxu0 %v21849_v17 }
0x1361   :  { %11041 = vmatprep.subr.bf16.mxu1 %v21850_v47  ;;  %11082 = vmatprep.subr.bf16.mxu0 %v21851_v45 }
0x13e3   :  { %v10225_v5 = vpop.f32.mrf.mxu1  ;;  %v10266_v51 = vpop.f32.mrf.mxu0 }
0x13e5   :  { %v10227_v21 = vpop.f32.mrf.mxu1  ;;  %v10268_v0 = vpop.f32.mrf.mxu0 }
0x13e7   :  { %v10229_v22 = vpop.f32.mrf.mxu1  ;;  %v10270_v9 = vpop.f32.mrf.mxu0 }
0x13e9   :  { %v10230_v42 = vpop.f32.mrf.mxu1  ;;  %v10271_v37 = vpop.f32.mrf.mxu0 }
0x1403   :  { %v10467_v10 = vpop.f32.mrf.mxu1  ;;  %v10508_v29 = vpop.f32.mrf.mxu0 }
0x1404   :  { %v10468_v14 = vadd.f32 %v10467_v10, %v10225_v5  ;;  %v10509_v4 = vadd.f32 %v10508_v29, %v10266_v51  ;;  %v10532_v51 = vrot.slane %v13150_v40, %v21601_v12 }
0x1405   :  { %v10469_v46 = vpop.f32.mrf.mxu1  ;;  %v10510_v60 = vpop.f32.mrf.mxu0 }
0x1406   :  { %v10537_v20 = vadd.f32 %v10520_v63, %v10468_v14  ;;  %v10539_v25 = vadd.f32 %v10528_v36, %v10509_v4  ;;  %v10470_v24 = vadd.f32 %v10469_v46, %v10227_v21  ;;  %v10511_v5 = vadd.f32 %v10510_v60, %v10268_v0 }
0x1407   :  { %v10471_v8 = vpop.f32.mrf.mxu1  ;;  %v10512_v31 = vpop.f32.mrf.mxu0 }
0x1408   :  { %v13151_v62 = vmul.f32 -1.442695, %v10537_v20  ;;  %v13153_v23 = vmul.f32 -1.442695, %v10539_v25  ;;  %v10538_v56 = vadd.f32 %v10524_v27, %v10470_v24  ;;  %v10540_v22 = vadd.f32 %v10532_v51, %v10511_v5 }
0x1409   :  { %v10472_v17 = vpop.f32.mrf.mxu1  ;;  %v10513_v47 = vpop.f32.mrf.mxu0 }
0x140a   :  { %14759 = vpow2.f32 %v13151_v62  ;;  %v13152_v45 = vmul.f32 -1.442695, %v10538_v56  ;;  %v13154_v37 = vmul.f32 -1.442695, %v10540_v22 }
0x140b   :  { %14761 = vpow2.f32 %v13153_v23 }
0x140c   :  { %14763 = vpow2.f32 %v13152_v45 }
0x1417   :  { %v14760_v9 = vpop.eup %14759 }
0x1418   :  { %v14762_v42 = vpop.eup %14761  ;;  %v10553_v10 = vadd.f32 1.0, %v14760_v9 }
0x1419   :  { %v14764_v63 = vpop.eup %14763  ;;  %v10555_v21 = vadd.f32 1.0, %v14762_v42 }
0x141a   :  { %v10554_v36 = vadd.f32 1.0, %v14764_v63 }
0x141b   :  { %14765 = vrcp.f32 %v10555_v21 }
0x141c   :  { %14767 = vpow2.f32 %v13154_v37 }
0x141d   :  { %14769 = vrcp.f32 %v10554_v36 }
0x141e   :  { %14771 = vrcp.f32 %v10553_v10 }
0x1428   :  { %v14766_v29 = vpop.eup %14765 }
0x1429   :  { %v14768_v14 = vpop.eup %14767  ;;  %v10565_v4 = vmul.f32 2.0, %v14766_v29 }
0x142a   :  { %v14770_v27 = vpop.eup %14769  ;;  %v10556_v60 = vadd.f32 1.0, %v14768_v14 }
0x142b   :  { %v13155_v46 = vadd.f32 -1.0, %v10565_v4  ;;  %v14772_v0 = vpop.eup %14771  ;;  %v10567_v20 = vmul.f32 %v14770_v27, %v20347_v11  ;;  %v21856_v11 = vld [vmem:[#allocation81_spill] sm:$0xff] }
0x142c   :  { %14773 = vrcp.f32 %v10556_v60 }
0x142d   :  { %v10568_v40 = vmul.f32 %v14772_v0, %v13155_v46 }
0x142f   :  { %v20586_v25 = vadd.f32 %v10568_v40, %v10567_v20 }
0x1431   :  { %14775 = vtanh.f32 %v20586_v25 }
0x1439   :  { %v14774_v24 = vpop.eup %14773 }
0x143e   :  { %v14776_v8 = vpop.eup %14775 }
0x143f   :  { %v20589_v31 = vmul.f32 %v14776_v8, %v14774_v24 }
0x1441   :  { %v10606_v62 = vpack.c.bf16 %v20589_v31, %v20589_v31 }
0x1443   :  { %10832 = vmatmul.mubr.bf16.vlgmr.msra.gmra.mxu1 %v10606_v62  ;;  %10873 = vmatmul.mubr.bf16.vlgmr.msra.gmra.mxu0 %v10606_v62  ;;  %v13306_v62 = vld [vmem:[%s20696_s3 + $0x14] sm:$0xf] }
0x1444   :  { %11042 = vmatpush1.bf16.msra.mxu1 %v20356_v43  ;;  %11083 = vmatpush1.bf16.msra.mxu0 %v20361_v7  ;;  %v14211_v43 = vld [vmem:[%s20697_s2 + $0x78] sm:$0xff]   ;;  %v10573_v7 = vpack.c.bf16 %v20536_v16, %v20536_v16 }
0x1445   :  { %11043 = vmatprep.subr.bf16.mxu1 %v20368_v59  ;;  %11084 = vmatprep.subr.bf16.mxu0 %v20373_v6  ;;  %v14212_v59 = vld [vmem:[%s20697_s2 + $0x70] sm:$0xff]  }
0x1446   :  { %11073 = vmatprep.mubr.bf16.mxu1 %v21154_v53  ;;  %11114 = vmatprep.mubr.bf16.mxu0 %v21154_v53  ;;  %v21855_v53 = vld [vmem:[#allocation80_spill] sm:$0xff]  ;;  %v21857_v6 = vld [vmem:[#allocation62_spill] sm:$0xff] }
0x1448   :  { %11044 = vmatpush1.bf16.msra.mxu1 %v20380_v35  ;;  %11085 = vmatpush1.bf16.msra.mxu0 %v20385_v55  ;;  %v21858_v35 = vld [vmem:[#allocation93_spill] sm:$0xff] }
0x1449   :  { %11045 = vmatprep.subr.bf16.mxu1 %v20392_v32  ;;  %11086 = vmatprep.subr.bf16.mxu0 %v20397_v34  ;;  %v11189_v55 = vpack.c.bf16 %v21858_v35, %v21857_v6  ;;  %v14214_v32 = vld [vmem:[%s20697_s2 + $0x60] sm:$0xff]   ;;  %v14215_v34 = vld [vmem:[%s20697_s2 + $0x58] sm:$0xff]  }
0x144c   :  { %11046 = vmatpush1.bf16.msra.mxu1 %v20406_v1  ;;  %11087 = vmatpush1.bf16.msra.mxu0 %v20411_v61  ;;  %v14216_v1 = vld [vmem:[%s20697_s2 + $0x50] sm:$0xff]   ;;  %v14217_v61 = vld [vmem:[%s20697_s2 + $0x48] sm:$0xff]  }
0x144d   :  { %11047 = vmatprep.subr.bf16.mxu1 %v20418_v19  ;;  %11088 = vmatprep.subr.bf16.mxu0 %v20423_v44  ;;  %v14218_v19 = vld [vmem:[%s20697_s2 + $0x40] sm:$0xff]   ;;  %v21859_v44 = vld [vmem:[#allocation18_spill] sm:$0xff] }
0x1450   :  { %11048 = vmatpush1.bf16.msra.mxu1 %v20431_v39  ;;  %11089 = vmatpush1.bf16.msra.mxu0 %v20436_v49  ;;  %v21860_v39 = vld [vmem:[#allocation52_spill] sm:$0xff] }
0x1451   :  { %11049 = vmatprep.subr.bf16.mxu1 %v20443_v3  ;;  %11090 = vmatprep.subr.bf16.mxu0 %v20448_v57  ;;  %v11190_v49 = vpack.c.bf16 %v21860_v39, %v21859_v44  ;;  %v21861_v3 = vld [vmem:[#allocation73_spill] sm:$0xff]  ;;  %v21862_v57 = vld [vmem:[#allocation79_spill] sm:$0xff] }
0x1454   :  { %11050 = vmatpush1.bf16.msra.mxu1 %v20455_v18  ;;  %11091 = vmatpush1.bf16.msra.mxu0 %v20460_v50  ;;  %v11191_v18 = vpack.c.bf16 %v21862_v57, %v21861_v3 }
0x1455   :  { %11051 = vmatprep.subr.bf16.mxu1 %v20467_v54  ;;  %11092 = vmatprep.subr.bf16.mxu0 %v20472_v28 }
0x1458   :  { %11052 = vmatpush1.bf16.msra.mxu1 %v20479_v2  ;;  %11093 = vmatpush1.bf16.msra.mxu0 %v20484_v52 }
0x1459   :  { %11053 = vmatprep.subr.bf16.mxu1 %v21855_v53  ;;  %11094 = vmatprep.subr.bf16.mxu0 %v21856_v11  ;;  %v11216_v53 = vrot.slane %v13306_v62, %v21852_v26 }
0x145c   :  { %11054 = vmatpush1.bf16.msra.mxu1 %v20503_v58  ;;  %11095 = vmatpush1.bf16.msra.mxu0 %v20508_v30  ;;  %v13284_v30 = vld [vmem:[%s20696_s3 + $0xc] sm:$0xf] }
0x145d   :  { %11055 = vmatprep.subr.bf16.mxu1 %v20515_v13  ;;  %11096 = vmatprep.subr.bf16.mxu0 %v20520_v48  ;;  %v11128_v13 = vrot.slane %v13284_v30, %v21852_v26  ;;  %v11136_v48 = vrot.slane %v13284_v30, %v21853_v15  ;;  %v11132_v45 = vrot.slane %v13284_v30, %v21854_v38 }
0x145e   :  { %v11140_v27 = vrot.slane %v13284_v30, %v21601_v12 }
0x1460   :  { %11056 = vmatpush1.bf16.msra.mxu1 %v20527_v33  ;;  %11097 = vmatpush1.bf16.msra.mxu0 %v20532_v41  ;;  %v14213_v33 = vld [vmem:[%s20697_s2 + $0x68] sm:$0xff]  }
0x1461   :  { %13356 = vmatprep.subr.bf16.mxu1 %v14211_v43 }
0x1463   :  { %11074 = vmatmul.mubr.bf16.vlgmr.msra.gmra.mxu1 %v10573_v7  ;;  %11115 = vmatmul.mubr.bf16.vlgmr.msra.gmra.mxu0 %v10573_v7 }
0x1464   :  { %13357 = vmatpush3.bf16.msra.mxu1 %v14211_v43  ;;  %13372 = vmatprep.mubr.bf16.mxu1 %v11189_v55 }
0x1465   :  { %13358 = vmatprep.subr.bf16.mxu1 %v14212_v59 }
0x1468   :  { %13359 = vmatpush3.bf16.msra.mxu1 %v14212_v59 }
0x1469   :  { %13360 = vmatprep.subr.bf16.mxu1 %v14213_v33 }
0x146c   :  { %13361 = vmatpush3.bf16.msra.mxu1 %v14213_v33 }
0x146d   :  { %13362 = vmatprep.subr.bf16.mxu1 %v14214_v32 }
0x1470   :  { %13363 = vmatpush3.bf16.msra.mxu1 %v14214_v32 }
0x1471   :  { %13364 = vmatprep.subr.bf16.mxu1 %v14215_v34 }
0x1474   :  { %13365 = vmatpush3.bf16.msra.mxu1 %v14215_v34 }
0x1475   :  { %13366 = vmatprep.subr.bf16.mxu1 %v14216_v1 }
0x1478   :  { %13367 = vmatpush3.bf16.msra.mxu1 %v14216_v1 }
0x1479   :  { %13368 = vmatprep.subr.bf16.mxu1 %v14217_v61 }
0x147c   :  { %13369 = vmatpush3.bf16.msra.mxu1 %v14217_v61 }
0x147d   :  { %13370 = vmatprep.subr.bf16.mxu1 %v14218_v19 }
0x1480   :  { %13371 = vmatpush3.bf16.msra.mxu1 %v14218_v19 }
0x1483   :  { %13373 = vmatmul.mubr.bf16.vlgmr.msra.gmra.mxu1 %v11190_v49 }
0x1484   :  { %13376 = vmatprep.mubr.bf16.mxu1 %v11191_v18 }
0x1503   :  { %v10833_v50 = vpop.f32.mrf.mxu1  ;;  %v10874_v54 = vpop.f32.mrf.mxu0 }
0x1505   :  { %v10835_v28 = vpop.f32.mrf.mxu1  ;;  %v10876_v2 = vpop.f32.mrf.mxu0 }
0x1507   :  { %v10837_v52 = vpop.f32.mrf.mxu1  ;;  %v10878_v16 = vpop.f32.mrf.mxu0 }
0x1509   :  { %v10838_v41 = vpop.f32.mrf.mxu1  ;;  %v10879_v58 = vpop.f32.mrf.mxu0 }
0x1523   :  { %v11075_v23 = vpop.f32.mrf.mxu1  ;;  %v11116_v56 = vpop.f32.mrf.mxu0 }
0x1524   :  { %v11076_v17 = vadd.f32 %v11075_v23, %v10833_v50  ;;  %v11117_v47 = vadd.f32 %v11116_v56, %v10874_v54 }
0x1525   :  { %v11077_v5 = vpop.f32.mrf.mxu1  ;;  %v11118_v51 = vpop.f32.mrf.mxu0 }
0x1526   :  { %v11145_v22 = vadd.f32 %v11128_v13, %v11076_v17  ;;  %v11147_v9 = vadd.f32 %v11136_v48, %v11117_v47  ;;  %v11078_v42 = vadd.f32 %v11077_v5, %v10835_v28  ;;  %v11119_v4 = vadd.f32 %v11118_v51, %v10876_v2 }
0x1527   :  { %v11079_v37 = vpop.f32.mrf.mxu1  ;;  %v11120_v63 = vpop.f32.mrf.mxu0 }
0x1528   :  { %v13285_v21 = vmul.f32 -1.442695, %v11145_v22  ;;  %v13287_v36 = vmul.f32 -1.442695, %v11147_v9  ;;  %v11146_v10 = vadd.f32 %v11132_v45, %v11078_v42  ;;  %v11148_v38 = vadd.f32 %v11140_v27, %v11119_v4 }
0x1529   :  { %v11080_v29 = vpop.f32.mrf.mxu1  ;;  %v11121_v14 = vpop.f32.mrf.mxu0 }
0x152a   :  { %14777 = vpow2.f32 %v13285_v21  ;;  %v13286_v15 = vmul.f32 -1.442695, %v11146_v10  ;;  %v13288_v60 = vmul.f32 -1.442695, %v11148_v38 }
0x152b   :  { %14779 = vpow2.f32 %v13287_v36 }
0x152c   :  { %14781 = vpow2.f32 %v13286_v15 }
0x1537   :  { %v14778_v46 = vpop.eup %14777 }
0x1538   :  { %v14780_v0 = vpop.eup %14779  ;;  %v11161_v8 = vadd.f32 1.0, %v14778_v46 }
0x1539   :  { %v14782_v40 = vpop.eup %14781  ;;  %v11163_v20 = vadd.f32 1.0, %v14780_v0 }
0x153a   :  { %v11162_v24 = vadd.f32 1.0, %v14782_v40 }
0x153b   :  { %14783 = vrcp.f32 %v11163_v20 }
0x153c   :  { %14785 = vpow2.f32 %v13288_v60 }
0x153d   :  { %14787 = vrcp.f32 %v11162_v24 }
0x153e   :  { %14789 = vrcp.f32 %v11161_v8 }
0x1543   :  { %v13374_v11 = vpop.f32.mrf.mxu1 }
0x1544   :  { %v11309_v12 = vadd.f32 %v13374_v11, %v11216_v53 }
0x1545   :  { %v11300_v43 = vpop.f32.mrf.mxu1 }
0x1546   :  { %11333 = vst [vmem:[%s20699_s4 + $0x10] sm:$0xff] %v11309_v12  ;;  %v11301_v7 = vadd.f32 %v11300_v43, %v11216_v53 }
0x1547   :  { %v13375_v59 = vpop.f32.mrf.mxu1 }
0x1548   :  { %v14784_v6 = vpop.eup %14783  ;;  %11331 = vst [vmem:[%s20699_s4] sm:$0xff] %v11301_v7  ;;  %v11312_v35 = vadd.f32 %v13375_v59, %v11216_v53 }
0x1549   :  { %v14786_v55 = vpop.eup %14785  ;;  %v11173_v33 = vmul.f32 2.0, %v14784_v6  ;;  %v11303_v32 = vpop.f32.mrf.mxu1 }
0x154a   :  { %v14788_v34 = vpop.eup %14787  ;;  %11334 = vst [vmem:[%s20699_s4 + $0x18] sm:$0xff] %v11312_v35  ;;  %v11304_v26 = vadd.f32 %v11303_v32, %v11216_v53  ;;  %v11164_v19 = vadd.f32 1.0, %v14786_v55 }
0x154b   :  { %v13289_v1 = vadd.f32 -1.0, %v11173_v33  ;;  %v14790_v61 = vpop.eup %14789  ;;  %v11175_v39 = vmul.f32 %v14788_v34, %v20586_v25 }
0x154c   :  { %11332 = vst [vmem:[%s20699_s4 + $0x8] sm:$0xff] %v11304_v26  ;;  %14791 = vrcp.f32 %v11164_v19 }
0x154d   :  { %v11176_v44 = vmul.f32 %v14790_v61, %v13289_v1 }
0x154f   :  { %v11177_v49 = vadd.f32 %v11176_v44, %v11175_v39 }
0x1551   :  { %14793 = vtanh.f32 %v11177_v49 }
0x1559   :  { %v14792_v3 = vpop.eup %14791 }
0x155e   :  { %v14794_v57 = vpop.eup %14793 }
0x155f   :  { %v11179_v18 = vmul.f32 %v14794_v57, %v14792_v3 }
0x1561   :  { %v11192_v50 = vpack.c.bf16 %v11179_v18, %v20589_v31 }
0x1563   :  { %13377 = vmatmul.mubr.bf16.gmra.mxu1 %v11192_v50 }
0x1623   :  { %v13378_v54 = vpop.f32.mrf.mxu1 }
0x1624   :  { %v11325_v28 = vadd.f32 %v13378_v54, %v11216_v53 }
0x1625   :  { %v11316_v2 = vpop.f32.mrf.mxu1 }
0x1626   :  { %11337 = vst [vmem:[%s20699_s4 + $0x30] sm:$0xff] %v11325_v28  ;;  %v11317_v52 = vadd.f32 %v11316_v2, %v11216_v53 }
0x1627   :  { %v13379_v16 = vpop.f32.mrf.mxu1 }
0x1628   :  { %11335 = vst [vmem:[%s20699_s4 + $0x20] sm:$0xff] %v11317_v52  ;;  %v11328_v25 = vadd.f32 %v13379_v16, %v11216_v53 }
0x1629   :  { %v11319_v41 = vpop.f32.mrf.mxu1 }
0x162a   :  { %11338 = vst [vmem:[%s20699_s4 + $0x38] sm:$0xff] %v11328_v25  ;;  %v11320_v31 = vadd.f32 %v11319_v41, %v11216_v53 }
0x162c   :  { %11336 = vst [vmem:[%s20699_s4 + $0x28] sm:$0xff] %v11320_v31 }

</bundles_post_ra>
